<compile_context>
chip_gen: v5e
topology: v5e:2x2
jax: 0.10.0
libtpu: 0.0.40
codegen_flags: <defaults>
</compile_context>

<pallas_src>
import math

import jax
import jax.numpy as jnp
from jax.experimental import pallas as pl
from jax.experimental.pallas import tpu as pltpu

# ------------------------- configuration (small) -------------------------
VID_IN_CH = 4
VID_OUT_CH = 4
VID_DIM = 64
TXT_IN_DIM = 32
TXT_DIM = 64
EMB_DIM = 64
HEADS = 2
HEAD_DIM = 32            # HEADS * HEAD_DIM == VID_DIM == TXT_DIM
EXPAND = 4
NORM_EPS = 1e-6
PATCH = (1, 2, 2)        # (pt, ph, pw)
NUM_LAYERS = 2
SIN_DIM = 256            # sinusoidal_dim of TimeEmbedding
T, H, W = 4, 8, 8        # video extents (single sample)
L_TXT = 8                # text tokens

PATCH_VOL = PATCH[0] * PATCH[1] * PATCH[2]
HEAD_PAD = 128                       # each head's Q/K/V chunk is 128 lanes
QKV_BLOCK = HEADS * HEAD_PAD         # 256 lanes per Q (or K or V) block
QKV_COLS = 3 * QKV_BLOCK             # 768 = padded fused QKV width
ATTN_COLS = HEADS * HEAD_PAD         # 256 = padded attention-output width
ADA_COLS = NUM_LAYERS * 2 * 6 * VID_DIM   # 1536 = combined adaLN width
OUT_PAD = 128                        # lane-dense output width (16 real cols)

# Order in which parameter arrays are passed to the fused kernel.
KERNEL_PARAM_ORDER = (
    "vid_in_w", "vid_in_b", "txt_in_w", "txt_in_b",
    "ada_w", "ada_b",
    "qkv_v_w", "qkv_v_b", "qkv_t_w", "qkv_t_b",
    "o_v_w", "o_v_b", "o_t_w", "o_t_b",
    "mlp1_v_w", "mlp1_v_b", "mlp2_v_w", "mlp2_v_b",
    "mlp1_t_w", "mlp1_t_b", "mlp2_t_w", "mlp2_t_b",
    "vid_out_w", "vid_out_b",
)


# ------------------------------ fused Pallas kernel ------------------------------
def _nadit_fused_kernel(
    # activations
    vid_p_ref, txt_ref, emb_ref,
    # top-level weights
    vid_in_w, vid_in_b, txt_in_w, txt_in_b,
    # combined adaLN projection (all layers, both streams)
    ada_w, ada_b,
    # per-layer weights (stacked on leading NUM_LAYERS axis)
    qkv_v_w, qkv_v_b, qkv_t_w, qkv_t_b,
    o_v_w, o_v_b, o_t_w, o_t_b,
    mlp1_v_w, mlp1_v_b, mlp2_v_w, mlp2_v_b,
    mlp1_t_w, mlp1_t_b, mlp2_t_w, mlp2_t_b,
    vid_out_w, vid_out_b,
    # output
    out_ref,
):
    f32 = jnp.float32
    bf16 = jnp.bfloat16
    D = VID_DIM

    def mm(x, w, b):
        # bf16 MXU matmul with f32 accumulation, f32 bias epilogue.
        y = jnp.dot(x.astype(bf16), w, preferred_element_type=f32)
        return y + b

    def layer_norm(x):
        mu = jnp.mean(x, axis=-1, keepdims=True)
        xc = x - mu
        var = jnp.mean(xc * xc, axis=-1, keepdims=True)
        return xc * jax.lax.rsqrt(var + NORM_EPS)

    # --- single combined adaLN GEMM (emb_silu is loop-invariant) ---
    ada_all = mm(emb_ref[...], ada_w[...], ada_b[...])        # [1, ADA_COLS]

    def ada_chunk(l, stream, i):
        off = ((l * 2 + stream) * 6 + i) * D
        return ada_all[:, off:off + D]                        # [1, D]

    # --- patch embed (NaPatchIn linear) / text embed ---
    vid = mm(vid_p_ref[...], vid_in_w[...], vid_in_b[...])    # [Lv, D]
    txt = mm(txt_ref[...], txt_in_w[...], txt_in_b[...])      # [Lt, D]
    Lv = vid.shape[0]

    attn_scale = 1.0 / math.sqrt(HEAD_DIM)

    # --- MMDiT blocks (static unrolled loop over resident stacked weights) ---
    for l in range(NUM_LAYERS):
        (sh_msa_v, sc_msa_v, g_msa_v,
         sh_mlp_v, sc_mlp_v, g_mlp_v) = (ada_chunk(l, 0, i) for i in range(6))
        (sh_msa_t, sc_msa_t, g_msa_t,
         sh_mlp_t, sc_mlp_t, g_mlp_t) = (ada_chunk(l, 1, i) for i in range(6))

        # ---- joint attention (LN + modulation fused as matmul prologue) ----
        vm = layer_norm(vid) * (1.0 + sc_msa_v) + sh_msa_v
        tm = layer_norm(txt) * (1.0 + sc_msa_t) + sh_msa_t
        qkv_v = mm(vm, qkv_v_w[l], qkv_v_b[l])                # [Lv, QKV_COLS]
        qkv_t = mm(tm, qkv_t_w[l], qkv_t_b[l])                # [Lt, QKV_COLS]
        # Single bf16 cast for the whole joint QKV activation.
        qkv = jnp.concatenate([qkv_v, qkv_t], axis=0).astype(bf16)   # [L, 768]

        head_outs = []
        for hd in range(HEADS):                               # static, 2 heads
            # All slices are 128 lanes wide and start on 128-lane boundaries;
            # the padded columns are zeros, so they contribute nothing.
            qh = qkv[:, hd * HEAD_PAD:(hd + 1) * HEAD_PAD]
            kh = qkv[:, QKV_BLOCK + hd * HEAD_PAD:QKV_BLOCK + (hd + 1) * HEAD_PAD]
            vh = qkv[:, 2 * QKV_BLOCK + hd * HEAD_PAD:2 * QKV_BLOCK + (hd + 1) * HEAD_PAD]
            s = jnp.dot(qh, kh.T, preferred_element_type=f32) * attn_scale
            m = jnp.max(s, axis=-1, keepdims=True)
            p = jnp.exp(s - m)
            denom = jnp.sum(p, axis=-1, keepdims=True)
            p = p * pl.reciprocal(denom, approx=False)        # EUP, exact
            head_outs.append(jnp.dot(p.astype(bf16), vh, preferred_element_type=f32))
        # [L, ATTN_COLS]; real values live in cols [hd*128 : hd*128+HEAD_DIM].
        attn = jnp.concatenate(head_outs, axis=-1)

        # Padded rows of o_*_w are zero, so the padded layout folds away here.
        ov = mm(attn[:Lv], o_v_w[l], o_v_b[l])                # [Lv, D]
        ot = mm(attn[Lv:], o_t_w[l], o_t_b[l])                # [Lt, D]
        vid = vid + g_msa_v * ov                              # gated residual
        txt = txt + g_msa_t * ot

        # ---- MLP ----
        vm2 = layer_norm(vid) * (1.0 + sc_mlp_v) + sh_mlp_v
        tm2 = layer_norm(txt) * (1.0 + sc_mlp_t) + sh_mlp_t
        hv = jax.nn.gelu(mm(vm2, mlp1_v_w[l], mlp1_v_b[l]), approximate=True)
        ht = jax.nn.gelu(mm(tm2, mlp1_t_w[l], mlp1_t_b[l]), approximate=True)
        vid = vid + g_mlp_v * mm(hv, mlp2_v_w[l], mlp2_v_b[l])
        txt = txt + g_mlp_t * mm(ht, mlp2_t_w[l], mlp2_t_b[l])

    # ---- NaPatchOut: non-affine LayerNorm + linear projection ----
    # Lane-dense [Lv, 128] output (real channels in cols [:PATCH_VOL*VID_OUT_CH]).
    out = mm(layer_norm(vid), vid_out_w[...], vid_out_b[...])
    out_ref[...] = out.astype(out_ref.dtype)


# ------------------------------ host-side helpers ------------------------------
def sinusoidal_embedding(t, dim=SIN_DIM):
    half = dim // 2
    freqs = jnp.exp(-jnp.log(10000.0) * jnp.arange(half, dtype=jnp.float32) / half)
    args = jnp.asarray(t, jnp.float32).reshape(1, 1) * freqs[None, :]
    return jnp.concatenate([jnp.cos(args), jnp.sin(args)], axis=-1)  # [1, dim]


def time_embedding(t, w1, b1, w2, b2):
    # TimeEmbedding: sinusoidal -> Linear -> SiLU -> Linear (host-side f32).
    h = jax.nn.silu(sinusoidal_embedding(t) @ w1 + b1)
    return h @ w2 + b2


def patchify(vid):
    # [T, H, W, C] -> [L, pt*ph*pw*C]
    pt, ph, pw = PATCH
    t, h, w, c = vid.shape
    x = vid.reshape(t // pt, pt, h // ph, ph, w // pw, pw, c)
    x = x.transpose(0, 2, 4, 1, 3, 5, 6)
    return x.reshape((t // pt) * (h // ph) * (w // pw), pt * ph * pw * c)


def unpatchify(x, tshape, out_ch):
    pt, ph, pw = PATCH
    t, h, w = tshape
    tp, hp, wp = t // pt, h // ph, w // pw
    x = x.reshape(tp, hp, wp, pt, ph, pw, out_ch)
    x = x.transpose(0, 3, 1, 4, 2, 5, 6)
    return x.reshape(t, h, w, out_ch)


# ------------------------------ parameter init ------------------------------
def init_params(key):
    keys = iter(jax.random.split(key, 64))
    bf16 = jnp.bfloat16

    def rand(shape, scale=0.02):
        return jax.random.normal(next(keys), shape, jnp.float32) * scale

    D = VID_DIM
    hidden = max(VID_DIM, TXT_DIM)
    p = {}

    # Host-side time-embedding MLPs (hoisted out of the kernel; f32).
    p["emb_t_w1"], p["emb_t_b1"] = rand((SIN_DIM, hidden)), jnp.zeros((1, hidden), jnp.float32)
    p["emb_t_w2"], p["emb_t_b2"] = rand((hidden, EMB_DIM)), jnp.zeros((1, EMB_DIM), jnp.float32)
    p["emb_s_w1"], p["emb_s_b1"] = rand((SIN_DIM, hidden)), jnp.zeros((1, hidden), jnp.float32)
    p["emb_s_w2"], p["emb_s_b2"] = rand((hidden, EMB_DIM)), jnp.zeros((1, EMB_DIM), jnp.float32)

    # In-kernel weights: bf16 for the MXU, f32 biases (VPU epilogue).
    def lin(din, dout):
        return rand((din, dout)).astype(bf16), jnp.zeros((1, dout), jnp.float32)

    def lin_stack(din, dout):
        return (rand((NUM_LAYERS, din, dout)).astype(bf16),
                jnp.zeros((NUM_LAYERS, 1, dout), jnp.float32))

    p["vid_in_w"], p["vid_in_b"] = lin(PATCH_VOL * VID_IN_CH, VID_DIM)
    p["txt_in_w"], p["txt_in_b"] = lin(TXT_IN_DIM, TXT_DIM)

    # Combined adaLN weight: all layers & both streams in one GEMM.
    p["ada_w"] = rand((EMB_DIM, ADA_COLS)).astype(bf16)
    p["ada_b"] = jnp.zeros((1, ADA_COLS), jnp.float32)

    # Fused, lane-padded QKV: per head, Q/K/V each occupy a 128-lane aligned
    # chunk with real weights in the first HEAD_DIM columns, zeros elsewhere.
    def qkv_padded(din):
        w = jnp.zeros((NUM_LAYERS, din, QKV_COLS), jnp.float32)
        for which in range(3):            # Q, K, V
            for hd in range(HEADS):
                col = (which * HEADS + hd) * HEAD_PAD
                w = w.at[:, :, col:col + HEAD_DIM].set(rand((NUM_LAYERS, din, HEAD_DIM)))
        return w.astype(bf16), jnp.zeros((NUM_LAYERS, 1, QKV_COLS), jnp.float32)

    # Output projection row-padded to match the padded attention output layout.
    def o_padded(dout):
        w = jnp.zeros((NUM_LAYERS, ATTN_COLS, dout), jnp.float32)
        for hd in range(HEADS):
            row = hd * HEAD_PAD
            w = w.at[:, row:row + HEAD_DIM, :].set(rand((NUM_LAYERS, HEAD_DIM, dout)))
        return w.astype(bf16), jnp.zeros((NUM_LAYERS, 1, dout), jnp.float32)

    p["qkv_v_w"], p["qkv_v_b"] = qkv_padded(D)
    p["qkv_t_w"], p["qkv_t_b"] = qkv_padded(D)
    p["o_v_w"], p["o_v_b"] = o_padded(D)
    p["o_t_w"], p["o_t_b"] = o_padded(D)
    p["mlp1_v_w"], p["mlp1_v_b"] = lin_stack(D, EXPAND * D)
    p["mlp2_v_w"], p["mlp2_v_b"] = lin_stack(EXPAND * D, D)
    p["mlp1_t_w"], p["mlp1_t_b"] = lin_stack(D, EXPAND * D)
    p["mlp2_t_w"], p["mlp2_t_b"] = lin_stack(EXPAND * D, D)

    # Lane-dense output projection: real 16 channels in cols [:16] of 128.
    w_out = jnp.zeros((VID_DIM, OUT_PAD), jnp.float32)
    w_out = w_out.at[:, :PATCH_VOL * VID_OUT_CH].set(rand((VID_DIM, PATCH_VOL * VID_OUT_CH)))
    p["vid_out_w"] = w_out.astype(bf16)
    p["vid_out_b"] = jnp.zeros((1, OUT_PAD), jnp.float32)
    return p


# ------------------------------ NaDiTUpscaler forward ------------------------------
def nadit_upscaler_forward(params, vid, txt, timestep, downscale):
    vid_p = patchify(vid)                                        # [Lv, PATCH_VOL*Cin]
    Lv = vid_p.shape[0]

    # Time embeddings on the host (tiny M=1 MLPs; kept off the kernel's
    # critical path).  emb_silu is the loop-invariant adaLN input.
    emb = (time_embedding(timestep, params["emb_t_w1"], params["emb_t_b1"],
                          params["emb_t_w2"], params["emb_t_b2"])
           + time_embedding(downscale, params["emb_s_w1"], params["emb_s_b1"],
                            params["emb_s_w2"], params["emb_s_b2"]))
    emb_silu = jax.nn.silu(emb)                                  # [1, EMB_DIM]

    args = [vid_p, txt, emb_silu] + [params[k] for k in KERNEL_PARAM_ORDER]

    out_tok = pl.pallas_call(
        _nadit_fused_kernel,
        out_shape=jax.ShapeDtypeStruct((Lv, OUT_PAD), jnp.float32),
        in_specs=[pl.BlockSpec(memory_space=pltpu.MemorySpace.VMEM)] * len(args),
        out_specs=pl.BlockSpec(memory_space=pltpu.MemorySpace.VMEM),
        compiler_params=pltpu.CompilerParams(vmem_limit_bytes=8 * 1024 * 1024),
    )(*args)

    out_tok = out_tok[:, :PATCH_VOL * VID_OUT_CH]                # drop lane padding
    return unpatchify(out_tok, (T, H, W), VID_OUT_CH)            # [T, H, W, C_out]


# ------------------------------ main ------------------------------
if __name__ == "__main__":
    key = jax.random.PRNGKey(0)
    k_param, k_vid, k_txt = jax.random.split(key, 3)

    params = init_params(k_param)

    vid = jax.random.normal(k_vid, (T, H, W, VID_IN_CH), jnp.float32)   # channels-last
    txt = jax.random.normal(k_txt, (L_TXT, TXT_IN_DIM), jnp.float32)
    timestep = jnp.float32(500.0)     # runtime scalars — no retrace per step
    downscale = jnp.float32(2.0)

    fwd = jax.jit(nadit_upscaler_forward)
    out = jax.block_until_ready(fwd(params, vid, txt, timestep, downscale))

    assert out.shape == (T, H, W, VID_OUT_CH), out.shape
    assert bool(jnp.all(jnp.isfinite(out)))
    print("KERNEL_OK")
</pallas_src>

<mosaic_0001>
module attributes {stable_mosaic.version = 11 : i64} {
  func.func @_nadit_fused_kernel(%arg0: memref<64x16xf32, #tpu.memory_space<vmem>>, %arg1: memref<8x32xf32, #tpu.memory_space<vmem>>, %arg2: memref<1x64xf32, #tpu.memory_space<vmem>>, %arg3: memref<16x64xbf16, #tpu.memory_space<vmem>>, %arg4: memref<1x64xf32, #tpu.memory_space<vmem>>, %arg5: memref<32x64xbf16, #tpu.memory_space<vmem>>, %arg6: memref<1x64xf32, #tpu.memory_space<vmem>>, %arg7: memref<64x1536xbf16, #tpu.memory_space<vmem>>, %arg8: memref<1x1536xf32, #tpu.memory_space<vmem>>, %arg9: memref<2x64x768xbf16, #tpu.memory_space<vmem>>, %arg10: memref<2x1x768xf32, #tpu.memory_space<vmem>>, %arg11: memref<2x64x768xbf16, #tpu.memory_space<vmem>>, %arg12: memref<2x1x768xf32, #tpu.memory_space<vmem>>, %arg13: memref<2x256x64xbf16, #tpu.memory_space<vmem>>, %arg14: memref<2x1x64xf32, #tpu.memory_space<vmem>>, %arg15: memref<2x256x64xbf16, #tpu.memory_space<vmem>>, %arg16: memref<2x1x64xf32, #tpu.memory_space<vmem>>, %arg17: memref<2x64x256xbf16, #tpu.memory_space<vmem>>, %arg18: memref<2x1x256xf32, #tpu.memory_space<vmem>>, %arg19: memref<2x256x64xbf16, #tpu.memory_space<vmem>>, %arg20: memref<2x1x64xf32, #tpu.memory_space<vmem>>, %arg21: memref<2x64x256xbf16, #tpu.memory_space<vmem>>, %arg22: memref<2x1x256xf32, #tpu.memory_space<vmem>>, %arg23: memref<2x256x64xbf16, #tpu.memory_space<vmem>>, %arg24: memref<2x1x64xf32, #tpu.memory_space<vmem>>, %arg25: memref<64x128xbf16, #tpu.memory_space<vmem>>, %arg26: memref<1x128xf32, #tpu.memory_space<vmem>>, %arg27: memref<64x128xf32, #tpu.memory_space<vmem>>) attributes {dimension_semantics = [], scalar_prefetch = 0 : i64, scratch_operands = 0 : i64, tpu.core_type = #tpu.core_type<tc>} {
    %c0 = arith.constant 0 : index
    %c0_0 = arith.constant 0 : index
    %0 = vector.load %arg2[%c0, %c0_0] : memref<1x64xf32, #tpu.memory_space<vmem>>, vector<1x64xf32>
    %c0_1 = arith.constant 0 : index
    %c0_2 = arith.constant 0 : index
    %1 = vector.load %arg7[%c0_1, %c0_2] : memref<64x1536xbf16, #tpu.memory_space<vmem>>, vector<64x1536xbf16>
    %c0_3 = arith.constant 0 : index
    %c0_4 = arith.constant 0 : index
    %2 = vector.load %arg8[%c0_3, %c0_4] : memref<1x1536xf32, #tpu.memory_space<vmem>>, vector<1x1536xf32>
    %3 = arith.truncf %0 : vector<1x64xf32> to vector<1x64xbf16>
    %cst = arith.constant dense<0.000000e+00> : vector<1x1536xf32>
    %4 = tpu.matmul %3, %1, %cst {dimension_numbers = #tpu.dot_dimension_numbers<[1], [0], [0], [1], [0, 0, 1, 1], [], []>} : vector<1x64xbf16>, vector<64x1536xbf16>, vector<1x1536xf32> -> vector<1x1536xf32>
    %5 = arith.addf %4, %2 : vector<1x1536xf32>
    %c0_5 = arith.constant 0 : index
    %c0_6 = arith.constant 0 : index
    %6 = vector.load %arg0[%c0_5, %c0_6] : memref<64x16xf32, #tpu.memory_space<vmem>>, vector<64x16xf32>
    %c0_7 = arith.constant 0 : index
    %c0_8 = arith.constant 0 : index
    %7 = vector.load %arg3[%c0_7, %c0_8] : memref<16x64xbf16, #tpu.memory_space<vmem>>, vector<16x64xbf16>
    %c0_9 = arith.constant 0 : index
    %c0_10 = arith.constant 0 : index
    %8 = vector.load %arg4[%c0_9, %c0_10] : memref<1x64xf32, #tpu.memory_space<vmem>>, vector<1x64xf32>
    %9 = arith.truncf %6 : vector<64x16xf32> to vector<64x16xbf16>
    %cst_11 = arith.constant dense<0.000000e+00> : vector<64x64xf32>
    %10 = tpu.matmul %9, %7, %cst_11 {dimension_numbers = #tpu.dot_dimension_numbers<[1], [0], [0], [1], [0, 0, 1, 1], [], []>} : vector<64x16xbf16>, vector<16x64xbf16>, vector<64x64xf32> -> vector<64x64xf32>
    %11 = vector.broadcast %8 : vector<1x64xf32> to vector<64x64xf32>
    %12 = arith.addf %10, %11 : vector<64x64xf32>
    %c0_12 = arith.constant 0 : index
    %c0_13 = arith.constant 0 : index
    %13 = vector.load %arg1[%c0_12, %c0_13] : memref<8x32xf32, #tpu.memory_space<vmem>>, vector<8x32xf32>
    %c0_14 = arith.constant 0 : index
    %c0_15 = arith.constant 0 : index
    %14 = vector.load %arg5[%c0_14, %c0_15] : memref<32x64xbf16, #tpu.memory_space<vmem>>, vector<32x64xbf16>
    %c0_16 = arith.constant 0 : index
    %c0_17 = arith.constant 0 : index
    %15 = vector.load %arg6[%c0_16, %c0_17] : memref<1x64xf32, #tpu.memory_space<vmem>>, vector<1x64xf32>
    %16 = arith.truncf %13 : vector<8x32xf32> to vector<8x32xbf16>
    %cst_18 = arith.constant dense<0.000000e+00> : vector<8x64xf32>
    %17 = tpu.matmul %16, %14, %cst_18 {dimension_numbers = #tpu.dot_dimension_numbers<[1], [0], [0], [1], [0, 0, 1, 1], [], []>} : vector<8x32xbf16>, vector<32x64xbf16>, vector<8x64xf32> -> vector<8x64xf32>
    %18 = vector.broadcast %15 : vector<1x64xf32> to vector<8x64xf32>
    %19 = arith.addf %17, %18 : vector<8x64xf32>
    %20 = vector.extract_strided_slice %5 {offsets = [0, 0], sizes = [1, 64], strides = [1, 1]} : vector<1x1536xf32> to vector<1x64xf32>
    %21 = vector.extract_strided_slice %5 {offsets = [0, 64], sizes = [1, 64], strides = [1, 1]} : vector<1x1536xf32> to vector<1x64xf32>
    %22 = vector.extract_strided_slice %5 {offsets = [0, 128], sizes = [1, 64], strides = [1, 1]} : vector<1x1536xf32> to vector<1x64xf32>
    %23 = vector.extract_strided_slice %5 {offsets = [0, 192], sizes = [1, 64], strides = [1, 1]} : vector<1x1536xf32> to vector<1x64xf32>
    %24 = vector.extract_strided_slice %5 {offsets = [0, 256], sizes = [1, 64], strides = [1, 1]} : vector<1x1536xf32> to vector<1x64xf32>
    %25 = vector.extract_strided_slice %5 {offsets = [0, 320], sizes = [1, 64], strides = [1, 1]} : vector<1x1536xf32> to vector<1x64xf32>
    %26 = vector.extract_strided_slice %5 {offsets = [0, 384], sizes = [1, 64], strides = [1, 1]} : vector<1x1536xf32> to vector<1x64xf32>
    %27 = vector.extract_strided_slice %5 {offsets = [0, 448], sizes = [1, 64], strides = [1, 1]} : vector<1x1536xf32> to vector<1x64xf32>
    %28 = vector.extract_strided_slice %5 {offsets = [0, 512], sizes = [1, 64], strides = [1, 1]} : vector<1x1536xf32> to vector<1x64xf32>
    %29 = vector.extract_strided_slice %5 {offsets = [0, 576], sizes = [1, 64], strides = [1, 1]} : vector<1x1536xf32> to vector<1x64xf32>
    %30 = vector.extract_strided_slice %5 {offsets = [0, 640], sizes = [1, 64], strides = [1, 1]} : vector<1x1536xf32> to vector<1x64xf32>
    %31 = vector.extract_strided_slice %5 {offsets = [0, 704], sizes = [1, 64], strides = [1, 1]} : vector<1x1536xf32> to vector<1x64xf32>
    %cst_19 = arith.constant dense<0.000000e+00> : vector<64xf32>
    %32 = vector.multi_reduction <add>, %12, %cst_19 [1] : vector<64x64xf32> to vector<64xf32>
    %33 = vector.shape_cast %32 : vector<64xf32> to vector<64x1xf32>
    %cst_20 = arith.constant 6.400000e+01 : f32
    %34 = vector.broadcast %cst_20 : f32 to vector<64x1xf32>
    %35 = arith.divf %33, %34 : vector<64x1xf32>
    %36 = vector.broadcast %35 : vector<64x1xf32> to vector<64x64xf32>
    %37 = arith.subf %12, %36 : vector<64x64xf32>
    %38 = arith.mulf %37, %37 : vector<64x64xf32>
    %cst_21 = arith.constant dense<0.000000e+00> : vector<64xf32>
    %39 = vector.multi_reduction <add>, %38, %cst_21 [1] : vector<64x64xf32> to vector<64xf32>
    %40 = vector.shape_cast %39 : vector<64xf32> to vector<64x1xf32>
    %cst_22 = arith.constant 6.400000e+01 : f32
    %41 = vector.broadcast %cst_22 : f32 to vector<64x1xf32>
    %42 = arith.divf %40, %41 : vector<64x1xf32>
    %cst_23 = arith.constant 9.99999997E-7 : f32
    %43 = vector.broadcast %cst_23 : f32 to vector<64x1xf32>
    %44 = arith.addf %42, %43 : vector<64x1xf32>
    %45 = math.rsqrt %44 : vector<64x1xf32>
    %46 = vector.broadcast %45 : vector<64x1xf32> to vector<64x64xf32>
    %47 = arith.mulf %37, %46 : vector<64x64xf32>
    %cst_24 = arith.constant 1.000000e+00 : f32
    %48 = vector.broadcast %cst_24 : f32 to vector<1x64xf32>
    %49 = arith.addf %48, %21 : vector<1x64xf32>
    %50 = vector.broadcast %49 : vector<1x64xf32> to vector<64x64xf32>
    %51 = arith.mulf %47, %50 : vector<64x64xf32>
    %52 = vector.broadcast %20 : vector<1x64xf32> to vector<64x64xf32>
    %53 = arith.addf %51, %52 : vector<64x64xf32>
    %cst_25 = arith.constant dense<0.000000e+00> : vector<8xf32>
    %54 = vector.multi_reduction <add>, %19, %cst_25 [1] : vector<8x64xf32> to vector<8xf32>
    %55 = vector.shape_cast %54 : vector<8xf32> to vector<8x1xf32>
    %cst_26 = arith.constant 6.400000e+01 : f32
    %56 = vector.broadcast %cst_26 : f32 to vector<8x1xf32>
    %57 = arith.divf %55, %56 : vector<8x1xf32>
    %58 = vector.broadcast %57 : vector<8x1xf32> to vector<8x64xf32>
    %59 = arith.subf %19, %58 : vector<8x64xf32>
    %60 = arith.mulf %59, %59 : vector<8x64xf32>
    %cst_27 = arith.constant dense<0.000000e+00> : vector<8xf32>
    %61 = vector.multi_reduction <add>, %60, %cst_27 [1] : vector<8x64xf32> to vector<8xf32>
    %62 = vector.shape_cast %61 : vector<8xf32> to vector<8x1xf32>
    %cst_28 = arith.constant 6.400000e+01 : f32
    %63 = vector.broadcast %cst_28 : f32 to vector<8x1xf32>
    %64 = arith.divf %62, %63 : vector<8x1xf32>
    %cst_29 = arith.constant 9.99999997E-7 : f32
    %65 = vector.broadcast %cst_29 : f32 to vector<8x1xf32>
    %66 = arith.addf %64, %65 : vector<8x1xf32>
    %67 = math.rsqrt %66 : vector<8x1xf32>
    %68 = vector.broadcast %67 : vector<8x1xf32> to vector<8x64xf32>
    %69 = arith.mulf %59, %68 : vector<8x64xf32>
    %cst_30 = arith.constant 1.000000e+00 : f32
    %70 = vector.broadcast %cst_30 : f32 to vector<1x64xf32>
    %71 = arith.addf %70, %27 : vector<1x64xf32>
    %72 = vector.broadcast %71 : vector<1x64xf32> to vector<8x64xf32>
    %73 = arith.mulf %69, %72 : vector<8x64xf32>
    %74 = vector.broadcast %26 : vector<1x64xf32> to vector<8x64xf32>
    %75 = arith.addf %73, %74 : vector<8x64xf32>
    %c0_31 = arith.constant 0 : index
    %c0_32 = arith.constant 0 : index
    %c0_33 = arith.constant 0 : index
    %76 = vector.load %arg9[%c0_31, %c0_32, %c0_33] : memref<2x64x768xbf16, #tpu.memory_space<vmem>>, vector<1x64x768xbf16>
    %77 = vector.shape_cast %76 : vector<1x64x768xbf16> to vector<64x768xbf16>
    %c0_34 = arith.constant 0 : index
    %c0_35 = arith.constant 0 : index
    %c0_36 = arith.constant 0 : index
    %78 = vector.load %arg10[%c0_34, %c0_35, %c0_36] : memref<2x1x768xf32, #tpu.memory_space<vmem>>, vector<1x1x768xf32>
    %79 = vector.shape_cast %78 : vector<1x1x768xf32> to vector<1x768xf32>
    %80 = arith.truncf %53 : vector<64x64xf32> to vector<64x64xbf16>
    %cst_37 = arith.constant dense<0.000000e+00> : vector<64x768xf32>
    %81 = tpu.matmul %80, %77, %cst_37 {dimension_numbers = #tpu.dot_dimension_numbers<[1], [0], [0], [1], [0, 0, 1, 1], [], []>} : vector<64x64xbf16>, vector<64x768xbf16>, vector<64x768xf32> -> vector<64x768xf32>
    %82 = vector.broadcast %79 : vector<1x768xf32> to vector<64x768xf32>
    %83 = arith.addf %81, %82 : vector<64x768xf32>
    %c0_38 = arith.constant 0 : index
    %c0_39 = arith.constant 0 : index
    %c0_40 = arith.constant 0 : index
    %84 = vector.load %arg11[%c0_38, %c0_39, %c0_40] : memref<2x64x768xbf16, #tpu.memory_space<vmem>>, vector<1x64x768xbf16>
    %85 = vector.shape_cast %84 : vector<1x64x768xbf16> to vector<64x768xbf16>
    %c0_41 = arith.constant 0 : index
    %c0_42 = arith.constant 0 : index
    %c0_43 = arith.constant 0 : index
    %86 = vector.load %arg12[%c0_41, %c0_42, %c0_43] : memref<2x1x768xf32, #tpu.memory_space<vmem>>, vector<1x1x768xf32>
    %87 = vector.shape_cast %86 : vector<1x1x768xf32> to vector<1x768xf32>
    %88 = arith.truncf %75 : vector<8x64xf32> to vector<8x64xbf16>
    %cst_44 = arith.constant dense<0.000000e+00> : vector<8x768xf32>
    %89 = tpu.matmul %88, %85, %cst_44 {dimension_numbers = #tpu.dot_dimension_numbers<[1], [0], [0], [1], [0, 0, 1, 1], [], []>} : vector<8x64xbf16>, vector<64x768xbf16>, vector<8x768xf32> -> vector<8x768xf32>
    %90 = vector.broadcast %87 : vector<1x768xf32> to vector<8x768xf32>
    %91 = arith.addf %89, %90 : vector<8x768xf32>
    %92 = tpu.concatenate %83, %91 in 0 : vector<64x768xf32>, vector<8x768xf32> -> vector<72x768xf32>
    %93 = arith.truncf %92 : vector<72x768xf32> to vector<72x768xbf16>
    %94 = vector.extract_strided_slice %93 {offsets = [0, 0], sizes = [72, 128], strides = [1, 1]} : vector<72x768xbf16> to vector<72x128xbf16>
    %95 = vector.extract_strided_slice %93 {offsets = [0, 256], sizes = [72, 128], strides = [1, 1]} : vector<72x768xbf16> to vector<72x128xbf16>
    %96 = vector.extract_strided_slice %93 {offsets = [0, 512], sizes = [72, 128], strides = [1, 1]} : vector<72x768xbf16> to vector<72x128xbf16>
    %97 = tpu.transpose %95, [1, 0] : vector<72x128xbf16> -> vector<128x72xbf16>
    %cst_45 = arith.constant dense<0.000000e+00> : vector<72x72xf32>
    %98 = tpu.matmul %94, %97, %cst_45 {dimension_numbers = #tpu.dot_dimension_numbers<[1], [0], [0], [1], [0, 0, 1, 1], [], []>} : vector<72x128xbf16>, vector<128x72xbf16>, vector<72x72xf32> -> vector<72x72xf32>
    %cst_46 = arith.constant 0.176776692 : f32
    %99 = vector.broadcast %cst_46 : f32 to vector<72x72xf32>
    %100 = arith.mulf %98, %99 : vector<72x72xf32>
    %cst_47 = arith.constant dense<0xFF800000> : vector<72xf32>
    %101 = vector.multi_reduction <maximumf>, %100, %cst_47 [1] : vector<72x72xf32> to vector<72xf32>
    %102 = vector.shape_cast %101 : vector<72xf32> to vector<72x1xf32>
    %103 = vector.broadcast %102 : vector<72x1xf32> to vector<72x72xf32>
    %104 = arith.subf %100, %103 : vector<72x72xf32>
    %105 = math.exp %104 : vector<72x72xf32>
    %cst_48 = arith.constant dense<0.000000e+00> : vector<72xf32>
    %106 = vector.multi_reduction <add>, %105, %cst_48 [1] : vector<72x72xf32> to vector<72xf32>
    %107 = vector.shape_cast %106 : vector<72xf32> to vector<72x1xf32>
    %108 = tpu.reciprocal %107 : vector<72x1xf32> -> vector<72x1xf32>
    %109 = vector.broadcast %108 : vector<72x1xf32> to vector<72x72xf32>
    %110 = arith.mulf %105, %109 : vector<72x72xf32>
    %111 = arith.truncf %110 : vector<72x72xf32> to vector<72x72xbf16>
    %cst_49 = arith.constant dense<0.000000e+00> : vector<72x128xf32>
    %112 = tpu.matmul %111, %96, %cst_49 {dimension_numbers = #tpu.dot_dimension_numbers<[1], [0], [0], [1], [0, 0, 1, 1], [], []>} : vector<72x72xbf16>, vector<72x128xbf16>, vector<72x128xf32> -> vector<72x128xf32>
    %113 = vector.extract_strided_slice %93 {offsets = [0, 128], sizes = [72, 128], strides = [1, 1]} : vector<72x768xbf16> to vector<72x128xbf16>
    %114 = vector.extract_strided_slice %93 {offsets = [0, 384], sizes = [72, 128], strides = [1, 1]} : vector<72x768xbf16> to vector<72x128xbf16>
    %115 = vector.extract_strided_slice %93 {offsets = [0, 640], sizes = [72, 128], strides = [1, 1]} : vector<72x768xbf16> to vector<72x128xbf16>
    %116 = tpu.transpose %114, [1, 0] : vector<72x128xbf16> -> vector<128x72xbf16>
    %cst_50 = arith.constant dense<0.000000e+00> : vector<72x72xf32>
    %117 = tpu.matmul %113, %116, %cst_50 {dimension_numbers = #tpu.dot_dimension_numbers<[1], [0], [0], [1], [0, 0, 1, 1], [], []>} : vector<72x128xbf16>, vector<128x72xbf16>, vector<72x72xf32> -> vector<72x72xf32>
    %cst_51 = arith.constant 0.176776692 : f32
    %118 = vector.broadcast %cst_51 : f32 to vector<72x72xf32>
    %119 = arith.mulf %117, %118 : vector<72x72xf32>
    %cst_52 = arith.constant dense<0xFF800000> : vector<72xf32>
    %120 = vector.multi_reduction <maximumf>, %119, %cst_52 [1] : vector<72x72xf32> to vector<72xf32>
    %121 = vector.shape_cast %120 : vector<72xf32> to vector<72x1xf32>
    %122 = vector.broadcast %121 : vector<72x1xf32> to vector<72x72xf32>
    %123 = arith.subf %119, %122 : vector<72x72xf32>
    %124 = math.exp %123 : vector<72x72xf32>
    %cst_53 = arith.constant dense<0.000000e+00> : vector<72xf32>
    %125 = vector.multi_reduction <add>, %124, %cst_53 [1] : vector<72x72xf32> to vector<72xf32>
    %126 = vector.shape_cast %125 : vector<72xf32> to vector<72x1xf32>
    %127 = tpu.reciprocal %126 : vector<72x1xf32> -> vector<72x1xf32>
    %128 = vector.broadcast %127 : vector<72x1xf32> to vector<72x72xf32>
    %129 = arith.mulf %124, %128 : vector<72x72xf32>
    %130 = arith.truncf %129 : vector<72x72xf32> to vector<72x72xbf16>
    %cst_54 = arith.constant dense<0.000000e+00> : vector<72x128xf32>
    %131 = tpu.matmul %130, %115, %cst_54 {dimension_numbers = #tpu.dot_dimension_numbers<[1], [0], [0], [1], [0, 0, 1, 1], [], []>} : vector<72x72xbf16>, vector<72x128xbf16>, vector<72x128xf32> -> vector<72x128xf32>
    %132 = tpu.concatenate %112, %131 in 1 : vector<72x128xf32>, vector<72x128xf32> -> vector<72x256xf32>
    %133 = vector.extract_strided_slice %132 {offsets = [0, 0], sizes = [64, 256], strides = [1, 1]} : vector<72x256xf32> to vector<64x256xf32>
    %c0_55 = arith.constant 0 : index
    %c0_56 = arith.constant 0 : index
    %c0_57 = arith.constant 0 : index
    %134 = vector.load %arg13[%c0_55, %c0_56, %c0_57] : memref<2x256x64xbf16, #tpu.memory_space<vmem>>, vector<1x256x64xbf16>
    %135 = vector.shape_cast %134 : vector<1x256x64xbf16> to vector<256x64xbf16>
    %c0_58 = arith.constant 0 : index
    %c0_59 = arith.constant 0 : index
    %c0_60 = arith.constant 0 : index
    %136 = vector.load %arg14[%c0_58, %c0_59, %c0_60] : memref<2x1x64xf32, #tpu.memory_space<vmem>>, vector<1x1x64xf32>
    %137 = vector.shape_cast %136 : vector<1x1x64xf32> to vector<1x64xf32>
    %138 = arith.truncf %133 : vector<64x256xf32> to vector<64x256xbf16>
    %cst_61 = arith.constant dense<0.000000e+00> : vector<64x64xf32>
    %139 = tpu.matmul %138, %135, %cst_61 {dimension_numbers = #tpu.dot_dimension_numbers<[1], [0], [0], [1], [0, 0, 1, 1], [], []>} : vector<64x256xbf16>, vector<256x64xbf16>, vector<64x64xf32> -> vector<64x64xf32>
    %140 = vector.broadcast %137 : vector<1x64xf32> to vector<64x64xf32>
    %141 = arith.addf %139, %140 : vector<64x64xf32>
    %142 = vector.extract_strided_slice %132 {offsets = [64, 0], sizes = [8, 256], strides = [1, 1]} : vector<72x256xf32> to vector<8x256xf32>
    %c0_62 = arith.constant 0 : index
    %c0_63 = arith.constant 0 : index
    %c0_64 = arith.constant 0 : index
    %143 = vector.load %arg15[%c0_62, %c0_63, %c0_64] : memref<2x256x64xbf16, #tpu.memory_space<vmem>>, vector<1x256x64xbf16>
    %144 = vector.shape_cast %143 : vector<1x256x64xbf16> to vector<256x64xbf16>
    %c0_65 = arith.constant 0 : index
    %c0_66 = arith.constant 0 : index
    %c0_67 = arith.constant 0 : index
    %145 = vector.load %arg16[%c0_65, %c0_66, %c0_67] : memref<2x1x64xf32, #tpu.memory_space<vmem>>, vector<1x1x64xf32>
    %146 = vector.shape_cast %145 : vector<1x1x64xf32> to vector<1x64xf32>
    %147 = arith.truncf %142 : vector<8x256xf32> to vector<8x256xbf16>
    %cst_68 = arith.constant dense<0.000000e+00> : vector<8x64xf32>
    %148 = tpu.matmul %147, %144, %cst_68 {dimension_numbers = #tpu.dot_dimension_numbers<[1], [0], [0], [1], [0, 0, 1, 1], [], []>} : vector<8x256xbf16>, vector<256x64xbf16>, vector<8x64xf32> -> vector<8x64xf32>
    %149 = vector.broadcast %146 : vector<1x64xf32> to vector<8x64xf32>
    %150 = arith.addf %148, %149 : vector<8x64xf32>
    %151 = vector.broadcast %22 : vector<1x64xf32> to vector<64x64xf32>
    %152 = arith.mulf %151, %141 : vector<64x64xf32>
    %153 = arith.addf %12, %152 : vector<64x64xf32>
    %154 = vector.broadcast %28 : vector<1x64xf32> to vector<8x64xf32>
    %155 = arith.mulf %154, %150 : vector<8x64xf32>
    %156 = arith.addf %19, %155 : vector<8x64xf32>
    %cst_69 = arith.constant dense<0.000000e+00> : vector<64xf32>
    %157 = vector.multi_reduction <add>, %153, %cst_69 [1] : vector<64x64xf32> to vector<64xf32>
    %158 = vector.shape_cast %157 : vector<64xf32> to vector<64x1xf32>
    %cst_70 = arith.constant 6.400000e+01 : f32
    %159 = vector.broadcast %cst_70 : f32 to vector<64x1xf32>
    %160 = arith.divf %158, %159 : vector<64x1xf32>
    %161 = vector.broadcast %160 : vector<64x1xf32> to vector<64x64xf32>
    %162 = arith.subf %153, %161 : vector<64x64xf32>
    %163 = arith.mulf %162, %162 : vector<64x64xf32>
    %cst_71 = arith.constant dense<0.000000e+00> : vector<64xf32>
    %164 = vector.multi_reduction <add>, %163, %cst_71 [1] : vector<64x64xf32> to vector<64xf32>
    %165 = vector.shape_cast %164 : vector<64xf32> to vector<64x1xf32>
    %cst_72 = arith.constant 6.400000e+01 : f32
    %166 = vector.broadcast %cst_72 : f32 to vector<64x1xf32>
    %167 = arith.divf %165, %166 : vector<64x1xf32>
    %cst_73 = arith.constant 9.99999997E-7 : f32
    %168 = vector.broadcast %cst_73 : f32 to vector<64x1xf32>
    %169 = arith.addf %167, %168 : vector<64x1xf32>
    %170 = math.rsqrt %169 : vector<64x1xf32>
    %171 = vector.broadcast %170 : vector<64x1xf32> to vector<64x64xf32>
    %172 = arith.mulf %162, %171 : vector<64x64xf32>
    %cst_74 = arith.constant 1.000000e+00 : f32
    %173 = vector.broadcast %cst_74 : f32 to vector<1x64xf32>
    %174 = arith.addf %173, %24 : vector<1x64xf32>
    %175 = vector.broadcast %174 : vector<1x64xf32> to vector<64x64xf32>
    %176 = arith.mulf %172, %175 : vector<64x64xf32>
    %177 = vector.broadcast %23 : vector<1x64xf32> to vector<64x64xf32>
    %178 = arith.addf %176, %177 : vector<64x64xf32>
    %cst_75 = arith.constant dense<0.000000e+00> : vector<8xf32>
    %179 = vector.multi_reduction <add>, %156, %cst_75 [1] : vector<8x64xf32> to vector<8xf32>
    %180 = vector.shape_cast %179 : vector<8xf32> to vector<8x1xf32>
    %cst_76 = arith.constant 6.400000e+01 : f32
    %181 = vector.broadcast %cst_76 : f32 to vector<8x1xf32>
    %182 = arith.divf %180, %181 : vector<8x1xf32>
    %183 = vector.broadcast %182 : vector<8x1xf32> to vector<8x64xf32>
    %184 = arith.subf %156, %183 : vector<8x64xf32>
    %185 = arith.mulf %184, %184 : vector<8x64xf32>
    %cst_77 = arith.constant dense<0.000000e+00> : vector<8xf32>
    %186 = vector.multi_reduction <add>, %185, %cst_77 [1] : vector<8x64xf32> to vector<8xf32>
    %187 = vector.shape_cast %186 : vector<8xf32> to vector<8x1xf32>
    %cst_78 = arith.constant 6.400000e+01 : f32
    %188 = vector.broadcast %cst_78 : f32 to vector<8x1xf32>
    %189 = arith.divf %187, %188 : vector<8x1xf32>
    %cst_79 = arith.constant 9.99999997E-7 : f32
    %190 = vector.broadcast %cst_79 : f32 to vector<8x1xf32>
    %191 = arith.addf %189, %190 : vector<8x1xf32>
    %192 = math.rsqrt %191 : vector<8x1xf32>
    %193 = vector.broadcast %192 : vector<8x1xf32> to vector<8x64xf32>
    %194 = arith.mulf %184, %193 : vector<8x64xf32>
    %cst_80 = arith.constant 1.000000e+00 : f32
    %195 = vector.broadcast %cst_80 : f32 to vector<1x64xf32>
    %196 = arith.addf %195, %30 : vector<1x64xf32>
    %197 = vector.broadcast %196 : vector<1x64xf32> to vector<8x64xf32>
    %198 = arith.mulf %194, %197 : vector<8x64xf32>
    %199 = vector.broadcast %29 : vector<1x64xf32> to vector<8x64xf32>
    %200 = arith.addf %198, %199 : vector<8x64xf32>
    %c0_81 = arith.constant 0 : index
    %c0_82 = arith.constant 0 : index
    %c0_83 = arith.constant 0 : index
    %201 = vector.load %arg17[%c0_81, %c0_82, %c0_83] : memref<2x64x256xbf16, #tpu.memory_space<vmem>>, vector<1x64x256xbf16>
    %202 = vector.shape_cast %201 : vector<1x64x256xbf16> to vector<64x256xbf16>
    %c0_84 = arith.constant 0 : index
    %c0_85 = arith.constant 0 : index
    %c0_86 = arith.constant 0 : index
    %203 = vector.load %arg18[%c0_84, %c0_85, %c0_86] : memref<2x1x256xf32, #tpu.memory_space<vmem>>, vector<1x1x256xf32>
    %204 = vector.shape_cast %203 : vector<1x1x256xf32> to vector<1x256xf32>
    %205 = arith.truncf %178 : vector<64x64xf32> to vector<64x64xbf16>
    %cst_87 = arith.constant dense<0.000000e+00> : vector<64x256xf32>
    %206 = tpu.matmul %205, %202, %cst_87 {dimension_numbers = #tpu.dot_dimension_numbers<[1], [0], [0], [1], [0, 0, 1, 1], [], []>} : vector<64x64xbf16>, vector<64x256xbf16>, vector<64x256xf32> -> vector<64x256xf32>
    %207 = vector.broadcast %204 : vector<1x256xf32> to vector<64x256xf32>
    %208 = arith.addf %206, %207 : vector<64x256xf32>
    %209 = arith.mulf %208, %208 : vector<64x256xf32>
    %210 = arith.mulf %208, %209 : vector<64x256xf32>
    %cst_88 = arith.constant 4.471500e-02 : f32
    %211 = vector.broadcast %cst_88 : f32 to vector<64x256xf32>
    %212 = arith.mulf %211, %210 : vector<64x256xf32>
    %213 = arith.addf %208, %212 : vector<64x256xf32>
    %cst_89 = arith.constant 0.797884583 : f32
    %214 = vector.broadcast %cst_89 : f32 to vector<64x256xf32>
    %215 = arith.mulf %214, %213 : vector<64x256xf32>
    %216 = math.tanh %215 : vector<64x256xf32>
    %cst_90 = arith.constant 1.000000e+00 : f32
    %217 = vector.broadcast %cst_90 : f32 to vector<64x256xf32>
    %218 = arith.addf %217, %216 : vector<64x256xf32>
    %cst_91 = arith.constant 5.000000e-01 : f32
    %219 = vector.broadcast %cst_91 : f32 to vector<64x256xf32>
    %220 = arith.mulf %219, %218 : vector<64x256xf32>
    %221 = arith.mulf %208, %220 : vector<64x256xf32>
    %c0_92 = arith.constant 0 : index
    %c0_93 = arith.constant 0 : index
    %c0_94 = arith.constant 0 : index
    %222 = vector.load %arg21[%c0_92, %c0_93, %c0_94] : memref<2x64x256xbf16, #tpu.memory_space<vmem>>, vector<1x64x256xbf16>
    %223 = vector.shape_cast %222 : vector<1x64x256xbf16> to vector<64x256xbf16>
    %c0_95 = arith.constant 0 : index
    %c0_96 = arith.constant 0 : index
    %c0_97 = arith.constant 0 : index
    %224 = vector.load %arg22[%c0_95, %c0_96, %c0_97] : memref<2x1x256xf32, #tpu.memory_space<vmem>>, vector<1x1x256xf32>
    %225 = vector.shape_cast %224 : vector<1x1x256xf32> to vector<1x256xf32>
    %226 = arith.truncf %200 : vector<8x64xf32> to vector<8x64xbf16>
    %cst_98 = arith.constant dense<0.000000e+00> : vector<8x256xf32>
    %227 = tpu.matmul %226, %223, %cst_98 {dimension_numbers = #tpu.dot_dimension_numbers<[1], [0], [0], [1], [0, 0, 1, 1], [], []>} : vector<8x64xbf16>, vector<64x256xbf16>, vector<8x256xf32> -> vector<8x256xf32>
    %228 = vector.broadcast %225 : vector<1x256xf32> to vector<8x256xf32>
    %229 = arith.addf %227, %228 : vector<8x256xf32>
    %230 = arith.mulf %229, %229 : vector<8x256xf32>
    %231 = arith.mulf %229, %230 : vector<8x256xf32>
    %cst_99 = arith.constant 4.471500e-02 : f32
    %232 = vector.broadcast %cst_99 : f32 to vector<8x256xf32>
    %233 = arith.mulf %232, %231 : vector<8x256xf32>
    %234 = arith.addf %229, %233 : vector<8x256xf32>
    %cst_100 = arith.constant 0.797884583 : f32
    %235 = vector.broadcast %cst_100 : f32 to vector<8x256xf32>
    %236 = arith.mulf %235, %234 : vector<8x256xf32>
    %237 = math.tanh %236 : vector<8x256xf32>
    %cst_101 = arith.constant 1.000000e+00 : f32
    %238 = vector.broadcast %cst_101 : f32 to vector<8x256xf32>
    %239 = arith.addf %238, %237 : vector<8x256xf32>
    %cst_102 = arith.constant 5.000000e-01 : f32
    %240 = vector.broadcast %cst_102 : f32 to vector<8x256xf32>
    %241 = arith.mulf %240, %239 : vector<8x256xf32>
    %242 = arith.mulf %229, %241 : vector<8x256xf32>
    %c0_103 = arith.constant 0 : index
    %c0_104 = arith.constant 0 : index
    %c0_105 = arith.constant 0 : index
    %243 = vector.load %arg19[%c0_103, %c0_104, %c0_105] : memref<2x256x64xbf16, #tpu.memory_space<vmem>>, vector<1x256x64xbf16>
    %244 = vector.shape_cast %243 : vector<1x256x64xbf16> to vector<256x64xbf16>
    %c0_106 = arith.constant 0 : index
    %c0_107 = arith.constant 0 : index
    %c0_108 = arith.constant 0 : index
    %245 = vector.load %arg20[%c0_106, %c0_107, %c0_108] : memref<2x1x64xf32, #tpu.memory_space<vmem>>, vector<1x1x64xf32>
    %246 = vector.shape_cast %245 : vector<1x1x64xf32> to vector<1x64xf32>
    %247 = arith.truncf %221 : vector<64x256xf32> to vector<64x256xbf16>
    %cst_109 = arith.constant dense<0.000000e+00> : vector<64x64xf32>
    %248 = tpu.matmul %247, %244, %cst_109 {dimension_numbers = #tpu.dot_dimension_numbers<[1], [0], [0], [1], [0, 0, 1, 1], [], []>} : vector<64x256xbf16>, vector<256x64xbf16>, vector<64x64xf32> -> vector<64x64xf32>
    %249 = vector.broadcast %246 : vector<1x64xf32> to vector<64x64xf32>
    %250 = arith.addf %248, %249 : vector<64x64xf32>
    %251 = vector.broadcast %25 : vector<1x64xf32> to vector<64x64xf32>
    %252 = arith.mulf %251, %250 : vector<64x64xf32>
    %253 = arith.addf %153, %252 : vector<64x64xf32>
    %c0_110 = arith.constant 0 : index
    %c0_111 = arith.constant 0 : index
    %c0_112 = arith.constant 0 : index
    %254 = vector.load %arg23[%c0_110, %c0_111, %c0_112] : memref<2x256x64xbf16, #tpu.memory_space<vmem>>, vector<1x256x64xbf16>
    %255 = vector.shape_cast %254 : vector<1x256x64xbf16> to vector<256x64xbf16>
    %c0_113 = arith.constant 0 : index
    %c0_114 = arith.constant 0 : index
    %c0_115 = arith.constant 0 : index
    %256 = vector.load %arg24[%c0_113, %c0_114, %c0_115] : memref<2x1x64xf32, #tpu.memory_space<vmem>>, vector<1x1x64xf32>
    %257 = vector.shape_cast %256 : vector<1x1x64xf32> to vector<1x64xf32>
    %258 = arith.truncf %242 : vector<8x256xf32> to vector<8x256xbf16>
    %cst_116 = arith.constant dense<0.000000e+00> : vector<8x64xf32>
    %259 = tpu.matmul %258, %255, %cst_116 {dimension_numbers = #tpu.dot_dimension_numbers<[1], [0], [0], [1], [0, 0, 1, 1], [], []>} : vector<8x256xbf16>, vector<256x64xbf16>, vector<8x64xf32> -> vector<8x64xf32>
    %260 = vector.broadcast %257 : vector<1x64xf32> to vector<8x64xf32>
    %261 = arith.addf %259, %260 : vector<8x64xf32>
    %262 = vector.broadcast %31 : vector<1x64xf32> to vector<8x64xf32>
    %263 = arith.mulf %262, %261 : vector<8x64xf32>
    %264 = arith.addf %156, %263 : vector<8x64xf32>
    %265 = vector.extract_strided_slice %5 {offsets = [0, 768], sizes = [1, 64], strides = [1, 1]} : vector<1x1536xf32> to vector<1x64xf32>
    %266 = vector.extract_strided_slice %5 {offsets = [0, 832], sizes = [1, 64], strides = [1, 1]} : vector<1x1536xf32> to vector<1x64xf32>
    %267 = vector.extract_strided_slice %5 {offsets = [0, 896], sizes = [1, 64], strides = [1, 1]} : vector<1x1536xf32> to vector<1x64xf32>
    %268 = vector.extract_strided_slice %5 {offsets = [0, 960], sizes = [1, 64], strides = [1, 1]} : vector<1x1536xf32> to vector<1x64xf32>
    %269 = vector.extract_strided_slice %5 {offsets = [0, 1024], sizes = [1, 64], strides = [1, 1]} : vector<1x1536xf32> to vector<1x64xf32>
    %270 = vector.extract_strided_slice %5 {offsets = [0, 1088], sizes = [1, 64], strides = [1, 1]} : vector<1x1536xf32> to vector<1x64xf32>
    %271 = vector.extract_strided_slice %5 {offsets = [0, 1152], sizes = [1, 64], strides = [1, 1]} : vector<1x1536xf32> to vector<1x64xf32>
    %272 = vector.extract_strided_slice %5 {offsets = [0, 1216], sizes = [1, 64], strides = [1, 1]} : vector<1x1536xf32> to vector<1x64xf32>
    %cst_117 = arith.constant dense<0.000000e+00> : vector<64xf32>
    %273 = vector.multi_reduction <add>, %253, %cst_117 [1] : vector<64x64xf32> to vector<64xf32>
    %274 = vector.shape_cast %273 : vector<64xf32> to vector<64x1xf32>
    %cst_118 = arith.constant 6.400000e+01 : f32
    %275 = vector.broadcast %cst_118 : f32 to vector<64x1xf32>
    %276 = arith.divf %274, %275 : vector<64x1xf32>
    %277 = vector.broadcast %276 : vector<64x1xf32> to vector<64x64xf32>
    %278 = arith.subf %253, %277 : vector<64x64xf32>
    %279 = arith.mulf %278, %278 : vector<64x64xf32>
    %cst_119 = arith.constant dense<0.000000e+00> : vector<64xf32>
    %280 = vector.multi_reduction <add>, %279, %cst_119 [1] : vector<64x64xf32> to vector<64xf32>
    %281 = vector.shape_cast %280 : vector<64xf32> to vector<64x1xf32>
    %cst_120 = arith.constant 6.400000e+01 : f32
    %282 = vector.broadcast %cst_120 : f32 to vector<64x1xf32>
    %283 = arith.divf %281, %282 : vector<64x1xf32>
    %cst_121 = arith.constant 9.99999997E-7 : f32
    %284 = vector.broadcast %cst_121 : f32 to vector<64x1xf32>
    %285 = arith.addf %283, %284 : vector<64x1xf32>
    %286 = math.rsqrt %285 : vector<64x1xf32>
    %287 = vector.broadcast %286 : vector<64x1xf32> to vector<64x64xf32>
    %288 = arith.mulf %278, %287 : vector<64x64xf32>
    %cst_122 = arith.constant 1.000000e+00 : f32
    %289 = vector.broadcast %cst_122 : f32 to vector<1x64xf32>
    %290 = arith.addf %289, %266 : vector<1x64xf32>
    %291 = vector.broadcast %290 : vector<1x64xf32> to vector<64x64xf32>
    %292 = arith.mulf %288, %291 : vector<64x64xf32>
    %293 = vector.broadcast %265 : vector<1x64xf32> to vector<64x64xf32>
    %294 = arith.addf %292, %293 : vector<64x64xf32>
    %cst_123 = arith.constant dense<0.000000e+00> : vector<8xf32>
    %295 = vector.multi_reduction <add>, %264, %cst_123 [1] : vector<8x64xf32> to vector<8xf32>
    %296 = vector.shape_cast %295 : vector<8xf32> to vector<8x1xf32>
    %cst_124 = arith.constant 6.400000e+01 : f32
    %297 = vector.broadcast %cst_124 : f32 to vector<8x1xf32>
    %298 = arith.divf %296, %297 : vector<8x1xf32>
    %299 = vector.broadcast %298 : vector<8x1xf32> to vector<8x64xf32>
    %300 = arith.subf %264, %299 : vector<8x64xf32>
    %301 = arith.mulf %300, %300 : vector<8x64xf32>
    %cst_125 = arith.constant dense<0.000000e+00> : vector<8xf32>
    %302 = vector.multi_reduction <add>, %301, %cst_125 [1] : vector<8x64xf32> to vector<8xf32>
    %303 = vector.shape_cast %302 : vector<8xf32> to vector<8x1xf32>
    %cst_126 = arith.constant 6.400000e+01 : f32
    %304 = vector.broadcast %cst_126 : f32 to vector<8x1xf32>
    %305 = arith.divf %303, %304 : vector<8x1xf32>
    %cst_127 = arith.constant 9.99999997E-7 : f32
    %306 = vector.broadcast %cst_127 : f32 to vector<8x1xf32>
    %307 = arith.addf %305, %306 : vector<8x1xf32>
    %308 = math.rsqrt %307 : vector<8x1xf32>
    %309 = vector.broadcast %308 : vector<8x1xf32> to vector<8x64xf32>
    %310 = arith.mulf %300, %309 : vector<8x64xf32>
    %cst_128 = arith.constant 1.000000e+00 : f32
    %311 = vector.broadcast %cst_128 : f32 to vector<1x64xf32>
    %312 = arith.addf %311, %272 : vector<1x64xf32>
    %313 = vector.broadcast %312 : vector<1x64xf32> to vector<8x64xf32>
    %314 = arith.mulf %310, %313 : vector<8x64xf32>
    %315 = vector.broadcast %271 : vector<1x64xf32> to vector<8x64xf32>
    %316 = arith.addf %314, %315 : vector<8x64xf32>
    %c1 = arith.constant 1 : index
    %c0_129 = arith.constant 0 : index
    %c0_130 = arith.constant 0 : index
    %317 = vector.load %arg9[%c1, %c0_129, %c0_130] : memref<2x64x768xbf16, #tpu.memory_space<vmem>>, vector<1x64x768xbf16>
    %318 = vector.shape_cast %317 : vector<1x64x768xbf16> to vector<64x768xbf16>
    %c1_131 = arith.constant 1 : index
    %c0_132 = arith.constant 0 : index
    %c0_133 = arith.constant 0 : index
    %319 = vector.load %arg10[%c1_131, %c0_132, %c0_133] : memref<2x1x768xf32, #tpu.memory_space<vmem>>, vector<1x1x768xf32>
    %320 = vector.shape_cast %319 : vector<1x1x768xf32> to vector<1x768xf32>
    %321 = arith.truncf %294 : vector<64x64xf32> to vector<64x64xbf16>
    %cst_134 = arith.constant dense<0.000000e+00> : vector<64x768xf32>
    %322 = tpu.matmul %321, %318, %cst_134 {dimension_numbers = #tpu.dot_dimension_numbers<[1], [0], [0], [1], [0, 0, 1, 1], [], []>} : vector<64x64xbf16>, vector<64x768xbf16>, vector<64x768xf32> -> vector<64x768xf32>
    %323 = vector.broadcast %320 : vector<1x768xf32> to vector<64x768xf32>
    %324 = arith.addf %322, %323 : vector<64x768xf32>
    %c1_135 = arith.constant 1 : index
    %c0_136 = arith.constant 0 : index
    %c0_137 = arith.constant 0 : index
    %325 = vector.load %arg11[%c1_135, %c0_136, %c0_137] : memref<2x64x768xbf16, #tpu.memory_space<vmem>>, vector<1x64x768xbf16>
    %326 = vector.shape_cast %325 : vector<1x64x768xbf16> to vector<64x768xbf16>
    %c1_138 = arith.constant 1 : index
    %c0_139 = arith.constant 0 : index
    %c0_140 = arith.constant 0 : index
    %327 = vector.load %arg12[%c1_138, %c0_139, %c0_140] : memref<2x1x768xf32, #tpu.memory_space<vmem>>, vector<1x1x768xf32>
    %328 = vector.shape_cast %327 : vector<1x1x768xf32> to vector<1x768xf32>
    %329 = arith.truncf %316 : vector<8x64xf32> to vector<8x64xbf16>
    %cst_141 = arith.constant dense<0.000000e+00> : vector<8x768xf32>
    %330 = tpu.matmul %329, %326, %cst_141 {dimension_numbers = #tpu.dot_dimension_numbers<[1], [0], [0], [1], [0, 0, 1, 1], [], []>} : vector<8x64xbf16>, vector<64x768xbf16>, vector<8x768xf32> -> vector<8x768xf32>
    %331 = vector.broadcast %328 : vector<1x768xf32> to vector<8x768xf32>
    %332 = arith.addf %330, %331 : vector<8x768xf32>
    %333 = tpu.concatenate %324, %332 in 0 : vector<64x768xf32>, vector<8x768xf32> -> vector<72x768xf32>
    %334 = arith.truncf %333 : vector<72x768xf32> to vector<72x768xbf16>
    %335 = vector.extract_strided_slice %334 {offsets = [0, 0], sizes = [72, 128], strides = [1, 1]} : vector<72x768xbf16> to vector<72x128xbf16>
    %336 = vector.extract_strided_slice %334 {offsets = [0, 256], sizes = [72, 128], strides = [1, 1]} : vector<72x768xbf16> to vector<72x128xbf16>
    %337 = vector.extract_strided_slice %334 {offsets = [0, 512], sizes = [72, 128], strides = [1, 1]} : vector<72x768xbf16> to vector<72x128xbf16>
    %338 = tpu.transpose %336, [1, 0] : vector<72x128xbf16> -> vector<128x72xbf16>
    %cst_142 = arith.constant dense<0.000000e+00> : vector<72x72xf32>
    %339 = tpu.matmul %335, %338, %cst_142 {dimension_numbers = #tpu.dot_dimension_numbers<[1], [0], [0], [1], [0, 0, 1, 1], [], []>} : vector<72x128xbf16>, vector<128x72xbf16>, vector<72x72xf32> -> vector<72x72xf32>
    %cst_143 = arith.constant 0.176776692 : f32
    %340 = vector.broadcast %cst_143 : f32 to vector<72x72xf32>
    %341 = arith.mulf %339, %340 : vector<72x72xf32>
    %cst_144 = arith.constant dense<0xFF800000> : vector<72xf32>
    %342 = vector.multi_reduction <maximumf>, %341, %cst_144 [1] : vector<72x72xf32> to vector<72xf32>
    %343 = vector.shape_cast %342 : vector<72xf32> to vector<72x1xf32>
    %344 = vector.broadcast %343 : vector<72x1xf32> to vector<72x72xf32>
    %345 = arith.subf %341, %344 : vector<72x72xf32>
    %346 = math.exp %345 : vector<72x72xf32>
    %cst_145 = arith.constant dense<0.000000e+00> : vector<72xf32>
    %347 = vector.multi_reduction <add>, %346, %cst_145 [1] : vector<72x72xf32> to vector<72xf32>
    %348 = vector.shape_cast %347 : vector<72xf32> to vector<72x1xf32>
    %349 = tpu.reciprocal %348 : vector<72x1xf32> -> vector<72x1xf32>
    %350 = vector.broadcast %349 : vector<72x1xf32> to vector<72x72xf32>
    %351 = arith.mulf %346, %350 : vector<72x72xf32>
    %352 = arith.truncf %351 : vector<72x72xf32> to vector<72x72xbf16>
    %cst_146 = arith.constant dense<0.000000e+00> : vector<72x128xf32>
    %353 = tpu.matmul %352, %337, %cst_146 {dimension_numbers = #tpu.dot_dimension_numbers<[1], [0], [0], [1], [0, 0, 1, 1], [], []>} : vector<72x72xbf16>, vector<72x128xbf16>, vector<72x128xf32> -> vector<72x128xf32>
    %354 = vector.extract_strided_slice %334 {offsets = [0, 128], sizes = [72, 128], strides = [1, 1]} : vector<72x768xbf16> to vector<72x128xbf16>
    %355 = vector.extract_strided_slice %334 {offsets = [0, 384], sizes = [72, 128], strides = [1, 1]} : vector<72x768xbf16> to vector<72x128xbf16>
    %356 = vector.extract_strided_slice %334 {offsets = [0, 640], sizes = [72, 128], strides = [1, 1]} : vector<72x768xbf16> to vector<72x128xbf16>
    %357 = tpu.transpose %355, [1, 0] : vector<72x128xbf16> -> vector<128x72xbf16>
    %cst_147 = arith.constant dense<0.000000e+00> : vector<72x72xf32>
    %358 = tpu.matmul %354, %357, %cst_147 {dimension_numbers = #tpu.dot_dimension_numbers<[1], [0], [0], [1], [0, 0, 1, 1], [], []>} : vector<72x128xbf16>, vector<128x72xbf16>, vector<72x72xf32> -> vector<72x72xf32>
    %cst_148 = arith.constant 0.176776692 : f32
    %359 = vector.broadcast %cst_148 : f32 to vector<72x72xf32>
    %360 = arith.mulf %358, %359 : vector<72x72xf32>
    %cst_149 = arith.constant dense<0xFF800000> : vector<72xf32>
    %361 = vector.multi_reduction <maximumf>, %360, %cst_149 [1] : vector<72x72xf32> to vector<72xf32>
    %362 = vector.shape_cast %361 : vector<72xf32> to vector<72x1xf32>
    %363 = vector.broadcast %362 : vector<72x1xf32> to vector<72x72xf32>
    %364 = arith.subf %360, %363 : vector<72x72xf32>
    %365 = math.exp %364 : vector<72x72xf32>
    %cst_150 = arith.constant dense<0.000000e+00> : vector<72xf32>
    %366 = vector.multi_reduction <add>, %365, %cst_150 [1] : vector<72x72xf32> to vector<72xf32>
    %367 = vector.shape_cast %366 : vector<72xf32> to vector<72x1xf32>
    %368 = tpu.reciprocal %367 : vector<72x1xf32> -> vector<72x1xf32>
    %369 = vector.broadcast %368 : vector<72x1xf32> to vector<72x72xf32>
    %370 = arith.mulf %365, %369 : vector<72x72xf32>
    %371 = arith.truncf %370 : vector<72x72xf32> to vector<72x72xbf16>
    %cst_151 = arith.constant dense<0.000000e+00> : vector<72x128xf32>
    %372 = tpu.matmul %371, %356, %cst_151 {dimension_numbers = #tpu.dot_dimension_numbers<[1], [0], [0], [1], [0, 0, 1, 1], [], []>} : vector<72x72xbf16>, vector<72x128xbf16>, vector<72x128xf32> -> vector<72x128xf32>
    %373 = tpu.concatenate %353, %372 in 1 : vector<72x128xf32>, vector<72x128xf32> -> vector<72x256xf32>
    %374 = vector.extract_strided_slice %373 {offsets = [0, 0], sizes = [64, 256], strides = [1, 1]} : vector<72x256xf32> to vector<64x256xf32>
    %c1_152 = arith.constant 1 : index
    %c0_153 = arith.constant 0 : index
    %c0_154 = arith.constant 0 : index
    %375 = vector.load %arg13[%c1_152, %c0_153, %c0_154] : memref<2x256x64xbf16, #tpu.memory_space<vmem>>, vector<1x256x64xbf16>
    %376 = vector.shape_cast %375 : vector<1x256x64xbf16> to vector<256x64xbf16>
    %c1_155 = arith.constant 1 : index
    %c0_156 = arith.constant 0 : index
    %c0_157 = arith.constant 0 : index
    %377 = vector.load %arg14[%c1_155, %c0_156, %c0_157] : memref<2x1x64xf32, #tpu.memory_space<vmem>>, vector<1x1x64xf32>
    %378 = vector.shape_cast %377 : vector<1x1x64xf32> to vector<1x64xf32>
    %379 = arith.truncf %374 : vector<64x256xf32> to vector<64x256xbf16>
    %cst_158 = arith.constant dense<0.000000e+00> : vector<64x64xf32>
    %380 = tpu.matmul %379, %376, %cst_158 {dimension_numbers = #tpu.dot_dimension_numbers<[1], [0], [0], [1], [0, 0, 1, 1], [], []>} : vector<64x256xbf16>, vector<256x64xbf16>, vector<64x64xf32> -> vector<64x64xf32>
    %381 = vector.broadcast %378 : vector<1x64xf32> to vector<64x64xf32>
    %382 = arith.addf %380, %381 : vector<64x64xf32>
    %383 = vector.broadcast %267 : vector<1x64xf32> to vector<64x64xf32>
    %384 = arith.mulf %383, %382 : vector<64x64xf32>
    %385 = arith.addf %253, %384 : vector<64x64xf32>
    %cst_159 = arith.constant dense<0.000000e+00> : vector<64xf32>
    %386 = vector.multi_reduction <add>, %385, %cst_159 [1] : vector<64x64xf32> to vector<64xf32>
    %387 = vector.shape_cast %386 : vector<64xf32> to vector<64x1xf32>
    %cst_160 = arith.constant 6.400000e+01 : f32
    %388 = vector.broadcast %cst_160 : f32 to vector<64x1xf32>
    %389 = arith.divf %387, %388 : vector<64x1xf32>
    %390 = vector.broadcast %389 : vector<64x1xf32> to vector<64x64xf32>
    %391 = arith.subf %385, %390 : vector<64x64xf32>
    %392 = arith.mulf %391, %391 : vector<64x64xf32>
    %cst_161 = arith.constant dense<0.000000e+00> : vector<64xf32>
    %393 = vector.multi_reduction <add>, %392, %cst_161 [1] : vector<64x64xf32> to vector<64xf32>
    %394 = vector.shape_cast %393 : vector<64xf32> to vector<64x1xf32>
    %cst_162 = arith.constant 6.400000e+01 : f32
    %395 = vector.broadcast %cst_162 : f32 to vector<64x1xf32>
    %396 = arith.divf %394, %395 : vector<64x1xf32>
    %cst_163 = arith.constant 9.99999997E-7 : f32
    %397 = vector.broadcast %cst_163 : f32 to vector<64x1xf32>
    %398 = arith.addf %396, %397 : vector<64x1xf32>
    %399 = math.rsqrt %398 : vector<64x1xf32>
    %400 = vector.broadcast %399 : vector<64x1xf32> to vector<64x64xf32>
    %401 = arith.mulf %391, %400 : vector<64x64xf32>
    %cst_164 = arith.constant 1.000000e+00 : f32
    %402 = vector.broadcast %cst_164 : f32 to vector<1x64xf32>
    %403 = arith.addf %402, %269 : vector<1x64xf32>
    %404 = vector.broadcast %403 : vector<1x64xf32> to vector<64x64xf32>
    %405 = arith.mulf %401, %404 : vector<64x64xf32>
    %406 = vector.broadcast %268 : vector<1x64xf32> to vector<64x64xf32>
    %407 = arith.addf %405, %406 : vector<64x64xf32>
    %c1_165 = arith.constant 1 : index
    %c0_166 = arith.constant 0 : index
    %c0_167 = arith.constant 0 : index
    %408 = vector.load %arg17[%c1_165, %c0_166, %c0_167] : memref<2x64x256xbf16, #tpu.memory_space<vmem>>, vector<1x64x256xbf16>
    %409 = vector.shape_cast %408 : vector<1x64x256xbf16> to vector<64x256xbf16>
    %c1_168 = arith.constant 1 : index
    %c0_169 = arith.constant 0 : index
    %c0_170 = arith.constant 0 : index
    %410 = vector.load %arg18[%c1_168, %c0_169, %c0_170] : memref<2x1x256xf32, #tpu.memory_space<vmem>>, vector<1x1x256xf32>
    %411 = vector.shape_cast %410 : vector<1x1x256xf32> to vector<1x256xf32>
    %412 = arith.truncf %407 : vector<64x64xf32> to vector<64x64xbf16>
    %cst_171 = arith.constant dense<0.000000e+00> : vector<64x256xf32>
    %413 = tpu.matmul %412, %409, %cst_171 {dimension_numbers = #tpu.dot_dimension_numbers<[1], [0], [0], [1], [0, 0, 1, 1], [], []>} : vector<64x64xbf16>, vector<64x256xbf16>, vector<64x256xf32> -> vector<64x256xf32>
    %414 = vector.broadcast %411 : vector<1x256xf32> to vector<64x256xf32>
    %415 = arith.addf %413, %414 : vector<64x256xf32>
    %416 = arith.mulf %415, %415 : vector<64x256xf32>
    %417 = arith.mulf %415, %416 : vector<64x256xf32>
    %cst_172 = arith.constant 4.471500e-02 : f32
    %418 = vector.broadcast %cst_172 : f32 to vector<64x256xf32>
    %419 = arith.mulf %418, %417 : vector<64x256xf32>
    %420 = arith.addf %415, %419 : vector<64x256xf32>
    %cst_173 = arith.constant 0.797884583 : f32
    %421 = vector.broadcast %cst_173 : f32 to vector<64x256xf32>
    %422 = arith.mulf %421, %420 : vector<64x256xf32>
    %423 = math.tanh %422 : vector<64x256xf32>
    %cst_174 = arith.constant 1.000000e+00 : f32
    %424 = vector.broadcast %cst_174 : f32 to vector<64x256xf32>
    %425 = arith.addf %424, %423 : vector<64x256xf32>
    %cst_175 = arith.constant 5.000000e-01 : f32
    %426 = vector.broadcast %cst_175 : f32 to vector<64x256xf32>
    %427 = arith.mulf %426, %425 : vector<64x256xf32>
    %428 = arith.mulf %415, %427 : vector<64x256xf32>
    %c1_176 = arith.constant 1 : index
    %c0_177 = arith.constant 0 : index
    %c0_178 = arith.constant 0 : index
    %429 = vector.load %arg19[%c1_176, %c0_177, %c0_178] : memref<2x256x64xbf16, #tpu.memory_space<vmem>>, vector<1x256x64xbf16>
    %430 = vector.shape_cast %429 : vector<1x256x64xbf16> to vector<256x64xbf16>
    %c1_179 = arith.constant 1 : index
    %c0_180 = arith.constant 0 : index
    %c0_181 = arith.constant 0 : index
    %431 = vector.load %arg20[%c1_179, %c0_180, %c0_181] : memref<2x1x64xf32, #tpu.memory_space<vmem>>, vector<1x1x64xf32>
    %432 = vector.shape_cast %431 : vector<1x1x64xf32> to vector<1x64xf32>
    %433 = arith.truncf %428 : vector<64x256xf32> to vector<64x256xbf16>
    %cst_182 = arith.constant dense<0.000000e+00> : vector<64x64xf32>
    %434 = tpu.matmul %433, %430, %cst_182 {dimension_numbers = #tpu.dot_dimension_numbers<[1], [0], [0], [1], [0, 0, 1, 1], [], []>} : vector<64x256xbf16>, vector<256x64xbf16>, vector<64x64xf32> -> vector<64x64xf32>
    %435 = vector.broadcast %432 : vector<1x64xf32> to vector<64x64xf32>
    %436 = arith.addf %434, %435 : vector<64x64xf32>
    %437 = vector.broadcast %270 : vector<1x64xf32> to vector<64x64xf32>
    %438 = arith.mulf %437, %436 : vector<64x64xf32>
    %439 = arith.addf %385, %438 : vector<64x64xf32>
    %cst_183 = arith.constant dense<0.000000e+00> : vector<64xf32>
    %440 = vector.multi_reduction <add>, %439, %cst_183 [1] : vector<64x64xf32> to vector<64xf32>
    %441 = vector.shape_cast %440 : vector<64xf32> to vector<64x1xf32>
    %cst_184 = arith.constant 6.400000e+01 : f32
    %442 = vector.broadcast %cst_184 : f32 to vector<64x1xf32>
    %443 = arith.divf %441, %442 : vector<64x1xf32>
    %444 = vector.broadcast %443 : vector<64x1xf32> to vector<64x64xf32>
    %445 = arith.subf %439, %444 : vector<64x64xf32>
    %446 = arith.mulf %445, %445 : vector<64x64xf32>
    %cst_185 = arith.constant dense<0.000000e+00> : vector<64xf32>
    %447 = vector.multi_reduction <add>, %446, %cst_185 [1] : vector<64x64xf32> to vector<64xf32>
    %448 = vector.shape_cast %447 : vector<64xf32> to vector<64x1xf32>
    %cst_186 = arith.constant 6.400000e+01 : f32
    %449 = vector.broadcast %cst_186 : f32 to vector<64x1xf32>
    %450 = arith.divf %448, %449 : vector<64x1xf32>
    %cst_187 = arith.constant 9.99999997E-7 : f32
    %451 = vector.broadcast %cst_187 : f32 to vector<64x1xf32>
    %452 = arith.addf %450, %451 : vector<64x1xf32>
    %453 = math.rsqrt %452 : vector<64x1xf32>
    %454 = vector.broadcast %453 : vector<64x1xf32> to vector<64x64xf32>
    %455 = arith.mulf %445, %454 : vector<64x64xf32>
    %c0_188 = arith.constant 0 : index
    %c0_189 = arith.constant 0 : index
    %456 = vector.load %arg25[%c0_188, %c0_189] : memref<64x128xbf16, #tpu.memory_space<vmem>>, vector<64x128xbf16>
    %c0_190 = arith.constant 0 : index
    %c0_191 = arith.constant 0 : index
    %457 = vector.load %arg26[%c0_190, %c0_191] : memref<1x128xf32, #tpu.memory_space<vmem>>, vector<1x128xf32>
    %458 = arith.truncf %455 : vector<64x64xf32> to vector<64x64xbf16>
    %cst_192 = arith.constant dense<0.000000e+00> : vector<64x128xf32>
    %459 = tpu.matmul %458, %456, %cst_192 {dimension_numbers = #tpu.dot_dimension_numbers<[1], [0], [0], [1], [0, 0, 1, 1], [], []>} : vector<64x64xbf16>, vector<64x128xbf16>, vector<64x128xf32> -> vector<64x128xf32>
    %460 = vector.broadcast %457 : vector<1x128xf32> to vector<64x128xf32>
    %461 = arith.addf %459, %460 : vector<64x128xf32>
    %c0_193 = arith.constant 0 : index
    %c0_194 = arith.constant 0 : index
    %462 = vector.load %arg27[%c0_193, %c0_194] : memref<64x128xf32, #tpu.memory_space<vmem>>, vector<64x128xf32>
    tpu.vector_store %arg27[%c0_193, %c0_194], %461 {strides = array<i32>} : memref<64x128xf32, #tpu.memory_space<vmem>>, vector<64x128xf32>,
    return
  }
}

</mosaic_0001>

<bundles_post_ra>
// kernel: nadit_upscaler_forward.1
= control target key start
LH: loop header
LB: loop body
LE: loop exit
PB: predicated region body
PF: predicated region fallthrough
CT: control target
= control target key end

     0   :  { %vm353_vm0 = vcmask 523264   ;;  %vm511_vm1 = vcmask 130048   ;;  %vm575_vm2 = vcmask 261120   ;;  %s12380_s7 = inlined_call_operand.vmem [shape: bf16[64,1536], index: 7, kind: input, shape index: {}]   ;;  %s12381_s2 = inlined_call_operand.vmem [shape: f32[1,64], index: 2, kind: input, shape index: {}]   ;;  %s12382_s3 = inlined_call_operand.vmem [shape: bf16[16,64], index: 3, kind: input, shape index: {}]   ;;  %s12383_s0 = inlined_call_operand.vmem [shape: f32[64,16], index: 0, kind: input, shape index: {}]   ;;  %s12384_s4 = inlined_call_operand.vmem [shape: f32[1,64], index: 4, kind: input, shape index: {}]   ;;  %s12385_s5 = inlined_call_operand.vmem [shape: bf16[32,64], index: 5, kind: input, shape index: {}]   ;;  %s12386_s1 = inlined_call_operand.vmem [shape: f32[8,32], index: 1, kind: input, shape index: {}]   ;;  %s12387_s6 = inlined_call_operand.vmem [shape: f32[1,64], index: 6, kind: input, shape index: {}]   ;;  %s12388_s8 = inlined_call_operand.vmem [shape: f32[1,1536], index: 8, kind: input, shape index: {}]   ;;  %s12389_s9 = inlined_call_operand.vmem [shape: bf16[2,64,768], index: 9, kind: input, shape index: {}]   ;;  %s12390_s11 = inlined_call_operand.vmem [shape: bf16[2,64,768], index: 11, kind: input, shape index: {}]   ;;  %s12391_s10 = inlined_call_operand.vmem [shape: f32[2,1,768], index: 10, kind: input, shape index: {}]   ;;  %s12392_s12 = inlined_call_operand.vmem [shape: f32[2,1,768], index: 12, kind: input, shape index: {}]   ;;  %s12393_s13 = inlined_call_operand.vmem [shape: bf16[2,256,64], index: 13, kind: input, shape index: {}]   ;;  %s12394_s14 = inlined_call_operand.vmem [shape: f32[2,1,64], index: 14, kind: input, shape index: {}]   ;;  %s12395_s15 = inlined_call_operand.vmem [shape: bf16[2,256,64], index: 15, kind: input, shape index: {}]   ;;  %s12396_s16 = inlined_call_operand.vmem [shape: f32[2,1,64], index: 16, kind: input, shape index: {}]   ;;  %s12397_s17 = inlined_call_operand.vmem [shape: bf16[2,64,256], index: 17, kind: input, shape index: {}]   ;;  %s12398_s21 = inlined_call_operand.vmem [shape: bf16[2,64,256], index: 21, kind: input, shape index: {}]   ;;  %s12399_s19 = inlined_call_operand.vmem [shape: bf16[2,256,64], index: 19, kind: input, shape index: {}]   ;;  %s12400_s18 = inlined_call_operand.vmem [shape: f32[2,1,256], index: 18, kind: input, shape index: {}]   ;;  %s12401_s20 = inlined_call_operand.vmem [shape: f32[2,1,64], index: 20, kind: input, shape index: {}]   ;;  %s12402_s23 = inlined_call_operand.vmem [shape: bf16[2,256,64], index: 23, kind: input, shape index: {}]   ;;  %s12403_s22 = inlined_call_operand.vmem [shape: f32[2,1,256], index: 22, kind: input, shape index: {}]   ;;  %s12404_s24 = inlined_call_operand.vmem [shape: f32[2,1,64], index: 24, kind: input, shape index: {}]   ;;  %s12405_s25 = inlined_call_operand.vmem [shape: bf16[64,128], index: 25, kind: input, shape index: {}]   ;;  %s12406_s26 = inlined_call_operand.vmem [shape: f32[1,128], index: 26, kind: input, shape index: {}]   ;;  %s12407_s27 = inlined_call_operand.vmem [shape: f32[64,128], index: 27, kind: output, shape index: {}]  }
   0x1   :  { %12424 = sst [smem:[#allocation16_spill]] %s12380_s7 }
   0x2   :  { %12425 = sst [smem:[#allocation17_spill]] %s12381_s2 }
   0x3   :  { %12426 = sst [smem:[#allocation18_spill]] %s12382_s3 }
   0x4   :  { %12427 = sst [smem:[#allocation19_spill]] %s12383_s0 }
   0x5   :  { %12428 = sst [smem:[#allocation20_spill]] %s12384_s4 }
   0x6   :  { %12429 = sst [smem:[#allocation21_spill]] %s12385_s5 }
   0x7   :  { %12430 = sst [smem:[#allocation22_spill]] %s12386_s1 }
   0x8   :  { %12431 = sst [smem:[#allocation23_spill]] %s12387_s6 }
   0x9   :  { %12432 = sst [smem:[#allocation24_spill]] %s12388_s8 }
   0xa   :  { %12433 = sst [smem:[#allocation25_spill]] %s12389_s9 }
   0xb   :  { %12434 = sst [smem:[#allocation26_spill]] %s12390_s11 }
   0xc   :  { %12435 = sst [smem:[#allocation27_spill]] %s12391_s10 }
   0xd   :  { %s12436_s8 = sld [smem:[#allocation16_spill]] }
   0xe   :  { %s12437_s29 = sld [smem:[#allocation17_spill]] }
   0xf   :  { %s12438_s10 = sld [smem:[#allocation18_spill]] }
  0x10   :  { %s12439_s7 = sld [smem:[#allocation19_spill]] }
  0x11   :  { %s12441_s0 = sld [smem:[#allocation21_spill]] }
  0x12   :  { %s12442_s2 = sld [smem:[#allocation22_spill]] }
  0x13   :  { %v6626_v0 = vld [vmem:[%s12436_s8 + $0x128] sm:$0xf]  ;;  %v7826_v1 = vld [vmem:[%s12436_s8 + $0x154] sm:$0xf0]  ;;  %v7821_v11 = vld [vmem:[%s12436_s8 + $0x12c] sm:$0xf] }
  0x14   :  { %v6586_v2 = vld [vmem:[%s12436_s8 + $0xc8] sm:$0xf]  ;;  %v6627_v3 = vor.u32 %v7826_v1, %v6626_v0  ;;  %v7816_v4 = vld [vmem:[%s12436_s8 + $0xf4] sm:$0xf0]  ;;  %v6628_v12 = vld [vmem:[%s12436_s8 + $0x158] sm:$0xf0] }
  0x15   :  { %v6587_v5 = vor.u32 %v7816_v4, %v6586_v2  ;;  %v6546_v6 = vld [vmem:[%s12436_s8 + $0x68] sm:$0xf]  ;;  %v7806_v7 = vld [vmem:[%s12436_s8 + $0x94] sm:$0xf0]  ;;  %v87_v14 = vld [vmem:[%s12437_s29] sm:$0x1]  ;;  %v6631_v15 = vor.u32 %v7821_v11, %v6628_v12 }
  0x16   :  { %387 = vmatpush.bf16.msra.mxu2 %v6627_v3  ;;  %v6547_v8 = vor.u32 %v7806_v7, %v6546_v6  ;;  %v6506_v9 = vld [vmem:[%s12436_s8 + $0x8] sm:$0xf]  ;;  %v7796_v10 = vld [vmem:[%s12436_s8 + $0x34] sm:$0xf0]  ;;  %v7811_v16 = vld [vmem:[%s12436_s8 + $0xcc] sm:$0xf]  ;;  %v8549_v18 = vpack.c.bf16 %v87_v14, %v87_v14 }
  0x17   :  { %v6507_v13 = vor.u32 %v7796_v10, %v6506_v9  ;;  %v6588_v17 = vld [vmem:[%s12436_s8 + $0xf8] sm:$0xf0]  ;;  %v7801_v20 = vld [vmem:[%s12436_s8 + $0x6c] sm:$0xf]  ;;  %v6642_v25 = vld [vmem:[%s12436_s8 + $0x138] sm:$0xf] }
  0x18   :  { %v6591_v19 = vor.u32 %v7811_v16, %v6588_v17  ;;  %v6548_v21 = vld [vmem:[%s12436_s8 + $0x98] sm:$0xf0]  ;;  %v7791_v23 = vld [vmem:[%s12436_s8 + $0xc] sm:$0xf]  ;;  %v7828_v26 = vld [vmem:[%s12436_s8 + $0x164] sm:$0xf0] }
  0x19   :  { %v6551_v22 = vor.u32 %v7801_v20, %v6548_v21  ;;  %v6508_v24 = vld [vmem:[%s12436_s8 + $0x38] sm:$0xf0]  ;;  %v6643_v28 = vor.u32 %v7828_v26, %v6642_v25  ;;  %v6602_v29 = vld [vmem:[%s12436_s8 + $0xd8] sm:$0xf]  ;;  %v7818_v30 = vld [vmem:[%s12436_s8 + $0x104] sm:$0xf0] }
  0x1a   :  { %388 = vmatpush.bf16.msra.mxu2 %v6587_v5  ;;  %v6511_v27 = vor.u32 %v7791_v23, %v6508_v24  ;;  %v6603_v31 = vor.u32 %v7818_v30, %v6602_v29  ;;  %v6562_v32 = vld [vmem:[%s12436_s8 + $0x78] sm:$0xf]  ;;  %v7808_v33 = vld [vmem:[%s12436_s8 + $0xa4] sm:$0xf0]  ;;  %v7830_v38 = vld [vmem:[%s12438_s10] sm:$0xff]  ;;  %s12444_s10 = sld [smem:[#allocation20_spill]] }
  0x1b   :  { %v6563_v34 = vor.u32 %v7808_v33, %v6562_v32  ;;  %v6522_v35 = vld [vmem:[%s12436_s8 + $0x18] sm:$0xf]  ;;  %v7798_v36 = vld [vmem:[%s12436_s8 + $0x44] sm:$0xf0]  ;;  %v487_v39 = vld [vmem:[%s12439_s7] sm:$0xff]  ;;  %s12452_s28 = sld [smem:[#allocation23_spill]] }
  0x1c   :  { %v6523_v37 = vor.u32 %v7798_v36, %v6522_v35  ;;  %v488_v40 = vld [vmem:[%s12439_s7 + $0x8] sm:$0xff]  ;;  %v489_v42 = vld [vmem:[%s12439_s7 + $0x10] sm:$0xff]  ;;  %v490_v43 = vld [vmem:[%s12439_s7 + $0x18] sm:$0xff]  ;;  %s12455_s9 = sld [smem:[#allocation25_spill]] }
  0x1d   :  { %v498_v41 = vpack.c.bf16 %v488_v40, %v487_v39  ;;  %v499_v44 = vpack.c.bf16 %v490_v43, %v489_v42  ;;  %v491_v45 = vld [vmem:[%s12439_s7 + $0x20] sm:$0xff]  ;;  %v492_v46 = vld [vmem:[%s12439_s7 + $0x28] sm:$0xff]  ;;  %v493_v48 = vld [vmem:[%s12439_s7 + $0x30] sm:$0xff]  ;;  %s12459_s1 = sld [smem:[#allocation26_spill]] }
  0x1e   :  { %389 = vmatpush.bf16.msra.mxu2 %v6547_v8  ;;  %v500_v47 = vpack.c.bf16 %v492_v46, %v491_v45  ;;  %v494_v49 = vld [vmem:[%s12439_s7 + $0x38] sm:$0xff]  ;;  %v6644_v52 = vld [vmem:[%s12436_s8 + $0x168] sm:$0xf0]  ;;  %v7831_v3 = vld [vmem:[%s12441_s0] sm:$0xff]  ;;  %v8368_v45 = vmov 64.0   ;;  %s12454_s7 = sld [smem:[#allocation24_spill]] }
  0x1f   :  { %v501_v50 = vpack.c.bf16 %v494_v49, %v493_v48  ;;  %v7823_v51 = vld [vmem:[%s12436_s8 + $0x13c] sm:$0xf]  ;;  %v6604_v55 = vld [vmem:[%s12436_s8 + $0x108] sm:$0xf0]  ;;  %v553_v4 = vld [vmem:[%s12442_s2] sm:$0xff]  ;;  %8064 = vrcp.f32 %v8368_v45  ;;  %s12463_s4 = sld [smem:[#allocation27_spill]] }
  0x20   :  { %v6647_v53 = vor.u32 %v7823_v51, %v6644_v52  ;;  %v7813_v54 = vld [vmem:[%s12436_s8 + $0xdc] sm:$0xf]  ;;  %v6564_v58 = vld [vmem:[%s12436_s8 + $0xa8] sm:$0xf0]  ;;  %v559_v5 = vpack.c.bf16 %v553_v4, %v553_v4  ;;  %v6618_v8 = vld [vmem:[%s12436_s8 + $0x120] sm:$0xf] }
  0x21   :  { %v6607_v56 = vor.u32 %v7813_v54, %v6604_v55  ;;  %v7803_v57 = vld [vmem:[%s12436_s8 + $0x7c] sm:$0xf]  ;;  %v6524_v62 = vld [vmem:[%s12436_s8 + $0x48] sm:$0xf0]  ;;  %v7825_v9 = vld [vmem:[%s12436_s8 + $0x14c] sm:$0xf0] }
  0x22   :  { %390 = vmatpush.bf16.msra.mxu2 %v6507_v13  ;;  %452 = vmatpush.bf16.msra.mxu3 %v6647_v53  ;;  %v6567_v59 = vor.u32 %v7803_v57, %v6564_v58  ;;  %v7793_v61 = vld [vmem:[%s12436_s8 + $0x1c] sm:$0xf]  ;;  %v7832_v1 = vld [vmem:[%s12441_s0 + $0x8] sm:$0xff]  ;;  %v6619_v10 = vor.u32 %v7825_v9, %v6618_v8  ;;  %v6578_v11 = vld [vmem:[%s12436_s8 + $0xc0] sm:$0xf] }
  0x23   :  { %v6527_v63 = vor.u32 %v7793_v61, %v6524_v62  ;;  %v7815_v12 = vld [vmem:[%s12436_s8 + $0xec] sm:$0xf0]  ;;  %v6498_v20 = vld [vmem:[%s12436_s8] sm:$0xf]  ;;  %v7790_v45 = vld [vmem:[%s12436_s8 + $0x4] sm:$0xf] }
  0x24   :  { %361 = vmatpush.bf16.msra.mxu0 %v6619_v10  ;;  %v6579_v13 = vor.u32 %v7815_v12, %v6578_v11  ;;  %v7805_v16 = vld [vmem:[%s12436_s8 + $0x8c] sm:$0xf0] }
  0x25   :  { %6658 = vmatmul.msk.bf16.vlgmr.msra.gmra.mxu2 %vm353_vm0, %v8549_v18  ;;  %v7795_v21 = vld [vmem:[%s12436_s8 + $0x2c] sm:$0xf0]  ;;  %v8065_v46 = vpop.eup %8064 }
  0x26   :  { %400 = vmatpush.bf16.msrb.mxu2 %v6631_v15  ;;  %453 = vmatpush.bf16.msra.mxu3 %v6607_v56  ;;  %v6538_v15 = vld [vmem:[%s12436_s8 + $0x60] sm:$0xf]  ;;  %v617_v48 = vmul.f32 64.0, %v8065_v46  ;;  %vm621_vm3 = vweird.f32 %v8065_v46 }
  0x27   :  { %v6539_v17 = vor.u32 %v7805_v16, %v6538_v15 }
  0x28   :  { %362 = vmatpush.bf16.msra.mxu0 %v6579_v13  ;;  %v618_v49 = vsub.f32 1.0, %v617_v48 }
  0x2a   :  { %401 = vmatpush.bf16.msrb.mxu2 %v6591_v19  ;;  %454 = vmatpush.bf16.msra.mxu3 %v6567_v59  ;;  %v8055_v19 = vld [vmem:[%s12444_s10] ss:$0 sm:$0xff]  ;;  %v619_v51 = vmul.f32 %v8065_v46, %v618_v49  ;;  %v7822_v49 = vld [vmem:[%s12436_s8 + $0x134] sm:$0xf] }
  0x2c   :  { %363 = vmatpush.bf16.msra.mxu0 %v6539_v17  ;;  %v620_v52 = vadd.f32 %v8065_v46, %v619_v51 }
  0x2e   :  { %402 = vmatpush.bf16.msrb.mxu2 %v6551_v22  ;;  %455 = vmatpush.bf16.msra.mxu3 %v6527_v63  ;;  %v6499_v22 = vor.u32 %v7795_v21, %v6498_v20  ;;  %v8720_v54 = vsel %vm621_vm3, %v8065_v46, %v620_v52  ;;  %v6620_v20 = vld [vmem:[%s12436_s8 + $0x150] sm:$0xf0]  ;;  %v7810_v21 = vld [vmem:[%s12436_s8 + $0xc4] sm:$0xf] }
  0x2f   :  { %12450 = vst [vmem:[#allocation9_spill] sm:$0xff] %v8720_v54  ;;  %v6500_v46 = vld [vmem:[%s12436_s8 + $0x30] sm:$0xf0] }
  0x30   :  { %364 = vmatpush.bf16.msra.mxu0 %v6499_v22  ;;  %v6503_v52 = vor.u32 %v7790_v45, %v6500_v46  ;;  %v7824_v45 = vld [vmem:[%s12436_s8 + $0x144] sm:$0xf] }
  0x31   :  { %6663 = vmatmul.msk.bf16.vlgmr.msra.gmra.mxu3 %vm353_vm0, %v8549_v18 }
  0x32   :  { %403 = vmatpush.bf16.msrb.mxu2 %v6511_v27  ;;  %585 = vmatpush.bf16.msrb.mxu3 %v7832_v1 }
  0x33   :  { %6656 = vmatmul.msk.bf16.vlgmr.msra.gmra.mxu0 %vm353_vm0, %v8549_v18 }
  0x35   :  { %6659 = vmatmul.msk.bf16.vlgmr.msrb.gmra.mxu2 %vm353_vm0, %v8549_v18 }
  0x36   :  { %439 = vmatpush.bf16.msra.mxu2 %v6643_v28  ;;  %586 = vmatpush.bf16.msrb.mxu3 %v7831_v3 }
  0x3a   :  { %440 = vmatpush.bf16.msra.mxu2 %v6603_v31 }
  0x3e   :  { %441 = vmatpush.bf16.msra.mxu2 %v6563_v34 }
  0x41   :  { %6682 = vmatmul.msk.bf16.vlgmr.msrb.gmra.mxu3 %vm575_vm2, %v559_v5  ;;  %v8056_v5 = vld [vmem:[%s12452_s28] ss:$0 sm:$0xff]  ;;  %s8369_s28 = smov 64  }
  0x42   :  { %442 = vmatpush.bf16.msra.mxu2 %v6523_v37 }
  0x45   :  { %6662 = vmatmul.msk.bf16.vlgmr.msra.gmra.mxu2 %vm353_vm0, %v8549_v18 }
  0x46   :  { %531 = vmatpush.bf16.msrb.mxu2 %v7830_v38 }
  0x55   :  { %6670 = vmatmul.msk.bf16.vlgmr.msrb.gmra.mxu2 %vm511_vm1, %v498_v41 }
  0x65   :  { %6671 = vmatmul.msk.bf16.gmra.mxu2 %vm511_vm1, %v499_v44 }
  0x75   :  { %6672 = vmatmul.msk.bf16.gmra.mxu2 %vm511_vm1, %v500_v47 }
  0x85   :  { %6673 = vmatmul.msk.bf16.gmra.mxu2 %vm511_vm1, %v501_v50 }
  0xa8   :  { %v8638_v60 = vpop.f32.mrf.mxu2 }
  0xa9   :  { %12440 = vst [vmem:[#allocation2_spill] sm:$0xff] %v8638_v60 }
  0xb0   :  { %v394_v0 = vpop.f32.mrf.mxu2 }
  0xb1   :  { %v366_v0 = vpop.f32.mrf.mxu0 }
  0xb4   :  { %v8718_v44 = vpop.f32.mrf.mxu3 }
  0xb5   :  { %12449 = vst [vmem:[#allocation8_spill] sm:$0xff] %v8718_v44 }
  0xb8   :  { %v8651_v2 = vpop.f32.mrf.mxu2 }
  0xb9   :  { %v368_v12 = vpop.f32.mrf.mxu0 }
  0xbc   :  { %v459_v47 = vpop.f32.mrf.mxu3 }
  0xc0   :  { %v407_v6 = vpop.f32.mrf.mxu2 }
  0xc4   :  { %v588_v50 = vpop.f32.mrf.mxu3 }
  0xc5   :  { %v8744_v11 = vadd.f32 %v8056_v5, %v588_v50  ;;  %v6636_v50 = vld [vmem:[%s12436_s8 + $0x160] sm:$0xf0] }
  0xc7   :  { %12453 = vst [vmem:[#allocation11_spill] sm:$0xff] %v8744_v11 }
  0xc8   :  { %v8659_v7 = vpop.f32.mrf.mxu2 }
  0xc9   :  { %12443 = vst [vmem:[#allocation3_spill] sm:$0xff] %v8659_v7 }
  0xcc   :  { %v590_v53 = vpop.f32.mrf.mxu3 }
  0xcd   :  { %v6639_v53 = vor.u32 %v7822_v49, %v6636_v50  ;;  %v6610_v49 = vld [vmem:[%s12436_s8 + $0xe0] sm:$0xf]  ;;  %v7819_v50 = vld [vmem:[%s12436_s8 + $0x10c] sm:$0xf0] }
  0xd0   :  { %v446_v14 = vpop.f32.mrf.mxu2 }
  0xd1   :  { %v798_v14 = vsel %vm353_vm0, %v8744_v11, 0.0 }
  0xd8   :  { %v533_v23 = vpop.f32.mrf.mxu2 }
  0xd9   :  { %v8688_v24 = vadd.f32 %v8055_v19, %v533_v23 }
  0xdb   :  { %v592_v25 = vsel %vm353_vm0, %v8688_v24, 0.0 }
  0xdc   :  { %593 = vadd.xlane.f32.xlu0 %v592_v25  ;;  %v6580_v25 = vld [vmem:[%s12436_s8 + $0xf0] sm:$0xf0] }
  0xe0   :  { %v535_v26 = vpop.f32.mrf.mxu2 }
  0xe1   :  { %v8694_v27 = vadd.f32 %v8055_v19, %v535_v26  ;;  %v6634_v26 = vld [vmem:[%s12436_s8 + $0x130] sm:$0xf] }
  0xe3   :  { %v595_v28 = vsel %vm353_vm0, %v8694_v27, 0.0 }
  0xe4   :  { %596 = vadd.xlane.f32.xlu0 %v595_v28 }
  0xe8   :  { %v538_v29 = vpop.f32.mrf.mxu2 }
  0xe9   :  { %v8698_v30 = vadd.f32 %v8055_v19, %v538_v29  ;;  %v6583_v29 = vor.u32 %v7810_v21, %v6580_v25  ;;  %v6554_v21 = vld [vmem:[%s12436_s8 + $0x70] sm:$0xf] }
  0xeb   :  { %v598_v31 = vsel %vm353_vm0, %v8698_v30, 0.0 }
  0xec   :  { %599 = vadd.xlane.f32.xlu1 %v598_v31  ;;  %v7827_v31 = vld [vmem:[%s12436_s8 + $0x15c] sm:$0xf0] }
  0xf0   :  { %v540_v32 = vpop.f32.mrf.mxu2 }
  0xf1   :  { %v8702_v33 = vadd.f32 %v8055_v19, %v540_v32  ;;  %v7800_v32 = vld [vmem:[%s12436_s8 + $0x64] sm:$0xf] }
  0xf3   :  { %12445 = vst [vmem:[#allocation4_spill] sm:$0xff] %v8702_v33  ;;  %v601_v34 = vsel %vm353_vm0, %v8702_v33, 0.0 }
  0xf4   :  { %602 = vadd.xlane.f32.xlu1 %v601_v34  ;;  %v6540_v34 = vld [vmem:[%s12436_s8 + $0x90] sm:$0xf0] }
  0xf8   :  { %v543_v35 = vpop.f32.mrf.mxu2 }
  0xf9   :  { %v8706_v36 = vadd.f32 %v8055_v19, %v543_v35  ;;  %v6635_v35 = vor.u32 %v7827_v31, %v6634_v26  ;;  %v6556_v26 = vld [vmem:[%s12436_s8 + $0xa0] sm:$0xf0]  ;;  %v6514_v31 = vld [vmem:[%s12436_s8 + $0x10] sm:$0xf] }
  0xfb   :  { %12446 = vst [vmem:[#allocation5_spill] sm:$0xff] %v8706_v36  ;;  %v604_v37 = vsel %vm353_vm0, %v8706_v36, 0.0  ;;  %413 = vmatpush.bf16.msrb.mxu0 %v6635_v35 }
  0xfc   :  { %605 = vadd.xlane.f32.xlu2 %v604_v37 }
 0x100   :  { %v545_v38 = vpop.f32.mrf.mxu2 }
 0x101   :  { %v8710_v39 = vadd.f32 %v8055_v19, %v545_v38 }
 0x103   :  { %12447 = vst [vmem:[#allocation6_spill] sm:$0xff] %v8710_v39  ;;  %v607_v40 = vsel %vm353_vm0, %v8710_v39, 0.0 }
 0x104   :  { %608 = vadd.xlane.f32.xlu2 %v607_v40  ;;  %v6543_v40 = vor.u32 %v7800_v32, %v6540_v34  ;;  %v7797_v32 = vld [vmem:[%s12436_s8 + $0x3c] sm:$0xf0]  ;;  %v7792_v34 = vld [vmem:[%s12436_s8 + $0x14] sm:$0xf] }
 0x105   :  { %v6515_v35 = vor.u32 %v7797_v32, %v6514_v31  ;;  %v6767_v31 = vld [vmem:[%s12455_s9 + $0xb0] sm:$0xf0] }
 0x108   :  { %v548_v41 = vpop.f32.mrf.mxu2 }
 0x109   :  { %v8714_v42 = vadd.f32 %v8055_v19, %v548_v41  ;;  %v8788_v41 = vld [vmem:[%s12454_s7] sm:$0xff] }
 0x10a   :  { %v333_v48 = vperm.slane %v8788_v41, 0 }
 0x10b   :  { %12448 = vst [vmem:[#allocation7_spill] sm:$0xff] %v8714_v42  ;;  %v610_v43 = vsel %vm353_vm0, %v8714_v42, 0.0 }
 0x10c   :  { %611 = vadd.xlane.f32.xlu2 %v610_v43 }
 0x110   :  { %v550_v61 = vpop.f32.mrf.mxu2 }
 0x111   :  { %v8730_v1 = vadd.f32 %v8055_v19, %v550_v61  ;;  %v7820_v19 = vld [vmem:[%s12436_s8 + $0x124] sm:$0xf] }
 0x112   :  { %v6623_v23 = vor.u32 %v7820_v19, %v6620_v20  ;;  %v6596_v19 = vld [vmem:[%s12436_s8 + $0x100] sm:$0xf0] }
 0x113   :  { %12451 = vst [vmem:[#allocation10_spill] sm:$0xff] %v8730_v1  ;;  %v613_v6 = vsel %vm353_vm0, %v8730_v1, 0.0 }
 0x114   :  { %374 = vmatpush.bf16.msra.mxu1 %v6623_v23  ;;  %v7802_v23 = vld [vmem:[%s12436_s8 + $0x74] sm:$0xf] }
 0x118   :  { %375 = vmatpush.bf16.msra.mxu1 %v6583_v29  ;;  %v6559_v29 = vor.u32 %v7802_v23, %v6556_v26  ;;  %v7855_v23 = vld [vmem:[%s12455_s9 + $0xac] sm:$0xf0] }
 0x11c   :  { %376 = vmatpush.bf16.msra.mxu1 %v6543_v40  ;;  %v6650_v40 = vld [vmem:[%s12436_s8 + $0x140] sm:$0xf] }
 0x120   :  { %377 = vmatpush.bf16.msra.mxu1 %v6503_v52  ;;  %v7814_v52 = vld [vmem:[%s12436_s8 + $0xe4] sm:$0xf] }
 0x123   :  { %6657 = vmatmul.msk.bf16.vlgmr.msra.gmra.mxu1 %vm353_vm0, %v8549_v18 }
 0x124   :  { %426 = vmatpush.bf16.msrb.mxu1 %v6639_v53  ;;  %v6611_v53 = vor.u32 %v7819_v50, %v6610_v49  ;;  %v7846_v50 = vld [vmem:[%s12455_s9 + $0x6c] sm:$0xf] }
 0x14f   :  { %v594_v55 = vpop.xlane.xlu0 %593 }
 0x150   :  { %v623_v56 = vmul.f32 %v8720_v54, %v594_v55 }
 0x152   :  { %v8724_v57 = vsub.f32 %v8688_v24, %v623_v56  ;;  %v8809_v56 = vadd.f32 %v366_v0, %v333_v48 }
 0x154   :  { %v639_v58 = vmul.f32 %v8724_v57, %v8724_v57 }
 0x156   :  { %v647_v59 = vsel %vm353_vm0, %v639_v58, 0.0 }
 0x157   :  { %648 = vadd.xlane.f32.xlu0 %v647_v59  ;;  %v597_v62 = vpop.xlane.xlu0 %596 }
 0x158   :  { %v624_v63 = vmul.f32 %v8720_v54, %v597_v62  ;;  %v775_v62 = vadd.f32 1.0, %v8809_v56 }
 0x15a   :  { %v8733_v3 = vsub.f32 %v8694_v27, %v624_v63 }
 0x15c   :  { %v640_v4 = vmul.f32 %v8733_v3, %v8733_v3 }
 0x15e   :  { %v650_v8 = vsel %vm353_vm0, %v640_v4, 0.0  ;;  %v776_v4 = vperm.slane %v775_v62, 0  ;;  %v7804_v62 = vld [vmem:[%s12436_s8 + $0x84] sm:$0xf] }
 0x15f   :  { %v600_v9 = vpop.xlane.xlu1 %599  ;;  %614 = vadd.xlane.f32.xlu0 %v613_v6  ;;  %651 = vadd.xlane.f32.xlu1 %v650_v8 }
 0x160   :  { %v625_v10 = vmul.f32 %v8720_v54, %v600_v9 }
 0x162   :  { %v8747_v13 = vsub.f32 %v8698_v30, %v625_v10 }
 0x164   :  { %v641_v15 = vmul.f32 %v8747_v13, %v8747_v13 }
 0x166   :  { %v653_v16 = vsel %vm353_vm0, %v641_v15, 0.0  ;;  %v7817_v15 = vld [vmem:[%s12436_s8 + $0xfc] sm:$0xf0] }
 0x167   :  { %v603_v17 = vpop.xlane.xlu1 %602  ;;  %799 = vadd.xlane.f32.xlu0 %v798_v14  ;;  %654 = vadd.xlane.f32.xlu1 %v653_v16  ;;  %v6594_v14 = vld [vmem:[%s12436_s8 + $0xd0] sm:$0xf]  ;;  %v7812_v16 = vld [vmem:[%s12436_s8 + $0xd4] sm:$0xf] }
 0x168   :  { %v626_v22 = vmul.f32 %v8720_v54, %v603_v17  ;;  %v6595_v17 = vor.u32 %v7817_v15, %v6594_v14  ;;  %v6599_v20 = vor.u32 %v7812_v16, %v6596_v19  ;;  %v6532_v14 = vld [vmem:[%s12436_s8 + $0x50] sm:$0xf0]  ;;  %v6757_v16 = vld [vmem:[%s12455_s9 + $0x90] sm:$0xf] }
 0x169   :  { %v7851_v19 = vld [vmem:[%s12455_s9 + $0x94] sm:$0xf] }
 0x16a   :  { %v8771_v28 = vsub.f32 %v8702_v33, %v626_v22  ;;  %414 = vmatpush.bf16.msrb.mxu0 %v6595_v17  ;;  %427 = vmatpush.bf16.msrb.mxu1 %v6599_v20  ;;  %v7807_v22 = vld [vmem:[%s12436_s8 + $0x9c] sm:$0xf0]  ;;  %v7854_v17 = vld [vmem:[%s12455_s9 + $0xa4] sm:$0xf0] }
 0x16b   :  { %v6555_v25 = vor.u32 %v7807_v22, %v6554_v21  ;;  %v6758_v20 = vor.u32 %v7854_v17, %v6757_v16  ;;  %v6759_v21 = vld [vmem:[%s12455_s9 + $0xa8] sm:$0xf0]  ;;  %v6765_v22 = vld [vmem:[%s12455_s9 + $0x98] sm:$0xf] }
 0x16c   :  { %v642_v37 = vmul.f32 %v8771_v28, %v8771_v28  ;;  %v6766_v26 = vor.u32 %v7855_v23, %v6765_v22  ;;  %v6687_v23 = vld [vmem:[%s12455_s9 + $0x18] sm:$0xf0] }
 0x16e   :  { %v656_v38 = vsel %vm353_vm0, %v642_v37, 0.0  ;;  %415 = vmatpush.bf16.msrb.mxu0 %v6555_v25  ;;  %428 = vmatpush.bf16.msrb.mxu1 %v6559_v29  ;;  %v6516_v37 = vld [vmem:[%s12436_s8 + $0x40] sm:$0xf0]  ;;  %v6762_v25 = vor.u32 %v7851_v19, %v6759_v21  ;;  %v7852_v29 = vld [vmem:[%s12455_s9 + $0x9c] sm:$0xf] }
 0x16f   :  { %v606_v43 = vpop.xlane.xlu2 %605  ;;  %657 = vadd.xlane.f32.xlu2 %v656_v38  ;;  %v6519_v38 = vor.u32 %v7792_v34, %v6516_v37  ;;  %v6770_v34 = vor.u32 %v7852_v29, %v6767_v31  ;;  %1065 = vmatpush.bf16.msra.mxu3 %v6766_v26  ;;  %v6733_v37 = vld [vmem:[%s12455_s9 + $0x60] sm:$0xf]  ;;  %v7833_v21 = vld [vmem:[%s12455_s9 + $0x4] sm:$0xf] }
 0x170   :  { %v627_v47 = vmul.f32 %v8720_v54, %v606_v43  ;;  %v7829_v43 = vld [vmem:[%s12436_s8 + $0x16c] sm:$0xf0]  ;;  %v6685_v19 = vld [vmem:[%s12455_s9] sm:$0xf] }
 0x171   :  { %v6651_v46 = vor.u32 %v7829_v43, %v6650_v40  ;;  %v7845_v40 = vld [vmem:[%s12455_s9 + $0x64] sm:$0xf]  ;;  %1094 = vmatpush.bf16.msra.mxu2 %v6770_v34  ;;  %v6735_v43 = vld [vmem:[%s12455_s9 + $0x78] sm:$0xf0]  ;;  %v7837_v26 = vld [vmem:[%s12455_s9 + $0x1c] sm:$0xf0] }
 0x172   :  { %v8805_v51 = vsub.f32 %v8706_v36, %v627_v47  ;;  %416 = vmatpush.bf16.msrb.mxu0 %v6515_v35  ;;  %429 = vmatpush.bf16.msrb.mxu1 %v6519_v38  ;;  %v6652_v47 = vld [vmem:[%s12436_s8 + $0x170] sm:$0xf0]  ;;  %v7848_v38 = vld [vmem:[%s12455_s9 + $0x74] sm:$0xf0] }
 0x173   :  { %v6655_v48 = vor.u32 %v7824_v45, %v6652_v47  ;;  %v6741_v45 = vld [vmem:[%s12455_s9 + $0x68] sm:$0xf] }
 0x174   :  { %v643_v55 = vmul.f32 %v8805_v51, %v8805_v51 }
 0x175   :  { %6660 = vmatmul.msk.bf16.vlgmr.msrb.gmra.mxu0 %vm353_vm0, %v8549_v18  ;;  %6661 = vmatmul.msk.bf16.vlgmr.msrb.gmra.mxu1 %vm353_vm0, %v8549_v18 }
 0x176   :  { %v659_v58 = vsel %vm353_vm0, %v643_v55, 0.0  ;;  %465 = vmatpush.bf16.msra.mxu0 %v6651_v46  ;;  %478 = vmatpush.bf16.msra.mxu1 %v6655_v48  ;;  %v6612_v55 = vld [vmem:[%s12436_s8 + $0x110] sm:$0xf0]  ;;  %v7849_v46 = vld [vmem:[%s12455_s9 + $0x7c] sm:$0xf0]  ;;  %v6738_v48 = vor.u32 %v7845_v40, %v6735_v43 }
 0x177   :  { %v609_v59 = vpop.xlane.xlu2 %608  ;;  %660 = vadd.xlane.f32.xlu2 %v659_v58  ;;  %v6615_v58 = vor.u32 %v7814_v52, %v6612_v55  ;;  %v6742_v49 = vor.u32 %v7849_v46, %v6741_v45  ;;  %v6743_v52 = vld [vmem:[%s12455_s9 + $0x80] sm:$0xf0]  ;;  %v6709_v55 = vld [vmem:[%s12455_s9 + $0x30] sm:$0xf] }
 0x178   :  { %v628_v61 = vmul.f32 %v8720_v54, %v609_v59  ;;  %v6570_v59 = vld [vmem:[%s12436_s8 + $0x80] sm:$0xf] }
 0x179   :  { %1066 = vmatpush.bf16.msra.mxu3 %v6742_v49 }
 0x17a   :  { %v8817_v63 = vsub.f32 %v8710_v39, %v628_v61  ;;  %466 = vmatpush.bf16.msra.mxu0 %v6611_v53  ;;  %479 = vmatpush.bf16.msra.mxu1 %v6615_v58  ;;  %v7809_v61 = vld [vmem:[%s12436_s8 + $0xac] sm:$0xf0]  ;;  %v6746_v53 = vor.u32 %v7846_v50, %v6743_v52  ;;  %v7842_v58 = vld [vmem:[%s12455_s9 + $0x44] sm:$0xf0] }
 0x17c   :  { %v644_v0 = vmul.f32 %v8817_v63, %v8817_v63  ;;  %1095 = vmatpush.bf16.msra.mxu2 %v6746_v53 }
 0x17e   :  { %v662_v5 = vsel %vm353_vm0, %v644_v0, 0.0  ;;  %v6572_v0 = vld [vmem:[%s12436_s8 + $0xb0] sm:$0xf0] }
 0x17f   :  { %v612_v6 = vpop.xlane.xlu2 %611  ;;  %663 = vadd.xlane.f32.xlu0 %v662_v5  ;;  %v6575_v5 = vor.u32 %v7804_v62, %v6572_v0  ;;  %v6711_v62 = vld [vmem:[%s12455_s9 + $0x48] sm:$0xf0]  ;;  %v7843_v0 = vld [vmem:[%s12455_s9 + $0x4c] sm:$0xf0] }
 0x180   :  { %v629_v8 = vmul.f32 %v8720_v54, %v612_v6  ;;  %778 = vrot.lane.b32.xlu1 %v776_v4, %s8369_s28  ;;  %v6571_v4 = vor.u32 %v7809_v61, %v6570_v59  ;;  %v6530_v6 = vld [vmem:[%s12436_s8 + $0x20] sm:$0xf]  ;;  %v7839_v59 = vld [vmem:[%s12455_s9 + $0x34] sm:$0xf]  ;;  %v6710_v61 = vor.u32 %v7842_v58, %v6709_v55 }
 0x181   :  { %480 = vmatpush.bf16.msra.mxu1 %v6575_v5  ;;  %v6714_v5 = vor.u32 %v7839_v59, %v6711_v62  ;;  %v336_v62 = vperm.slane %v8788_v41, 3 }
 0x182   :  { %v8825_v9 = vsub.f32 %v8714_v42, %v629_v8  ;;  %467 = vmatpush.bf16.msra.mxu0 %v6571_v4  ;;  %v7799_v8 = vld [vmem:[%s12436_s8 + $0x4c] sm:$0xf0]  ;;  %v6717_v4 = vld [vmem:[%s12455_s9 + $0x38] sm:$0xf] }
 0x184   :  { %v645_v10 = vmul.f32 %v8825_v9, %v8825_v9 }
 0x186   :  { %v665_v12 = vsel %vm353_vm0, %v645_v10, 0.0  ;;  %v7794_v10 = vld [vmem:[%s12436_s8 + $0x24] sm:$0xf] }
 0x187   :  { %666 = vadd.xlane.f32.xlu2 %v665_v12  ;;  %v6531_v12 = vor.u32 %v7799_v8, %v6530_v6  ;;  %v6535_v15 = vor.u32 %v7794_v10, %v6532_v14  ;;  %v6718_v6 = vor.u32 %v7843_v0, %v6717_v4  ;;  %v7840_v8 = vld [vmem:[%s12455_s9 + $0x3c] sm:$0xf]  ;;  %v6719_v10 = vld [vmem:[%s12455_s9 + $0x50] sm:$0xf0] }
 0x189   :  { %468 = vmatpush.bf16.msra.mxu0 %v6531_v12  ;;  %481 = vmatpush.bf16.msra.mxu1 %v6535_v15  ;;  %v6722_v15 = vor.u32 %v7840_v8, %v6719_v10 }
 0x18a   :  { %1067 = vmatpush.bf16.msra.mxu3 %v6718_v6 }
 0x18b   :  { %1096 = vmatpush.bf16.msra.mxu2 %v6722_v15 }
 0x18c   :  { %6664 = vmatmul.msk.bf16.vlgmr.msra.gmra.mxu0 %vm353_vm0, %v8549_v18  ;;  %6665 = vmatmul.msk.bf16.vlgmr.msra.gmra.mxu1 %vm353_vm0, %v8549_v18  ;;  %v6734_v18 = vor.u32 %v7848_v38, %v6733_v37  ;;  %v6695_v37 = vld [vmem:[%s12455_s9 + $0x20] sm:$0xf0] }
 0x18d   :  { %1007 = vmatpush.bf16.msrb.mxu0 %v6758_v20  ;;  %1036 = vmatpush.bf16.msrb.mxu1 %v6762_v25  ;;  %v7836_v20 = vld [vmem:[%s12455_s9 + $0x14] sm:$0xf0]  ;;  %v6693_v25 = vld [vmem:[%s12455_s9 + $0x8] sm:$0xf] }
 0x18e   :  { %v6686_v22 = vor.u32 %v7836_v20, %v6685_v19  ;;  %v6694_v34 = vor.u32 %v7837_v26, %v6693_v25 }
 0x190   :  { %1068 = vmatpush.bf16.msra.mxu3 %v6694_v34 }
 0x191   :  { %1008 = vmatpush.bf16.msrb.mxu0 %v6734_v18  ;;  %1037 = vmatpush.bf16.msrb.mxu1 %v6738_v48 }
 0x195   :  { %1009 = vmatpush.bf16.msrb.mxu0 %v6710_v61  ;;  %1038 = vmatpush.bf16.msrb.mxu1 %v6714_v5 }
 0x199   :  { %1010 = vmatpush.bf16.msrb.mxu0 %v6686_v22 }
 0x1ca   :  { %v649_v32 = vpop.xlane.xlu0 %648 }
 0x1cb   :  { %v671_v35 = vmul.f32 %v649_v32, %v8720_v54  ;;  %v6690_v32 = vor.u32 %v7833_v21, %v6687_v23 }
 0x1cd   :  { %v8965_v47 = vadd.f32 1e-06, %v671_v35  ;;  %v7834_v35 = vld [vmem:[%s12455_s9 + $0xc] sm:$0xf]  ;;  %1039 = vmatpush.bf16.msrb.mxu1 %v6690_v32 }
 0x1ce   :  { %v6698_v38 = vor.u32 %v7834_v35, %v6695_v37 }
 0x1cf   :  { %8066 = vrsqrt.f32 %v8965_v47  ;;  %vm693_vm6 = vweird.f32 %v8965_v47 }
 0x1d0   :  { %1097 = vmatpush.bf16.msra.mxu2 %v6698_v38 }
 0x1d2   :  { %v652_v12 = vpop.xlane.xlu1 %651  ;;  %v615_v14 = vpop.xlane.xlu0 %614 }
 0x1d3   :  { %v672_v16 = vmul.f32 %v652_v12, %v8720_v54  ;;  %v630_v17 = vmul.f32 %v8720_v54, %v615_v14  ;;  %v9045_v12 = vadd.f32 %v8651_v2, %v336_v62 }
 0x1d5   :  { %v680_v29 = vadd.f32 1e-06, %v672_v16  ;;  %v9019_v31 = vsub.f32 %v8730_v1, %v630_v17  ;;  %v8067_v40 = vpop.eup %8066  ;;  %v820_v19 = vadd.f32 1.0, %v9045_v12 }
 0x1d6   :  { %v688_v45 = vmul.f32 %v8067_v40, %v8965_v47  ;;  %vm694_vm4 = vweird.f32 %v8067_v40 }
 0x1d7   :  { %8068 = vrsqrt.f32 %v680_v29  ;;  %v646_v18 = vmul.f32 %v9019_v31, %v9019_v31  ;;  %v821_v25 = vperm.slane %v820_v19, 0  ;;  %vm695_vm7 = vmor %vm693_vm6, %vm694_vm4  ;;  %vm703_vm8 = vweird.f32 %v680_v29 }
 0x1d8   :  { %v689_v58 = vmul.f32 %v8067_v40, %v688_v45 }
 0x1d9   :  { %v668_v43 = vsel %vm353_vm0, %v646_v18, 0.0 }
 0x1da   :  { %v655_v46 = vpop.xlane.xlu1 %654  ;;  %669 = vadd.xlane.f32.xlu0 %v668_v43  ;;  %v800_v48 = vpop.xlane.xlu0 %799  ;;  %v690_v5 = vmul.f32 0.5, %v689_v58 }
 0x1db   :  { %v673_v49 = vmul.f32 %v655_v46, %v8720_v54  ;;  %v801_v50 = vmul.f32 %v800_v48, %v8720_v54 }
 0x1dc   :  { %v691_v16 = vsub.f32 1.5, %v690_v5 }
 0x1dd   :  { %v8069_v52 = vpop.eup %8068  ;;  %v9033_v53 = vadd.f32 1e-06, %v673_v49  ;;  %v9036_v55 = vsub.f32 %v8744_v11, %v801_v50  ;;  %v9064_v49 = vperm.slane %v8809_v56, 0 }
 0x1de   :  { %v698_v59 = vmul.f32 %v8069_v52, %v680_v29  ;;  %v692_v20 = vmul.f32 %v8067_v40, %v691_v16  ;;  %vm704_vm5 = vweird.f32 %v8069_v52 }
 0x1df   :  { %8070 = vrsqrt.f32 %v9033_v53  ;;  %v803_v61 = vmul.f32 %v9036_v55, %v9036_v55  ;;  %vm705_vm9 = vmor %vm703_vm8, %vm704_vm5  ;;  %vm713_vm14 = vweird.f32 %v9033_v53 }
 0x1e0   :  { %v699_v4 = vmul.f32 %v8069_v52, %v698_v59  ;;  %v696_v34 = vsel %vm695_vm7, %v8067_v40, %v692_v20 }
 0x1e1   :  { %v804_v0 = vsel %vm353_vm0, %v803_v61, 0.0  ;;  %v767_v47 = vmul.f32 %v696_v34, %v8724_v57 }
 0x1e2   :  { %v700_v6 = vmul.f32 0.5, %v699_v4  ;;  %v658_v8 = vpop.xlane.xlu2 %657  ;;  %805 = vadd.xlane.f32.xlu2 %v804_v0 }
 0x1e3   :  { %v674_v10 = vmul.f32 %v658_v8, %v8720_v54 }
 0x1e4   :  { %v701_v17 = vsub.f32 1.5, %v700_v6 }
 0x1e5   :  { %v9047_v14 = vpop.eup %8070  ;;  %v682_v15 = vadd.f32 1e-06, %v674_v10  ;;  %v9086_v10 = vpop.f32.mrf.mxu1 }
 0x1e6   :  { %v708_v41 = vmul.f32 %v9047_v14, %v9033_v53  ;;  %v702_v21 = vmul.f32 %v8069_v52, %v701_v17  ;;  %vm714_vm11 = vweird.f32 %v9047_v14 }
 0x1e7   :  { %8072 = vrsqrt.f32 %v682_v15  ;;  %vm723_vm12 = vweird.f32 %v682_v15  ;;  %vm715_vm15 = vmor %vm713_vm14, %vm714_vm11 }
 0x1e8   :  { %v709_v22 = vmul.f32 %v9047_v14, %v708_v41  ;;  %v706_v35 = vsel %vm705_vm9, %v8069_v52, %v702_v21 }
 0x1e9   :  { %v768_v43 = vmul.f32 %v706_v35, %v8733_v3 }
 0x1ea   :  { %v661_v23 = vpop.xlane.xlu2 %660  ;;  %v710_v37 = vmul.f32 0.5, %v709_v22 }
 0x1eb   :  { %v675_v2 = vmul.f32 %v661_v23, %v8720_v54 }
 0x1ec   :  { %v711_v45 = vsub.f32 1.5, %v710_v37 }
 0x1ed   :  { %v8073_v26 = vpop.eup %8072  ;;  %v9055_v32 = vadd.f32 1e-06, %v675_v2  ;;  %v381_v23 = vpop.f32.mrf.mxu1 }
 0x1ee   :  { %v718_v38 = vmul.f32 %v8073_v26, %v682_v15  ;;  %823 = vrot.lane.b32.xlu0 %v821_v25, %s8369_s28  ;;  %vm724_vm10 = vweird.f32 %v8073_v26  ;;  %v712_v62 = vmul.f32 %v9047_v14, %v711_v45  ;;  %v7872_v23 = vld [vmem:[%s12459_s1 + $0x74] sm:$0xf0] }
 0x1ef   :  { %8074 = vrsqrt.f32 %v9055_v32  ;;  %vm725_vm13 = vmor %vm723_vm12, %vm724_vm10  ;;  %vm733_vm5 = vweird.f32 %v9055_v32 }
 0x1f0   :  { %v719_v18 = vmul.f32 %v8073_v26, %v718_v38  ;;  %v716_v6 = vsel %vm715_vm15, %v9047_v14, %v712_v62  ;;  %v6877_v62 = vld [vmem:[%s12459_s1 + $0x90] sm:$0xf] }
 0x1f1   :  { %v769_v16 = vmul.f32 %v716_v6, %v8747_v13  ;;  %v7856_v6 = vld [vmem:[%s12455_s9 + $0xb4] sm:$0xf0] }
 0x1f2   :  { %v720_v46 = vmul.f32 0.5, %v719_v18  ;;  %v9061_v29 = vpop.permute.xlu1 %778  ;;  %v664_v48 = vpop.xlane.xlu0 %663 }
 0x1f3   :  { %v676_v40 = vmul.f32 %v664_v48, %v8720_v54  ;;  %v781_v50 = vmul.f32 %v9061_v29, %v767_v47  ;;  %v782_v52 = vmul.f32 %v9061_v29, %v768_v43  ;;  %v783_v14 = vmul.f32 %v9061_v29, %v769_v16  ;;  %v9122_v48 = vpop.f32.mrf.mxu0  ;;  %v6775_v16 = vld [vmem:[%s12455_s9 + $0xb8] sm:$0xf0] }
 0x1f4   :  { %v721_v58 = vsub.f32 1.5, %v720_v46  ;;  %12456 = vst [vmem:[#allocation12_spill] sm:$0xff] %v9122_v48 }
 0x1f5   :  { %v8075_v59 = vpop.eup %8074  ;;  %v684_v57 = vadd.f32 1e-06, %v676_v40  ;;  %v790_v3 = vadd.f32 %v9064_v49, %v781_v50  ;;  %v791_v61 = vadd.f32 %v9064_v49, %v782_v52  ;;  %v9124_v40 = vpop.f32.mrf.mxu1 }
 0x1f6   :  { %v722_v56 = vmul.f32 %v8073_v26, %v721_v58  ;;  %v728_v4 = vmul.f32 %v8075_v59, %v9055_v32  ;;  %vm734_vm2 = vweird.f32 %v8075_v59  ;;  %12457 = vst [vmem:[#allocation13_spill] sm:$0xff] %v9124_v40 }
 0x1f7   :  { %8076 = vrsqrt.f32 %v684_v57  ;;  %v9074_v0 = vpack.c.bf16 %v791_v61, %v790_v3  ;;  %vm743_vm3 = vweird.f32 %v684_v57  ;;  %vm735_vm6 = vmor %vm733_vm5, %vm734_vm2  ;;  %vm1542_vm2 = vcmask 588800  }
 0x1f8   :  { %v726_v5 = vsel %vm725_vm13, %v8073_v26, %v722_v56  ;;  %v729_v8 = vmul.f32 %v8075_v59, %v728_v4  ;;  %v792_v26 = vadd.f32 %v9064_v49, %v783_v14  ;;  %v7878_v56 = vld [vmem:[%s12459_s1 + $0xa4] sm:$0xf0] }
 0x1f9   :  { %6779 = vmatmul.msk.bf16.vlgmr.msrb.gmra.mxu0 %vm353_vm0, %v9074_v0  ;;  %6783 = vmatmul.msk.bf16.vlgmr.msrb.gmra.mxu1 %vm353_vm0, %v9074_v0  ;;  %v770_v53 = vmul.f32 %v726_v5, %v8771_v28  ;;  %v6878_v4 = vor.u32 %v7878_v56, %v6877_v62  ;;  %v6773_v5 = vld [vmem:[%s12455_s9 + $0xa0] sm:$0xf]  ;;  %v7841_v62 = vld [vmem:[%s12455_s9 + $0x44] sm:$0xf] }
 0x1fa   :  { %6787 = vmatmul.msk.bf16.vlgmr.msra.gmra.mxu3 %vm353_vm0, %v9074_v0  ;;  %6791 = vmatmul.msk.bf16.vlgmr.msra.gmra.mxu2 %vm353_vm0, %v9074_v0  ;;  %v730_v17 = vmul.f32 0.5, %v729_v8  ;;  %v7853_v8 = vld [vmem:[%s12455_s9 + $0xa4] sm:$0xf] }
 0x1fb   :  { %v784_v19 = vmul.f32 %v9061_v29, %v770_v53  ;;  %v420_v52 = vpop.f32.mrf.mxu0  ;;  %1343 = vmatpush.bf16.msrb.mxu3 %v6878_v4  ;;  %v6727_v4 = vld [vmem:[%s12455_s9 + $0x58] sm:$0xf0] }
 0x1fc   :  { %v731_v21 = vsub.f32 1.5, %v730_v17  ;;  %v7876_v17 = vld [vmem:[%s12459_s1 + $0x9c] sm:$0xf] }
 0x1fd   :  { %v8077_v15 = vpop.eup %8076  ;;  %v793_v2 = vadd.f32 %v9064_v49, %v784_v19  ;;  %v433_v58 = vpop.f32.mrf.mxu1 }
 0x1fe   :  { %v738_v41 = vmul.f32 %v8077_v15, %v684_v57  ;;  %vm744_vm1 = vweird.f32 %v8077_v15  ;;  %v732_v28 = vmul.f32 %v8075_v59, %v731_v21 }
 0x1ff   :  { %vm745_vm4 = vmor %vm743_vm3, %vm744_vm1  ;;  %v9094_v13 = vpack.c.bf16 %v793_v2, %v792_v26  ;;  %v6749_v26 = vld [vmem:[%s12455_s9 + $0x70] sm:$0xf]  ;;  %vm1806_vm1 = vcmask 1043456  }
 0x200   :  { %v739_v20 = vmul.f32 %v8077_v15, %v738_v41  ;;  %v736_v37 = vsel %vm735_vm6, %v8075_v59, %v732_v28  ;;  %v6887_v41 = vld [vmem:[%s12459_s1 + $0xb0] sm:$0xf0] }
 0x201   :  { %v771_v18 = vmul.f32 %v736_v37, %v8805_v51  ;;  %v667_v51 = vpop.xlane.xlu2 %666  ;;  %v6890_v14 = vor.u32 %v7876_v17, %v6887_v41  ;;  %v7850_v37 = vld [vmem:[%s12455_s9 + $0x84] sm:$0xf0]  ;;  %v7864_v41 = vld [vmem:[%s12459_s1 + $0x3c] sm:$0xf] }
 0x202   :  { %v740_v22 = vmul.f32 0.5, %v739_v20  ;;  %v6778_v20 = vor.u32 %v7853_v8, %v6775_v16  ;;  %v6730_v16 = vor.u32 %v7841_v62, %v6727_v4  ;;  %v7869_v4 = vld [vmem:[%s12459_s1 + $0x64] sm:$0xf] }
 0x203   :  { %v785_v47 = vmul.f32 %v9061_v29, %v771_v18  ;;  %1382 = vmatpush.bf16.msrb.mxu2 %v6890_v14  ;;  %v7847_v18 = vld [vmem:[%s12455_s9 + $0x74] sm:$0xf] }
 0x204   :  { %v741_v25 = vsub.f32 1.5, %v740_v22  ;;  %v6853_v22 = vld [vmem:[%s12459_s1 + $0x60] sm:$0xf]  ;;  %1152 = vmatpush.bf16.msra.mxu1 %v6778_v20 }
 0x205   :  { %v794_v45 = vadd.f32 %v9064_v49, %v785_v47  ;;  %v7870_v47 = vld [vmem:[%s12459_s1 + $0x6c] sm:$0xf] }
 0x206   :  { %v742_v34 = vmul.f32 %v8077_v15, %v741_v25 }
 0x208   :  { %v746_v35 = vsel %vm745_vm4, %v8077_v15, %v742_v34  ;;  %v6774_v15 = vor.u32 %v7856_v6, %v6773_v5  ;;  %v6829_v5 = vld [vmem:[%s12459_s1 + $0x30] sm:$0xf]  ;;  %v7866_v6 = vld [vmem:[%s12459_s1 + $0x44] sm:$0xf0] }
 0x209   :  { %6780 = vmatmul.msk.bf16.gmra.mxu0 %vm353_vm0, %v9094_v13  ;;  %6784 = vmatmul.msk.bf16.gmra.mxu1 %vm353_vm0, %v9094_v13  ;;  %v772_v38 = vmul.f32 %v746_v35, %v8817_v63  ;;  %v677_v63 = vmul.f32 %v667_v51, %v8720_v54  ;;  %v470_v57 = vpop.f32.mrf.mxu0  ;;  %v9131_v3 = vpop.f32.mrf.mxu1  ;;  %v6854_v35 = vor.u32 %v7872_v23, %v6853_v22  ;;  %v6863_v51 = vld [vmem:[%s12459_s1 + $0x80] sm:$0xf0]  ;;  %v7838_v23 = vld [vmem:[%s12455_s9 + $0x24] sm:$0xf0] }
 0x20a   :  { %6788 = vmatmul.msk.bf16.gmra.mxu3 %vm353_vm0, %v9094_v13  ;;  %6792 = vmatmul.msk.bf16.gmra.mxu2 %vm353_vm0, %v9094_v13  ;;  %12458 = vst [vmem:[#allocation14_spill] sm:$0xff] %v9131_v3  ;;  %v6866_v58 = vor.u32 %v7870_v47, %v6863_v51  ;;  %v6830_v17 = vor.u32 %v7866_v6, %v6829_v5  ;;  %v7875_v51 = vld [vmem:[%s12459_s1 + $0x94] sm:$0xf]  ;;  %v6855_v5 = vld [vmem:[%s12459_s1 + $0x78] sm:$0xf0] }
 0x20b   :  { %v786_v32 = vmul.f32 %v9061_v29, %v772_v38  ;;  %v9126_v50 = vadd.f32 1e-06, %v677_v63  ;;  %1123 = vmatpush.bf16.msra.mxu0 %v6774_v15  ;;  %v6750_v38 = vor.u32 %v7850_v37, %v6749_v26  ;;  %1344 = vmatpush.bf16.msrb.mxu3 %v6854_v35  ;;  %v6725_v63 = vld [vmem:[%s12455_s9 + $0x40] sm:$0xf] }
 0x20c   :  { %1383 = vmatpush.bf16.msrb.mxu2 %v6866_v58  ;;  %v6805_v35 = vld [vmem:[%s12459_s1] sm:$0xf] }
 0x20d   :  { %v795_v43 = vadd.f32 %v9064_v49, %v786_v32  ;;  %8078 = vrsqrt.f32 %v9126_v50  ;;  %v6751_v32 = vld [vmem:[%s12455_s9 + $0x88] sm:$0xf0]  ;;  %vm753_vm8 = vweird.f32 %v9126_v50 }
 0x20f   :  { %v9111_v46 = vpack.c.bf16 %v795_v43, %v794_v45  ;;  %v129_v43 = vld [vmem:[%s12454_s7 + $0x8] sm:$0xf]  ;;  %v6754_v45 = vor.u32 %v7847_v18, %v6751_v32  ;;  %1124 = vmatpush.bf16.msra.mxu0 %v6750_v38  ;;  %1345 = vmatpush.bf16.msrb.mxu3 %v6830_v17  ;;  %v7860_v18 = vld [vmem:[%s12459_s1 + $0x14] sm:$0xf0]  ;;  %v7858_v32 = vld [vmem:[%s12459_s1 + $0xc] sm:$0xf] }
 0x210   :  { %v341_v52 = vperm.slane %v129_v43, 0  ;;  %v6806_v43 = vor.u32 %v7860_v18, %v6805_v35 }
 0x211   :  { %v472_v2 = vpop.f32.mrf.mxu0  ;;  %v485_v25 = vpop.f32.mrf.mxu1  ;;  %1153 = vmatpush.bf16.msra.mxu1 %v6754_v45  ;;  %v6815_v45 = vld [vmem:[%s12459_s1 + $0x20] sm:$0xf0] }
 0x212   :  { %v9209_v15 = vadd.f32 %v470_v57, %v341_v52  ;;  %v6701_v57 = vld [vmem:[%s12455_s9 + $0x10] sm:$0xf]  ;;  %v7835_v2 = vld [vmem:[%s12455_s9 + $0x14] sm:$0xf]  ;;  %v6818_v52 = vor.u32 %v7858_v32, %v6815_v45 }
 0x213   :  { %v9129_v59 = vpop.eup %8078  ;;  %v6702_v37 = vor.u32 %v7838_v23, %v6701_v57  ;;  %1346 = vmatpush.bf16.msrb.mxu3 %v6806_v43  ;;  %v827_v43 = vperm.slane %v9045_v12, 0 }
 0x214   :  { %v748_v61 = vmul.f32 %v9129_v59, %v9126_v50  ;;  %12460 = vst [vmem:[#allocation15_spill] sm:$0xff] %v9209_v15  ;;  %vm754_vm7 = vweird.f32 %v9129_v59  ;;  %v6879_v50 = vld [vmem:[%s12459_s1 + $0xa8] sm:$0xf0] }
 0x215   :  { %1154 = vmatpush.bf16.msra.mxu1 %v6730_v16  ;;  %vm9254_vm9 = vmor %vm753_vm8, %vm754_vm7  ;;  %v6882_v62 = vor.u32 %v7875_v51, %v6879_v50  ;;  %v6885_v50 = vld [vmem:[%s12459_s1 + $0x98] sm:$0xf] }
 0x216   :  { %v749_v53 = vmul.f32 %v9129_v59, %v748_v61  ;;  %v7844_v61 = vld [vmem:[%s12455_s9 + $0x54] sm:$0xf0] }
 0x217   :  { %v6726_v56 = vor.u32 %v7844_v61, %v6725_v63  ;;  %1356 = vmatpush.bf16.msra.mxu3 %v6882_v62 }
 0x218   :  { %v750_v28 = vmul.f32 0.5, %v749_v53 }
 0x219   :  { %6781 = vmatmul.msk.bf16.gmra.mxu0 %vm353_vm0, %v9111_v46  ;;  %6785 = vmatmul.msk.bf16.gmra.mxu1 %vm353_vm0, %v9111_v46 }
 0x21a   :  { %6789 = vmatmul.msk.bf16.gmra.mxu3 %vm353_vm0, %v9111_v46  ;;  %6793 = vmatmul.msk.bf16.gmra.mxu2 %vm353_vm0, %v9111_v46  ;;  %v751_v8 = vsub.f32 1.5, %v750_v28  ;;  %v6703_v28 = vld [vmem:[%s12455_s9 + $0x28] sm:$0xf0] }
 0x21b   :  { %1125 = vmatpush.bf16.msra.mxu0 %v6726_v56  ;;  %v6706_v38 = vor.u32 %v7835_v2, %v6703_v28 }
 0x21c   :  { %v752_v25 = vmul.f32 %v9129_v59, %v751_v8 }
 0x21d   :  { %1155 = vmatpush.bf16.msra.mxu1 %v6706_v38 }
 0x21e   :  { %v756_v58 = vsel %vm9254_vm9, %v9129_v59, %v752_v25  ;;  %v6807_v25 = vld [vmem:[%s12459_s1 + $0x18] sm:$0xf0] }
 0x21f   :  { %1126 = vmatpush.bf16.msra.mxu0 %v6702_v37  ;;  %v773_v8 = vmul.f32 %v756_v58, %v8825_v9  ;;  %v7879_v58 = vld [vmem:[%s12459_s1 + $0xac] sm:$0xf0] }
 0x221   :  { %v787_v9 = vmul.f32 %v9061_v29, %v773_v8 }
 0x24d   :  { %v670_v19 = vpop.xlane.xlu0 %669 }
 0x24e   :  { %v678_v21 = vmul.f32 %v670_v19, %v8720_v54  ;;  %v6839_v19 = vld [vmem:[%s12459_s1 + $0x50] sm:$0xf0] }
 0x24f   :  { %v6842_v14 = vor.u32 %v7864_v41, %v6839_v19  ;;  %v7863_v19 = vld [vmem:[%s12459_s1 + $0x34] sm:$0xf] }
 0x250   :  { %v9170_v34 = vadd.f32 1e-06, %v678_v21 }
 0x251   :  { %1384 = vmatpush.bf16.msrb.mxu2 %v6842_v14 }
 0x252   :  { %8080 = vrsqrt.f32 %v9170_v34  ;;  %vm763_vm11 = vweird.f32 %v9170_v34 }
 0x255   :  { %v806_v53 = vpop.xlane.xlu2 %805  ;;  %1385 = vmatpush.bf16.msrb.mxu2 %v6818_v52 }
 0x256   :  { %v807_v20 = vmul.f32 %v806_v53, %v8720_v54  ;;  %v6858_v53 = vor.u32 %v7869_v4, %v6855_v5  ;;  %v6861_v5 = vld [vmem:[%s12459_s1 + $0x68] sm:$0xf] }
 0x258   :  { %v8081_v21 = vpop.eup %8080  ;;  %v9221_v22 = vadd.f32 1e-06, %v807_v20  ;;  %1357 = vmatpush.bf16.msra.mxu3 %v6858_v53  ;;  %v6831_v20 = vld [vmem:[%s12459_s1 + $0x48] sm:$0xf0] }
 0x259   :  { %v758_v26 = vmul.f32 %v8081_v21, %v9170_v34  ;;  %vm764_vm10 = vweird.f32 %v8081_v21  ;;  %v6834_v57 = vor.u32 %v7863_v19, %v6831_v20  ;;  %v7867_v20 = vld [vmem:[%s12459_s1 + $0x4c] sm:$0xf0] }
 0x25a   :  { %8082 = vrsqrt.f32 %v9221_v22  ;;  %vm765_vm12 = vmor %vm763_vm11, %vm764_vm10  ;;  %vm815_vm14 = vweird.f32 %v9221_v22 }
 0x25b   :  { %v759_v47 = vmul.f32 %v8081_v21, %v758_v26  ;;  %v796_v26 = vadd.f32 %v9064_v49, %v787_v9 }
 0x25c   :  { %1358 = vmatpush.bf16.msra.mxu3 %v6834_v57  ;;  %v6813_v57 = vld [vmem:[%s12459_s1 + $0x8] sm:$0xf] }
 0x25d   :  { %v760_v61 = vmul.f32 0.5, %v759_v47 }
 0x25f   :  { %v761_v56 = vsub.f32 1.5, %v760_v61 }
 0x260   :  { %v8083_v6 = vpop.eup %8082  ;;  %v824_v38 = vpop.permute.xlu0 %823 }
 0x261   :  { %v762_v59 = vmul.f32 %v8081_v21, %v761_v56  ;;  %v810_v16 = vmul.f32 %v8083_v6, %v9221_v22  ;;  %vm816_vm13 = vweird.f32 %v8083_v6  ;;  %v9305_v22 = vld [vmem:[%s12463_s4] sm:$0x3f]  ;;  %v6886_v56 = vor.u32 %v7879_v58, %v6885_v50  ;;  %v7871_v58 = vld [vmem:[%s12459_s1 + $0x74] sm:$0xf] }
 0x262   :  { %vm817_vm15 = vmor %vm815_vm14, %vm816_vm13  ;;  %v9308_v32 = vperm.slane %v9305_v22, 0  ;;  %v9311_v47 = vperm.slane %v9305_v22, 1  ;;  %v9325_v62 = vperm.slane %v9305_v22, 2  ;;  %v9328_v12 = vperm.slane %v9305_v22, 3 }
 0x263   :  { %v766_v17 = vsel %vm765_vm12, %v8081_v21, %v762_v59  ;;  %v811_v41 = vmul.f32 %v8083_v6, %v810_v16  ;;  %v7857_v21 = vld [vmem:[%s12459_s1 + $0x4] sm:$0xf] }
 0x264   :  { %v774_v14 = vmul.f32 %v766_v17, %v9019_v31  ;;  %v6810_v31 = vor.u32 %v7857_v21, %v6807_v25 }
 0x265   :  { %v812_v34 = vmul.f32 0.5, %v811_v41 }
 0x266   :  { %v788_v23 = vmul.f32 %v9061_v29, %v774_v14  ;;  %1359 = vmatpush.bf16.msra.mxu3 %v6810_v31 }
 0x267   :  { %v813_v2 = vsub.f32 1.5, %v812_v34  ;;  %v7861_v34 = vld [vmem:[%s12459_s1 + $0x1c] sm:$0xf0] }
 0x268   :  { %v797_v28 = vadd.f32 %v9064_v49, %v788_v23 }
 0x269   :  { %v814_v35 = vmul.f32 %v8083_v6, %v813_v2 }
 0x26a   :  { %v9290_v37 = vpack.c.bf16 %v797_v28, %v796_v26  ;;  %v6814_v26 = vor.u32 %v7861_v34, %v6813_v57  ;;  %v6821_v57 = vld [vmem:[%s12459_s1 + $0x10] sm:$0xf] }
 0x26b   :  { %v818_v29 = vsel %vm817_vm15, %v8083_v6, %v814_v35  ;;  %v7873_v6 = vld [vmem:[%s12459_s1 + $0x7c] sm:$0xf0] }
 0x26c   :  { %6782 = vmatmul.msk.bf16.gmra.mxu0 %vm353_vm0, %v9290_v37  ;;  %6786 = vmatmul.msk.bf16.gmra.mxu1 %vm353_vm0, %v9290_v37  ;;  %v819_v49 = vmul.f32 %v818_v29, %v9036_v55  ;;  %v6862_v19 = vor.u32 %v7873_v6, %v6861_v5  ;;  %v6893_v35 = vld [vmem:[%s12459_s1 + $0xa0] sm:$0xf]  ;;  %v7880_v29 = vld [vmem:[%s12459_s1 + $0xb4] sm:$0xf0] }
 0x26d   :  { %6790 = vmatmul.msk.bf16.gmra.mxu3 %vm353_vm0, %v9290_v37  ;;  %6794 = vmatmul.msk.bf16.gmra.mxu2 %vm353_vm0, %v9290_v37 }
 0x26e   :  { %v826_v18 = vmul.f32 %v824_v38, %v819_v49  ;;  %v6894_v38 = vor.u32 %v7880_v29, %v6893_v35 }
 0x270   :  { %v828_v63 = vadd.f32 %v827_v43, %v826_v18  ;;  %v6869_v18 = vld [vmem:[%s12459_s1 + $0x70] sm:$0xf]  ;;  %v7874_v43 = vld [vmem:[%s12459_s1 + $0x84] sm:$0xf0] }
 0x271   :  { %v6870_v50 = vor.u32 %v7874_v43, %v6869_v18 }
 0x272   :  { %v9330_v4 = vpack.c.bf16 %v828_v63, %v828_v63 }
 0x276   :  { %v1012_v45 = vpop.f32.mrf.mxu0  ;;  %v1041_v51 = vpop.f32.mrf.mxu1 }
 0x277   :  { %v1013_v55 = vadd.f32 %v1012_v45, %v9308_v32  ;;  %v1042_v52 = vadd.f32 %v1041_v51, %v9311_v47  ;;  %v7877_v45 = vld [vmem:[%s12459_s1 + $0xa4] sm:$0xf]  ;;  %v6895_v51 = vld [vmem:[%s12459_s1 + $0xb8] sm:$0xf0] }
 0x278   :  { %v6898_v63 = vor.u32 %v7877_v45, %v6895_v51 }
 0x279   :  { %v9322_v61 = vpack.c.bf16 %v1042_v52, %v1013_v55 }
 0x27a   :  { %1408 = vmatpush.bf16.msrb.mxu0 %v6898_v63 }
 0x27c   :  { %6795 = vmatmul.msk.bf16.vlgmr.msra.gmra.mxu0 %vm353_vm0, %v9074_v0  ;;  %6799 = vmatmul.msk.bf16.vlgmr.msra.gmra.mxu1 %vm353_vm0, %v9074_v0  ;;  %v6837_v0 = vld [vmem:[%s12459_s1 + $0x38] sm:$0xf] }
 0x27d   :  { %v1070_v8 = vpop.f32.mrf.mxu3  ;;  %v1099_v53 = vpop.f32.mrf.mxu2  ;;  %6899 = vmatmul.msk.bf16.vlgmr.msrb.gmra.mxu3 %vm353_vm0, %v9330_v4  ;;  %6902 = vmatmul.msk.bf16.vlgmr.msrb.gmra.mxu2 %vm353_vm0, %v9330_v4  ;;  %v6838_v14 = vor.u32 %v7867_v20, %v6837_v0  ;;  %v6847_v0 = vld [vmem:[%s12459_s1 + $0x58] sm:$0xf0] }
 0x27e   :  { %v1071_v59 = vadd.f32 %v1070_v8, %v9325_v62  ;;  %v1100_v16 = vadd.f32 %v1099_v53, %v9328_v12  ;;  %v9348_v17 = vpop.f32.mrf.mxu0  ;;  %v9350_v41 = vpop.f32.mrf.mxu1  ;;  %1369 = vmatpush.bf16.msrb.mxu3 %v6886_v56  ;;  %v6871_v56 = vld [vmem:[%s12459_s1 + $0x88] sm:$0xf0]  ;;  %v6845_v53 = vld [vmem:[%s12459_s1 + $0x40] sm:$0xf] }
 0x280   :  { %v9358_v9 = vpack.c.bf16 %v1100_v16, %v1071_v59  ;;  %v6874_v59 = vor.u32 %v7871_v58, %v6871_v56  ;;  %v7868_v16 = vld [vmem:[%s12459_s1 + $0x54] sm:$0xf0] }
 0x282   :  { %1370 = vmatpush.bf16.msrb.mxu3 %v6862_v19  ;;  %v7865_v19 = vld [vmem:[%s12459_s1 + $0x44] sm:$0xf]  ;;  %1409 = vmatpush.bf16.msrb.mxu0 %v6874_v59 }
 0x283   :  { %v6850_v34 = vor.u32 %v7865_v19, %v6847_v0 }
 0x285   :  { %v9366_v23 = vpop.f32.mrf.mxu3  ;;  %v9368_v2 = vpop.f32.mrf.mxu2 }
 0x286   :  { %v1017_v21 = vpop.f32.mrf.mxu0  ;;  %v1046_v25 = vpop.f32.mrf.mxu1  ;;  %1371 = vmatpush.bf16.msrb.mxu3 %v6838_v14  ;;  %v6846_v14 = vor.u32 %v7868_v16, %v6845_v53  ;;  %1410 = vmatpush.bf16.msrb.mxu0 %v6850_v34  ;;  %v9479_v34 = vperm.slane %v9305_v22, 4 }
 0x287   :  { %v1018_v28 = vadd.f32 %v1017_v21, %v9308_v32  ;;  %v1047_v31 = vadd.f32 %v1046_v25, %v9311_v47  ;;  %v7862_v21 = vld [vmem:[%s12459_s1 + $0x24] sm:$0xf0]  ;;  %v7859_v25 = vld [vmem:[%s12459_s1 + $0x14] sm:$0xf] }
 0x289   :  { %v9378_v49 = vpack.c.bf16 %v1047_v31, %v1018_v28 }
 0x28a   :  { %1372 = vmatpush.bf16.msrb.mxu3 %v6814_v26  ;;  %v6823_v26 = vld [vmem:[%s12459_s1 + $0x28] sm:$0xf0] }
 0x28b   :  { %v6826_v18 = vor.u32 %v7859_v25, %v6823_v26 }
 0x28c   :  { %6796 = vmatmul.msk.bf16.gmra.mxu0 %vm353_vm0, %v9094_v13  ;;  %6800 = vmatmul.msk.bf16.gmra.mxu1 %vm353_vm0, %v9094_v13 }
 0x28d   :  { %v1075_v55 = vpop.f32.mrf.mxu3  ;;  %v1104_v52 = vpop.f32.mrf.mxu2  ;;  %6900 = vmatmul.msk.bf16.vlgmr.msra.gmra.mxu3 %vm353_vm0, %v9330_v4  ;;  %1411 = vmatpush.bf16.msrb.mxu0 %v6826_v18 }
 0x28e   :  { %v1076_v5 = vadd.f32 %v1075_v55, %v9325_v62  ;;  %v1105_v6 = vadd.f32 %v1104_v52, %v9328_v12  ;;  %v9406_v13 = vpop.f32.mrf.mxu0  ;;  %v9408_v8 = vpop.f32.mrf.mxu1  ;;  %1395 = vmatpush.bf16.msra.mxu3 %v6894_v38  ;;  %v6822_v38 = vor.u32 %v7862_v21, %v6821_v57  ;;  %v9482_v21 = vperm.slane %v9305_v22, 5 }
 0x290   :  { %v9422_v20 = vpack.c.bf16 %v1105_v6, %v1076_v5 }
 0x292   :  { %1396 = vmatpush.bf16.msra.mxu3 %v6870_v50 }
 0x295   :  { %v9436_v28 = vpop.f32.mrf.mxu3  ;;  %v9438_v31 = vpop.f32.mrf.mxu2 }
 0x296   :  { %v1022_v35 = vpop.f32.mrf.mxu0  ;;  %v1051_v29 = vpop.f32.mrf.mxu1  ;;  %1397 = vmatpush.bf16.msra.mxu3 %v6846_v14 }
 0x297   :  { %v1023_v43 = vadd.f32 %v1022_v35, %v9308_v32  ;;  %v1052_v45 = vadd.f32 %v1051_v29, %v9311_v47 }
 0x299   :  { %v9442_v51 = vpack.c.bf16 %v1052_v45, %v1023_v43  ;;  %v9489_v43 = vld [vmem:[%s12392_s12] sm:$0x3f] }
 0x29a   :  { %1398 = vmatpush.bf16.msra.mxu3 %v6822_v38 }
 0x29c   :  { %6797 = vmatmul.msk.bf16.gmra.mxu0 %vm353_vm0, %v9111_v46  ;;  %6801 = vmatmul.msk.bf16.gmra.mxu1 %vm353_vm0, %v9111_v46 }
 0x29d   :  { %v1080_v63 = vpop.f32.mrf.mxu3  ;;  %v1109_v55 = vpop.f32.mrf.mxu2  ;;  %6901 = vmatmul.msk.bf16.vlgmr.msrb.gmra.mxu3 %vm353_vm0, %v9330_v4 }
 0x29e   :  { %v1081_v52 = vadd.f32 %v1080_v63, %v9325_v62  ;;  %v1110_v50 = vadd.f32 %v1109_v55, %v9328_v12  ;;  %v9462_v46 = vpop.f32.mrf.mxu0  ;;  %v9464_v56 = vpop.f32.mrf.mxu1  ;;  %v1204_v63 = vperm.slane %v9489_v43, 0 }
 0x2a0   :  { %v9452_v58 = vpack.c.bf16 %v1110_v50, %v1081_v52 }
 0x2a5   :  { %v9466_v5 = vpop.f32.mrf.mxu3  ;;  %v9468_v6 = vpop.f32.mrf.mxu2 }
 0x2ac   :  { %6798 = vmatmul.msk.bf16.gmra.mxu0 %vm353_vm0, %v9290_v37  ;;  %6802 = vmatmul.msk.bf16.gmra.mxu1 %vm353_vm0, %v9290_v37 }
 0x2ad   :  { %6903 = vmatmul.msk.bf16.vlgmr.msra.gmra.mxu3 %vm353_vm0, %v9330_v4 }
 0x2bc   :  { %6904 = vmatmul.msk.bf16.vlgmr.msrb.gmra.mxu0 %vm353_vm0, %v9330_v4 }
 0x2e9   :  { %v1027_v53 = vpop.f32.mrf.mxu0  ;;  %v1056_v59 = vpop.f32.mrf.mxu1 }
 0x2ea   :  { %v1028_v16 = vadd.f32 %v1027_v53, %v9308_v32  ;;  %v1057_v37 = vadd.f32 %v1056_v59, %v9311_v47 }
 0x2ec   :  { %v9472_v19 = vpack.c.bf16 %v1057_v37, %v1028_v16 }
 0x2f0   :  { %v1085_v0 = vpop.f32.mrf.mxu3  ;;  %v1114_v14 = vpop.f32.mrf.mxu2 }
 0x2f1   :  { %v9474_v57 = vpop.f32.mrf.mxu0  ;;  %v9476_v4 = vpop.f32.mrf.mxu1  ;;  %v1115_v11 = vadd.f32 %v1114_v14, %v9328_v12 }
 0x2f8   :  { %v1087_v25 = vpop.f32.mrf.mxu3  ;;  %v1116_v26 = vpop.f32.mrf.mxu2 }
 0x2f9   :  { %v1128_v35 = vpop.f32.mrf.mxu0  ;;  %v1157_v29 = vpop.f32.mrf.mxu1 }
 0x2fa   :  { %v1129_v38 = vadd.f32 %v1128_v35, %v9479_v34  ;;  %v1158_v18 = vadd.f32 %v1157_v29, %v9482_v21  ;;  %v1205_v29 = vperm.slane %v9489_v43, 1 }
 0x2fc   :  { %v9491_v45 = vpack.c.bf16 %v1158_v18, %v1129_v38 }
 0x300   :  { %v1348_v55 = vpop.f32.mrf.mxu3  ;;  %v1387_v22 = vpop.f32.mrf.mxu2 }
 0x301   :  { %v1349_v52 = vadd.f32 %v1348_v55, %v1204_v63  ;;  %v9494_v50 = vpop.f32.mrf.mxu0  ;;  %v9496_v53 = vpop.f32.mrf.mxu1 }
 0x308   :  { %v1350_v59 = vpop.f32.mrf.mxu3  ;;  %v1389_v16 = vpop.f32.mrf.mxu2 }
 0x309   :  { %v9498_v37 = vpop.f32.mrf.mxu0  ;;  %v9500_v35 = vpop.f32.mrf.mxu1  ;;  %v1207_v59 = vperm.slane %v9489_v43, 3  ;;  %v1206_v16 = vperm.slane %v9489_v43, 2 }
 0x30b   :  { %v1388_v60 = vadd.f32 %v1387_v22, %v1207_v59 }
 0x310   :  { %v1361_v15 = vpop.f32.mrf.mxu3 }
 0x311   :  { %v1362_v38 = vadd.f32 %v1361_v15, %v1205_v29  ;;  %v9503_v18 = vpop.f32.mrf.mxu0  ;;  %v9505_v44 = vpop.f32.mrf.mxu1  ;;  %v1088_v29 = vadd.f32 %v1087_v25, %v9325_v62  ;;  %v1083_v25 = vadd.f32 %v9466_v5, %v9325_v62 }
 0x313   :  { %v9507_v3 = vpack.c.bf16 %v1362_v38, %v1349_v52  ;;  %v1117_v52 = vadd.f32 %v1116_v26, %v9328_v12 }
 0x315   :  { %v1439_v39 = vpack.c.bf16 %v1117_v52, %v1088_v29  ;;  %v1866_v52 = vunpack.c.h.b16 %v9452_v58 }
 0x318   :  { %v1363_v63 = vpop.f32.mrf.mxu3 }
 0x319   :  { %v9509_v55 = vpop.f32.mrf.mxu0  ;;  %v9511_v7 = vpop.f32.mrf.mxu1  ;;  %v1086_v63 = vadd.f32 %v1085_v0, %v9325_v62  ;;  %v1869_v0 = vunpack.c.h.b16 %v1439_v39 }
 0x320   :  { %v1374_v40 = vpop.f32.mrf.mxu3 }
 0x321   :  { %v1375_v1 = vadd.f32 %v1374_v40, %v1206_v16  ;;  %v9515_v54 = vpop.f32.mrf.mxu0  ;;  %v9517_v15 = vpop.f32.mrf.mxu1  ;;  %v1436_v40 = vpack.c.bf16 %v1115_v11, %v1086_v63  ;;  %v1107_v11 = vadd.f32 %v9438_v31, %v9328_v12  ;;  %v1102_v31 = vadd.f32 %v9368_v2, %v9328_v12 }
 0x322   :  { %v1481_v2 = vunpack.c.l.b16 %v9358_v9 }
 0x323   :  { %v1442_v38 = vpack.c.bf16 %v1388_v60, %v1375_v1  ;;  %v1112_v60 = vadd.f32 %v9468_v6, %v9328_v12  ;;  %v1488_v1 = vunpack.c.l.b16 %v1439_v39  ;;  %v1487_v14 = vunpack.c.l.b16 %v1436_v40 }
 0x324   :  { %v1868_v16 = vunpack.c.h.b16 %v1436_v40  ;;  %v1485_v39 = vunpack.c.l.b16 %v9452_v58 }
 0x325   :  { %v1489_v48 = vunpack.c.l.b16 %v1442_v38  ;;  %v1870_v42 = vunpack.c.h.b16 %v1442_v38  ;;  %v1433_v38 = vpack.c.bf16 %v1112_v60, %v1083_v25  ;;  %v1493_v29 = vpack.c.b16 %v1488_v1, %v1487_v14 }
 0x326   :  { %v1209_v25 = vperm.slane %v9489_v43, 5 }
 0x327   :  { %v1494_v36 = vpack.c.b16 %v1489_v48, %v1489_v48  ;;  %v1875_v33 = vpack.c.b16 %v1870_v42, %v1870_v42  ;;  %v1874_v48 = vpack.c.b16 %v1869_v0, %v1868_v16  ;;  %v1486_v5 = vunpack.c.l.b16 %v1433_v38 }
 0x328   :  { %v1376_v22 = vpop.f32.mrf.mxu3  ;;  %v1867_v6 = vunpack.c.h.b16 %v1433_v38 }
 0x329   :  { %1503 = vmatpush.bf16.xpose.msrb.mxu1 %v1494_v36  ;;  %1884 = vmatpush.bf16.xpose.msrb.mxu3 %v1875_v33  ;;  %v1143_v59 = vpop.f32.mrf.mxu0  ;;  %v1172_v26 = vpop.f32.mrf.mxu1  ;;  %v1078_v33 = vadd.f32 %v9436_v28, %v9325_v62  ;;  %v1208_v22 = vperm.slane %v9489_v43, 4  ;;  %v1492_v60 = vpack.c.b16 %v1486_v5, %v1485_v39  ;;  %v1073_v28 = vadd.f32 %v9366_v23, %v9325_v62 }
 0x32a   :  { %v1873_v1 = vpack.c.b16 %v1867_v6, %v1866_v52  ;;  %v1044_v62 = vadd.f32 %v9350_v41, %v9311_v47  ;;  %v1144_v23 = vadd.f32 %v1143_v59, %v9479_v34  ;;  %v1173_v12 = vadd.f32 %v1172_v26, %v9482_v21 }
 0x32b   :  { %v1427_v63 = vpack.c.bf16 %v1107_v11, %v1078_v33  ;;  %v1015_v33 = vadd.f32 %v9348_v17, %v9308_v32  ;;  %v1864_v11 = vunpack.c.h.b16 %v9422_v20  ;;  %v1421_v6 = vpack.c.bf16 %v1102_v31, %v1073_v28 }
 0x32c   :  { %v1170_v17 = vadd.f32 %v9517_v15, %v9482_v21  ;;  %v1139_v26 = vadd.f32 %v9509_v55, %v9479_v34 }
 0x32d   :  { %v1484_v38 = vunpack.c.l.b16 %v1427_v63  ;;  %v1863_v31 = vunpack.c.h.b16 %v1421_v6 }
 0x330   :  { %v1400_v42 = vpop.f32.mrf.mxu3 }
 0x331   :  { %1504 = vmatpush.bf16.xpose.msrb.mxu1 %v1493_v29  ;;  %1885 = vmatpush.bf16.xpose.msrb.mxu3 %v1874_v48  ;;  %v1145_v36 = vpop.f32.mrf.mxu0  ;;  %v1174_v40 = vpop.f32.mrf.mxu1  ;;  %v1865_v29 = vunpack.c.h.b16 %v1427_v63  ;;  %v1401_v48 = vadd.f32 %v1400_v42, %v1208_v22  ;;  %v1141_v42 = vadd.f32 %v9515_v54, %v9479_v34  ;;  %v1168_v22 = vadd.f32 %v9511_v7, %v9482_v21 }
 0x332   :  { %v1146_v14 = vadd.f32 %v1145_v36, %v9479_v34  ;;  %v1175_v16 = vadd.f32 %v1174_v40, %v9482_v21  ;;  %v1483_v36 = vunpack.c.l.b16 %v9422_v20  ;;  %v1437_v20 = vpack.c.bf16 %v1173_v12, %v1144_v23 }
 0x333   :  { %v1872_v63 = vpack.c.b16 %v1865_v29, %v1864_v11  ;;  %v1136_v40 = vadd.f32 %v9503_v18, %v9479_v34  ;;  %v1165_v54 = vadd.f32 %v9505_v44, %v9482_v21  ;;  %v1134_v7 = vadd.f32 %v9498_v37, %v9479_v34 }
 0x334   :  { %v1440_v39 = vpack.c.bf16 %v1175_v16, %v1146_v14  ;;  %v1491_v59 = vpack.c.b16 %v1484_v38, %v1483_v36  ;;  %v1163_v44 = vadd.f32 %v9500_v35, %v9482_v21  ;;  %v1431_v16 = vpack.c.bf16 %v1168_v22, %v1139_v26 }
 0x335   :  { %v2150_v38 = vunpack.c.h.b16 %v1437_v20  ;;  %v1862_v29 = vunpack.c.h.b16 %v9358_v9  ;;  %v1160_v37 = vadd.f32 %v9496_v53, %v9482_v21 }
 0x336   :  { %v1780_v28 = vunpack.c.l.b16 %v1440_v39 }
 0x338   :  { %v1402_v0 = vpop.f32.mrf.mxu3 }
 0x339   :  { %1505 = vmatpush.bf16.xpose.msrb.mxu1 %v1492_v60  ;;  %1886 = vmatpush.bf16.xpose.msrb.mxu3 %v1873_v1  ;;  %v1413_v58 = vpop.f32.mrf.mxu0  ;;  %v1482_v60 = vunpack.c.l.b16 %v1421_v6  ;;  %v1434_v1 = vpack.c.bf16 %v1170_v17, %v1141_v42  ;;  %v2151_v0 = vunpack.c.h.b16 %v1440_v39  ;;  %v1425_v6 = vpack.c.bf16 %v1163_v44, %v1134_v7 }
 0x33a   :  { %v1414_v43 = vadd.f32 %v1413_v58, %v1209_v25  ;;  %v1779_v58 = vunpack.c.l.b16 %v1437_v20  ;;  %v1777_v42 = vunpack.c.l.b16 %v1431_v16  ;;  %v2148_v17 = vunpack.c.h.b16 %v1431_v16 }
 0x33b   :  { %v1778_v23 = vunpack.c.l.b16 %v1434_v1  ;;  %v2149_v12 = vunpack.c.h.b16 %v1434_v1  ;;  %v2156_v11 = vpack.c.b16 %v2151_v0, %v2150_v38  ;;  %v1490_v35 = vpack.c.b16 %v1482_v60, %v1481_v2 }
 0x33c   :  { %v1443_v5 = vpack.c.bf16 %v1414_v43, %v1401_v48  ;;  %v1131_v48 = vadd.f32 %v9494_v50, %v9479_v34  ;;  %v1428_v43 = vpack.c.bf16 %v1165_v54, %v1136_v40  ;;  %v1785_v36 = vpack.c.b16 %v1780_v28, %v1779_v58 }
 0x33d   :  { %v1871_v39 = vpack.c.b16 %v1863_v31, %v1862_v29  ;;  %v1784_v34 = vpack.c.b16 %v1778_v23, %v1777_v42  ;;  %v2155_v21 = vpack.c.b16 %v2149_v12, %v2148_v17  ;;  %v1020_v28 = vadd.f32 %v9406_v13, %v9308_v32 }
 0x33e   :  { %v1781_v41 = vunpack.c.l.b16 %v1443_v5  ;;  %v2152_v52 = vunpack.c.h.b16 %v1443_v5  ;;  %v1420_v5 = vpack.c.bf16 %v1044_v62, %v1015_v33  ;;  %v1422_v9 = vpack.c.bf16 %v1160_v37, %v1131_v48 }
 0x33f   :  { %v1453_v33 = vunpack.c.l.b16 %v9322_v61  ;;  %v1843_v62 = vunpack.c.h.b16 %v9322_v61  ;;  %v1049_v61 = vadd.f32 %v9408_v8, %v9311_v47  ;;  %v1455_v7 = vunpack.c.l.b16 %v9378_v49 }
 0x340   :  { %v1786_v15 = vpack.c.b16 %v1781_v41, %v1781_v41  ;;  %v2157_v25 = vpack.c.b16 %v2152_v52, %v2152_v52  ;;  %v1776_v41 = vunpack.c.l.b16 %v1428_v43  ;;  %v2147_v52 = vunpack.c.h.b16 %v1428_v43 }
 0x341   :  { %1506 = vmatpush.bf16.xpose.msrb.mxu1 %v1491_v59  ;;  %1887 = vmatpush.bf16.xpose.msrb.mxu3 %v1872_v63  ;;  %v1415_v55 = vpop.f32.mrf.mxu0  ;;  %v1454_v50 = vunpack.c.l.b16 %v1420_v5  ;;  %v1844_v53 = vunpack.c.h.b16 %v1420_v5  ;;  %v1775_v59 = vunpack.c.l.b16 %v1425_v6  ;;  %v2146_v63 = vunpack.c.h.b16 %v1425_v6 }
 0x342   :  { %v1808_v14 = vsel %vm1806_vm1, %v1786_v15, 0  ;;  %v2178_v18 = vsel %vm1806_vm1, %v2157_v25, 0  ;;  %v1774_v2 = vunpack.c.l.b16 %v1422_v9  ;;  %v2145_v26 = vunpack.c.h.b16 %v1422_v9 }
 0x343   :  { %1813 = vmatpush.bf16.msra.mxu2 %v1808_v14  ;;  %2183 = vmatpush.bf16.msra.mxu0 %v2178_v18  ;;  %v1783_v22 = vpack.c.b16 %v1776_v41, %v1775_v59  ;;  %v2154_v20 = vpack.c.b16 %v2147_v52, %v2146_v63  ;;  %v1462_v40 = vpack.c.b16 %v1454_v50, %v1453_v33  ;;  %v1773_v15 = vunpack.c.l.b16 %v9491_v45 }
 0x344   :  { %v1852_v54 = vpack.c.b16 %v1844_v53, %v1843_v62  ;;  %v2144_v25 = vunpack.c.h.b16 %v9491_v45  ;;  %v1426_v0 = vpack.c.bf16 %v1049_v61, %v1020_v28  ;;  %v1845_v45 = vunpack.c.h.b16 %v9378_v49 }
 0x345   :  { %v1782_v60 = vpack.c.b16 %v1774_v2, %v1773_v15  ;;  %v1025_v44 = vadd.f32 %v9462_v46, %v9308_v32  ;;  %v1054_v13 = vadd.f32 %v9464_v56, %v9311_v47  ;;  %v1457_v38 = vunpack.c.l.b16 %v9442_v51 }
 0x346   :  { %v2153_v1 = vpack.c.b16 %v2145_v26, %v2144_v25  ;;  %v1456_v55 = vunpack.c.l.b16 %v1426_v0  ;;  %v1846_v31 = vunpack.c.h.b16 %v1426_v0  ;;  %v1847_v29 = vunpack.c.h.b16 %v9442_v51 }
 0x347   :  { %1814 = vmatpush.bf16.msra.mxu2 %v1785_v36  ;;  %2184 = vmatpush.bf16.msra.mxu0 %v2156_v11  ;;  %v1432_v8 = vpack.c.bf16 %v1054_v13, %v1025_v44  ;;  %v1030_v49 = vadd.f32 %v9474_v57, %v9308_v32  ;;  %v1059_v46 = vadd.f32 %v9476_v4, %v9311_v47  ;;  %v1459_v12 = vunpack.c.l.b16 %v9472_v19 }
 0x348   :  { %v1463_v14 = vpack.c.b16 %v1456_v55, %v1455_v7  ;;  %v1853_v18 = vpack.c.b16 %v1846_v31, %v1845_v45  ;;  %v1849_v36 = vunpack.c.h.b16 %v9472_v19  ;;  %v1461_v51 = vunpack.c.l.b16 %v9507_v3 }
 0x349   :  { %1507 = vmatpush.bf16.xpose.msrb.mxu1 %v1490_v35  ;;  %1888 = vmatpush.bf16.xpose.msrb.mxu3 %v1871_v39  ;;  %v1458_v16 = vunpack.c.l.b16 %v1432_v8  ;;  %v1848_v58 = vunpack.c.h.b16 %v1432_v8  ;;  %v1438_v43 = vpack.c.bf16 %v1059_v46, %v1030_v49  ;;  %v1851_v35 = vunpack.c.h.b16 %v9507_v3 }
 0x34a   :  { %v1466_v6 = vpack.c.b16 %v1461_v51, %v1461_v51 }
 0x34b   :  { %1815 = vmatpush.bf16.msra.mxu2 %v1784_v34  ;;  %2185 = vmatpush.bf16.msra.mxu0 %v2155_v21  ;;  %v1464_v48 = vpack.c.b16 %v1458_v16, %v1457_v38  ;;  %v1854_v37 = vpack.c.b16 %v1848_v58, %v1847_v29  ;;  %v1460_v23 = vunpack.c.l.b16 %v1438_v43  ;;  %v1850_v56 = vunpack.c.h.b16 %v1438_v43 }
 0x34c   :  { %v1856_v32 = vpack.c.b16 %v1851_v35, %v1851_v35 }
 0x34d   :  { %v1465_v11 = vpack.c.b16 %v1460_v23, %v1459_v12  ;;  %v1855_v5 = vpack.c.b16 %v1850_v56, %v1849_v36 }
 0x34f   :  { %1816 = vmatpush.bf16.msra.mxu2 %v1783_v22  ;;  %2186 = vmatpush.bf16.msra.mxu0 %v2154_v20 }
 0x350   :  { %1508 = vmatmul.bf16.vlgmr.msrb.gmra.mxu1 %v1462_v40  ;;  %1889 = vmatmul.bf16.vlgmr.msrb.gmra.mxu3 %v1852_v54 }
 0x353   :  { %1817 = vmatpush.bf16.msra.mxu2 %v1782_v60  ;;  %2187 = vmatpush.bf16.msra.mxu0 %v2153_v1 }
 0x360   :  { %1513 = vmatmul.bf16.gmra.mxu1 %v1463_v14  ;;  %1894 = vmatmul.bf16.gmra.mxu3 %v1853_v18 }
 0x370   :  { %1518 = vmatmul.bf16.gmra.mxu1 %v1464_v48  ;;  %1899 = vmatmul.bf16.gmra.mxu3 %v1854_v37 }
 0x380   :  { %1523 = vmatmul.bf16.gmra.mxu1 %v1465_v11  ;;  %1904 = vmatmul.bf16.gmra.mxu3 %v1855_v5 }
 0x390   :  { %1528 = vmatmul.bf16.gmra.mxu1 %v1466_v6  ;;  %1909 = vmatmul.bf16.gmra.mxu3 %v1856_v32 }
 0x3cd   :  { %v1509_v47 = vpop.f32.mrf.mxu1 }
 0x3ce   :  { %v9597_v57 = vmul.f32 0.17677669, %v1509_v47 }
 0x3d0   :  { %v1543_v4 = vsel %vm1542_vm2, %v9597_v57, -inf }
 0x3d1   :  { %1544 = vmax.xlane.f32.xlu2 %v1543_v4 }
 0x3d3   :  { %v1890_v19 = vpop.f32.mrf.mxu3 }
 0x3d4   :  { %v9601_v42 = vmul.f32 0.17677669, %v1890_v19 }
 0x3d5   :  { %v1511_v17 = vpop.f32.mrf.mxu1 }
 0x3d6   :  { %v9603_v39 = vmul.f32 0.17677669, %v1511_v17  ;;  %v1923_v3 = vsel %vm1542_vm2, %v9601_v42, -inf }
 0x3d8   :  { %v1546_v9 = vsel %vm1542_vm2, %v9603_v39, -inf }
 0x3d9   :  { %1924 = vmax.xlane.f32.xlu2 %v1923_v3  ;;  %1547 = vmax.xlane.f32.xlu1 %v1546_v9 }
 0x3db   :  { %v1892_v41 = vpop.f32.mrf.mxu3 }
 0x3dc   :  { %v9609_v52 = vmul.f32 0.17677669, %v1892_v41 }
 0x3dd   :  { %v1514_v34 = vpop.f32.mrf.mxu1 }
 0x3de   :  { %v9611_v21 = vmul.f32 0.17677669, %v1514_v34  ;;  %v1926_v50 = vsel %vm1542_vm2, %v9609_v52, -inf }
 0x3e0   :  { %v1549_v53 = vsel %vm1542_vm2, %v9611_v21, -inf }
 0x3e1   :  { %1927 = vmax.xlane.f32.xlu2 %v1926_v50  ;;  %1550 = vmax.xlane.f32.xlu0 %v1549_v53 }
 0x3e3   :  { %v1895_v59 = vpop.f32.mrf.mxu3 }
 0x3e4   :  { %v9617_v63 = vmul.f32 0.17677669, %v1895_v59 }
 0x3e5   :  { %v1516_v33 = vpop.f32.mrf.mxu1 }
 0x3e6   :  { %v1929_v62 = vsel %vm1542_vm2, %v9617_v63, -inf  ;;  %v9621_v26 = vmul.f32 0.17677669, %v1516_v33 }
 0x3e8   :  { %v1552_v40 = vsel %vm1542_vm2, %v9621_v26, -inf }
 0x3e9   :  { %1930 = vmax.xlane.f32.xlu2 %v1929_v62 }
 0x3eb   :  { %v1897_v2 = vpop.f32.mrf.mxu3 }
 0x3ec   :  { %v9629_v25 = vmul.f32 0.17677669, %v1897_v2 }
 0x3ed   :  { %v1519_v22 = vpop.f32.mrf.mxu1 }
 0x3ee   :  { %v9623_v20 = vmul.f32 0.17677669, %v1519_v22  ;;  %v1932_v28 = vsel %vm1542_vm2, %v9629_v25, -inf }
 0x3f0   :  { %v1555_v54 = vsel %vm1542_vm2, %v9623_v20, -inf }
 0x3f1   :  { %1553 = vmax.xlane.f32.xlu2 %v1552_v40  ;;  %1556 = vmax.xlane.f32.xlu1 %v1555_v54 }
 0x3f3   :  { %v1900_v15 = vpop.f32.mrf.mxu3 }
 0x3f4   :  { %v9631_v60 = vmul.f32 0.17677669, %v1900_v15 }
 0x3f5   :  { %v1521_v1 = vpop.f32.mrf.mxu1 }
 0x3f6   :  { %v1935_v61 = vsel %vm1542_vm2, %v9631_v60, -inf  ;;  %v9637_v55 = vmul.f32 0.17677669, %v1521_v1 }
 0x3f8   :  { %v1558_v45 = vsel %vm1542_vm2, %v9637_v55, -inf }
 0x3f9   :  { %1933 = vmax.xlane.f32.xlu2 %v1932_v28  ;;  %1936 = vmax.xlane.f32.xlu1 %v1935_v61 }
 0x3fb   :  { %v1902_v0 = vpop.f32.mrf.mxu3 }
 0x3fc   :  { %v9645_v44 = vmul.f32 0.17677669, %v1902_v0 }
 0x3fd   :  { %v1524_v31 = vpop.f32.mrf.mxu1 }
 0x3fe   :  { %v9639_v7 = vmul.f32 0.17677669, %v1524_v31  ;;  %v1938_v16 = vsel %vm1542_vm2, %v9645_v44, -inf }
 0x400   :  { %v1561_v14 = vsel %vm1542_vm2, %v9639_v7, -inf }
 0x401   :  { %1559 = vmax.xlane.f32.xlu2 %v1558_v45  ;;  %1562 = vmax.xlane.f32.xlu1 %v1561_v14 }
 0x403   :  { %v1905_v18 = vpop.f32.mrf.mxu3 }
 0x404   :  { %v9653_v29 = vmul.f32 0.17677669, %v1905_v18 }
 0x405   :  { %v1526_v13 = vpop.f32.mrf.mxu1 }
 0x406   :  { %v9647_v8 = vmul.f32 0.17677669, %v1526_v13  ;;  %v1941_v46 = vsel %vm1542_vm2, %v9653_v29, -inf }
 0x408   :  { %v1564_v58 = vsel %vm1542_vm2, %v9647_v8, -inf }
 0x409   :  { %1939 = vmax.xlane.f32.xlu2 %v1938_v16  ;;  %1565 = vmax.xlane.f32.xlu0 %v1564_v58 }
 0x40b   :  { %v1907_v38 = vpop.f32.mrf.mxu3 }
 0x40c   :  { %v9655_v48 = vmul.f32 0.17677669, %v1907_v38 }
 0x40d   :  { %v9657_v37 = vpop.f32.mrf.mxu1 }
 0x40e   :  { %v1944_v49 = vsel %vm1542_vm2, %v9655_v48, -inf }
 0x40f   :  { %1945 = vmax.xlane.f32.xlu1 %v1944_v49 }
 0x411   :  { %1942 = vmax.xlane.f32.xlu2 %v1941_v46 }
 0x413   :  { %v1910_v43 = vpop.f32.mrf.mxu3 }
 0x414   :  { %v9694_v61 = vmul.f32 0.17677669, %v1910_v43 }
 0x415   :  { %v1531_v23 = vpop.f32.mrf.mxu1 }
 0x416   :  { %v1947_v38 = vsel %vm1542_vm2, %v9694_v61, -inf }
 0x41b   :  { %v1912_v56 = vpop.f32.mrf.mxu3 }
 0x444   :  { %v1545_v12 = vpop.xlane.xlu2 %1544 }
 0x445   :  { %v1570_v36 = vsub.f32 %v9597_v57, %v1545_v12 }
 0x447   :  { %v1579_v11 = vmul.f32 1.442695, %v1570_v36 }
 0x449   :  { %8084 = vpow2.f32 %v1579_v11 }
 0x44c   :  { %v1925_v5 = vpop.xlane.xlu2 %1924  ;;  %v1548_v51 = vpop.xlane.xlu1 %1547 }
 0x44d   :  { %v1950_v35 = vsub.f32 %v9601_v42, %v1925_v5  ;;  %v1571_v6 = vsub.f32 %v9603_v39, %v1548_v51 }
 0x44f   :  { %v9666_v32 = vpop.eup %8084  ;;  %v1959_v47 = vmul.f32 1.442695, %v1950_v35  ;;  %v1581_v4 = vmul.f32 1.442695, %v1571_v6 }
 0x450   :  { %v1597_v19 = vsel %vm1542_vm2, %v9666_v32, 0.0 }
 0x451   :  { %8086 = vpow2.f32 %v1959_v47  ;;  %1598 = vadd.xlane.f32.xlu0 %v1597_v19 }
 0x452   :  { %8088 = vpow2.f32 %v1581_v4 }
 0x454   :  { %v1928_v17 = vpop.xlane.xlu2 %1927  ;;  %v1551_v57 = vpop.xlane.xlu0 %1550 }
 0x455   :  { %v1951_v3 = vsub.f32 %v9609_v52, %v1928_v17  ;;  %v1572_v9 = vsub.f32 %v9611_v21, %v1551_v57 }
 0x457   :  { %v9672_v41 = vpop.eup %8086  ;;  %v1961_v42 = vmul.f32 1.442695, %v1951_v3  ;;  %v1583_v39 = vmul.f32 1.442695, %v1572_v9 }
 0x458   :  { %v9674_v34 = vpop.eup %8088  ;;  %v1977_v50 = vsel %vm1542_vm2, %v9672_v41, 0.0 }
 0x459   :  { %8090 = vpow2.f32 %v1961_v42  ;;  %v1600_v53 = vsel %vm1542_vm2, %v9674_v34, 0.0  ;;  %1978 = vadd.xlane.f32.xlu1 %v1977_v50 }
 0x45a   :  { %8092 = vpow2.f32 %v1583_v39  ;;  %1601 = vadd.xlane.f32.xlu2 %v1600_v53 }
 0x45c   :  { %v1931_v59 = vpop.xlane.xlu2 %1930 }
 0x45d   :  { %v1952_v52 = vsub.f32 %v9617_v63, %v1931_v59 }
 0x45f   :  { %v9681_v21 = vpop.eup %8090  ;;  %v1963_v33 = vmul.f32 1.442695, %v1952_v52 }
 0x460   :  { %v9683_v62 = vpop.eup %8092  ;;  %v1980_v2 = vsel %vm1542_vm2, %v9681_v21, 0.0 }
 0x461   :  { %8094 = vpow2.f32 %v1963_v33  ;;  %v1603_v22 = vsel %vm1542_vm2, %v9683_v62, 0.0  ;;  %1981 = vadd.xlane.f32.xlu0 %v1980_v2 }
 0x462   :  { %1604 = vadd.xlane.f32.xlu2 %v1603_v22 }
 0x464   :  { %v1554_v40 = vpop.xlane.xlu2 %1553  ;;  %v1557_v54 = vpop.xlane.xlu1 %1556 }
 0x465   :  { %v1573_v15 = vsub.f32 %v9621_v26, %v1554_v40  ;;  %v1574_v26 = vsub.f32 %v9623_v20, %v1557_v54 }
 0x467   :  { %v9690_v1 = vpop.eup %8094  ;;  %v1585_v63 = vmul.f32 1.442695, %v1573_v15  ;;  %v1587_v49 = vmul.f32 1.442695, %v1574_v26 }
 0x468   :  { %v1983_v28 = vsel %vm1542_vm2, %v9690_v1, 0.0 }
 0x469   :  { %8096 = vpow2.f32 %v1585_v63  ;;  %1984 = vadd.xlane.f32.xlu0 %v1983_v28 }
 0x46c   :  { %v1934_v0 = vpop.xlane.xlu2 %1933  ;;  %v1937_v31 = vpop.xlane.xlu1 %1936 }
 0x46d   :  { %v1953_v45 = vsub.f32 %v9629_v25, %v1934_v0  ;;  %v1954_v14 = vsub.f32 %v9631_v60, %v1937_v31  ;;  %v9706_v25 = vmul.f32 0.17677669, %v9657_v37 }
 0x46f   :  { %v9698_v18 = vpop.eup %8096  ;;  %v1965_v13 = vmul.f32 1.442695, %v1953_v45  ;;  %v1967_v16 = vmul.f32 1.442695, %v1954_v14  ;;  %v1567_v11 = vsel %vm1542_vm2, %v9706_v25, -inf }
 0x470   :  { %v1606_v58 = vsel %vm1542_vm2, %v9698_v18, 0.0 }
 0x471   :  { %8098 = vpow2.f32 %v1965_v13  ;;  %1607 = vadd.xlane.f32.xlu1 %v1606_v58  ;;  %1948 = vmax.xlane.f32.xlu0 %v1947_v38 }
 0x472   :  { %8100 = vpow2.f32 %v1967_v16 }
 0x473   :  { %8102 = vpow2.f32 %v1587_v49 }
 0x474   :  { %v1560_v60 = vpop.xlane.xlu2 %1559  ;;  %v1563_v46 = vpop.xlane.xlu1 %1562 }
 0x475   :  { %v1575_v20 = vsub.f32 %v9637_v55, %v1560_v60  ;;  %v1576_v56 = vsub.f32 %v9639_v7, %v1563_v46 }
 0x477   :  { %v9709_v43 = vpop.eup %8098  ;;  %v1589_v23 = vmul.f32 1.442695, %v1575_v20  ;;  %v1591_v55 = vmul.f32 1.442695, %v1576_v56 }
 0x478   :  { %v9712_v12 = vpop.eup %8100  ;;  %v1986_v36 = vsel %vm1542_vm2, %v9709_v43, 0.0 }
 0x479   :  { %8104 = vpow2.f32 %v1589_v23  ;;  %1987 = vadd.xlane.f32.xlu2 %v1986_v36  ;;  %v1989_v37 = vsel %vm1542_vm2, %v9712_v12, 0.0  ;;  %1568 = vmax.xlane.f32.xlu1 %v1567_v11  ;;  %v9720_v35 = vpop.eup %8102 }
 0x47a   :  { %1990 = vadd.xlane.f32.xlu0 %v1989_v37  ;;  %8106 = vpow2.f32 %v1591_v55  ;;  %v1609_v17 = vsel %vm1542_vm2, %v9720_v35, 0.0 }
 0x47c   :  { %v1940_v5 = vpop.xlane.xlu2 %1939  ;;  %v1566_v51 = vpop.xlane.xlu0 %1565 }
 0x47d   :  { %v1955_v7 = vsub.f32 %v9645_v44, %v1940_v5  ;;  %v1577_v6 = vsub.f32 %v9647_v8, %v1566_v51 }
 0x47f   :  { %v9724_v47 = vpop.eup %8104  ;;  %v1969_v4 = vmul.f32 1.442695, %v1955_v7  ;;  %v1593_v19 = vmul.f32 1.442695, %v1577_v6 }
 0x480   :  { %v1612_v57 = vsel %vm1542_vm2, %v9724_v47, 0.0  ;;  %v9731_v8 = vpop.eup %8106 }
 0x481   :  { %8108 = vpow2.f32 %v1969_v4  ;;  %1610 = vadd.xlane.f32.xlu2 %v1609_v17  ;;  %1613 = vadd.xlane.f32.xlu1 %v1612_v57  ;;  %v1615_v33 = vsel %vm1542_vm2, %v9731_v8, 0.0 }
 0x482   :  { %8110 = vpow2.f32 %v1593_v19  ;;  %v1946_v3 = vpop.xlane.xlu1 %1945 }
 0x483   :  { %v1957_v44 = vsub.f32 %v9655_v48, %v1946_v3 }
 0x484   :  { %v1943_v9 = vpop.xlane.xlu2 %1942 }
 0x485   :  { %v1973_v42 = vmul.f32 1.442695, %v1957_v44  ;;  %v1956_v39 = vsub.f32 %v9653_v29, %v1943_v9 }
 0x487   :  { %v9734_v50 = vpop.eup %8108  ;;  %8112 = vpow2.f32 %v1973_v42  ;;  %v1971_v53 = vmul.f32 1.442695, %v1956_v39 }
 0x488   :  { %v9736_v59 = vpop.eup %8110  ;;  %v1992_v52 = vsel %vm1542_vm2, %v9734_v50, 0.0 }
 0x489   :  { %8114 = vpow2.f32 %v1971_v53  ;;  %1993 = vadd.xlane.f32.xlu2 %v1992_v52  ;;  %v1618_v48 = vsel %vm1542_vm2, %v9736_v59, 0.0  ;;  %1616 = vadd.xlane.f32.xlu1 %v1615_v33 }
 0x48a   :  { %1619 = vadd.xlane.f32.xlu0 %v1618_v48 }
 0x48d   :  { %v9744_v29 = vpop.eup %8112 }
 0x48e   :  { %v1998_v40 = vsel %vm1542_vm2, %v9744_v29, 0.0 }
 0x48f   :  { %v9746_v2 = vpop.eup %8114 }
 0x490   :  { %v1995_v22 = vsel %vm1542_vm2, %v9746_v2, 0.0 }
 0x491   :  { %1996 = vadd.xlane.f32.xlu2 %v1995_v22  ;;  %1999 = vadd.xlane.f32.xlu1 %v1998_v40 }
 0x4c4   :  { %v1599_v54 = vpop.xlane.xlu0 %1598 }
 0x4c5   :  { %8116 = vrcp.f32 %v1599_v54  ;;  %v1635_v49 = vand.u32 2147483648, %v1599_v54  ;;  %vm1629_vm4 = vweird.f32 %v1599_v54  ;;  %v1633_v46 = vand.u32 2147483647, %v1599_v54 }
 0x4c7   :  { %v1636_v5 = vor.u32 1.1754944e-38, %v1635_v49  ;;  %vm1634_vm7 = vcmp.eq.f32.partialorder %v1633_v46, 8.507059e+37 }
 0x4cb   :  { %v8117_v15 = vpop.eup %8116 }
 0x4cc   :  { %v1625_v63 = vmul.f32 %v8117_v15, %v1599_v54  ;;  %v1979_v28 = vpop.xlane.xlu1 %1978  ;;  %vm1630_vm3 = vweird.f32 %v8117_v15 }
 0x4cd   :  { %v1602_v0 = vpop.xlane.xlu2 %1601  ;;  %8118 = vrcp.f32 %v1979_v28  ;;  %vm1631_vm5 = vmor %vm1629_vm4, %vm1630_vm3  ;;  %v2015_v44 = vand.u32 2147483648, %v1979_v28  ;;  %vm2009_vm12 = vweird.f32 %v1979_v28  ;;  %v2013_v42 = vand.u32 2147483647, %v1979_v28 }
 0x4ce   :  { %v1626_v31 = vsub.f32 1.0, %v1625_v63  ;;  %8120 = vrcp.f32 %v1602_v0  ;;  %v1649_v23 = vand.u32 2147483648, %v1602_v0  ;;  %v1647_v55 = vand.u32 2147483647, %v1602_v0 }
 0x4cf   :  { %vm1643_vm8 = vweird.f32 %v1602_v0  ;;  %vm2014_vm15 = vcmp.eq.f32.partialorder %v2013_v42, 8.507059e+37 }
 0x4d0   :  { %v1627_v45 = vmul.f32 %v8117_v15, %v1626_v31  ;;  %v1650_v6 = vor.u32 1.1754944e-38, %v1649_v23  ;;  %vm1648_vm11 = vcmp.eq.f32.partialorder %v1647_v55, 8.507059e+37 }
 0x4d2   :  { %v1628_v58 = vadd.f32 %v8117_v15, %v1627_v45 }
 0x4d3   :  { %v8119_v14 = vpop.eup %8118 }
 0x4d4   :  { %v8121_v26 = vpop.eup %8120  ;;  %v2005_v13 = vmul.f32 %v8119_v14, %v1979_v28  ;;  %v1982_v16 = vpop.xlane.xlu0 %1981  ;;  %v1632_v11 = vsel %vm1631_vm5, %v8117_v15, %v1628_v58  ;;  %vm2010_vm10 = vweird.f32 %v8119_v14  ;;  %v2016_v15 = vor.u32 1.1754944e-38, %v2015_v44 }
 0x4d5   :  { %v1639_v38 = vmul.f32 %v8121_v26, %v1602_v0  ;;  %8122 = vrcp.f32 %v1982_v16  ;;  %v9752_v56 = vpop.xlane.xlu2 %1604  ;;  %vm1644_vm6 = vweird.f32 %v8121_v26  ;;  %v1637_v4 = vsel %vm1634_vm7, %v1636_v5, %v1632_v11  ;;  %vm2011_vm13 = vmor %vm2009_vm12, %vm2010_vm10 }
 0x4d6   :  { %v2006_v60 = vsub.f32 1.0, %v2005_v13  ;;  %8124 = vrcp.f32 %v9752_v56  ;;  %vm1645_vm9 = vmor %vm1643_vm8, %vm1644_vm6  ;;  %v1750_v53 = vmul.f32 %v9666_v32, %v1637_v4  ;;  %v2029_v33 = vand.u32 2147483648, %v1982_v16 }
 0x4d7   :  { %v1640_v20 = vsub.f32 1.0, %v1639_v38  ;;  %v2027_v54 = vand.u32 2147483647, %v1982_v16  ;;  %vm2023_vm3 = vweird.f32 %v1982_v16  ;;  %vm1657_vm7 = vweird.f32 %v9752_v56 }
 0x4d8   :  { %v2007_v36 = vmul.f32 %v8119_v14, %v2006_v60 }
 0x4d9   :  { %v1641_v37 = vmul.f32 %v8121_v26, %v1640_v20  ;;  %vm2028_vm5 = vcmp.eq.f32.partialorder %v2027_v54, 8.507059e+37 }
 0x4da   :  { %v2008_v19 = vadd.f32 %v8119_v14, %v2007_v36 }
 0x4db   :  { %v8123_v51 = vpop.eup %8122  ;;  %v1642_v7 = vadd.f32 %v8121_v26, %v1641_v37 }
 0x4dc   :  { %v2019_v17 = vmul.f32 %v8123_v51, %v1982_v16  ;;  %v9755_v57 = vpop.xlane.xlu0 %1984  ;;  %v9759_v48 = vpop.eup %8124  ;;  %v2012_v22 = vsel %vm2011_vm13, %v8119_v14, %v2008_v19  ;;  %vm2024_vm14 = vweird.f32 %v8123_v51 }
 0x4dd   :  { %v1646_v3 = vsel %vm1645_vm9, %v8121_v26, %v1642_v7  ;;  %8126 = vrcp.f32 %v9755_v57  ;;  %v2017_v28 = vsel %vm2014_vm15, %v2016_v15, %v2012_v22  ;;  %v1653_v32 = vmul.f32 %v9759_v48, %v9752_v56  ;;  %vm2025_vm4 = vmor %vm2023_vm3, %vm2024_vm14 }
 0x4de   :  { %v1651_v9 = vsel %vm1648_vm11, %v1650_v6, %v1646_v3  ;;  %v2020_v39 = vsub.f32 1.0, %v2019_v17  ;;  %v2130_v13 = vmul.f32 %v9672_v41, %v2017_v28  ;;  %vm1658_vm6 = vweird.f32 %v9759_v48 }
 0x4df   :  { %v1751_v52 = vmul.f32 %v9674_v34, %v1651_v9  ;;  %v2030_v34 = vor.u32 1.1754944e-38, %v2029_v33  ;;  %v1654_v58 = vsub.f32 1.0, %v1653_v32  ;;  %v1661_v7 = vand.u32 2147483647, %v9752_v56  ;;  %vm9788_vm9 = vmor %vm1657_vm7, %vm1658_vm6 }
 0x4e0   :  { %v2021_v40 = vmul.f32 %v8123_v51, %v2020_v39  ;;  %v1663_v6 = vand.u32 2147483648, %v9752_v56  ;;  %vm2037_vm15 = vweird.f32 %v9755_v57 }
 0x4e1   :  { %v1759_v63 = vpack.c.bf16 %v1751_v52, %v1750_v53  ;;  %v1655_v23 = vmul.f32 %v9759_v48, %v1654_v58  ;;  %vm1662_vm11 = vcmp.eq.f32.partialorder %v1661_v7, 8.507059e+37 }
 0x4e2   :  { %v2022_v0 = vadd.f32 %v8123_v51, %v2021_v40  ;;  %v1664_v52 = vor.u32 1.1754944e-38, %v1663_v6 }
 0x4e3   :  { %6905 = vmatmul.msk.bf16.vlgmr.msra.gmra.mxu2 %vm1542_vm2, %v1759_v63  ;;  %v9768_v49 = vpop.eup %8126  ;;  %v1656_v55 = vadd.f32 %v9759_v48, %v1655_v23  ;;  %v2041_v63 = vand.u32 2147483647, %v9755_v57 }
 0x4e4   :  { %v2026_v31 = vsel %vm2025_vm4, %v8123_v51, %v2022_v0  ;;  %v1608_v45 = vpop.xlane.xlu1 %1607  ;;  %v1949_v14 = vpop.xlane.xlu0 %1948  ;;  %v2033_v36 = vmul.f32 %v9768_v49, %v9755_v57  ;;  %vm2038_vm13 = vweird.f32 %v9768_v49 }
 0x4e5   :  { %v2031_v26 = vsel %vm2028_vm5, %v2030_v34, %v2026_v31  ;;  %8128 = vrcp.f32 %v1608_v45  ;;  %v1958_v38 = vsub.f32 %v9694_v61, %v1949_v14  ;;  %vm1671_vm10 = vweird.f32 %v1608_v45  ;;  %vm9829_vm3 = vmor %vm2037_vm15, %vm2038_vm13 }
 0x4e6   :  { %v2131_v16 = vmul.f32 %v9681_v21, %v2031_v26  ;;  %v2034_v5 = vsub.f32 1.0, %v2033_v36  ;;  %v1677_v9 = vand.u32 2147483648, %v1608_v45  ;;  %v1675_v53 = vand.u32 2147483647, %v1608_v45 }
 0x4e7   :  { %v1975_v46 = vmul.f32 1.442695, %v1958_v38  ;;  %v1660_v56 = vsel %vm9788_vm9, %v9759_v48, %v1656_v55  ;;  %v2043_v48 = vand.u32 2147483648, %v9755_v57  ;;  %vm9833_vm4 = vcmp.eq.f32.partialorder %v2041_v63, 8.507059e+37 }
 0x4e8   :  { %v2139_v60 = vpack.c.bf16 %v2131_v16, %v2130_v13  ;;  %v2035_v39 = vmul.f32 %v9768_v49, %v2034_v5  ;;  %v1678_v28 = vor.u32 1.1754944e-38, %v1677_v9  ;;  %v1665_v34 = vsel %vm1662_vm11, %v1664_v52, %v1660_v56 }
 0x4e9   :  { %8130 = vpow2.f32 %v1975_v46  ;;  %vm1676_vm14 = vcmp.eq.f32.partialorder %v1675_v53, 8.507059e+37  ;;  %v1752_v16 = vmul.f32 %v9683_v62, %v1665_v34  ;;  %v2044_v46 = vor.u32 1.1754944e-38, %v2043_v48 }
 0x4ea   :  { %6910 = vmatmul.msk.bf16.vlgmr.msra.gmra.mxu0 %vm1542_vm2, %v2139_v60  ;;  %v2036_v31 = vadd.f32 %v9768_v49, %v2035_v39 }
 0x4eb   :  { %v8129_v20 = vpop.eup %8128 }
 0x4ec   :  { %v1667_v11 = vmul.f32 %v8129_v20, %v1608_v45  ;;  %v9774_v41 = vpop.xlane.xlu2 %1987  ;;  %v1569_v21 = vpop.xlane.xlu1 %1568  ;;  %vm1672_vm8 = vweird.f32 %v8129_v20 }
 0x4ed   :  { %8132 = vrcp.f32 %v9774_v41  ;;  %v9777_v61 = vpop.xlane.xlu0 %1990  ;;  %v1578_v51 = vsub.f32 %v9706_v25, %v1569_v21  ;;  %vm9801_vm12 = vmor %vm1671_vm10, %vm1672_vm8  ;;  %vm2051_vm6 = vweird.f32 %v9774_v41 }
 0x4ee   :  { %v1668_v37 = vsub.f32 1.0, %v1667_v11  ;;  %8134 = vrcp.f32 %v9777_v61  ;;  %v2057_v11 = vand.u32 2147483648, %v9774_v41  ;;  %v2071_v7 = vand.u32 2147483648, %v9777_v61 }
 0x4ef   :  { %v9785_v19 = vpop.eup %8130  ;;  %v1595_v17 = vmul.f32 1.442695, %v1578_v51  ;;  %v2055_v51 = vand.u32 2147483647, %v9774_v41  ;;  %vm2065_vm9 = vweird.f32 %v9777_v61  ;;  %v2069_v39 = vand.u32 2147483647, %v9777_v61 }
 0x4f0   :  { %v1669_v4 = vmul.f32 %v8129_v20, %v1668_v37  ;;  %v2001_v25 = vsel %vm1542_vm2, %v9785_v19, 0.0  ;;  %v2058_v9 = vor.u32 1.1754944e-38, %v2057_v11  ;;  %v9880_v53 = vor.u32 1.1754944e-38, %v2071_v7  ;;  %v7896_v7 = vld [vmem:[%s12393_s13 + $0x78] sm:$0xff] }
 0x4f1   :  { %8136 = vpow2.f32 %v1595_v17  ;;  %2002 = vadd.xlane.f32.xlu2 %v2001_v25  ;;  %vm2056_vm8 = vcmp.eq.f32.partialorder %v2055_v51, 8.507059e+37  ;;  %2382 = vmatpush.bf16.msrb.mxu2 %v7896_v7 }
 0x4f2   :  { %v1670_v44 = vadd.f32 %v8129_v20, %v1669_v4 }
 0x4f3   :  { %v9794_v42 = vpop.eup %8132 }
 0x4f4   :  { %v2047_v22 = vmul.f32 %v9794_v42, %v9774_v41  ;;  %v9807_v40 = vpop.xlane.xlu2 %1610  ;;  %v9809_v54 = vpop.xlane.xlu1 %1613  ;;  %v1674_v0 = vsel %vm9801_vm12, %v8129_v20, %v1670_v44  ;;  %vm2052_vm5 = vweird.f32 %v9794_v42  ;;  %vm9903_vm12 = vcmp.eq.f32.partialorder %v2069_v39, 8.507059e+37 }
 0x4f5   :  { %v9811_v15 = vpop.eup %8134  ;;  %8138 = vrcp.f32 %v9807_v40  ;;  %v1679_v26 = vsel %vm1676_vm14, %v1678_v28, %v1674_v0  ;;  %vm9866_vm7 = vmor %vm2051_vm6, %vm2052_vm5  ;;  %vm1685_vm11 = vweird.f32 %v9807_v40  ;;  %v1689_v63 = vand.u32 2147483647, %v9807_v40 }
 0x4f6   :  { %v2048_v32 = vsub.f32 1.0, %v2047_v22  ;;  %8140 = vrcp.f32 %v9809_v54  ;;  %v2061_v14 = vmul.f32 %v9811_v15, %v9777_v61  ;;  %v1753_v58 = vmul.f32 %v9698_v18, %v1679_v26 }
 0x4f7   :  { %v9824_v13 = vpop.eup %8136  ;;  %v2040_v18 = vsel %vm9829_vm3, %v9768_v49, %v2036_v31  ;;  %vm2066_vm10 = vweird.f32 %v9811_v15  ;;  %v1691_v48 = vand.u32 2147483648, %v9807_v40  ;;  %v1705_v34 = vand.u32 2147483648, %v9809_v54 }
 0x4f8   :  { %v2049_v45 = vmul.f32 %v9794_v42, %v2048_v32  ;;  %v1621_v20 = vsel %vm1542_vm2, %v9824_v13, 0.0  ;;  %v1760_v62 = vpack.c.bf16 %v1753_v58, %v1752_v16  ;;  %v2062_v21 = vsub.f32 1.0, %v2061_v14 }
 0x4f9   :  { %1622 = vadd.xlane.f32.xlu0 %v1621_v20  ;;  %v2045_v41 = vsel %vm9833_vm4, %v2044_v46, %v2040_v18  ;;  %v1703_v32 = vand.u32 2147483647, %v9809_v54  ;;  %v7888_v18 = vld [vmem:[%s12393_s13 + $0x38] sm:$0xff]  ;;  %vm9933_vm3 = vcmp.eq.f32.partialorder %v1689_v63, 8.507059e+37  ;;  %vm1699_vm4 = vweird.f32 %v9809_v54 }
 0x4fa   :  { %v2050_v57 = vadd.f32 %v9794_v42, %v2049_v45  ;;  %6906 = vmatmul.msk.bf16.gmra.mxu2 %vm1542_vm2, %v1760_v62  ;;  %v2063_v25 = vmul.f32 %v9811_v15, %v2062_v21  ;;  %v2132_v56 = vmul.f32 %v9690_v1, %v2045_v41  ;;  %2353 = vmatpush.bf16.msra.mxu1 %v7888_v18 }
 0x4fb   :  { %v9839_v23 = vpop.eup %8138  ;;  %vm9948_vm6 = vcmp.eq.f32.partialorder %v1703_v32, 8.507059e+37 }
 0x4fc   :  { %v9846_v36 = vpop.eup %8140  ;;  %v1681_v37 = vmul.f32 %v9839_v23, %v9807_v40  ;;  %v9852_v55 = vpop.xlane.xlu2 %1993  ;;  %v2054_v44 = vsel %vm9866_vm7, %v9794_v42, %v2050_v57  ;;  %v2064_v1 = vadd.f32 %v9811_v15, %v2063_v25  ;;  %vm1686_vm13 = vweird.f32 %v9839_v23 }
 0x4fd   :  { %v9854_v5 = vpop.xlane.xlu1 %1616  ;;  %v1695_v49 = vmul.f32 %v9846_v36, %v9809_v54  ;;  %8142 = vrcp.f32 %v9852_v55  ;;  %v9862_v6 = vpop.xlane.xlu0 %1619  ;;  %v2059_v33 = vsel %vm2056_vm8, %v2058_v9, %v2054_v44  ;;  %vm1700_vm14 = vweird.f32 %v9846_v36  ;;  %vm9929_vm15 = vmor %vm1685_vm11, %vm1686_vm13 }
 0x4fe   :  { %v1682_v17 = vsub.f32 1.0, %v1681_v37  ;;  %8144 = vrcp.f32 %v9862_v6  ;;  %v2133_v0 = vmul.f32 %v9709_v43, %v2059_v33  ;;  %v2083_v20 = vand.u32 2147483647, %v9852_v55  ;;  %vm9944_vm5 = vmor %vm1699_vm4, %vm1700_vm14 }
 0x4ff   :  { %v1696_v3 = vsub.f32 1.0, %v1695_v49  ;;  %8146 = vrcp.f32 %v9854_v5  ;;  %v2085_v57 = vand.u32 2147483648, %v9852_v55  ;;  %v1692_v49 = vor.u32 1.1754944e-38, %v1691_v48  ;;  %vm9960_vm8 = vmor %vm2065_vm9, %vm2066_vm10 }
 0x500   :  { %v1683_v52 = vmul.f32 %v9839_v23, %v1682_v17  ;;  %v2140_v16 = vpack.c.bf16 %v2133_v0, %v2132_v56  ;;  %v7887_v17 = vld [vmem:[%s12393_s13 + $0x30] sm:$0xff]  ;;  %vm2079_vm11 = vweird.f32 %v9852_v55  ;;  %vm9974_vm9 = vcmp.eq.f32.partialorder %v2083_v20, 8.507059e+37 }
 0x501   :  { %v1697_v42 = vmul.f32 %v9846_v36, %v1696_v3  ;;  %v1706_v3 = vor.u32 1.1754944e-38, %v1705_v34  ;;  %v2086_v56 = vor.u32 1.1754944e-38, %v2085_v57  ;;  %2354 = vmatpush.bf16.msra.mxu1 %v7887_v17  ;;  %v1733_v26 = vand.u32 2147483648, %v9862_v6 }
 0x502   :  { %v1684_v38 = vadd.f32 %v9839_v23, %v1683_v52  ;;  %6911 = vmatmul.msk.bf16.gmra.mxu0 %vm1542_vm2, %v2140_v16  ;;  %v2068_v52 = vsel %vm9960_vm8, %v9811_v15, %v2064_v1  ;;  %v7886_v1 = vld [vmem:[%s12393_s13 + $0x28] sm:$0xff]  ;;  %v1719_v20 = vand.u32 2147483648, %v9854_v5 }
 0x503   :  { %v9886_v22 = vpop.eup %8142  ;;  %v1698_v60 = vadd.f32 %v9846_v36, %v1697_v42  ;;  %v2073_v34 = vsel %vm9903_vm12, %v9880_v53, %v2068_v52  ;;  %vm1727_vm12 = vweird.f32 %v9862_v6 }
 0x504   :  { %v9892_v28 = vpop.eup %8144  ;;  %v2075_v31 = vmul.f32 %v9886_v22, %v9852_v55  ;;  %v9899_v45 = vpop.xlane.xlu2 %1996  ;;  %vm2080_vm7 = vweird.f32 %v9886_v22  ;;  %v1688_v9 = vsel %vm9929_vm15, %v9839_v23, %v1684_v38  ;;  %v2134_v53 = vmul.f32 %v9712_v12, %v2073_v34 }
 0x505   :  { %v9901_v14 = vpop.xlane.xlu1 %1999  ;;  %v1723_v43 = vmul.f32 %v9892_v28, %v9862_v6  ;;  %8148 = vrcp.f32 %v9899_v45  ;;  %v9911_v58 = vpop.eup %8146  ;;  %v1702_v25 = vsel %vm9944_vm5, %v9846_v36, %v1698_v60  ;;  %vm2081_vm10 = vmor %vm2079_vm11, %vm2080_vm7  ;;  %v1693_v55 = vsel %vm9933_vm3, %v1692_v49, %v1688_v9  ;;  %2355 = vmatpush.bf16.msra.mxu1 %v7886_v1 }
 0x506   :  { %v2076_v46 = vsub.f32 1.0, %v2075_v31  ;;  %v1709_v62 = vmul.f32 %v9911_v58, %v9854_v5  ;;  %8150 = vrcp.f32 %v9901_v14  ;;  %v1707_v42 = vsel %vm9948_vm6, %v1706_v3, %v1702_v25 }
 0x507   :  { %v1724_v51 = vsub.f32 1.0, %v1723_v43  ;;  %v1754_v15 = vmul.f32 %v9720_v35, %v1693_v55  ;;  %v1755_v48 = vmul.f32 %v9724_v47, %v1707_v42  ;;  %vm1728_vm13 = vweird.f32 %v9892_v28  ;;  %v7882_v55 = vld [vmem:[%s12393_s13 + $0x8] sm:$0xff]  ;;  %v7893_v42 = vld [vmem:[%s12393_s13 + $0x60] sm:$0xff] }
 0x508   :  { %v2077_v37 = vmul.f32 %v9886_v22, %v2076_v46  ;;  %v1710_v54 = vsub.f32 1.0, %v1709_v62  ;;  %vm1714_vm14 = vweird.f32 %v9911_v58  ;;  %v1717_v46 = vand.u32 2147483647, %v9854_v5  ;;  %vm10021_vm15 = vmor %vm1727_vm12, %vm1728_vm13 }
 0x509   :  { %v1725_v23 = vmul.f32 %v9892_v28, %v1724_v51  ;;  %v1761_v43 = vpack.c.bf16 %v1755_v48, %v1754_v15  ;;  %vm1713_vm3 = vweird.f32 %v9854_v5  ;;  %v1734_v51 = vor.u32 1.1754944e-38, %v1733_v26 }
 0x50a   :  { %v2078_v44 = vadd.f32 %v9886_v22, %v2077_v37  ;;  %v1711_v63 = vmul.f32 %v9911_v58, %v1710_v54  ;;  %vm10028_vm4 = vmor %vm1713_vm3, %vm1714_vm14  ;;  %v7884_v37 = vld [vmem:[%s12393_s13 + $0x18] sm:$0xff]  ;;  %vm1718_vm6 = vcmp.eq.f32.partialorder %v1717_v46, 8.507059e+37  ;;  %v1720_v7 = vor.u32 1.1754944e-38, %v1719_v20 }
 0x50b   :  { %v9971_v39 = vpop.eup %8148  ;;  %v1726_v38 = vadd.f32 %v9892_v28, %v1725_v23  ;;  %6907 = vmatmul.msk.bf16.gmra.mxu2 %vm1542_vm2, %v1761_v43  ;;  %vm2093_vm8 = vweird.f32 %v9899_v45  ;;  %v2113_v40 = vand.u32 2147483648, %v9901_v14  ;;  %v2097_v17 = vand.u32 2147483647, %v9899_v45 }
 0x50c   :  { %v2089_v36 = vmul.f32 %v9971_v39, %v9899_v45  ;;  %v9990_v33 = vpop.eup %8150  ;;  %v2082_v0 = vsel %vm2081_vm10, %v9886_v22, %v2078_v44  ;;  %v1731_v22 = vand.u32 2147483647, %v9862_v6  ;;  %v1712_v60 = vadd.f32 %v9911_v58, %v1711_v63 }
 0x50d   :  { %v2103_v32 = vmul.f32 %v9990_v33, %v9901_v14  ;;  %v2087_v31 = vsel %vm9974_vm9, %v2086_v56, %v2082_v0  ;;  %v1730_v5 = vsel %vm10021_vm15, %v9892_v28, %v1726_v38  ;;  %vm2094_vm7 = vweird.f32 %v9971_v39  ;;  %v7891_v0 = vld [vmem:[%s12393_s13 + $0x50] sm:$0xff] }
 0x50e   :  { %v2090_v35 = vsub.f32 1.0, %v2089_v36  ;;  %v2135_v47 = vmul.f32 %v9734_v50, %v2087_v31  ;;  %v7885_v50 = vld [vmem:[%s12393_s13 + $0x20] sm:$0xff]  ;;  %vm10032_vm5 = vcmp.eq.f32.partialorder %v1731_v22, 8.507059e+37  ;;  %v1716_v21 = vsel %vm10028_vm4, %v9911_v58, %v1712_v60  ;;  %vm2095_vm9 = vmor %vm2093_vm8, %vm2094_vm7 }
 0x50f   :  { %v2104_v16 = vsub.f32 1.0, %v2103_v32  ;;  %2356 = vmatpush.bf16.msra.mxu1 %v7885_v50  ;;  %vm2108_vm11 = vweird.f32 %v9990_v33  ;;  %v2099_v28 = vand.u32 2147483648, %v9899_v45  ;;  %v1721_v4 = vsel %vm1718_vm6, %v1720_v7, %v1716_v21  ;;  %v7889_v60 = vld [vmem:[%s12393_s13 + $0x40] sm:$0xff] }
 0x510   :  { %v2091_v12 = vmul.f32 %v9971_v39, %v2090_v35  ;;  %v2141_v18 = vpack.c.bf16 %v2135_v47, %v2134_v53  ;;  %v1735_v54 = vsel %vm10032_vm5, %v1734_v51, %v1730_v5  ;;  %vm2107_vm10 = vweird.f32 %v9901_v14  ;;  %v7890_v35 = vld [vmem:[%s12393_s13 + $0x48] sm:$0xff] }
 0x511   :  { %v2105_v62 = vmul.f32 %v9990_v33, %v2104_v16  ;;  %v2111_v41 = vand.u32 2147483647, %v9901_v14  ;;  %vm2109_vm13 = vmor %vm2107_vm10, %vm2108_vm11  ;;  %v1756_v9 = vmul.f32 %v9731_v8, %v1721_v4  ;;  %v1757_v25 = vmul.f32 %v9736_v59, %v1735_v54  ;;  %v7883_v8 = vld [vmem:[%s12393_s13 + $0x10] sm:$0xff] }
 0x512   :  { %v2092_v49 = vadd.f32 %v9971_v39, %v2091_v12  ;;  %6912 = vmatmul.msk.bf16.gmra.mxu0 %vm1542_vm2, %v2141_v18  ;;  %v2100_v61 = vor.u32 1.1754944e-38, %v2099_v28  ;;  %v2114_v56 = vor.u32 1.1754944e-38, %v2113_v40  ;;  %vm2098_vm14 = vcmp.eq.f32.partialorder %v2097_v17, 8.507059e+37  ;;  %v7895_v59 = vld [vmem:[%s12393_s13 + $0x70] sm:$0xff] }
 0x513   :  { %v2106_v58 = vadd.f32 %v9990_v33, %v2105_v62  ;;  %2357 = vmatpush.bf16.msra.mxu1 %v7884_v37  ;;  %vm2112_vm12 = vcmp.eq.f32.partialorder %v2111_v41, 8.507059e+37  ;;  %v1762_v23 = vpack.c.bf16 %v1757_v25, %v1756_v9  ;;  %2383 = vmatpush.bf16.msrb.mxu2 %v7895_v59 }
 0x514   :  { %v2096_v3 = vsel %vm2095_vm9, %v9971_v39, %v2092_v49 }
 0x515   :  { %v2110_v44 = vsel %vm2109_vm13, %v9990_v33, %v2106_v58  ;;  %v2101_v52 = vsel %vm2098_vm14, %v2100_v61, %v2096_v3  ;;  %v7892_v33 = vld [vmem:[%s12393_s13 + $0x58] sm:$0xff] }
 0x516   :  { %v2115_v45 = vsel %vm2112_vm12, %v2114_v56, %v2110_v44  ;;  %v2136_v14 = vmul.f32 %v9746_v2, %v2101_v52  ;;  %v7894_v2 = vld [vmem:[%s12393_s13 + $0x68] sm:$0xff]  ;;  %v7904_v52 = vld [vmem:[%s12395_s15 + $0x38] sm:$0xff] }
 0x517   :  { %v2137_v36 = vmul.f32 %v9744_v29, %v2115_v45  ;;  %2358 = vmatpush.bf16.msra.mxu1 %v7883_v8  ;;  %v7881_v29 = vld [vmem:[%s12393_s13] sm:$0xff]  ;;  %2384 = vmatpush.bf16.msrb.mxu2 %v7894_v2  ;;  %v7911_v45 = vld [vmem:[%s12395_s15 + $0x70] sm:$0xff] }
 0x518   :  { %2545 = vmatpush.bf16.msrb.mxu0 %v7904_v52  ;;  %v7909_v8 = vld [vmem:[%s12395_s15 + $0x60] sm:$0xff] }
 0x519   :  { %v2142_v39 = vpack.c.bf16 %v2137_v36, %v2136_v14 }
 0x51b   :  { %6908 = vmatmul.msk.bf16.gmra.mxu2 %vm1542_vm2, %v1762_v23  ;;  %2359 = vmatpush.bf16.msra.mxu1 %v7882_v55  ;;  %v7910_v23 = vld [vmem:[%s12395_s15 + $0x68] sm:$0xff]  ;;  %v7908_v55 = vld [vmem:[%s12395_s15 + $0x58] sm:$0xff] }
 0x51c   :  { %2385 = vmatpush.bf16.msrb.mxu2 %v7893_v42 }
 0x51f   :  { %2360 = vmatpush.bf16.msra.mxu1 %v7881_v29 }
 0x520   :  { %2386 = vmatpush.bf16.msrb.mxu2 %v7892_v33  ;;  %v7903_v33 = vld [vmem:[%s12395_s15 + $0x30] sm:$0xff] }
 0x521   :  { %2546 = vmatpush.bf16.msrb.mxu0 %v7903_v33  ;;  %v12496_v33 = vld [vmem:[#allocation6_spill] sm:$0xff] }
 0x522   :  { %6913 = vmatmul.msk.bf16.gmra.mxu0 %vm1542_vm2, %v2142_v39 }
 0x524   :  { %2387 = vmatpush.bf16.msrb.mxu2 %v7891_v0  ;;  %v7901_v0 = vld [vmem:[%s12395_s15 + $0x20] sm:$0xff] }
 0x528   :  { %2388 = vmatpush.bf16.msrb.mxu2 %v7890_v35  ;;  %v7897_v35 = vld [vmem:[%s12395_s15] sm:$0xff] }
 0x52c   :  { %2389 = vmatpush.bf16.msrb.mxu2 %v7889_v60 }
 0x564   :  { %v2003_v63 = vpop.xlane.xlu2 %2002 }
 0x565   :  { %8152 = vrcp.f32 %v2003_v63  ;;  %v2127_v47 = vand.u32 2147483648, %v2003_v63  ;;  %v2125_v16 = vand.u32 2147483647, %v2003_v63  ;;  %vm2121_vm3 = vweird.f32 %v2003_v63 }
 0x566   :  { %v1819_v15 = vpop.f32.mrf.mxu2 }
 0x567   :  { %v2128_v50 = vor.u32 1.1754944e-38, %v2127_v47  ;;  %vm2126_vm5 = vcmp.eq.f32.partialorder %v2125_v16, 8.507059e+37  ;;  %v2189_v21 = vpop.f32.mrf.mxu0 }
 0x56b   :  { %v8153_v48 = vpop.eup %8152 }
 0x56c   :  { %v2117_v1 = vmul.f32 %v8153_v48, %v2003_v63  ;;  %v1623_v32 = vpop.xlane.xlu0 %1622  ;;  %vm2122_vm15 = vweird.f32 %v8153_v48  ;;  %v7907_v63 = vld [vmem:[%s12395_s15 + $0x50] sm:$0xff] }
 0x56d   :  { %8154 = vrcp.f32 %v1623_v32  ;;  %vm2123_vm4 = vmor %vm2121_vm3, %vm2122_vm15  ;;  %v1747_v62 = vand.u32 2147483648, %v1623_v32  ;;  %v1745_v6 = vand.u32 2147483647, %v1623_v32  ;;  %vm1741_vm7 = vweird.f32 %v1623_v32 }
 0x56e   :  { %v1821_v34 = vpop.f32.mrf.mxu2  ;;  %v2118_v43 = vsub.f32 1.0, %v2117_v1  ;;  %v7905_v1 = vld [vmem:[%s12395_s15 + $0x40] sm:$0xff] }
 0x56f   :  { %v2246_v31 = vpack.c.bf16 %v1821_v34, %v1819_v15  ;;  %v1748_v37 = vor.u32 1.1754944e-38, %v1747_v62  ;;  %vm1746_vm11 = vcmp.eq.f32.partialorder %v1745_v6, 8.507059e+37  ;;  %v7902_v15 = vld [vmem:[%s12395_s15 + $0x28] sm:$0xff]  ;;  %v7899_v34 = vld [vmem:[%s12395_s15 + $0x10] sm:$0xff] }
 0x570   :  { %v2119_v22 = vmul.f32 %v8153_v48, %v2118_v43  ;;  %2547 = vmatpush.bf16.msrb.mxu0 %v7902_v15 }
 0x571   :  { %2361 = vmatmul.bf16.vlgmr.msra.gmra.mxu1 %v2246_v31  ;;  %v7898_v31 = vld [vmem:[%s12395_s15 + $0x8] sm:$0xff] }
 0x572   :  { %v2120_v38 = vadd.f32 %v8153_v48, %v2119_v22 }
 0x573   :  { %v8155_v53 = vpop.eup %8154 }
 0x574   :  { %v1737_v26 = vmul.f32 %v8155_v53, %v1623_v32  ;;  %v2124_v46 = vsel %vm2123_vm4, %v8153_v48, %v2120_v38  ;;  %vm1742_vm6 = vweird.f32 %v8155_v53  ;;  %v7906_v48 = vld [vmem:[%s12395_s15 + $0x48] sm:$0xff]  ;;  %2548 = vmatpush.bf16.msrb.mxu0 %v7901_v0  ;;  %v7900_v32 = vld [vmem:[%s12395_s15 + $0x18] sm:$0xff] }
 0x575   :  { %v2129_v20 = vsel %vm2126_vm5, %v2128_v50, %v2124_v46  ;;  %vm1743_vm8 = vmor %vm1741_vm7, %vm1742_vm6  ;;  %v10151_v50 = vld [vmem:[%s12454_s7] sm:$0xff] }
 0x576   :  { %v1738_v57 = vsub.f32 1.0, %v1737_v26  ;;  %v2138_v12 = vmul.f32 %v9785_v19, %v2129_v20  ;;  %v2191_v19 = vpop.f32.mrf.mxu0  ;;  %v334_v26 = vperm.slane %v10151_v50, 1  ;;  %v10157_v46 = vld [vmem:[%s12394_s14] ss:$0 sm:$0xff] }
 0x577   :  { %v2247_v17 = vpack.c.bf16 %v2191_v19, %v2189_v21 }
 0x578   :  { %v1739_v18 = vmul.f32 %v8155_v53, %v1738_v57  ;;  %v2143_v11 = vpack.c.bf16 %v2138_v12, %v2138_v12  ;;  %2549 = vmatpush.bf16.msrb.mxu0 %v7900_v32  ;;  %v380_v57 = vadd.f32 %v9086_v10, %v334_v26 }
 0x57a   :  { %6914 = vmatmul.msk.bf16.gmra.mxu0 %vm1542_vm2, %v2143_v11  ;;  %v1740_v5 = vadd.f32 %v8155_v53, %v1739_v18  ;;  %v10161_v18 = vperm.slane %v380_v57, 0 }
 0x57c   :  { %v1744_v51 = vsel %vm1743_vm8, %v8155_v53, %v1740_v5  ;;  %2550 = vmatpush.bf16.msrb.mxu0 %v7899_v34  ;;  %v12497_v34 = vld [vmem:[#allocation7_spill] sm:$0xff] }
 0x57d   :  { %v1749_v7 = vsel %vm1746_vm11, %v1748_v37, %v1744_v51  ;;  %v1824_v49 = vpop.f32.mrf.mxu2 }
 0x57e   :  { %v1758_v58 = vmul.f32 %v9824_v13, %v1749_v7  ;;  %v7912_v13 = vld [vmem:[%s12395_s15 + $0x78] sm:$0xff] }
 0x57f   :  { %v2194_v54 = vpop.f32.mrf.mxu0  ;;  %2558 = vmatpush.bf16.msra.mxu3 %v7912_v13 }
 0x580   :  { %v1763_v28 = vpack.c.bf16 %v1758_v58, %v1758_v58  ;;  %2551 = vmatpush.bf16.msrb.mxu0 %v7898_v31 }
 0x582   :  { %6909 = vmatmul.msk.bf16.gmra.mxu2 %vm1542_vm2, %v1763_v28 }
 0x583   :  { %2559 = vmatpush.bf16.msra.mxu3 %v7911_v45 }
 0x584   :  { %2552 = vmatpush.bf16.msrb.mxu0 %v7897_v35 }
 0x585   :  { %v1826_v40 = vpop.f32.mrf.mxu2 }
 0x586   :  { %v2248_v4 = vpack.c.bf16 %v1826_v40, %v1824_v49 }
 0x587   :  { %v2196_v3 = vpop.f32.mrf.mxu0  ;;  %2560 = vmatpush.bf16.msra.mxu3 %v7910_v23 }
 0x588   :  { %2366 = vmatmul.bf16.gmra.mxu1 %v2248_v4  ;;  %v2249_v61 = vpack.c.bf16 %v2196_v3, %v2194_v54 }
 0x58b   :  { %2561 = vmatpush.bf16.msra.mxu3 %v7909_v8 }
 0x58e   :  { %v1829_v41 = vpop.f32.mrf.mxu2 }
 0x58f   :  { %v2199_v25 = vpop.f32.mrf.mxu0  ;;  %2562 = vmatpush.bf16.msra.mxu3 %v7908_v55 }
 0x592   :  { %2390 = vmatmul.bf16.vlgmr.msrb.gmra.mxu2 %v2247_v17 }
 0x593   :  { %2563 = vmatpush.bf16.msra.mxu3 %v7907_v63 }
 0x596   :  { %v1831_v44 = vpop.f32.mrf.mxu2 }
 0x597   :  { %v2250_v9 = vpack.c.bf16 %v1831_v44, %v1829_v41  ;;  %v2201_v14 = vpop.f32.mrf.mxu0  ;;  %2564 = vmatpush.bf16.msra.mxu3 %v7906_v48 }
 0x598   :  { %v2251_v59 = vpack.c.bf16 %v2201_v14, %v2199_v25 }
 0x599   :  { %2371 = vmatmul.bf16.gmra.mxu1 %v2250_v9 }
 0x59b   :  { %2565 = vmatpush.bf16.msra.mxu3 %v7905_v1 }
 0x59e   :  { %v1834_v56 = vpop.f32.mrf.mxu2 }
 0x59f   :  { %v2204_v29 = vpop.f32.mrf.mxu0 }
 0x5a2   :  { %2395 = vmatmul.bf16.gmra.mxu2 %v2249_v61  ;;  %v12494_v61 = vld [vmem:[#allocation4_spill] sm:$0xff] }
 0x5a6   :  { %v1836_v36 = vpop.f32.mrf.mxu2 }
 0x5a7   :  { %v2252_v39 = vpack.c.bf16 %v1836_v36, %v1834_v56  ;;  %v2206_v2 = vpop.f32.mrf.mxu0  ;;  %v12495_v36 = vld [vmem:[#allocation5_spill] sm:$0xff] }
 0x5a8   :  { %v2253_v42 = vpack.c.bf16 %v2206_v2, %v2204_v29 }
 0x5a9   :  { %2376 = vmatmul.bf16.gmra.mxu1 %v2252_v39 }
 0x5b2   :  { %2400 = vmatmul.bf16.gmra.mxu2 %v2251_v59 }
 0x5c2   :  { %2405 = vmatmul.bf16.gmra.mxu2 %v2253_v42 }
 0x5ee   :  { %v2362_v60 = vpop.f32.mrf.mxu1 }
 0x5ef   :  { %v2363_v12 = vadd.f32 %v10157_v46, %v2362_v60 }
 0x5f6   :  { %v2364_v20 = vpop.f32.mrf.mxu1 }
 0x5f7   :  { %v2209_v43 = vpop.f32.mrf.mxu0  ;;  %v2365_v37 = vadd.f32 %v10157_v46, %v2364_v20 }
 0x5f8   :  { %v2445_v47 = vpack.c.bf16 %v2209_v43, %v2209_v43 }
 0x5fa   :  { %2566 = vmatmul.bf16.vlgmr.msra.gmra.mxu3 %v2445_v47  ;;  %v337_v47 = vperm.slane %v10151_v50, 4 }
 0x5ff   :  { %v2211_v22 = vpop.f32.mrf.mxu0 }
 0x600   :  { %v8058_v22 = vld [vmem:[%s12396_s16] ss:$0 sm:$0xff] }
 0x605   :  { %v1839_v16 = vpop.f32.mrf.mxu2  ;;  %v2367_v21 = vpop.f32.mrf.mxu1 }
 0x606   :  { %v2444_v38 = vpack.c.bf16 %v1839_v16, %v1839_v16  ;;  %v2368_v19 = vadd.f32 %v10157_v46, %v2367_v21  ;;  %v12498_v16 = vld [vmem:[#allocation12_spill] sm:$0xff] }
 0x608   :  { %2553 = vmatmul.bf16.vlgmr.msrb.gmra.mxu0 %v2444_v38  ;;  %v419_v38 = vadd.f32 %v12498_v16, %v337_v47 }
 0x60a   :  { %v2588_v20 = vperm.slane %v419_v38, 0 }
 0x60d   :  { %v1841_v53 = vpop.f32.mrf.mxu2  ;;  %v2369_v28 = vpop.f32.mrf.mxu1 }
 0x60e   :  { %v2370_v41 = vadd.f32 %v10157_v46, %v2369_v28 }
 0x615   :  { %v2391_v62 = vpop.f32.mrf.mxu2 }
 0x616   :  { %v2392_v11 = vadd.f32 %v2391_v62, %v2363_v12  ;;  %v2372_v3 = vpop.f32.mrf.mxu1  ;;  %v12499_v62 = vld [vmem:[#allocation11_spill] sm:$0xff] }
 0x617   :  { %v2373_v13 = vadd.f32 %v10157_v46, %v2372_v3 }
 0x618   :  { %v2572_v6 = vmul.f32 %v10161_v18, %v2392_v11 }
 0x61a   :  { %v10165_v5 = vadd.f32 %v2572_v6, %v8688_v24 }
 0x61c   :  { %v2591_v51 = vsel %vm353_vm0, %v10165_v5, 0.0 }
 0x61d   :  { %v2393_v7 = vpop.f32.mrf.mxu2  ;;  %2592 = vadd.xlane.f32.xlu1 %v2591_v51 }
 0x61e   :  { %v2394_v10 = vadd.f32 %v2393_v7, %v2365_v37  ;;  %v2374_v23 = vpop.f32.mrf.mxu1 }
 0x61f   :  { %v2375_v8 = vadd.f32 %v10157_v46, %v2374_v23 }
 0x620   :  { %v2573_v49 = vmul.f32 %v10161_v18, %v2394_v10 }
 0x622   :  { %v10172_v58 = vadd.f32 %v2573_v49, %v8694_v27  ;;  %v12500_v49 = vld [vmem:[#allocation9_spill] sm:$0xff] }
 0x624   :  { %v2594_v24 = vsel %vm353_vm0, %v10172_v58, 0.0 }
 0x625   :  { %v2396_v40 = vpop.f32.mrf.mxu2  ;;  %2595 = vadd.xlane.f32.xlu0 %v2594_v24 }
 0x626   :  { %v2397_v4 = vadd.f32 %v2396_v40, %v2368_v19  ;;  %v2377_v42 = vpop.f32.mrf.mxu1 }
 0x627   :  { %v2378_v15 = vadd.f32 %v10157_v46, %v2377_v42 }
 0x628   :  { %v2574_v54 = vmul.f32 %v10161_v18, %v2397_v4 }
 0x62a   :  { %v10179_v17 = vadd.f32 %v2574_v54, %v8698_v30 }
 0x62c   :  { %v2597_v27 = vsel %vm353_vm0, %v10179_v17, 0.0 }
 0x62d   :  { %v2398_v44 = vpop.f32.mrf.mxu2  ;;  %2598 = vadd.xlane.f32.xlu2 %v2597_v27 }
 0x62e   :  { %v2399_v9 = vadd.f32 %v2398_v44, %v2370_v41  ;;  %v2379_v21 = vpop.f32.mrf.mxu1 }
 0x62f   :  { %v2380_v10 = vadd.f32 %v10157_v46, %v2379_v21  ;;  %v12501_v46 = vld [vmem:[#allocation10_spill] sm:$0xff]  ;;  %v7919_v21 = vld [vmem:[%s12397_s17 + $0x34] sm:$0xf] }
 0x630   :  { %v2575_v25 = vmul.f32 %v10161_v18, %v2399_v9 }
 0x632   :  { %v10186_v56 = vadd.f32 %v2575_v25, %v12494_v61 }
 0x634   :  { %v2600_v30 = vsel %vm353_vm0, %v10186_v56, 0.0 }
 0x635   :  { %v2401_v52 = vpop.f32.mrf.mxu2  ;;  %2601 = vadd.xlane.f32.xlu1 %v2600_v30 }
 0x636   :  { %v2402_v45 = vadd.f32 %v2401_v52, %v2373_v13 }
 0x638   :  { %v2576_v14 = vmul.f32 %v10161_v18, %v2402_v45 }
 0x63a   :  { %v10193_v39 = vadd.f32 %v2576_v14, %v12495_v36 }
 0x63c   :  { %v2603_v59 = vsel %vm353_vm0, %v10193_v39, 0.0 }
 0x63d   :  { %v2403_v55 = vpop.f32.mrf.mxu2  ;;  %2604 = vadd.xlane.f32.xlu0 %v2603_v59 }
 0x63e   :  { %v2404_v29 = vadd.f32 %v2403_v55, %v2375_v8 }
 0x640   :  { %v2577_v2 = vmul.f32 %v10161_v18, %v2404_v29 }
 0x642   :  { %v10200_v63 = vadd.f32 %v2577_v2, %v12496_v33 }
 0x644   :  { %v2606_v48 = vsel %vm353_vm0, %v10200_v63, 0.0 }
 0x645   :  { %v2406_v0 = vpop.f32.mrf.mxu2  ;;  %2607 = vadd.xlane.f32.xlu2 %v2606_v48 }
 0x646   :  { %v2407_v1 = vadd.f32 %v2406_v0, %v2378_v15 }
 0x648   :  { %v2578_v32 = vmul.f32 %v10161_v18, %v2407_v1 }
 0x64a   :  { %v10207_v31 = vadd.f32 %v2578_v32, %v12497_v34 }
 0x64c   :  { %v2609_v35 = vsel %vm353_vm0, %v10207_v31, 0.0 }
 0x64d   :  { %2610 = vadd.xlane.f32.xlu2 %v2609_v35  ;;  %v2408_v51 = vpop.f32.mrf.mxu2 }
 0x64e   :  { %v2409_v19 = vadd.f32 %v2408_v51, %v2380_v10  ;;  %v7071_v51 = vld [vmem:[%s12397_s17 + $0x38] sm:$0xf0] }
 0x650   :  { %v2579_v4 = vmul.f32 %v10161_v18, %v2409_v19  ;;  %v7061_v19 = vld [vmem:[%s12397_s17 + $0x20] sm:$0xf] }
 0x652   :  { %v10235_v44 = vadd.f32 %v2579_v4, %v12501_v46  ;;  %v7917_v4 = vld [vmem:[%s12397_s17 + $0x24] sm:$0xf]  ;;  %v7063_v46 = vld [vmem:[%s12397_s17 + $0x28] sm:$0xf0] }
 0x654   :  { %v2612_v61 = vsel %vm353_vm0, %v10235_v44, 0.0 }
 0x67d   :  { %v2567_v43 = vpop.f32.mrf.mxu3 }
 0x685   :  { %v2554_v60 = vpop.f32.mrf.mxu0  ;;  %v2569_v53 = vpop.f32.mrf.mxu3 }
 0x686   :  { %v2555_v26 = vadd.f32 %v8058_v22, %v2554_v60 }
 0x688   :  { %v2568_v57 = vadd.f32 %v2567_v43, %v2555_v26 }
 0x68a   :  { %v2589_v12 = vmul.f32 %v2588_v20, %v2568_v57 }
 0x68c   :  { %v10217_v11 = vadd.f32 %v2589_v12, %v12499_v62  ;;  %v7069_v62 = vld [vmem:[%s12397_s17 + $0x30] sm:$0xf] }
 0x68d   :  { %v2556_v6 = vpop.f32.mrf.mxu0 }
 0x68e   :  { %v2789_v37 = vsel %vm353_vm0, %v10217_v11, 0.0  ;;  %v7920_v6 = vld [vmem:[%s12397_s17 + $0x34] sm:$0xf0] }
 0x68f   :  { %2790 = vadd.xlane.f32.xlu0 %v2789_v37  ;;  %v7070_v37 = vor.u32 %v7920_v6, %v7069_v62  ;;  %v12502_v62 = vld [vmem:[#allocation2_spill] sm:$0xff] }
 0x690   :  { %v2593_v7 = vpop.xlane.xlu1 %2592 }
 0x691   :  { %v2615_v28 = vmul.f32 %v2593_v7, %v12500_v49  ;;  %v7074_v7 = vor.u32 %v7919_v21, %v7071_v51  ;;  %2893 = vmatpush.bf16.msra.mxu0 %v7070_v37 }
 0x693   :  { %v10224_v24 = vsub.f32 %v10165_v5, %v2615_v28  ;;  %2922 = vmatpush.bf16.msrb.mxu3 %v7074_v7 }
 0x695   :  { %v2631_v40 = vmul.f32 %v10224_v24, %v10224_v24 }
 0x697   :  { %v2639_v54 = vsel %vm353_vm0, %v2631_v40, 0.0  ;;  %v7918_v40 = vld [vmem:[%s12397_s17 + $0x24] sm:$0xf0] }
 0x698   :  { %v2596_v41 = vpop.xlane.xlu0 %2595  ;;  %2640 = vadd.xlane.f32.xlu1 %v2639_v54 }
 0x699   :  { %v2616_v27 = vmul.f32 %v2596_v41, %v12500_v49 }
 0x69b   :  { %v10232_v3 = vsub.f32 %v10172_v58, %v2616_v27  ;;  %v7062_v27 = vor.u32 %v7918_v40, %v7061_v19 }
 0x69d   :  { %v2632_v9 = vmul.f32 %v10232_v3, %v10232_v3  ;;  %2894 = vmatpush.bf16.msra.mxu0 %v7062_v27 }
 0x69f   :  { %v2642_v25 = vsel %vm353_vm0, %v2632_v9, 0.0  ;;  %v7066_v9 = vor.u32 %v7917_v4, %v7063_v46 }
 0x6a0   :  { %v2599_v13 = vpop.xlane.xlu2 %2598  ;;  %2643 = vadd.xlane.f32.xlu0 %v2642_v25  ;;  %2613 = vadd.xlane.f32.xlu1 %v2612_v61 }
 0x6a1   :  { %v2617_v30 = vmul.f32 %v2599_v13, %v12500_v49  ;;  %2923 = vmatpush.bf16.msrb.mxu3 %v7066_v9 }
 0x6a3   :  { %v10244_v52 = vsub.f32 %v10179_v17, %v2617_v30 }
 0x6a5   :  { %v2633_v45 = vmul.f32 %v10244_v52, %v10244_v52 }
 0x6a7   :  { %v2645_v23 = vsel %vm353_vm0, %v2633_v45, 0.0  ;;  %v7053_v45 = vld [vmem:[%s12397_s17 + $0x10] sm:$0xf] }
 0x6a8   :  { %2646 = vadd.xlane.f32.xlu2 %v2645_v23  ;;  %v2602_v14 = vpop.xlane.xlu1 %2601  ;;  %v7916_v23 = vld [vmem:[%s12397_s17 + $0x14] sm:$0xf0] }
 0x6a9   :  { %v2618_v36 = vmul.f32 %v2602_v14, %v12500_v49  ;;  %v7915_v14 = vld [vmem:[%s12397_s17 + $0x14] sm:$0xf] }
 0x6ab   :  { %v10251_v8 = vsub.f32 %v10186_v56, %v2618_v36 }
 0x6ad   :  { %v2634_v59 = vmul.f32 %v10251_v8, %v10251_v8 }
 0x6af   :  { %v2648_v55 = vsel %vm353_vm0, %v2634_v59, 0.0  ;;  %v7054_v59 = vor.u32 %v7916_v23, %v7053_v45 }
 0x6b0   :  { %v2605_v29 = vpop.xlane.xlu0 %2604  ;;  %2649 = vadd.xlane.f32.xlu1 %v2648_v55  ;;  %v7055_v55 = vld [vmem:[%s12397_s17 + $0x18] sm:$0xf0] }
 0x6b1   :  { %v2619_v2 = vmul.f32 %v2605_v29, %v12500_v49  ;;  %2895 = vmatpush.bf16.msra.mxu0 %v7054_v59 }
 0x6b3   :  { %v10258_v42 = vsub.f32 %v10193_v39, %v2619_v2  ;;  %v7058_v2 = vor.u32 %v7915_v14, %v7055_v55 }
 0x6b4   :  { %2778 = vrot.lane.b32.xlu0 %v10161_v18, %s8369_s28 }
 0x6b5   :  { %v2635_v33 = vmul.f32 %v10258_v42, %v10258_v42  ;;  %2924 = vmatpush.bf16.msrb.mxu3 %v7058_v2 }
 0x6b7   :  { %v2651_v15 = vsel %vm353_vm0, %v2635_v33, 0.0 }
 0x6b8   :  { %v2608_v48 = vpop.xlane.xlu2 %2607  ;;  %2652 = vadd.xlane.f32.xlu2 %v2651_v15 }
 0x6b9   :  { %v2620_v0 = vmul.f32 %v2608_v48, %v12500_v49 }
 0x6bb   :  { %v10267_v1 = vsub.f32 %v10200_v63, %v2620_v0  ;;  %v7045_v0 = vld [vmem:[%s12397_s17] sm:$0xf] }
 0x6bc   :  { %2815 = vrot.lane.b32.xlu0 %v2588_v20, %s8369_s28 }
 0x6bd   :  { %v2636_v32 = vmul.f32 %v10267_v1, %v10267_v1 }
 0x6bf   :  { %v2654_v34 = vsel %vm353_vm0, %v2636_v32, 0.0  ;;  %v7914_v32 = vld [vmem:[%s12397_s17 + $0x4] sm:$0xf0] }
 0x6c0   :  { %v2611_v18 = vpop.xlane.xlu2 %2610  ;;  %2655 = vadd.xlane.f32.xlu1 %v2654_v34  ;;  %v335_v34 = vperm.slane %v10151_v50, 2 }
 0x6c1   :  { %v2621_v35 = vmul.f32 %v2611_v18, %v12500_v49 }
 0x6c2   :  { %v10347_v6 = vadd.f32 %v12502_v62, %v335_v34 }
 0x6c3   :  { %v10275_v43 = vsub.f32 %v10207_v31, %v2621_v35  ;;  %v7046_v35 = vor.u32 %v7914_v32, %v7045_v0 }
 0x6c5   :  { %v2637_v47 = vmul.f32 %v10275_v43, %v10275_v43  ;;  %2896 = vmatpush.bf16.msra.mxu0 %v7046_v35 }
 0x6c7   :  { %v2657_v22 = vsel %vm353_vm0, %v2637_v47, 0.0  ;;  %v7913_v47 = vld [vmem:[%s12397_s17 + $0x4] sm:$0xf] }
 0x6c8   :  { %2658 = vadd.xlane.f32.xlu2 %v2657_v22  ;;  %v7047_v22 = vld [vmem:[%s12397_s17 + $0x8] sm:$0xf0] }
 0x702   :  { %v2791_v16 = vpop.xlane.xlu0 %2790 }
 0x703   :  { %v2792_v38 = vmul.f32 %v2791_v16, %v12500_v49 }
 0x705   :  { %v10282_v60 = vsub.f32 %v10217_v11, %v2792_v38  ;;  %v7050_v38 = vor.u32 %v7913_v47, %v7047_v22 }
 0x707   :  { %v2794_v53 = vmul.f32 %v10282_v60, %v10282_v60  ;;  %2925 = vmatpush.bf16.msrb.mxu3 %v7050_v38 }
 0x709   :  { %v2795_v26 = vsel %vm353_vm0, %v2794_v53, 0.0 }
 0x70a   :  { %2796 = vadd.xlane.f32.xlu2 %v2795_v26 }
 0x70b   :  { %v2641_v20 = vpop.xlane.xlu1 %2640 }
 0x70c   :  { %v2663_v57 = vmul.f32 %v2641_v20, %v12500_v49 }
 0x70e   :  { %v2671_v12 = vadd.f32 1e-06, %v2663_v57 }
 0x710   :  { %8156 = vrsqrt.f32 %v2671_v12  ;;  %vm2685_vm10 = vweird.f32 %v2671_v12 }
 0x713   :  { %v2644_v10 = vpop.xlane.xlu0 %2643  ;;  %v2614_v28 = vpop.xlane.xlu1 %2613 }
 0x714   :  { %v2664_v54 = vmul.f32 %v2644_v10, %v12500_v49  ;;  %v2622_v41 = vmul.f32 %v2614_v28, %v12500_v49  ;;  %v2767_v10 = vadd.f32 1.0, %v10347_v6 }
 0x716   :  { %v8157_v25 = vpop.eup %8156  ;;  %v2672_v61 = vadd.f32 1e-06, %v2664_v54  ;;  %v10315_v13 = vsub.f32 %v10235_v44, %v2622_v41  ;;  %v10352_v46 = vperm.slane %v2767_v10, 0 }
 0x717   :  { %v2680_v30 = vmul.f32 %v8157_v25, %v2671_v12  ;;  %vm2686_vm9 = vweird.f32 %v8157_v25 }
 0x718   :  { %8158 = vrsqrt.f32 %v2672_v61  ;;  %v2638_v36 = vmul.f32 %v10315_v13, %v10315_v13  ;;  %vm2687_vm13 = vmor %vm2685_vm10, %vm2686_vm9  ;;  %vm2695_vm12 = vweird.f32 %v2672_v61 }
 0x719   :  { %v2681_v29 = vmul.f32 %v8157_v25, %v2680_v30 }
 0x71a   :  { %v2660_v33 = vsel %vm353_vm0, %v2638_v36, 0.0 }
 0x71b   :  { %v2682_v15 = vmul.f32 0.5, %v2681_v29  ;;  %v2647_v48 = vpop.xlane.xlu2 %2646  ;;  %2661 = vadd.xlane.f32.xlu1 %v2660_v33 }
 0x71c   :  { %v2665_v18 = vmul.f32 %v2647_v48, %v12500_v49 }
 0x71d   :  { %v2683_v16 = vsub.f32 1.5, %v2682_v15 }
 0x71e   :  { %v8159_v53 = vpop.eup %8158  ;;  %v2673_v26 = vadd.f32 1e-06, %v2665_v18 }
 0x71f   :  { %v2684_v20 = vmul.f32 %v8157_v25, %v2683_v16  ;;  %v2690_v57 = vmul.f32 %v8159_v53, %v2672_v61  ;;  %vm2696_vm14 = vweird.f32 %v8159_v53 }
 0x720   :  { %8160 = vrsqrt.f32 %v2673_v26  ;;  %vm2697_vm15 = vmor %vm2695_vm12, %vm2696_vm14  ;;  %vm2705_vm4 = vweird.f32 %v2673_v26 }
 0x721   :  { %v2691_v21 = vmul.f32 %v8159_v53, %v2690_v57  ;;  %v2688_v37 = vsel %vm2687_vm13, %v8157_v25, %v2684_v20 }
 0x722   :  { %v2759_v4 = vmul.f32 %v2688_v37, %v10224_v24 }
 0x723   :  { %v2692_v51 = vmul.f32 0.5, %v2691_v21  ;;  %v2650_v7 = vpop.xlane.xlu1 %2649 }
 0x724   :  { %v2666_v28 = vmul.f32 %v2650_v7, %v12500_v49  ;;  %v2769_v25 = vmul.f32 %v10352_v46, %v2759_v4 }
 0x725   :  { %v2693_v19 = vsub.f32 1.5, %v2692_v51 }
 0x726   :  { %v8161_v40 = vpop.eup %8160  ;;  %v2674_v54 = vadd.f32 1e-06, %v2666_v28  ;;  %v10356_v23 = vpop.permute.xlu0 %2778 }
 0x727   :  { %v2694_v41 = vmul.f32 %v8159_v53, %v2693_v19  ;;  %v2700_v27 = vmul.f32 %v8161_v40, %v2673_v26  ;;  %v2781_v29 = vadd.f32 %v10356_v23, %v2769_v25  ;;  %vm2706_vm3 = vweird.f32 %v8161_v40 }
 0x728   :  { %8162 = vrsqrt.f32 %v2674_v54  ;;  %vm2707_vm5 = vmor %vm2705_vm4, %vm2706_vm3  ;;  %vm2715_vm7 = vweird.f32 %v2674_v54 }
 0x729   :  { %v2698_v12 = vsel %vm2697_vm15, %v8159_v53, %v2694_v41  ;;  %v2701_v9 = vmul.f32 %v8161_v40, %v2700_v27 }
 0x72a   :  { %v2760_v30 = vmul.f32 %v2698_v12, %v10232_v3 }
 0x72b   :  { %v2702_v45 = vmul.f32 0.5, %v2701_v9  ;;  %v2653_v14 = vpop.xlane.xlu2 %2652 }
 0x72c   :  { %v2770_v24 = vmul.f32 %v10352_v46, %v2760_v30  ;;  %v2667_v36 = vmul.f32 %v2653_v14, %v12500_v49 }
 0x72d   :  { %v2703_v61 = vsub.f32 1.5, %v2702_v45 }
 0x72e   :  { %v8163_v59 = vpop.eup %8162  ;;  %v2675_v55 = vadd.f32 1e-06, %v2667_v36  ;;  %v2782_v2 = vadd.f32 %v10356_v23, %v2770_v24 }
 0x72f   :  { %v2704_v33 = vmul.f32 %v8161_v40, %v2703_v61  ;;  %v2710_v15 = vmul.f32 %v8163_v59, %v2674_v54  ;;  %vm2716_vm6 = vweird.f32 %v8163_v59 }
 0x730   :  { %8164 = vrsqrt.f32 %v2675_v55  ;;  %v2828_v3 = vpack.c.bf16 %v2782_v2, %v2781_v29  ;;  %vm2717_vm8 = vmor %vm2715_vm7, %vm2716_vm6  ;;  %vm2725_vm9 = vweird.f32 %v2675_v55 }
 0x731   :  { %v2711_v48 = vmul.f32 %v8163_v59, %v2710_v15  ;;  %v2708_v0 = vsel %vm2707_vm5, %v8161_v40, %v2704_v33  ;;  %v7101_v33 = vld [vmem:[%s12398_s21 + $0x20] sm:$0xf]  ;;  %v7926_v15 = vld [vmem:[%s12398_s21 + $0x24] sm:$0xf0] }
 0x732   :  { %7075 = vmatmul.msk.bf16.vlgmr.msra.gmra.mxu0 %vm353_vm0, %v2828_v3  ;;  %7079 = vmatmul.msk.bf16.vlgmr.msrb.gmra.mxu3 %vm353_vm0, %v2828_v3  ;;  %v2761_v22 = vmul.f32 %v2708_v0, %v10244_v52 }
 0x733   :  { %v2712_v32 = vmul.f32 0.5, %v2711_v48  ;;  %v2656_v34 = vpop.xlane.xlu1 %2655  ;;  %v7102_v48 = vor.u32 %v7926_v15, %v7101_v33 }
 0x734   :  { %v2668_v18 = vmul.f32 %v2656_v34, %v12500_v49  ;;  %v2771_v62 = vmul.f32 %v10352_v46, %v2761_v22  ;;  %v7924_v34 = vld [vmem:[%s12398_s21 + $0x14] sm:$0xf0]  ;;  %v7927_v22 = vld [vmem:[%s12398_s21 + $0x34] sm:$0xf] }
 0x735   :  { %v2713_v35 = vsub.f32 1.5, %v2712_v32  ;;  %v7093_v32 = vld [vmem:[%s12398_s21 + $0x10] sm:$0xf] }
 0x736   :  { %v8165_v47 = vpop.eup %8164  ;;  %v2676_v16 = vadd.f32 1e-06, %v2668_v18  ;;  %v2783_v10 = vadd.f32 %v10356_v23, %v2771_v62  ;;  %v7094_v18 = vor.u32 %v7924_v34, %v7093_v32 }
 0x737   :  { %v2714_v38 = vmul.f32 %v8163_v59, %v2713_v35  ;;  %v2720_v53 = vmul.f32 %v8165_v47, %v2675_v55  ;;  %vm2726_vm11 = vweird.f32 %v8165_v47  ;;  %v7085_v35 = vld [vmem:[%s12398_s21] sm:$0xf] }
 0x738   :  { %8166 = vrsqrt.f32 %v2676_v16  ;;  %vm2727_vm10 = vmor %vm2725_vm9, %vm2726_vm11  ;;  %vm2735_vm14 = vweird.f32 %v2676_v16 }
 0x739   :  { %v2718_v26 = vsel %vm2717_vm8, %v8163_v59, %v2714_v38  ;;  %v2721_v20 = vmul.f32 %v8165_v47, %v2720_v53  ;;  %v7928_v59 = vld [vmem:[%s12398_s21 + $0x34] sm:$0xf0]  ;;  %v7111_v38 = vld [vmem:[%s12398_s21 + $0x38] sm:$0xf0]  ;;  %v7925_v53 = vld [vmem:[%s12398_s21 + $0x24] sm:$0xf] }
 0x73a   :  { %v2762_v57 = vmul.f32 %v2718_v26, %v10251_v8  ;;  %v7103_v26 = vld [vmem:[%s12398_s21 + $0x28] sm:$0xf0] }
 0x73b   :  { %v2722_v21 = vmul.f32 0.5, %v2721_v20 }
 0x73c   :  { %v2772_v37 = vmul.f32 %v10352_v46, %v2762_v57  ;;  %v7114_v57 = vor.u32 %v7927_v22, %v7111_v38  ;;  %v7935_v38 = vld [vmem:[%s12399_s19 + $0x30] sm:$0xff] }
 0x73d   :  { %v2723_v51 = vsub.f32 1.5, %v2722_v21  ;;  %v338_v21 = vperm.slane %v10151_v50, 5 }
 0x73e   :  { %v8167_v7 = vpop.eup %8166  ;;  %v2784_v52 = vadd.f32 %v10356_v23, %v2772_v37 }
 0x73f   :  { %v2724_v28 = vmul.f32 %v8165_v47, %v2723_v51  ;;  %v2730_v19 = vmul.f32 %v8167_v7, %v2676_v16  ;;  %vm2736_vm13 = vweird.f32 %v8167_v7  ;;  %v7106_v51 = vor.u32 %v7925_v53, %v7103_v26 }
 0x740   :  { %v2829_v40 = vpack.c.bf16 %v2784_v52, %v2783_v10  ;;  %vm2737_vm12 = vmor %vm2735_vm14, %vm2736_vm13  ;;  %v7923_v10 = vld [vmem:[%s12398_s21 + $0x14] sm:$0xf]  ;;  %v7095_v52 = vld [vmem:[%s12398_s21 + $0x18] sm:$0xf0] }
 0x741   :  { %v2731_v4 = vmul.f32 %v8167_v7, %v2730_v19  ;;  %v2728_v8 = vsel %vm2727_vm10, %v8165_v47, %v2724_v28  ;;  %v7922_v47 = vld [vmem:[%s12398_s21 + $0x4] sm:$0xf0]  ;;  %v12503_v19 = vld [vmem:[#allocation13_spill] sm:$0xff]  ;;  %v7098_v50 = vor.u32 %v7923_v10, %v7095_v52 }
 0x742   :  { %7076 = vmatmul.msk.bf16.gmra.mxu0 %vm353_vm0, %v2829_v40  ;;  %7080 = vmatmul.msk.bf16.gmra.mxu3 %vm353_vm0, %v2829_v40  ;;  %v2763_v27 = vmul.f32 %v2728_v8, %v10258_v42  ;;  %v2659_v42 = vpop.xlane.xlu2 %2658  ;;  %v7086_v16 = vor.u32 %v7922_v47, %v7085_v35  ;;  %v10431_v40 = vadd.f32 %v12503_v19, %v338_v21  ;;  %v7936_v35 = vld [vmem:[%s12399_s19 + $0x38] sm:$0xff]  ;;  %v7941_v19 = vld [vmem:[%s12399_s19 + $0x60] sm:$0xff] }
 0x743   :  { %v2732_v54 = vmul.f32 0.5, %v2731_v4  ;;  %v2669_v61 = vmul.f32 %v2659_v42, %v12500_v49  ;;  %3333 = vmatpush.bf16.msrb.mxu1 %v7936_v35  ;;  %v7932_v10 = vld [vmem:[%s12399_s19 + $0x18] sm:$0xff] }
 0x744   :  { %v2773_v30 = vmul.f32 %v10352_v46, %v2763_v27  ;;  %v7087_v27 = vld [vmem:[%s12398_s21 + $0x8] sm:$0xf0] }
 0x745   :  { %v2733_v41 = vsub.f32 1.5, %v2732_v54  ;;  %v10388_v29 = vadd.f32 1e-06, %v2669_v61 }
 0x746   :  { %v2785_v14 = vadd.f32 %v10356_v23, %v2773_v30 }
 0x747   :  { %v2734_v12 = vmul.f32 %v8167_v7, %v2733_v41  ;;  %8168 = vrsqrt.f32 %v10388_v29  ;;  %v7921_v41 = vld [vmem:[%s12398_s21 + $0x4] sm:$0xf]  ;;  %vm2745_vm6 = vweird.f32 %v10388_v29  ;;  %3334 = vmatpush.bf16.msrb.mxu1 %v7935_v38 }
 0x749   :  { %v2738_v9 = vsel %vm2737_vm12, %v8167_v7, %v2734_v12 }
 0x74a   :  { %v2764_v25 = vmul.f32 %v2738_v9, %v10267_v1  ;;  %v7109_v1 = vld [vmem:[%s12398_s21 + $0x30] sm:$0xf] }
 0x74b   :  { %v7110_v55 = vor.u32 %v7928_v59, %v7109_v1 }
 0x74c   :  { %v2774_v45 = vmul.f32 %v10352_v46, %v2764_v25  ;;  %v2811_v25 = vadd.f32 1.0, %v10431_v40 }
 0x74d   :  { %3153 = vmatpush.bf16.msra.mxu2 %v7110_v55  ;;  %v8169_v20 = vpop.eup %8168  ;;  %v2816_v55 = vpop.permute.xlu0 %2815 }
 0x74e   :  { %v2786_v24 = vadd.f32 %v10356_v23, %v2774_v45  ;;  %v2740_v7 = vmul.f32 %v8169_v20, %v10388_v29  ;;  %v2812_v42 = vperm.slane %v2811_v25, 0  ;;  %vm2746_vm5 = vweird.f32 %v8169_v20 }
 0x74f   :  { %vm2747_vm7 = vmor %vm2745_vm6, %vm2746_vm5 }
 0x750   :  { %v2830_v36 = vpack.c.bf16 %v2786_v24, %v2785_v14  ;;  %v2741_v8 = vmul.f32 %v8169_v20, %v2740_v7  ;;  %v7090_v14 = vor.u32 %v7921_v41, %v7087_v27 }
 0x751   :  { %3154 = vmatpush.bf16.msra.mxu2 %v7102_v48 }
 0x752   :  { %7077 = vmatmul.msk.bf16.gmra.mxu0 %vm353_vm0, %v2830_v36  ;;  %7081 = vmatmul.msk.bf16.gmra.mxu3 %vm353_vm0, %v2830_v36  ;;  %v2742_v24 = vmul.f32 0.5, %v2741_v8  ;;  %v7931_v8 = vld [vmem:[%s12399_s19 + $0x10] sm:$0xff] }
 0x754   :  { %v2743_v1 = vsub.f32 1.5, %v2742_v24 }
 0x755   :  { %3155 = vmatpush.bf16.msra.mxu2 %v7094_v18 }
 0x756   :  { %v2744_v15 = vmul.f32 %v8169_v20, %v2743_v1 }
 0x758   :  { %v2748_v32 = vsel %vm2747_vm7, %v8169_v20, %v2744_v15 }
 0x759   :  { %3156 = vmatpush.bf16.msra.mxu2 %v7086_v16 }
 0x75d   :  { %3166 = vmatpush.bf16.msrb.mxu2 %v7114_v57  ;;  %v7934_v57 = vld [vmem:[%s12399_s19 + $0x28] sm:$0xff] }
 0x75e   :  { %3335 = vmatpush.bf16.msrb.mxu1 %v7934_v57 }
 0x761   :  { %3167 = vmatpush.bf16.msrb.mxu2 %v7106_v51  ;;  %v7942_v51 = vld [vmem:[%s12399_s19 + $0x68] sm:$0xff] }
 0x765   :  { %3168 = vmatpush.bf16.msrb.mxu2 %v7098_v50 }
 0x769   :  { %3169 = vmatpush.bf16.msrb.mxu2 %v7090_v14 }
 0x77d   :  { %v2797_v2 = vpop.xlane.xlu2 %2796 }
 0x77e   :  { %v2798_v3 = vmul.f32 %v2797_v2, %v12500_v49 }
 0x780   :  { %v2799_v0 = vadd.f32 1e-06, %v2798_v3 }
 0x782   :  { %8170 = vrsqrt.f32 %v2799_v0  ;;  %vm2806_vm3 = vweird.f32 %v2799_v0 }
 0x788   :  { %v8171_v62 = vpop.eup %8170 }
 0x789   :  { %v2801_v37 = vmul.f32 %v8171_v62, %v2799_v0  ;;  %vm2807_vm15 = vweird.f32 %v8171_v62 }
 0x78a   :  { %vm2808_vm4 = vmor %vm2806_vm3, %vm2807_vm15 }
 0x78b   :  { %v2802_v28 = vmul.f32 %v8171_v62, %v2801_v37 }
 0x78d   :  { %v2803_v4 = vmul.f32 0.5, %v2802_v28 }
 0x78e   :  { %v2662_v54 = vpop.xlane.xlu1 %2661 }
 0x78f   :  { %v2804_v12 = vsub.f32 1.5, %v2803_v4  ;;  %v2670_v9 = vmul.f32 %v2662_v54, %v12500_v49 }
 0x791   :  { %v2805_v30 = vmul.f32 %v8171_v62, %v2804_v12  ;;  %v2678_v45 = vadd.f32 1e-06, %v2670_v9  ;;  %v7940_v12 = vld [vmem:[%s12399_s19 + $0x58] sm:$0xff]  ;;  %v7930_v9 = vld [vmem:[%s12399_s19 + $0x8] sm:$0xff] }
 0x793   :  { %v2809_v36 = vsel %vm2808_vm4, %v8171_v62, %v2805_v30  ;;  %8172 = vrsqrt.f32 %v2678_v45  ;;  %vm2755_vm11 = vweird.f32 %v2678_v45 }
 0x794   :  { %v2810_v61 = vmul.f32 %v2809_v36, %v10282_v60  ;;  %v2765_v60 = vmul.f32 %v2748_v32, %v10275_v43  ;;  %v7944_v43 = vld [vmem:[%s12399_s19 + $0x78] sm:$0xff] }
 0x795   :  { %3362 = vmatpush.bf16.msrb.mxu0 %v7944_v43 }
 0x796   :  { %v2813_v59 = vmul.f32 %v2812_v42, %v2810_v61  ;;  %v2775_v16 = vmul.f32 %v10352_v46, %v2765_v60  ;;  %v7939_v42 = vld [vmem:[%s12399_s19 + $0x50] sm:$0xff] }
 0x798   :  { %v2818_v2 = vadd.f32 %v2816_v55, %v2813_v59  ;;  %v2787_v26 = vadd.f32 %v10356_v23, %v2775_v16  ;;  %v7929_v59 = vld [vmem:[%s12399_s19] sm:$0xff] }
 0x799   :  { %v8173_v33 = vpop.eup %8172 }
 0x79a   :  { %v3100_v3 = vpack.c.bf16 %v2818_v2, %v2818_v2  ;;  %v2750_v48 = vmul.f32 %v8173_v33, %v2678_v45  ;;  %vm2756_vm8 = vweird.f32 %v8173_v33 }
 0x79b   :  { %vm2757_vm9 = vmor %vm2755_vm11, %vm2756_vm8 }
 0x79c   :  { %v2751_v0 = vmul.f32 %v8173_v33, %v2750_v48  ;;  %7115 = vmatmul.msk.bf16.vlgmr.msra.gmra.mxu2 %vm353_vm0, %v3100_v3 }
 0x79e   :  { %v2752_v34 = vmul.f32 0.5, %v2751_v0 }
 0x7a0   :  { %v2753_v18 = vsub.f32 1.5, %v2752_v34 }
 0x7a2   :  { %v2754_v47 = vmul.f32 %v8173_v33, %v2753_v18 }
 0x7a4   :  { %v2758_v22 = vsel %vm2757_vm9, %v8173_v33, %v2754_v47 }
 0x7a5   :  { %v2766_v29 = vmul.f32 %v2758_v22, %v10315_v13  ;;  %v2827_v13 = vld [vmem:[%s12400_s18] sm:$0x3] }
 0x7a6   :  { %v10469_v21 = vperm.slane %v2827_v13, 0  ;;  %v10487_v28 = vperm.slane %v2827_v13, 1  ;;  %v7937_v22 = vld [vmem:[%s12399_s19 + $0x40] sm:$0xff] }
 0x7a7   :  { %v2776_v53 = vmul.f32 %v10352_v46, %v2766_v29  ;;  %v7943_v46 = vld [vmem:[%s12399_s19 + $0x70] sm:$0xff] }
 0x7a8   :  { %3363 = vmatpush.bf16.msrb.mxu0 %v7943_v46 }
 0x7a9   :  { %v2788_v20 = vadd.f32 %v10356_v23, %v2776_v53  ;;  %v7933_v23 = vld [vmem:[%s12399_s19 + $0x20] sm:$0xff] }
 0x7aa   :  { %3336 = vmatpush.bf16.msrb.mxu1 %v7933_v23 }
 0x7ab   :  { %v2831_v62 = vpack.c.bf16 %v2788_v20, %v2787_v26 }
 0x7ac   :  { %7116 = vmatmul.msk.bf16.vlgmr.msrb.gmra.mxu2 %vm353_vm0, %v3100_v3  ;;  %3364 = vmatpush.bf16.msrb.mxu0 %v7942_v51  ;;  %v7938_v3 = vld [vmem:[%s12399_s19 + $0x48] sm:$0xff] }
 0x7ad   :  { %7078 = vmatmul.msk.bf16.gmra.mxu0 %vm353_vm0, %v2831_v62  ;;  %7082 = vmatmul.msk.bf16.gmra.mxu3 %vm353_vm0, %v2831_v62 }
 0x7ae   :  { %3337 = vmatpush.bf16.msrb.mxu1 %v7932_v10 }
 0x7af   :  { %v2898_v37 = vpop.f32.mrf.mxu0 }
 0x7b0   :  { %v10480_v7 = vadd.f32 %v2898_v37, %v10469_v21  ;;  %3365 = vmatpush.bf16.msrb.mxu0 %v7941_v19 }
 0x7b2   :  { %v2947_v52 = vmul.f32 %v10480_v7, %v10480_v7  ;;  %3338 = vmatpush.bf16.msrb.mxu1 %v7931_v8 }
 0x7b4   :  { %v2963_v4 = vmul.f32 %v2947_v52, %v10480_v7  ;;  %3366 = vmatpush.bf16.msrb.mxu0 %v7940_v12 }
 0x7b5   :  { %v2927_v50 = vpop.f32.mrf.mxu3 }
 0x7b6   :  { %v2979_v54 = vmul.f32 0.044715, %v2963_v4  ;;  %v10497_v41 = vadd.f32 %v2927_v50, %v10487_v28  ;;  %3339 = vmatpush.bf16.msrb.mxu1 %v7930_v9 }
 0x7b7   :  { %v2900_v27 = vpop.f32.mrf.mxu0 }
 0x7b8   :  { %v2995_v25 = vadd.f32 %v2979_v54, %v10480_v7  ;;  %v2948_v30 = vmul.f32 %v10497_v41, %v10497_v41  ;;  %v10509_v45 = vadd.f32 %v2900_v27, %v10469_v21  ;;  %3367 = vmatpush.bf16.msrb.mxu0 %v7939_v42 }
 0x7ba   :  { %v3011_v14 = vmul.f32 0.7978846, %v2995_v25  ;;  %v2964_v24 = vmul.f32 %v2948_v30, %v10497_v41  ;;  %v2949_v36 = vmul.f32 %v10509_v45, %v10509_v45  ;;  %3340 = vmatpush.bf16.msrb.mxu1 %v7929_v59 }
 0x7bc   :  { %v2980_v61 = vmul.f32 0.044715, %v2964_v24  ;;  %v2965_v1 = vmul.f32 %v2949_v36, %v10509_v45  ;;  %8174 = vtanh.f32 %v3011_v14  ;;  %3368 = vmatpush.bf16.msrb.mxu0 %v7938_v3 }
 0x7bd   :  { %v2929_v55 = vpop.f32.mrf.mxu3 }
 0x7be   :  { %v2996_v2 = vadd.f32 %v2980_v61, %v10497_v41  ;;  %v2981_v33 = vmul.f32 0.044715, %v2965_v1  ;;  %v10523_v15 = vadd.f32 %v2929_v55, %v10487_v28 }
 0x7bf   :  { %v2903_v48 = vpop.f32.mrf.mxu0 }
 0x7c0   :  { %v3012_v0 = vmul.f32 0.7978846, %v2996_v2  ;;  %v2997_v32 = vadd.f32 %v2981_v33, %v10509_v45  ;;  %v2950_v34 = vmul.f32 %v10523_v15, %v10523_v15  ;;  %v10532_v18 = vadd.f32 %v2903_v48, %v10469_v21  ;;  %3369 = vmatpush.bf16.msrb.mxu0 %v7937_v22 }
 0x7c2   :  { %v3013_v60 = vmul.f32 0.7978846, %v2997_v32  ;;  %v2966_v35 = vmul.f32 %v2950_v34, %v10523_v15  ;;  %v2951_v47 = vmul.f32 %v10532_v18, %v10532_v18  ;;  %8176 = vtanh.f32 %v3012_v0  ;;  %v8175_v29 = vpop.eup %8174 }
 0x7c3   :  { %v3043_v13 = vadd.f32 1.0, %v8175_v29 }
 0x7c4   :  { %8178 = vtanh.f32 %v3013_v60  ;;  %v2982_v16 = vmul.f32 0.044715, %v2966_v35  ;;  %v2967_v38 = vmul.f32 %v2951_v47, %v10532_v18 }
 0x7c5   :  { %v2932_v53 = vpop.f32.mrf.mxu3  ;;  %v3059_v50 = vmul.f32 0.5, %v3043_v13 }
 0x7c6   :  { %v2998_v43 = vadd.f32 %v2982_v16, %v10523_v15  ;;  %v2983_v26 = vmul.f32 0.044715, %v2967_v38  ;;  %v10543_v20 = vadd.f32 %v2932_v53, %v10487_v28 }
 0x7c7   :  { %v2905_v57 = vpop.f32.mrf.mxu0  ;;  %v3075_v36 = vmul.f32 %v3059_v50, %v10480_v7 }
 0x7c8   :  { %v3014_v62 = vmul.f32 0.7978846, %v2998_v43  ;;  %v2999_v46 = vadd.f32 %v2983_v26, %v10532_v18  ;;  %v2952_v23 = vmul.f32 %v10543_v20, %v10543_v20  ;;  %v10549_v37 = vadd.f32 %v2905_v57, %v10469_v21  ;;  %v8177_v51 = vpop.eup %8176 }
 0x7c9   :  { %v3044_v12 = vadd.f32 1.0, %v8177_v51 }
 0x7ca   :  { %v8179_v10 = vpop.eup %8178  ;;  %8180 = vtanh.f32 %v3014_v62  ;;  %v3015_v52 = vmul.f32 0.7978846, %v2999_v46  ;;  %v2968_v19 = vmul.f32 %v2952_v23, %v10543_v20  ;;  %v2953_v4 = vmul.f32 %v10549_v37, %v10549_v37 }
 0x7cb   :  { %v3045_v8 = vadd.f32 1.0, %v8179_v10  ;;  %v3060_v3 = vmul.f32 0.5, %v3044_v12 }
 0x7cc   :  { %v2984_v54 = vmul.f32 0.044715, %v2968_v19  ;;  %v2969_v27 = vmul.f32 %v2953_v4, %v10549_v37  ;;  %8182 = vtanh.f32 %v3015_v52 }
 0x7cd   :  { %v3061_v9 = vmul.f32 0.5, %v3045_v8  ;;  %v2934_v25 = vpop.f32.mrf.mxu3  ;;  %v3076_v22 = vmul.f32 %v3060_v3, %v10497_v41 }
 0x7ce   :  { %v3000_v30 = vadd.f32 %v2984_v54, %v10543_v20  ;;  %v2985_v14 = vmul.f32 0.044715, %v2969_v27  ;;  %v10557_v24 = vadd.f32 %v2934_v25, %v10487_v28 }
 0x7cf   :  { %v3077_v42 = vmul.f32 %v3061_v9, %v10509_v45  ;;  %v2908_v61 = vpop.f32.mrf.mxu0 }
 0x7d0   :  { %v8181_v1 = vpop.eup %8180  ;;  %v3016_v59 = vmul.f32 0.7978846, %v3000_v30  ;;  %v3001_v55 = vadd.f32 %v2985_v14, %v10549_v37  ;;  %v2954_v2 = vmul.f32 %v10557_v24, %v10557_v24  ;;  %v10565_v33 = vadd.f32 %v2908_v61, %v10469_v21 }
 0x7d1   :  { %v3226_v48 = vpack.c.bf16 %v3077_v42, %v3075_v36  ;;  %v3046_v0 = vadd.f32 1.0, %v8181_v1 }
 0x7d2   :  { %v3017_v32 = vmul.f32 0.7978846, %v3001_v55  ;;  %v2970_v34 = vmul.f32 %v2954_v2, %v10557_v24  ;;  %v2955_v7 = vmul.f32 %v10565_v33, %v10565_v33  ;;  %8184 = vtanh.f32 %v3016_v59  ;;  %v8183_v60 = vpop.eup %8182 }
 0x7d3   :  { %v3062_v45 = vmul.f32 0.5, %v3046_v0  ;;  %3341 = vmatmul.bf16.vlgmr.msrb.gmra.mxu1 %v3226_v48  ;;  %v3047_v57 = vadd.f32 1.0, %v8183_v60 }
 0x7d4   :  { %v2986_v35 = vmul.f32 0.044715, %v2970_v34  ;;  %v2971_v47 = vmul.f32 %v2955_v7, %v10565_v33  ;;  %8186 = vtanh.f32 %v3017_v32 }
 0x7d5   :  { %v3078_v29 = vmul.f32 %v3062_v45, %v10523_v15  ;;  %v2937_v16 = vpop.f32.mrf.mxu3  ;;  %v7952_v15 = vld [vmem:[%s12402_s23 + $0x38] sm:$0xff]  ;;  %v3063_v8 = vmul.f32 0.5, %v3047_v57 }
 0x7d6   :  { %v3002_v38 = vadd.f32 %v2986_v35, %v10557_v24  ;;  %v2987_v53 = vmul.f32 0.044715, %v2971_v47  ;;  %v10575_v43 = vadd.f32 %v2937_v16, %v10487_v28  ;;  %3606 = vmatpush.bf16.msra.mxu2 %v7952_v15 }
 0x7d7   :  { %v3227_v26 = vpack.c.bf16 %v3078_v29, %v3076_v22  ;;  %v2910_v13 = vpop.f32.mrf.mxu0  ;;  %v3079_v42 = vmul.f32 %v3063_v8, %v10532_v18  ;;  %v7960_v8 = vld [vmem:[%s12402_s23 + $0x78] sm:$0xff] }
 0x7d8   :  { %v3018_v62 = vmul.f32 0.7978846, %v3002_v38  ;;  %v3003_v46 = vadd.f32 %v2987_v53, %v10565_v33  ;;  %v2956_v23 = vmul.f32 %v10575_v43, %v10575_v43  ;;  %v2911_v41 = vadd.f32 %v2910_v13, %v10469_v21  ;;  %v8185_v51 = vpop.eup %8184  ;;  %3619 = vmatpush.bf16.msra.mxu3 %v7960_v8 }
 0x7d9   :  { %3370 = vmatmul.bf16.vlgmr.msrb.gmra.mxu0 %v3227_v26  ;;  %v3048_v25 = vadd.f32 1.0, %v8185_v51 }
 0x7da   :  { %v8187_v10 = vpop.eup %8186  ;;  %v3019_v52 = vmul.f32 0.7978846, %v3003_v46  ;;  %v2972_v19 = vmul.f32 %v2956_v23, %v10575_v43  ;;  %v2957_v4 = vmul.f32 %v2911_v41, %v2911_v41  ;;  %8188 = vtanh.f32 %v3018_v62 }
 0x7db   :  { %v3049_v50 = vadd.f32 1.0, %v8187_v10  ;;  %v3064_v0 = vmul.f32 0.5, %v3048_v25 }
 0x7dc   :  { %v2988_v54 = vmul.f32 0.044715, %v2972_v19  ;;  %v2973_v27 = vmul.f32 %v2957_v4, %v2911_v41  ;;  %8190 = vtanh.f32 %v3019_v52  ;;  %v7951_v4 = vld [vmem:[%s12402_s23 + $0x30] sm:$0xff] }
 0x7dd   :  { %v2939_v12 = vpop.f32.mrf.mxu3  ;;  %v3065_v9 = vmul.f32 0.5, %v3049_v50  ;;  %v3080_v35 = vmul.f32 %v3064_v0, %v10543_v20  ;;  %3607 = vmatpush.bf16.msra.mxu2 %v7951_v4  ;;  %v7948_v50 = vld [vmem:[%s12402_s23 + $0x18] sm:$0xff] }
 0x7de   :  { %v3004_v30 = vadd.f32 %v2988_v54, %v10575_v43  ;;  %v2989_v14 = vmul.f32 0.044715, %v2973_v27  ;;  %v2940_v36 = vadd.f32 %v2939_v12, %v10487_v28  ;;  %v7947_v27 = vld [vmem:[%s12402_s23 + $0x10] sm:$0xff] }
 0x7df   :  { %v3081_v61 = vmul.f32 %v3065_v9, %v10549_v37  ;;  %v7959_v12 = vld [vmem:[%s12402_s23 + $0x70] sm:$0xff] }
 0x7e0   :  { %v8189_v1 = vpop.eup %8188  ;;  %v3020_v59 = vmul.f32 0.7978846, %v3004_v30  ;;  %v3005_v55 = vadd.f32 %v2989_v14, %v2911_v41  ;;  %v2958_v2 = vmul.f32 %v2940_v36, %v2940_v36  ;;  %3620 = vmatpush.bf16.msra.mxu3 %v7959_v12  ;;  %v7946_v30 = vld [vmem:[%s12402_s23 + $0x8] sm:$0xff] }
 0x7e1   :  { %v3228_v3 = vpack.c.bf16 %v3081_v61, %v3079_v42  ;;  %v3050_v48 = vadd.f32 1.0, %v8189_v1  ;;  %v7958_v14 = vld [vmem:[%s12402_s23 + $0x68] sm:$0xff]  ;;  %v7945_v61 = vld [vmem:[%s12402_s23] sm:$0xff] }
 0x7e2   :  { %v3021_v32 = vmul.f32 0.7978846, %v3005_v55  ;;  %v2974_v34 = vmul.f32 %v2958_v2, %v2940_v36  ;;  %8192 = vtanh.f32 %v3020_v59  ;;  %v8191_v45 = vpop.eup %8190  ;;  %v7957_v1 = vld [vmem:[%s12402_s23 + $0x60] sm:$0xff] }
 0x7e3   :  { %3346 = vmatmul.bf16.gmra.mxu1 %v3228_v3  ;;  %v3066_v7 = vmul.f32 0.5, %v3050_v48  ;;  %v3051_v22 = vadd.f32 1.0, %v8191_v45  ;;  %v7956_v3 = vld [vmem:[%s12402_s23 + $0x58] sm:$0xff] }
 0x7e4   :  { %v2990_v60 = vmul.f32 0.044715, %v2974_v34  ;;  %8194 = vtanh.f32 %v3021_v32  ;;  %3621 = vmatpush.bf16.msra.mxu3 %v7958_v14  ;;  %v7955_v34 = vld [vmem:[%s12402_s23 + $0x50] sm:$0xff] }
 0x7e5   :  { %v3082_v18 = vmul.f32 %v3066_v7, %v10557_v24  ;;  %v3067_v26 = vmul.f32 0.5, %v3051_v22 }
 0x7e6   :  { %v3006_v37 = vadd.f32 %v2990_v60, %v2940_v36 }
 0x7e7   :  { %v3229_v47 = vpack.c.bf16 %v3082_v18, %v3080_v35  ;;  %v3083_v62 = vmul.f32 %v3067_v26, %v10565_v33  ;;  %v7950_v33 = vld [vmem:[%s12402_s23 + $0x28] sm:$0xff] }
 0x7e8   :  { %v3022_v29 = vmul.f32 0.7978846, %v3006_v37  ;;  %v8193_v16 = vpop.eup %8192  ;;  %3608 = vmatpush.bf16.msra.mxu2 %v7950_v33  ;;  %3622 = vmatpush.bf16.msra.mxu3 %v7957_v1  ;;  %v7954_v18 = vld [vmem:[%s12402_s23 + $0x48] sm:$0xff] }
 0x7e9   :  { %3375 = vmatmul.bf16.gmra.mxu0 %v3229_v47  ;;  %v3052_v57 = vadd.f32 1.0, %v8193_v16 }
 0x7ea   :  { %v8195_v38 = vpop.eup %8194  ;;  %8196 = vtanh.f32 %v3022_v29 }
 0x7eb   :  { %v3053_v53 = vadd.f32 1.0, %v8195_v38  ;;  %v3068_v15 = vmul.f32 0.5, %v3052_v57 }
 0x7ec   :  { %3623 = vmatpush.bf16.msra.mxu3 %v7956_v3 }
 0x7ed   :  { %v3069_v13 = vmul.f32 0.5, %v3053_v53  ;;  %v3084_v10 = vmul.f32 %v3068_v15, %v10575_v43  ;;  %v3099_v43 = vld [vmem:[%s12403_s22] sm:$0x3] }
 0x7ee   :  { %v3102_v54 = vperm.slane %v3099_v43, 0  ;;  %v3103_v7 = vperm.slane %v3099_v43, 1 }
 0x7ef   :  { %v3085_v46 = vmul.f32 %v3069_v13, %v2911_v41  ;;  %v7949_v41 = vld [vmem:[%s12402_s23 + $0x20] sm:$0xff] }
 0x7f0   :  { %v8197_v23 = vpop.eup %8196  ;;  %3609 = vmatpush.bf16.msra.mxu2 %v7949_v41  ;;  %3624 = vmatpush.bf16.msra.mxu3 %v7955_v34 }
 0x7f1   :  { %v3230_v51 = vpack.c.bf16 %v3085_v46, %v3083_v62  ;;  %v3054_v20 = vadd.f32 1.0, %v8197_v23  ;;  %v7953_v46 = vld [vmem:[%s12402_s23 + $0x40] sm:$0xff] }
 0x7f3   :  { %3351 = vmatmul.bf16.gmra.mxu1 %v3230_v51  ;;  %v3070_v24 = vmul.f32 0.5, %v3054_v20 }
 0x7f4   :  { %3610 = vmatpush.bf16.msra.mxu2 %v7948_v50  ;;  %3625 = vmatpush.bf16.msra.mxu3 %v7954_v18 }
 0x7f5   :  { %v3086_v52 = vmul.f32 %v3070_v24, %v2940_v36 }
 0x7f7   :  { %v3231_v19 = vpack.c.bf16 %v3086_v52, %v3084_v10 }
 0x7f8   :  { %3611 = vmatpush.bf16.msra.mxu2 %v7947_v27  ;;  %3626 = vmatpush.bf16.msra.mxu3 %v7953_v46 }
 0x7f9   :  { %3380 = vmatmul.bf16.gmra.mxu0 %v3231_v19 }
 0x7fc   :  { %3612 = vmatpush.bf16.msra.mxu2 %v7946_v30 }
 0x800   :  { %3613 = vmatpush.bf16.msra.mxu2 %v7945_v61 }
 0x81f   :  { %v3158_v9 = vpop.f32.mrf.mxu2 }
 0x820   :  { %v3159_v25 = vadd.f32 %v3158_v9, %v3102_v54 }
 0x822   :  { %v3175_v36 = vmul.f32 %v3159_v25, %v3159_v25 }
 0x824   :  { %v3177_v42 = vmul.f32 %v3175_v36, %v3159_v25 }
 0x826   :  { %v3179_v59 = vmul.f32 0.044715, %v3177_v42 }
 0x827   :  { %v3160_v55 = vpop.f32.mrf.mxu2 }
 0x828   :  { %v3181_v2 = vadd.f32 %v3179_v59, %v3159_v25 }
 0x82a   :  { %v3183_v48 = vmul.f32 0.7978846, %v3181_v2  ;;  %v2913_v0 = vpop.f32.mrf.mxu0 }
 0x82b   :  { %v10633_v32 = vadd.f32 %v2913_v0, %v10469_v21 }
 0x82c   :  { %8198 = vtanh.f32 %v3183_v48 }
 0x82d   :  { %v2959_v45 = vmul.f32 %v10633_v32, %v10633_v32 }
 0x82f   :  { %v2975_v60 = vmul.f32 %v2959_v45, %v10633_v32  ;;  %v3171_v35 = vpop.f32.mrf.mxu2 }
 0x830   :  { %v3172_v37 = vadd.f32 %v3171_v35, %v3103_v7  ;;  %v2942_v47 = vpop.f32.mrf.mxu3 }
 0x831   :  { %v2991_v22 = vmul.f32 0.044715, %v2975_v60  ;;  %v10645_v29 = vadd.f32 %v2942_v47, %v10487_v28 }
 0x832   :  { %v8199_v16 = vpop.eup %8198  ;;  %v3176_v38 = vmul.f32 %v3172_v37, %v3172_v37  ;;  %v2915_v53 = vpop.f32.mrf.mxu0 }
 0x833   :  { %v3187_v26 = vadd.f32 1.0, %v8199_v16  ;;  %v3007_v13 = vadd.f32 %v2991_v22, %v10633_v32  ;;  %v2960_v57 = vmul.f32 %v10645_v29, %v10645_v29  ;;  %v2916_v62 = vadd.f32 %v2915_v53, %v10469_v21 }
 0x834   :  { %v3178_v23 = vmul.f32 %v3176_v38, %v3172_v37 }
 0x835   :  { %v3189_v51 = vmul.f32 0.5, %v3187_v26  ;;  %v3023_v20 = vmul.f32 0.7978846, %v3007_v13  ;;  %v2976_v15 = vmul.f32 %v2960_v57, %v10645_v29  ;;  %v2961_v24 = vmul.f32 %v2916_v62, %v2916_v62 }
 0x836   :  { %v3180_v10 = vmul.f32 0.044715, %v3178_v23 }
 0x837   :  { %v3191_v52 = vmul.f32 %v3189_v51, %v3159_v25  ;;  %v2992_v19 = vmul.f32 0.044715, %v2976_v15  ;;  %v2977_v4 = vmul.f32 %v2961_v24, %v2916_v62  ;;  %v3173_v33 = vpop.f32.mrf.mxu2  ;;  %8200 = vtanh.f32 %v3023_v20 }
 0x838   :  { %v3182_v41 = vadd.f32 %v3180_v10, %v3172_v37  ;;  %v2944_v21 = vpop.f32.mrf.mxu3 }
 0x839   :  { %v3505_v43 = vpack.c.bf16 %v3191_v52, %v3191_v52  ;;  %v3008_v50 = vadd.f32 %v2992_v19, %v10645_v29  ;;  %v2993_v8 = vmul.f32 0.044715, %v2977_v4  ;;  %v2945_v54 = vadd.f32 %v2944_v21, %v10487_v28 }
 0x83a   :  { %v3184_v27 = vmul.f32 0.7978846, %v3182_v41 }
 0x83b   :  { %v3024_v12 = vmul.f32 0.7978846, %v3008_v50  ;;  %v3009_v9 = vadd.f32 %v2993_v8, %v2916_v62  ;;  %v2962_v30 = vmul.f32 %v2945_v54, %v2945_v54  ;;  %3614 = vmatmul.bf16.vlgmr.msra.gmra.mxu2 %v3505_v43 }
 0x83c   :  { %8202 = vtanh.f32 %v3184_v27 }
 0x83d   :  { %v3025_v25 = vmul.f32 0.7978846, %v3009_v9  ;;  %v2978_v14 = vmul.f32 %v2962_v30, %v2945_v54  ;;  %v8201_v36 = vpop.eup %8200  ;;  %8204 = vtanh.f32 %v3024_v12 }
 0x83e   :  { %v3055_v59 = vadd.f32 1.0, %v8201_v36 }
 0x83f   :  { %v2994_v42 = vmul.f32 0.044715, %v2978_v14  ;;  %8206 = vtanh.f32 %v3025_v25  ;;  %v3391_v14 = vperm.slane %v10347_v6, 0 }
 0x840   :  { %v3071_v34 = vmul.f32 0.5, %v3055_v59 }
 0x841   :  { %v3010_v61 = vadd.f32 %v2994_v42, %v2945_v54 }
 0x842   :  { %v8203_v1 = vpop.eup %8202  ;;  %v3087_v18 = vmul.f32 %v3071_v34, %v10633_v32 }
 0x843   :  { %v3188_v55 = vadd.f32 1.0, %v8203_v1  ;;  %v3026_v2 = vmul.f32 0.7978846, %v3010_v61  ;;  %v8205_v3 = vpop.eup %8204 }
 0x844   :  { %v3056_v60 = vadd.f32 1.0, %v8205_v3 }
 0x845   :  { %v8207_v48 = vpop.eup %8206  ;;  %v3190_v28 = vmul.f32 0.5, %v3188_v55  ;;  %8208 = vtanh.f32 %v3026_v2 }
 0x846   :  { %v3057_v0 = vadd.f32 1.0, %v8207_v48  ;;  %v3072_v53 = vmul.f32 0.5, %v3056_v60 }
 0x847   :  { %v3192_v7 = vmul.f32 %v3190_v28, %v3172_v37  ;;  %v8059_v37 = vld [vmem:[%s12401_s20] ss:$0 sm:$0xff] }
 0x848   :  { %v3073_v45 = vmul.f32 0.5, %v3057_v0  ;;  %v3088_v57 = vmul.f32 %v3072_v53, %v10645_v29 }
 0x849   :  { %v3506_v35 = vpack.c.bf16 %v3192_v7, %v3192_v7 }
 0x84a   :  { %v3089_v47 = vmul.f32 %v3073_v45, %v2916_v62 }
 0x84b   :  { %v8209_v22 = vpop.eup %8208  ;;  %3627 = vmatmul.bf16.vlgmr.msra.gmra.mxu3 %v3506_v35 }
 0x84c   :  { %v3232_v16 = vpack.c.bf16 %v3089_v47, %v3087_v18  ;;  %v3058_v38 = vadd.f32 1.0, %v8209_v22  ;;  %v8060_v18 = vld [vmem:[%s12404_s24] ss:$0 sm:$0xff] }
 0x84e   :  { %3356 = vmatmul.bf16.gmra.mxu1 %v3232_v16  ;;  %v3074_v26 = vmul.f32 0.5, %v3058_v38 }
 0x850   :  { %v3342_v13 = vpop.f32.mrf.mxu1  ;;  %v3090_v46 = vmul.f32 %v3074_v26, %v2945_v54 }
 0x851   :  { %v3343_v51 = vadd.f32 %v8059_v37, %v3342_v13 }
 0x852   :  { %v3233_v23 = vpack.c.bf16 %v3090_v46, %v3088_v57 }
 0x854   :  { %3385 = vmatmul.bf16.gmra.mxu0 %v3233_v23 }
 0x856   :  { %v3371_v32 = vpop.f32.mrf.mxu0 }
 0x857   :  { %v3372_v62 = vadd.f32 %v3371_v32, %v3343_v51 }
 0x858   :  { %v3344_v20 = vpop.f32.mrf.mxu1 }
 0x859   :  { %3400 = vrot.lane.b32.xlu1 %v3372_v62, %s8369_s28  ;;  %v3345_v15 = vadd.f32 %v8059_v37, %v3344_v20 }
 0x85e   :  { %v3373_v24 = vpop.f32.mrf.mxu0 }
 0x85f   :  { %v3374_v10 = vadd.f32 %v3373_v24, %v3345_v15 }
 0x860   :  { %v3347_v52 = vpop.f32.mrf.mxu1 }
 0x861   :  { %3402 = vrot.lane.b32.xlu2 %v3374_v10, %s8369_s28  ;;  %v3348_v29 = vadd.f32 %v8059_v37, %v3347_v52  ;;  %v3632_v10 = vperm.slane %v10431_v40, 0 }
 0x866   :  { %v3376_v19 = vpop.f32.mrf.mxu0 }
 0x867   :  { %v3377_v4 = vadd.f32 %v3376_v19, %v3348_v29 }
 0x868   :  { %v3349_v33 = vpop.f32.mrf.mxu1 }
 0x869   :  { %3404 = vrot.lane.b32.xlu0 %v3377_v4, %s8369_s28  ;;  %v3350_v41 = vadd.f32 %v8059_v37, %v3349_v33 }
 0x86e   :  { %v3378_v21 = vpop.f32.mrf.mxu0 }
 0x86f   :  { %v3379_v43 = vadd.f32 %v3378_v21, %v3350_v41 }
 0x870   :  { %v3352_v50 = vpop.f32.mrf.mxu1 }
 0x871   :  { %3406 = vrot.lane.b32.xlu0 %v3379_v43, %s8369_s28  ;;  %v3353_v8 = vadd.f32 %v8059_v37, %v3352_v50 }
 0x876   :  { %v3381_v54 = vpop.f32.mrf.mxu0 }
 0x877   :  { %v3382_v27 = vadd.f32 %v3381_v54, %v3353_v8 }
 0x878   :  { %v3354_v12 = vpop.f32.mrf.mxu1 }
 0x879   :  { %3408 = vrot.lane.b32.xlu0 %v3382_v27, %s8369_s28  ;;  %v3355_v9 = vadd.f32 %v8059_v37, %v3354_v12 }
 0x87e   :  { %v3383_v30 = vpop.f32.mrf.mxu0 }
 0x87f   :  { %v3384_v25 = vadd.f32 %v3383_v30, %v3355_v9 }
 0x881   :  { %3410 = vrot.lane.b32.xlu1 %v3384_v25, %s8369_s28 }
 0x8bb   :  { %v3403_v36 = vpop.permute.xlu2 %3402 }
 0x8bc   :  { %v3425_v42 = vmul.f32 %v3403_v36, %v3391_v14 }
 0x8be   :  { %v3615_v61 = vpop.f32.mrf.mxu2  ;;  %3442 = vrot.lane.b32.xlu0 %v3425_v42, %s8369_s28 }
 0x8bf   :  { %v3616_v22 = vadd.f32 %v8060_v18, %v3615_v61 }
 0x8c6   :  { %v3617_v1 = vpop.f32.mrf.mxu2 }
 0x8cb   :  { %v3401_v59 = vpop.permute.xlu1 %3400  ;;  %v3357_v55 = vpop.f32.mrf.mxu1 }
 0x8cc   :  { %v3424_v2 = vmul.f32 %v3401_v59, %v3391_v14  ;;  %v3358_v48 = vadd.f32 %v8059_v37, %v3357_v55 }
 0x8ce   :  { %v3628_v3 = vpop.f32.mrf.mxu3  ;;  %3440 = vrot.lane.b32.xlu2 %v3424_v2, %s8369_s28 }
 0x8cf   :  { %v3629_v16 = vadd.f32 %v3628_v3, %v3616_v22 }
 0x8d1   :  { %v3386_v28 = vpop.f32.mrf.mxu0 }
 0x8d2   :  { %v3387_v0 = vadd.f32 %v3386_v28, %v3358_v48 }
 0x8d3   :  { %v3359_v34 = vpop.f32.mrf.mxu1 }
 0x8d4   :  { %3412 = vrot.lane.b32.xlu1 %v3387_v0, %s8369_s28  ;;  %v3360_v6 = vadd.f32 %v8059_v37, %v3359_v34 }
 0x8d6   :  { %v3630_v7 = vpop.f32.mrf.mxu3 }
 0x8d9   :  { %v3388_v45 = vpop.f32.mrf.mxu0 }
 0x8da   :  { %v3389_v60 = vadd.f32 %v3388_v45, %v3360_v6 }
 0x8db   :  { %v3405_v35 = vpop.permute.xlu0 %3404 }
 0x8dc   :  { %v3426_v47 = vmul.f32 %v3405_v35, %v3391_v14  ;;  %3414 = vrot.lane.b32.xlu2 %v3389_v60, %s8369_s28  ;;  %v12504_v60 = vld [vmem:[#allocation3_spill] sm:$0xff] }
 0x8de   :  { %3444 = vrot.lane.b32.xlu0 %v3426_v47, %s8369_s28 }
 0x8e3   :  { %v3407_v38 = vpop.permute.xlu0 %3406 }
 0x8e4   :  { %v3427_v53 = vmul.f32 %v3407_v38, %v3391_v14  ;;  %3634 = vrot.lane.b32.xlu2 %v3629_v16, %s8369_s28 }
 0x8e6   :  { %3446 = vrot.lane.b32.xlu1 %v3427_v53, %s8369_s28 }
 0x8eb   :  { %v3409_v26 = vpop.permute.xlu0 %3408 }
 0x8ec   :  { %v3428_v13 = vmul.f32 %v3409_v26, %v3391_v14 }
 0x8ee   :  { %3448 = vrot.lane.b32.xlu0 %v3428_v13, %s8369_s28 }
 0x8f3   :  { %v3411_v57 = vpop.permute.xlu1 %3410 }
 0x8f4   :  { %v3429_v46 = vmul.f32 %v3411_v57, %v3391_v14 }
 0x8f6   :  { %3450 = vrot.lane.b32.xlu1 %v3429_v46, %s8369_s28 }
 0x928   :  { %v3441_v37 = vpop.permute.xlu2 %3440 }
 0x929   :  { %v10682_v23 = vadd.f32 %v3441_v37, %v10165_v5 }
 0x92b   :  { %v3643_v51 = vsel %vm353_vm0, %v10682_v23, 0.0 }
 0x92c   :  { %3644 = vadd.xlane.f32.xlu2 %v3643_v51 }
 0x930   :  { %v3443_v32 = vpop.permute.xlu0 %3442 }
 0x931   :  { %v10687_v62 = vadd.f32 %v3443_v32, %v10172_v58 }
 0x933   :  { %v3646_v20 = vsel %vm353_vm0, %v10687_v62, 0.0 }
 0x934   :  { %3647 = vadd.xlane.f32.xlu0 %v3646_v20 }
 0x936   :  { %v3415_v15 = vpop.permute.xlu2 %3414 }
 0x937   :  { %v3431_v19 = vmul.f32 %v3415_v15, %v3391_v14 }
 0x93e   :  { %v3635_v24 = vpop.permute.xlu2 %3634 }
 0x93f   :  { %v3637_v52 = vmul.f32 %v3635_v24, %v3632_v10 }
 0x946   :  { %v3413_v29 = vpop.permute.xlu1 %3412 }
 0x947   :  { %v3430_v5 = vmul.f32 %v3413_v29, %v3391_v14 }
 0x948   :  { %3639 = vrot.lane.b32.xlu0 %v3637_v52, %s8369_s28 }
 0x949   :  { %3452 = vrot.lane.b32.xlu1 %v3430_v5, %s8369_s28 }
 0x950   :  { %v3445_v58 = vpop.permute.xlu0 %3444 }
 0x951   :  { %3454 = vrot.lane.b32.xlu1 %v3431_v19, %s8369_s28  ;;  %v10711_v54 = vadd.f32 %v3445_v58, %v10179_v17 }
 0x953   :  { %v3649_v27 = vsel %vm353_vm0, %v10711_v54, 0.0 }
 0x958   :  { %v3447_v4 = vpop.permute.xlu1 %3446 }
 0x959   :  { %v10696_v33 = vadd.f32 %v3447_v4, %v10186_v56 }
 0x95b   :  { %v3652_v41 = vsel %vm353_vm0, %v10696_v33, 0.0 }
 0x95c   :  { %3653 = vadd.xlane.f32.xlu2 %v3652_v41 }
 0x960   :  { %v3449_v40 = vpop.permute.xlu0 %3448 }
 0x961   :  { %v10701_v21 = vadd.f32 %v3449_v40, %v10193_v39 }
 0x963   :  { %v3655_v43 = vsel %vm353_vm0, %v10701_v21, 0.0 }
 0x964   :  { %3656 = vadd.xlane.f32.xlu2 %v3655_v43 }
 0x968   :  { %v3451_v50 = vpop.permute.xlu1 %3450 }
 0x969   :  { %v10706_v8 = vadd.f32 %v3451_v50, %v10200_v63 }
 0x96b   :  { %v3658_v56 = vsel %vm353_vm0, %v10706_v8, 0.0 }
 0x96c   :  { %3659 = vadd.xlane.f32.xlu2 %v3658_v56 }
 0x97b   :  { %3650 = vadd.xlane.f32.xlu1 %v3649_v27 }
 0x99f   :  { %v3645_v39 = vpop.xlane.xlu2 %3644 }
 0x9a0   :  { %v3667_v12 = vmul.f32 %v3645_v39, %v12500_v49 }
 0x9a2   :  { %v10717_v9 = vsub.f32 %v10682_v23, %v3667_v12 }
 0x9a4   :  { %v3683_v63 = vmul.f32 %v10717_v9, %v10717_v9 }
 0x9a6   :  { %v3691_v30 = vsel %vm353_vm0, %v3683_v63, 0.0 }
 0x9a7   :  { %v3648_v25 = vpop.xlane.xlu0 %3647  ;;  %3692 = vadd.xlane.f32.xlu1 %v3691_v30 }
 0x9a8   :  { %v3668_v17 = vmul.f32 %v3648_v25, %v12500_v49 }
 0x9aa   :  { %v10724_v14 = vsub.f32 %v10687_v62, %v3668_v17 }
 0x9ac   :  { %v3684_v36 = vmul.f32 %v10724_v14, %v10724_v14 }
 0x9ae   :  { %v3694_v42 = vsel %vm353_vm0, %v3684_v36, 0.0 }
 0x9af   :  { %3695 = vadd.xlane.f32.xlu0 %v3694_v42  ;;  %v8366_v42 = vld [vmem:[%s12454_s7 + $0x8] sm:$0xf] }
 0x9ba   :  { %v3640_v55 = vpop.permute.xlu0 %3639 }
 0x9bb   :  { %v3453_v61 = vpop.permute.xlu1 %3452  ;;  %v3642_v2 = vadd.f32 %v3640_v55, %v10217_v11 }
 0x9bc   :  { %v10730_v1 = vadd.f32 %v3453_v61, %v10207_v31  ;;  %v342_v61 = vperm.slane %v8366_v42, 1  ;;  %v7272_v42 = vld [vmem:[%s12455_s9 + $0xc0] sm:$0xf] }
 0x9bd   :  { %v3842_v28 = vsel %vm353_vm0, %v3642_v2, 0.0 }
 0x9be   :  { %v3661_v59 = vsel %vm353_vm0, %v10730_v1, 0.0 }
 0x9bf   :  { %3662 = vadd.xlane.f32.xlu2 %v3661_v59 }
 0x9c3   :  { %v3455_v3 = vpop.permute.xlu1 %3454 }
 0x9c4   :  { %v10736_v48 = vadd.f32 %v3455_v3, %v10235_v44  ;;  %v8365_v44 = vld [vmem:[%s12454_s7] sm:$0xff]  ;;  %v7982_v3 = vld [vmem:[%s12455_s9 + $0x164] sm:$0xf0] }
 0x9c5   :  { %v339_v45 = vperm.slane %v8365_v44, 6  ;;  %v7980_v44 = vld [vmem:[%s12455_s9 + $0x15c] sm:$0xf] }
 0x9c6   :  { %v3664_v0 = vsel %vm353_vm0, %v10736_v48, 0.0 }
 0x9c7   :  { %3843 = vadd.xlane.f32.xlu2 %v3842_v28  ;;  %3665 = vadd.xlane.f32.xlu1 %v3664_v0  ;;  %v10752_v35 = vadd.f32 %v12504_v60, %v339_v45  ;;  %v7979_v0 = vld [vmem:[%s12455_s9 + $0x154] sm:$0xf] }
 0x9c8   :  { %v7354_v45 = vld [vmem:[%s12455_s9 + $0x170] sm:$0xf0] }
 0x9c9   :  { %v3819_v18 = vadd.f32 1.0, %v10752_v35 }
 0x9cb   :  { %v3820_v22 = vperm.slane %v3819_v18, 0  ;;  %v7357_v18 = vor.u32 %v7980_v44, %v7354_v45  ;;  %v7282_v44 = vld [vmem:[%s12455_s9 + $0xe0] sm:$0xf0] }
 0x9cd   :  { %4140 = vmatpush.bf16.msra.mxu0 %v7357_v18 }
 0x9cf   :  { %v3654_v31 = vpop.xlane.xlu2 %3653 }
 0x9d0   :  { %v3670_v34 = vmul.f32 %v3654_v31, %v12500_v49  ;;  %v7346_v31 = vld [vmem:[%s12455_s9 + $0x168] sm:$0xf0] }
 0x9d2   :  { %v10743_v7 = vsub.f32 %v10696_v33, %v3670_v34  ;;  %v7352_v34 = vld [vmem:[%s12455_s9 + $0x158] sm:$0xf] }
 0x9d4   :  { %v3686_v11 = vmul.f32 %v10743_v7, %v10743_v7 }
 0x9d6   :  { %v3700_v6 = vsel %vm353_vm0, %v3686_v11, 0.0  ;;  %v7349_v11 = vor.u32 %v7979_v0, %v7346_v31  ;;  %v7280_v0 = vld [vmem:[%s12455_s9 + $0xc8] sm:$0xf]  ;;  %v7965_v31 = vld [vmem:[%s12455_s9 + $0xdc] sm:$0xf0] }
 0x9d7   :  { %3701 = vadd.xlane.f32.xlu1 %v3700_v6  ;;  %v3657_v47 = vpop.xlane.xlu2 %3656  ;;  %v7983_v6 = vld [vmem:[%s12455_s9 + $0x16c] sm:$0xf0] }
 0x9d8   :  { %v3671_v53 = vmul.f32 %v3657_v47, %v12500_v49  ;;  %v7353_v60 = vor.u32 %v7983_v6, %v7352_v34  ;;  %v7320_v47 = vld [vmem:[%s12455_s9 + $0x120] sm:$0xf]  ;;  %4082 = vmatpush.bf16.msrb.mxu3 %v7349_v11  ;;  %v7962_v6 = vld [vmem:[%s12455_s9 + $0xcc] sm:$0xf] }
 0x9da   :  { %v10764_v57 = vsub.f32 %v10701_v21, %v3671_v53  ;;  %v7322_v53 = vld [vmem:[%s12455_s9 + $0x138] sm:$0xf0]  ;;  %4111 = vmatpush.bf16.msra.mxu1 %v7353_v60 }
 0x9dc   :  { %v3687_v32 = vmul.f32 %v10764_v57, %v10764_v57 }
 0x9de   :  { %v3703_v15 = vsel %vm353_vm0, %v3687_v32, 0.0 }
 0x9df   :  { %v3660_v37 = vpop.xlane.xlu2 %3659 }
 0x9e0   :  { %v3672_v51 = vmul.f32 %v3660_v37, %v12500_v49 }
 0x9e2   :  { %v10771_v20 = vsub.f32 %v10706_v8, %v3672_v51 }
 0x9e4   :  { %v3688_v24 = vmul.f32 %v10771_v20, %v10771_v20 }
 0x9e6   :  { %v3706_v10 = vsel %vm353_vm0, %v3688_v24, 0.0  ;;  %v7330_v24 = vld [vmem:[%s12455_s9 + $0x140] sm:$0xf0] }
 0x9ee   :  { %v3651_v16 = vpop.xlane.xlu1 %3650 }
 0x9ef   :  { %v3669_v38 = vmul.f32 %v3651_v16, %v12500_v49  ;;  %v7973_v16 = vld [vmem:[%s12455_s9 + $0x124] sm:$0xf] }
 0x9f0   :  { %3822 = vrot.lane.b32.xlu1 %v3820_v22, %s8369_s28  ;;  %v7976_v22 = vld [vmem:[%s12455_s9 + $0x134] sm:$0xf0]  ;;  %v7325_v51 = vor.u32 %v7973_v16, %v7322_v53 }
 0x9f1   :  { %v10759_v26 = vsub.f32 %v10711_v54, %v3669_v38  ;;  %v7321_v38 = vor.u32 %v7976_v22, %v7320_v47  ;;  %v7281_v47 = vor.u32 %v7965_v31, %v7280_v0  ;;  %v7285_v22 = vor.u32 %v7962_v6, %v7282_v44 }
 0x9f2   :  { %4083 = vmatpush.bf16.msrb.mxu3 %v7325_v51 }
 0x9f3   :  { %v3685_v13 = vmul.f32 %v10759_v26, %v10759_v26 }
 0x9f5   :  { %v3697_v46 = vsel %vm353_vm0, %v3685_v13, 0.0  ;;  %v7328_v13 = vld [vmem:[%s12455_s9 + $0x128] sm:$0xf] }
 0x9f6   :  { %3698 = vadd.xlane.f32.xlu2 %v3697_v46  ;;  %v7977_v46 = vld [vmem:[%s12455_s9 + $0x13c] sm:$0xf0] }
 0x9f7   :  { %v7329_v32 = vor.u32 %v7977_v46, %v7328_v13 }
 0x9f9   :  { %4112 = vmatpush.bf16.msra.mxu1 %v7329_v32 }
 0x9fe   :  { %3704 = vadd.xlane.f32.xlu2 %v3703_v15  ;;  %v7974_v15 = vld [vmem:[%s12455_s9 + $0x12c] sm:$0xf] }
 0xa06   :  { %3707 = vadd.xlane.f32.xlu2 %v3706_v10  ;;  %v7296_v10 = vld [vmem:[%s12455_s9 + $0xf0] sm:$0xf] }
 0xa1a   :  { %v3693_v52 = vpop.xlane.xlu1 %3692 }
 0xa1b   :  { %v3715_v41 = vmul.f32 %v3693_v52, %v12500_v49 }
 0xa1d   :  { %v10788_v12 = vadd.f32 1e-06, %v3715_v41  ;;  %v12505_v41 = vld [vmem:[#allocation14_spill] sm:$0xff] }
 0xa1f   :  { %8210 = vrsqrt.f32 %v10788_v12  ;;  %vm3737_vm14 = vweird.f32 %v10788_v12 }
 0xa22   :  { %v3696_v58 = vpop.xlane.xlu0 %3695 }
 0xa23   :  { %v3716_v40 = vmul.f32 %v3696_v58, %v12500_v49  ;;  %v7967_v58 = vld [vmem:[%s12455_s9 + $0xf4] sm:$0xf] }
 0xa25   :  { %v10790_v63 = vadd.f32 1e-06, %v3716_v40  ;;  %v10850_v37 = vpop.eup %8210  ;;  %v10873_v40 = vadd.f32 %v12505_v41, %v342_v61  ;;  %v7964_v61 = vld [vmem:[%s12455_s9 + $0xd4] sm:$0xf0] }
 0xa26   :  { %v7273_v11 = vor.u32 %v7964_v61, %v7272_v42  ;;  %vm3738_vm10 = vweird.f32 %v10850_v37 }
 0xa27   :  { %8212 = vrsqrt.f32 %v10790_v63  ;;  %v3864_v34 = vadd.f32 1.0, %v10873_v40  ;;  %vm3739_vm12 = vmor %vm3737_vm14, %vm3738_vm10  ;;  %vm3747_vm15 = vweird.f32 %v10790_v63 }
 0xa29   :  { %v3865_v16 = vperm.slane %v3864_v34, 0 }
 0xa2d   :  { %v10861_v52 = vpop.eup %8212 }
 0xa2e   :  { %vm3748_vm13 = vweird.f32 %v10861_v52 }
 0xa2f   :  { %vm3749_vm3 = vmor %vm3747_vm15, %vm3748_vm13 }
 0xa32   :  { %v3663_v29 = vpop.xlane.xlu2 %3662 }
 0xa33   :  { %v3673_v5 = vmul.f32 %v3663_v29, %v12500_v49  ;;  %v7333_v29 = vor.u32 %v7974_v15, %v7330_v24 }
 0xa35   :  { %v10779_v19 = vsub.f32 %v10730_v1, %v3673_v5  ;;  %v7970_v5 = vld [vmem:[%s12455_s9 + $0x104] sm:$0xf0]  ;;  %4141 = vmatpush.bf16.msra.mxu0 %v7333_v29 }
 0xa37   :  { %v3689_v4 = vmul.f32 %v10779_v19, %v10779_v19 }
 0xa39   :  { %v3709_v43 = vsel %vm353_vm0, %v3689_v4, 0.0  ;;  %v7298_v4 = vld [vmem:[%s12455_s9 + $0x108] sm:$0xf0] }
 0xa3a   :  { %v3844_v50 = vpop.xlane.xlu2 %3843  ;;  %3710 = vadd.xlane.f32.xlu2 %v3709_v43  ;;  %v3666_v56 = vpop.xlane.xlu1 %3665  ;;  %v7297_v43 = vor.u32 %v7970_v5, %v7296_v10 }
 0xa3b   :  { %v3845_v27 = vmul.f32 %v3844_v50, %v12500_v49  ;;  %v3674_v39 = vmul.f32 %v3666_v56, %v12500_v49  ;;  %v7304_v50 = vld [vmem:[%s12455_s9 + $0xf8] sm:$0xf]  ;;  %v7971_v56 = vld [vmem:[%s12455_s9 + $0x10c] sm:$0xf0] }
 0xa3d   :  { %v10792_v30 = vsub.f32 %v3642_v2, %v3845_v27  ;;  %v10795_v25 = vsub.f32 %v10736_v48, %v3674_v39  ;;  %v7344_v2 = vld [vmem:[%s12455_s9 + $0x150] sm:$0xf]  ;;  %v7968_v27 = vld [vmem:[%s12455_s9 + $0xfc] sm:$0xf]  ;;  %v3732_v39 = vmul.f32 %v10850_v37, %v10788_v12 }
 0xa3e   :  { %v7345_v28 = vor.u32 %v7982_v3, %v7344_v2  ;;  %v7961_v3 = vld [vmem:[%s12455_s9 + $0xc4] sm:$0xf] }
 0xa3f   :  { %v3847_v17 = vmul.f32 %v10792_v30, %v10792_v30  ;;  %v3690_v36 = vmul.f32 %v10795_v25, %v10795_v25  ;;  %v3733_v60 = vmul.f32 %v10850_v37, %v3732_v39 }
 0xa40   :  { %4053 = vmatpush.bf16.msrb.mxu2 %v7345_v28  ;;  %v7274_v28 = vld [vmem:[%s12455_s9 + $0xd8] sm:$0xf0] }
 0xa41   :  { %v3848_v59 = vsel %vm353_vm0, %v3847_v17, 0.0  ;;  %v3712_v55 = vsel %vm353_vm0, %v3690_v36, 0.0  ;;  %v7301_v17 = vor.u32 %v7967_v58, %v7298_v4  ;;  %v7306_v36 = vld [vmem:[%s12455_s9 + $0x110] sm:$0xf0]  ;;  %v7277_v45 = vor.u32 %v7961_v3, %v7274_v28 }
 0xa42   :  { %3849 = vadd.xlane.f32.xlu1 %v3848_v59  ;;  %3713 = vadd.xlane.f32.xlu0 %v3712_v55  ;;  %v3742_v59 = vmul.f32 %v10861_v52, %v10790_v63  ;;  %v7305_v55 = vor.u32 %v7971_v56, %v7304_v50  ;;  %v7309_v2 = vor.u32 %v7968_v27, %v7306_v36  ;;  %v3734_v53 = vmul.f32 0.5, %v3733_v60 }
 0xa43   :  { %4084 = vmatpush.bf16.msrb.mxu3 %v7301_v17  ;;  %v10933_v50 = vperm.slane %v10752_v35, 0 }
 0xa44   :  { %4054 = vmatpush.bf16.msrb.mxu2 %v7321_v38  ;;  %v3743_v18 = vmul.f32 %v10861_v52, %v3742_v59  ;;  %4113 = vmatpush.bf16.msra.mxu1 %v7305_v55  ;;  %v3735_v51 = vsub.f32 1.5, %v3734_v53 }
 0xa45   :  { %4142 = vmatpush.bf16.msra.mxu0 %v7309_v2 }
 0xa46   :  { %v3744_v13 = vmul.f32 0.5, %v3743_v18  ;;  %v3736_v24 = vmul.f32 %v10850_v37, %v3735_v51 }
 0xa47   :  { %4085 = vmatpush.bf16.msrb.mxu3 %v7277_v45 }
 0xa48   :  { %4055 = vmatpush.bf16.msrb.mxu2 %v7297_v43  ;;  %4114 = vmatpush.bf16.msra.mxu1 %v7281_v47  ;;  %v3745_v32 = vsub.f32 1.5, %v3744_v13  ;;  %v3740_v29 = vsel %vm3739_vm12, %v10850_v37, %v3736_v24 }
 0xa49   :  { %4143 = vmatpush.bf16.msra.mxu0 %v7285_v22  ;;  %v3811_v58 = vmul.f32 %v3740_v29, %v10717_v9 }
 0xa4a   :  { %v3702_v38 = vpop.xlane.xlu1 %3701  ;;  %v3746_v10 = vmul.f32 %v10861_v52, %v3745_v32 }
 0xa4b   :  { %v3718_v46 = vmul.f32 %v3702_v38, %v12500_v49 }
 0xa4c   :  { %4056 = vmatpush.bf16.msrb.mxu2 %v7273_v11  ;;  %v3750_v5 = vsel %vm3749_vm3, %v10861_v52, %v3746_v10 }
 0xa4d   :  { %v3726_v15 = vadd.f32 1e-06, %v3718_v46  ;;  %v3812_v4 = vmul.f32 %v3750_v5, %v10724_v14 }
 0xa4f   :  { %8214 = vrsqrt.f32 %v3726_v15  ;;  %vm3767_vm5 = vweird.f32 %v3726_v15 }
 0xa52   :  { %3867 = vrot.lane.b32.xlu2 %v3865_v16, %s8369_s28 }
 0xa55   :  { %v8215_v41 = vpop.eup %8214 }
 0xa56   :  { %v3762_v56 = vmul.f32 %v8215_v41, %v3726_v15  ;;  %vm3768_vm4 = vweird.f32 %v8215_v41 }
 0xa57   :  { %vm3769_vm6 = vmor %vm3767_vm5, %vm3768_vm4 }
 0xa58   :  { %v3763_v9 = vmul.f32 %v8215_v41, %v3762_v56 }
 0xa5a   :  { %v3764_v17 = vmul.f32 0.5, %v3763_v9 }
 0xa5c   :  { %v3765_v36 = vsub.f32 1.5, %v3764_v17  ;;  %v7489_v17 = vld [vmem:[%s12459_s1 + $0x150] sm:$0xf] }
 0xa5e   :  { %v3766_v2 = vmul.f32 %v8215_v41, %v3765_v36  ;;  %v8006_v36 = vld [vmem:[%s12459_s1 + $0x164] sm:$0xf0] }
 0xa60   :  { %v3770_v0 = vsel %vm3769_vm6, %v8215_v41, %v3766_v2  ;;  %v8000_v2 = vld [vmem:[%s12459_s1 + $0x134] sm:$0xf0] }
 0xa61   :  { %v3814_v45 = vmul.f32 %v3770_v0, %v10743_v7  ;;  %v7997_v0 = vld [vmem:[%s12459_s1 + $0x124] sm:$0xf] }
 0xa62   :  { %v10930_v43 = vpop.permute.xlu1 %3822 }
 0xa63   :  { %v3825_v12 = vmul.f32 %v10930_v43, %v3811_v58  ;;  %v3826_v63 = vmul.f32 %v10930_v43, %v3812_v4  ;;  %v3828_v53 = vmul.f32 %v10930_v43, %v3814_v45  ;;  %v7984_v45 = vld [vmem:[%s12455_s9 + $0x174] sm:$0xf0] }
 0xa65   :  { %v3834_v27 = vadd.f32 %v10933_v50, %v3825_v12  ;;  %v3835_v37 = vadd.f32 %v10933_v50, %v3826_v63  ;;  %v3837_v7 = vadd.f32 %v10933_v50, %v3828_v53  ;;  %v7336_v53 = vld [vmem:[%s12455_s9 + $0x130] sm:$0xf] }
 0xa67   :  { %v10939_v52 = vpack.c.bf16 %v3835_v37, %v3834_v27 }
 0xa69   :  { %v3699_v39 = vpop.xlane.xlu2 %3698  ;;  %7366 = vmatmul.msk.bf16.vlgmr.msrb.gmra.mxu2 %vm353_vm0, %v10939_v52  ;;  %7370 = vmatmul.msk.bf16.vlgmr.msrb.gmra.mxu3 %vm353_vm0, %v10939_v52 }
 0xa6a   :  { %v3717_v14 = vmul.f32 %v3699_v39, %v12500_v49  ;;  %7374 = vmatmul.msk.bf16.vlgmr.msra.gmra.mxu1 %vm353_vm0, %v10939_v52  ;;  %7378 = vmatmul.msk.bf16.vlgmr.msra.gmra.mxu0 %vm353_vm0, %v10939_v52 }
 0xa6c   :  { %v3725_v35 = vadd.f32 1e-06, %v3717_v14 }
 0xa6e   :  { %8216 = vrsqrt.f32 %v3725_v35  ;;  %vm3757_vm8 = vweird.f32 %v3725_v35 }
 0xa71   :  { %v3705_v42 = vpop.xlane.xlu2 %3704 }
 0xa72   :  { %v3719_v61 = vmul.f32 %v3705_v42, %v12500_v49  ;;  %v8003_v42 = vld [vmem:[%s12459_s1 + $0x154] sm:$0xf] }
 0xa74   :  { %v8217_v59 = vpop.eup %8216  ;;  %v3727_v55 = vadd.f32 1e-06, %v3719_v61  ;;  %v7490_v61 = vor.u32 %v8006_v36, %v7489_v17  ;;  %v7963_v17 = vld [vmem:[%s12455_s9 + $0xd4] sm:$0xf] }
 0xa75   :  { %v3752_v3 = vmul.f32 %v8217_v59, %v3725_v35  ;;  %vm3758_vm7 = vweird.f32 %v8217_v59 }
 0xa76   :  { %8218 = vrsqrt.f32 %v3727_v55  ;;  %vm3759_vm11 = vmor %vm3757_vm8, %vm3758_vm7  ;;  %vm3777_vm10 = vweird.f32 %v3727_v55  ;;  %4391 = vmatpush.bf16.msrb.mxu1 %v7490_v61 }
 0xa77   :  { %v3753_v28 = vmul.f32 %v8217_v59, %v3752_v3 }
 0xa79   :  { %v3754_v31 = vmul.f32 0.5, %v3753_v28  ;;  %v3708_v34 = vpop.xlane.xlu2 %3707 }
 0xa7a   :  { %v3720_v11 = vmul.f32 %v3708_v34, %v12500_v49  ;;  %v7360_v34 = vld [vmem:[%s12455_s9 + $0x160] sm:$0xf] }
 0xa7b   :  { %v3755_v6 = vsub.f32 1.5, %v3754_v31  ;;  %v7467_v31 = vld [vmem:[%s12459_s1 + $0x138] sm:$0xf0] }
 0xa7c   :  { %v8219_v44 = vpop.eup %8218  ;;  %v3728_v60 = vadd.f32 1e-06, %v3720_v11 }
 0xa7d   :  { %v3756_v18 = vmul.f32 %v8217_v59, %v3755_v6  ;;  %v3772_v47 = vmul.f32 %v8219_v44, %v3727_v55  ;;  %vm3778_vm9 = vweird.f32 %v8219_v44  ;;  %v7465_v55 = vld [vmem:[%s12459_s1 + $0x120] sm:$0xf] }
 0xa7e   :  { %8220 = vrsqrt.f32 %v3728_v60  ;;  %vm3779_vm13 = vmor %vm3777_vm10, %vm3778_vm9  ;;  %vm3787_vm12 = vweird.f32 %v3728_v60 }
 0xa7f   :  { %v3760_v22 = vsel %vm3759_vm11, %v8217_v59, %v3756_v18  ;;  %v3773_v16 = vmul.f32 %v8219_v44, %v3772_v47  ;;  %v7491_v59 = vld [vmem:[%s12459_s1 + $0x168] sm:$0xf0]  ;;  %v7362_v18 = vld [vmem:[%s12455_s9 + $0x178] sm:$0xf0] }
 0xa80   :  { %v3813_v38 = vmul.f32 %v3760_v22, %v10759_v26  ;;  %v7494_v28 = vor.u32 %v8003_v42, %v7491_v59  ;;  %v7470_v22 = vor.u32 %v7997_v0, %v7467_v31  ;;  %v7290_v59 = vld [vmem:[%s12455_s9 + $0xe8] sm:$0xf0] }
 0xa81   :  { %v3774_v13 = vmul.f32 0.5, %v3773_v16  ;;  %v7361_v16 = vor.u32 %v7984_v45, %v7360_v34 }
 0xa82   :  { %v3827_v46 = vmul.f32 %v10930_v43, %v3813_v38  ;;  %4404 = vmatpush.bf16.msrb.mxu0 %v7494_v28  ;;  %v7419_v28 = vld [vmem:[%s12459_s1 + $0xd8] sm:$0xf0] }
 0xa83   :  { %v3775_v51 = vsub.f32 1.5, %v3774_v13  ;;  %v7978_v13 = vld [vmem:[%s12455_s9 + $0x144] sm:$0xf0]  ;;  %4169 = vmatpush.bf16.msra.mxu2 %v7361_v16 }
 0xa84   :  { %v8221_v32 = vpop.eup %8220  ;;  %v3836_v15 = vadd.f32 %v10933_v50, %v3827_v46  ;;  %v7975_v46 = vld [vmem:[%s12455_s9 + $0x134] sm:$0xf] }
 0xa85   :  { %v3776_v24 = vmul.f32 %v8219_v44, %v3775_v51  ;;  %v3782_v10 = vmul.f32 %v8221_v32, %v3728_v60  ;;  %vm3788_vm14 = vweird.f32 %v8221_v32  ;;  %v7981_v60 = vld [vmem:[%s12455_s9 + $0x164] sm:$0xf] }
 0xa86   :  { %v10958_v29 = vpack.c.bf16 %v3837_v7, %v3836_v15  ;;  %vm3789_vm15 = vmor %vm3787_vm12, %vm3788_vm14  ;;  %v7365_v38 = vor.u32 %v7981_v60, %v7362_v18  ;;  %v7338_v15 = vld [vmem:[%s12455_s9 + $0x148] sm:$0xf0]  ;;  %4405 = vmatpush.bf16.msrb.mxu0 %v7470_v22  ;;  %v7293_v18 = vor.u32 %v7963_v17, %v7290_v59  ;;  %v7449_v17 = vld [vmem:[%s12459_s1 + $0xf8] sm:$0xf] }
 0xa87   :  { %v3783_v5 = vmul.f32 %v8221_v32, %v3782_v10  ;;  %v3780_v26 = vsel %vm3779_vm13, %v8219_v44, %v3776_v24  ;;  %v7466_v44 = vor.u32 %v8000_v2, %v7465_v55  ;;  %v7337_v10 = vor.u32 %v7978_v13, %v7336_v53  ;;  %v7417_v55 = vld [vmem:[%s12459_s1 + $0xc0] sm:$0xf]  ;;  %v7988_v2 = vld [vmem:[%s12459_s1 + $0xd4] sm:$0xf0] }
 0xa88   :  { %7367 = vmatmul.msk.bf16.gmra.mxu2 %vm353_vm0, %v10958_v29  ;;  %7371 = vmatmul.msk.bf16.gmra.mxu3 %vm353_vm0, %v10958_v29  ;;  %v3815_v41 = vmul.f32 %v3780_v26, %v10764_v57  ;;  %v7312_v26 = vld [vmem:[%s12455_s9 + $0x100] sm:$0xf]  ;;  %v7418_v31 = vor.u32 %v7988_v2, %v7417_v55  ;;  %v7497_v13 = vld [vmem:[%s12459_s1 + $0x158] sm:$0xf]  ;;  %v7425_v2 = vld [vmem:[%s12459_s1 + $0xc8] sm:$0xf] }
 0xa89   :  { %v3784_v58 = vmul.f32 0.5, %v3783_v5  ;;  %7375 = vmatmul.msk.bf16.gmra.mxu1 %vm353_vm0, %v10958_v29  ;;  %7379 = vmatmul.msk.bf16.gmra.mxu0 %vm353_vm0, %v10958_v29  ;;  %v7341_v5 = vor.u32 %v7975_v46, %v7338_v15  ;;  %v8007_v46 = vld [vmem:[%s12459_s1 + $0x16c] sm:$0xf0] }
 0xa8a   :  { %v3829_v56 = vmul.f32 %v10930_v43, %v3815_v41  ;;  %4198 = vmatpush.bf16.msra.mxu3 %v7365_v38  ;;  %4392 = vmatpush.bf16.msrb.mxu1 %v7466_v44  ;;  %v7314_v41 = vld [vmem:[%s12455_s9 + $0x118] sm:$0xf0]  ;;  %v7498_v15 = vor.u32 %v8007_v46, %v7497_v13 }
 0xa8b   :  { %v3785_v4 = vsub.f32 1.5, %v3784_v58  ;;  %v7972_v58 = vld [vmem:[%s12455_s9 + $0x114] sm:$0xf0]  ;;  %4170 = vmatpush.bf16.msra.mxu2 %v7337_v10 }
 0xa8c   :  { %v3838_v9 = vadd.f32 %v10933_v50, %v3829_v56  ;;  %v7994_v56 = vld [vmem:[%s12459_s1 + $0x104] sm:$0xf0]  ;;  %v7313_v42 = vor.u32 %v7972_v58, %v7312_v26 }
 0xa8d   :  { %v3786_v12 = vmul.f32 %v8221_v32, %v3785_v4  ;;  %v7969_v4 = vld [vmem:[%s12455_s9 + $0x104] sm:$0xf] }
 0xa8e   :  { %4199 = vmatpush.bf16.msra.mxu3 %v7341_v5  ;;  %v7317_v61 = vor.u32 %v7969_v4, %v7314_v41 }
 0xa8f   :  { %v3790_v63 = vsel %vm3789_vm15, %v8221_v32, %v3786_v12  ;;  %v7441_v12 = vld [vmem:[%s12459_s1 + $0xf0] sm:$0xf]  ;;  %4171 = vmatpush.bf16.msra.mxu2 %v7313_v42 }
 0xa90   :  { %v3816_v27 = vmul.f32 %v3790_v63, %v10771_v20 }
 0xa92   :  { %v3830_v37 = vmul.f32 %v10930_v43, %v3816_v27  ;;  %v7991_v27 = vld [vmem:[%s12459_s1 + $0xf4] sm:$0xf]  ;;  %4200 = vmatpush.bf16.msra.mxu3 %v7317_v61 }
 0xa93   :  { %v7451_v61 = vld [vmem:[%s12459_s1 + $0x110] sm:$0xf0] }
 0xa94   :  { %v3839_v39 = vadd.f32 %v10933_v50, %v3830_v37  ;;  %v7443_v37 = vld [vmem:[%s12459_s1 + $0x108] sm:$0xf0] }
 0xa96   :  { %v10974_v14 = vpack.c.bf16 %v3839_v39, %v3838_v9  ;;  %v7442_v9 = vor.u32 %v7994_v56, %v7441_v12  ;;  %v7446_v39 = vor.u32 %v7991_v27, %v7443_v37  ;;  %4201 = vmatpush.bf16.msra.mxu3 %v7293_v18  ;;  %v7473_v56 = vld [vmem:[%s12459_s1 + $0x128] sm:$0xf]  ;;  %v7475_v37 = vld [vmem:[%s12459_s1 + $0x140] sm:$0xf0] }
 0xa98   :  { %7368 = vmatmul.msk.bf16.gmra.mxu2 %vm353_vm0, %v10974_v14  ;;  %7372 = vmatmul.msk.bf16.gmra.mxu3 %vm353_vm0, %v10974_v14 }
 0xa99   :  { %7376 = vmatmul.msk.bf16.gmra.mxu1 %vm353_vm0, %v10974_v14  ;;  %7380 = vmatmul.msk.bf16.gmra.mxu0 %vm353_vm0, %v10974_v14 }
 0xa9a   :  { %4393 = vmatpush.bf16.msrb.mxu1 %v7442_v9  ;;  %4406 = vmatpush.bf16.msrb.mxu0 %v7446_v39 }
 0xa9e   :  { %4394 = vmatpush.bf16.msrb.mxu1 %v7418_v31 }
 0xaa2   :  { %4417 = vmatpush.bf16.msra.mxu1 %v7498_v15 }
 0xaad   :  { %v3711_v57 = vpop.xlane.xlu2 %3710 }
 0xaae   :  { %v3721_v20 = vmul.f32 %v3711_v57, %v12500_v49  ;;  %v7288_v57 = vld [vmem:[%s12455_s9 + $0xd0] sm:$0xf] }
 0xab0   :  { %v10985_v35 = vadd.f32 1e-06, %v3721_v20  ;;  %v7966_v20 = vld [vmem:[%s12455_s9 + $0xe4] sm:$0xf0] }
 0xab2   :  { %8222 = vrsqrt.f32 %v10985_v35  ;;  %vm3797_vm4 = vweird.f32 %v10985_v35 }
 0xab5   :  { %v3714_v3 = vpop.xlane.xlu0 %3713  ;;  %v3850_v6 = vpop.xlane.xlu1 %3849 }
 0xab6   :  { %v3722_v11 = vmul.f32 %v3714_v3, %v12500_v49  ;;  %v3851_v47 = vmul.f32 %v3850_v6, %v12500_v49  ;;  %v7985_v3 = vld [vmem:[%s12459_s1 + $0xc4] sm:$0xf]  ;;  %v7289_v6 = vor.u32 %v7966_v20, %v7288_v57 }
 0xab7   :  { %v7422_v34 = vor.u32 %v7985_v3, %v7419_v28  ;;  %v7986_v3 = vld [vmem:[%s12459_s1 + $0xcc] sm:$0xf]  ;;  %v7427_v28 = vld [vmem:[%s12459_s1 + $0xe0] sm:$0xf0] }
 0xab8   :  { %v11035_v51 = vpop.eup %8222  ;;  %v11037_v32 = vadd.f32 1e-06, %v3722_v11  ;;  %v11044_v24 = vadd.f32 1e-06, %v3851_v47  ;;  %4172 = vmatpush.bf16.msra.mxu2 %v7289_v6  ;;  %v7430_v31 = vor.u32 %v7986_v3, %v7427_v28 }
 0xab9   :  { %v3792_v7 = vmul.f32 %v11035_v51, %v10985_v35  ;;  %vm3798_vm3 = vweird.f32 %v11035_v51  ;;  %4407 = vmatpush.bf16.msrb.mxu0 %v7422_v34  ;;  %v8004_v35 = vld [vmem:[%s12459_s1 + $0x15c] sm:$0xf] }
 0xaba   :  { %8224 = vrsqrt.f32 %v11037_v32  ;;  %vm3799_vm5 = vmor %vm3797_vm4, %vm3798_vm3  ;;  %vm3807_vm7 = vweird.f32 %v11037_v32  ;;  %vm3859_vm9 = vweird.f32 %v11044_v24 }
 0xabb   :  { %v3793_v63 = vmul.f32 %v11035_v51, %v3792_v7  ;;  %8226 = vrsqrt.f32 %v11044_v24 }
 0xabd   :  { %v3794_v36 = vmul.f32 0.5, %v3793_v63 }
 0xabf   :  { %v3795_v0 = vsub.f32 1.5, %v3794_v36  ;;  %v7995_v36 = vld [vmem:[%s12459_s1 + $0x10c] sm:$0xf0] }
 0xac0   :  { %v8225_v11 = vpop.eup %8224 }
 0xac1   :  { %v11097_v44 = vpop.eup %8226  ;;  %v3796_v45 = vmul.f32 %v11035_v51, %v3795_v0  ;;  %v3802_v60 = vmul.f32 %v8225_v11, %v11037_v32  ;;  %vm3808_vm6 = vweird.f32 %v8225_v11  ;;  %v7998_v32 = vld [vmem:[%s12459_s1 + $0x12c] sm:$0xf] }
 0xac2   :  { %v3854_v47 = vmul.f32 %v11097_v44, %v11044_v24  ;;  %vm3809_vm8 = vmor %vm3807_vm7, %vm3808_vm6  ;;  %vm3860_vm11 = vweird.f32 %v11097_v44  ;;  %v7989_v24 = vld [vmem:[%s12459_s1 + $0xdc] sm:$0xf0] }
 0xac3   :  { %v3803_v22 = vmul.f32 %v8225_v11, %v3802_v60  ;;  %v3800_v38 = vsel %vm3799_vm5, %v11035_v51, %v3796_v45  ;;  %v7499_v51 = vld [vmem:[%s12459_s1 + $0x170] sm:$0xf0]  ;;  %vm3861_vm10 = vmor %vm3859_vm9, %vm3860_vm11  ;;  %v7426_v0 = vor.u32 %v7989_v24, %v7425_v2  ;;  %v11181_v60 = vld [vmem:[%s12463_s4 + $0x6] sm:$0x3f] }
 0xac4   :  { %v3855_v16 = vmul.f32 %v11097_v44, %v3854_v47  ;;  %v7502_v5 = vor.u32 %v8004_v35, %v7499_v51  ;;  %v3817_v26 = vmul.f32 %v3800_v38, %v10779_v19  ;;  %v8001_v19 = vld [vmem:[%s12459_s1 + $0x13c] sm:$0xf0]  ;;  %v11193_v47 = vperm.slane %v11181_v60, 3 }
 0xac5   :  { %v3804_v53 = vmul.f32 0.5, %v3803_v22  ;;  %v7474_v27 = vor.u32 %v8001_v19, %v7473_v56  ;;  %v7483_v56 = vld [vmem:[%s12459_s1 + $0x148] sm:$0xf0] }
 0xac6   :  { %v3856_v10 = vmul.f32 0.5, %v3855_v16  ;;  %4430 = vmatpush.bf16.msra.mxu0 %v7502_v5  ;;  %v3831_v12 = vmul.f32 %v10930_v43, %v3817_v26  ;;  %v8008_v5 = vld [vmem:[%s12459_s1 + $0x174] sm:$0xf0]  ;;  %v8005_v26 = vld [vmem:[%s12459_s1 + $0x164] sm:$0xf] }
 0xac7   :  { %v3805_v7 = vsub.f32 1.5, %v3804_v53  ;;  %4418 = vmatpush.bf16.msra.mxu1 %v7474_v27  ;;  %v11205_v53 = vperm.slane %v11181_v60, 1 }
 0xac8   :  { %v3857_v41 = vsub.f32 1.5, %v3856_v10  ;;  %v3840_v39 = vadd.f32 %v10933_v50, %v3831_v12  ;;  %v7505_v10 = vld [vmem:[%s12459_s1 + $0x160] sm:$0xf] }
 0xac9   :  { %v3806_v58 = vmul.f32 %v8225_v11, %v3805_v7 }
 0xaca   :  { %v3858_v20 = vmul.f32 %v11097_v44, %v3857_v41  ;;  %v8002_v41 = vld [vmem:[%s12459_s1 + $0x144] sm:$0xf0] }
 0xacb   :  { %v3810_v4 = vsel %vm3809_vm8, %v8225_v11, %v3806_v58  ;;  %v3868_v11 = vpop.permute.xlu2 %3867  ;;  %v7506_v58 = vor.u32 %v8008_v5, %v7505_v10 }
 0xacc   :  { %v3818_v63 = vmul.f32 %v3810_v4, %v10795_v25  ;;  %v7478_v25 = vor.u32 %v7998_v32, %v7475_v37  ;;  %v3862_v55 = vsel %vm3861_vm10, %v11097_v44, %v3858_v20  ;;  %v3871_v44 = vperm.slane %v10873_v40, 0  ;;  %v7481_v4 = vld [vmem:[%s12459_s1 + $0x130] sm:$0xf]  ;;  %v7993_v20 = vld [vmem:[%s12459_s1 + $0x104] sm:$0xf] }
 0xacd   :  { %v3863_v34 = vmul.f32 %v3862_v55, %v10792_v30  ;;  %v11190_v30 = vperm.slane %v11181_v60, 2  ;;  %4443 = vmatpush.bf16.msrb.mxu2 %v7506_v58  ;;  %v7482_v27 = vor.u32 %v8002_v41, %v7481_v4 }
 0xace   :  { %v3832_v9 = vmul.f32 %v10930_v43, %v3818_v63  ;;  %4431 = vmatpush.bf16.msra.mxu0 %v7478_v25  ;;  %v7992_v43 = vld [vmem:[%s12459_s1 + $0xfc] sm:$0xf]  ;;  %v7999_v63 = vld [vmem:[%s12459_s1 + $0x134] sm:$0xf] }
 0xacf   :  { %v7454_v59 = vor.u32 %v7992_v43, %v7451_v61  ;;  %v3870_v6 = vmul.f32 %v3868_v11, %v3863_v34  ;;  %v7486_v37 = vor.u32 %v7999_v63, %v7483_v56  ;;  %v7433_v43 = vld [vmem:[%s12459_s1 + $0xd0] sm:$0xf] }
 0xad0   :  { %v3841_v57 = vadd.f32 %v10933_v50, %v3832_v9  ;;  %v7450_v50 = vor.u32 %v7995_v36, %v7449_v17  ;;  %v7459_v36 = vld [vmem:[%s12459_s1 + $0x118] sm:$0xf0] }
 0xad1   :  { %v3872_v45 = vadd.f32 %v3871_v44, %v3870_v6  ;;  %4444 = vmatpush.bf16.msrb.mxu2 %v7482_v27  ;;  %v7462_v61 = vor.u32 %v7993_v20, %v7459_v36 }
 0xad2   :  { %v11149_v42 = vpack.c.bf16 %v3841_v57, %v3840_v39  ;;  %4419 = vmatpush.bf16.msra.mxu1 %v7450_v50  ;;  %4432 = vmatpush.bf16.msra.mxu0 %v7454_v59  ;;  %v7457_v39 = vld [vmem:[%s12459_s1 + $0x100] sm:$0xf]  ;;  %v7996_v57 = vld [vmem:[%s12459_s1 + $0x114] sm:$0xf0]  ;;  %v7990_v50 = vld [vmem:[%s12459_s1 + $0xe4] sm:$0xf0] }
 0xad3   :  { %v11183_v18 = vpack.c.bf16 %v3872_v45, %v3872_v45  ;;  %v7458_v17 = vor.u32 %v7996_v57, %v7457_v39  ;;  %v7987_v59 = vld [vmem:[%s12459_s1 + $0xd4] sm:$0xf]  ;;  %v7434_v24 = vor.u32 %v7990_v50, %v7433_v43 }
 0xad4   :  { %7369 = vmatmul.msk.bf16.gmra.mxu2 %vm353_vm0, %v11149_v42  ;;  %7373 = vmatmul.msk.bf16.gmra.mxu3 %vm353_vm0, %v11149_v42 }
 0xad5   :  { %7377 = vmatmul.msk.bf16.gmra.mxu1 %vm353_vm0, %v11149_v42  ;;  %7381 = vmatmul.msk.bf16.gmra.mxu0 %vm353_vm0, %v11149_v42 }
 0xad6   :  { %4420 = vmatpush.bf16.msra.mxu1 %v7426_v0  ;;  %4433 = vmatpush.bf16.msra.mxu0 %v7430_v31 }
 0xad7   :  { %4445 = vmatpush.bf16.msrb.mxu2 %v7458_v17 }
 0xadb   :  { %4446 = vmatpush.bf16.msrb.mxu2 %v7434_v24 }
 0xae4   :  { %7382 = vmatmul.msk.bf16.vlgmr.msra.gmra.mxu2 %vm353_vm0, %v10939_v52  ;;  %7386 = vmatmul.msk.bf16.vlgmr.msra.gmra.mxu3 %vm353_vm0, %v10939_v52  ;;  %v11202_v52 = vperm.slane %v11181_v60, 0 }
 0xae5   :  { %7511 = vmatmul.msk.bf16.vlgmr.msrb.gmra.mxu1 %vm353_vm0, %v11183_v18  ;;  %7512 = vmatmul.msk.bf16.vlgmr.msrb.gmra.mxu0 %vm353_vm0, %v11183_v18 }
 0xae7   :  { %v4116_v40 = vpop.f32.mrf.mxu1  ;;  %v4145_v22 = vpop.f32.mrf.mxu0 }
 0xae8   :  { %v4117_v16 = vadd.f32 %v4116_v40, %v11190_v30  ;;  %v4146_v38 = vadd.f32 %v4145_v22, %v11193_v47 }
 0xaea   :  { %v11207_v13 = vpack.c.bf16 %v4146_v38, %v4117_v16 }
 0xaec   :  { %v4058_v46 = vpop.f32.mrf.mxu2  ;;  %v4087_v15 = vpop.f32.mrf.mxu3 }
 0xaed   :  { %v4059_v35 = vadd.f32 %v4058_v46, %v11202_v52  ;;  %v4088_v51 = vadd.f32 %v4087_v15, %v11205_v53 }
 0xaef   :  { %v11211_v7 = vpack.c.bf16 %v4088_v51, %v4059_v35  ;;  %v11245_v19 = vpop.f32.mrf.mxu1  ;;  %v11247_v32 = vpop.f32.mrf.mxu0 }
 0xaf4   :  { %7383 = vmatmul.msk.bf16.gmra.mxu2 %vm353_vm0, %v10958_v29  ;;  %7387 = vmatmul.msk.bf16.gmra.mxu3 %vm353_vm0, %v10958_v29  ;;  %v7507_v29 = vld [vmem:[%s12459_s1 + $0x178] sm:$0xf0]  ;;  %v11249_v9 = vpop.f32.mrf.mxu2  ;;  %v11251_v25 = vpop.f32.mrf.mxu3 }
 0xaf5   :  { %7513 = vmatmul.msk.bf16.vlgmr.msra.gmra.mxu1 %vm353_vm0, %v11183_v18  ;;  %7514 = vmatmul.msk.bf16.vlgmr.msra.gmra.mxu0 %vm353_vm0, %v11183_v18  ;;  %v7510_v12 = vor.u32 %v8005_v26, %v7507_v29 }
 0xaf7   :  { %4456 = vmatpush.bf16.msrb.mxu3 %v7510_v12 }
 0xafb   :  { %4457 = vmatpush.bf16.msrb.mxu3 %v7486_v37 }
 0xaff   :  { %4458 = vmatpush.bf16.msrb.mxu3 %v7462_v61 }
 0xb04   :  { %7384 = vmatmul.msk.bf16.gmra.mxu2 %vm353_vm0, %v10974_v14  ;;  %7388 = vmatmul.msk.bf16.gmra.mxu3 %vm353_vm0, %v10974_v14  ;;  %v7435_v14 = vld [vmem:[%s12459_s1 + $0xe8] sm:$0xf0] }
 0xb05   :  { %v7438_v0 = vor.u32 %v7987_v59, %v7435_v14 }
 0xb06   :  { %v4121_v55 = vpop.f32.mrf.mxu1  ;;  %v4150_v2 = vpop.f32.mrf.mxu0 }
 0xb07   :  { %v4122_v3 = vadd.f32 %v4121_v55, %v11190_v30  ;;  %v4151_v28 = vadd.f32 %v4150_v2, %v11193_v47  ;;  %4459 = vmatpush.bf16.msrb.mxu3 %v7438_v0  ;;  %v11336_v0 = vperm.slane %v11181_v60, 5 }
 0xb09   :  { %v11283_v31 = vpack.c.bf16 %v4151_v28, %v4122_v3  ;;  %v11333_v28 = vperm.slane %v11181_v60, 4 }
 0xb0b   :  { %v4063_v34 = vpop.f32.mrf.mxu2  ;;  %v4092_v11 = vpop.f32.mrf.mxu3 }
 0xb0c   :  { %v4064_v6 = vadd.f32 %v4063_v34, %v11202_v52  ;;  %v4093_v44 = vadd.f32 %v4092_v11, %v11205_v53 }
 0xb0e   :  { %v11287_v45 = vpack.c.bf16 %v4093_v44, %v4064_v6  ;;  %v11289_v40 = vpop.f32.mrf.mxu1  ;;  %v11291_v22 = vpop.f32.mrf.mxu0 }
 0xb13   :  { %v11293_v16 = vpop.f32.mrf.mxu2  ;;  %v11295_v38 = vpop.f32.mrf.mxu3 }
 0xb14   :  { %7385 = vmatmul.msk.bf16.gmra.mxu2 %vm353_vm0, %v11149_v42  ;;  %7389 = vmatmul.msk.bf16.gmra.mxu3 %vm353_vm0, %v11149_v42 }
 0xb16   :  { %v4126_v46 = vpop.f32.mrf.mxu1  ;;  %v4155_v15 = vpop.f32.mrf.mxu0 }
 0xb17   :  { %v4127_v35 = vadd.f32 %v4126_v46, %v11190_v30  ;;  %v4156_v51 = vadd.f32 %v4155_v15, %v11193_v47 }
 0xb19   :  { %v11303_v10 = vpack.c.bf16 %v4156_v51, %v4127_v35 }
 0xb1b   :  { %v4068_v5 = vpop.f32.mrf.mxu2  ;;  %v4097_v26 = vpop.f32.mrf.mxu3 }
 0xb1c   :  { %v4069_v58 = vadd.f32 %v4068_v5, %v11202_v52  ;;  %v4098_v29 = vadd.f32 %v4097_v26, %v11205_v53 }
 0xb1e   :  { %v11307_v4 = vpack.c.bf16 %v4098_v29, %v4069_v58  ;;  %v4128_v42 = vpop.f32.mrf.mxu1  ;;  %v4157_v41 = vpop.f32.mrf.mxu0 }
 0xb23   :  { %v11313_v12 = vpop.f32.mrf.mxu2  ;;  %v11315_v63 = vpop.f32.mrf.mxu3 }
 0xb24   :  { %7515 = vmatmul.msk.bf16.vlgmr.msrb.gmra.mxu2 %vm353_vm0, %v11183_v18  ;;  %7516 = vmatmul.msk.bf16.vlgmr.msrb.gmra.mxu3 %vm353_vm0, %v11183_v18  ;;  %v11324_v18 = vld [vmem:[%s12392_s12 + $0x6] sm:$0x3f] }
 0xb25   :  { %v4252_v59 = vperm.slane %v11324_v18, 0  ;;  %v4253_v14 = vperm.slane %v11324_v18, 1  ;;  %v4254_v58 = vperm.slane %v11324_v18, 2  ;;  %v4255_v60 = vperm.slane %v11324_v18, 3 }
 0xb52   :  { %v4131_v56 = vpop.f32.mrf.mxu1  ;;  %v4160_v27 = vpop.f32.mrf.mxu0 }
 0xb57   :  { %v4073_v37 = vpop.f32.mrf.mxu2  ;;  %v4102_v39 = vpop.f32.mrf.mxu3 }
 0xb58   :  { %v4074_v57 = vadd.f32 %v4073_v37, %v11202_v52  ;;  %v4103_v20 = vadd.f32 %v4102_v39, %v11205_v53 }
 0xb5a   :  { %v11319_v17 = vpack.c.bf16 %v4103_v20, %v4074_v57  ;;  %v4133_v36 = vpop.f32.mrf.mxu1  ;;  %v4162_v43 = vpop.f32.mrf.mxu0 }
 0xb5b   :  { %v4134_v20 = vadd.f32 %v4133_v36, %v11190_v30  ;;  %v4129_v36 = vadd.f32 %v4128_v42, %v11190_v30  ;;  %v4153_v42 = vadd.f32 %v11291_v22, %v11193_v47  ;;  %v4148_v22 = vadd.f32 %v11247_v32, %v11193_v47 }
 0xb5c   :  { %v4529_v32 = vunpack.c.l.b16 %v11207_v13 }
 0xb5f   :  { %v11326_v50 = vpop.f32.mrf.mxu2  ;;  %v11328_v61 = vpop.f32.mrf.mxu3 }
 0xb62   :  { %v4396_v55 = vpop.f32.mrf.mxu1  ;;  %v4409_v2 = vpop.f32.mrf.mxu0 }
 0xb63   :  { %v4397_v24 = vadd.f32 %v4396_v55, %v4252_v59  ;;  %v4410_v3 = vadd.f32 %v4409_v2, %v4253_v14  ;;  %v4163_v59 = vadd.f32 %v4162_v43, %v11193_v47  ;;  %v4132_v55 = vadd.f32 %v4131_v56, %v11190_v30 }
 0xb64   :  { %v4161_v2 = vadd.f32 %v4160_v27, %v11193_v47  ;;  %v4158_v56 = vadd.f32 %v4157_v41, %v11193_v47 }
 0xb65   :  { %v11338_v34 = vpack.c.bf16 %v4410_v3, %v4397_v24 }
 0xb67   :  { %v4174_v11 = vpop.f32.mrf.mxu2  ;;  %v4203_v6 = vpop.f32.mrf.mxu3 }
 0xb68   :  { %v4175_v44 = vadd.f32 %v4174_v11, %v11333_v28  ;;  %v4204_v46 = vadd.f32 %v4203_v6, %v11336_v0 }
 0xb6a   :  { %v11342_v15 = vpack.c.bf16 %v4204_v46, %v4175_v44  ;;  %v4398_v35 = vpop.f32.mrf.mxu1  ;;  %v4411_v51 = vpop.f32.mrf.mxu0  ;;  %v4487_v44 = vpack.c.bf16 %v4163_v59, %v4134_v20  ;;  %v4481_v20 = vpack.c.bf16 %v4158_v56, %v4129_v36  ;;  %v4531_v56 = vunpack.c.l.b16 %v11283_v31 }
 0xb6c   :  { %v4536_v43 = vunpack.c.l.b16 %v4487_v44  ;;  %v4914_v27 = vunpack.c.h.b16 %v4487_v44  ;;  %v4534_v41 = vunpack.c.l.b16 %v4481_v20 }
 0xb6f   :  { %v11344_v5 = vpop.f32.mrf.mxu2  ;;  %v11346_v26 = vpop.f32.mrf.mxu3 }
 0xb72   :  { %v4422_v29 = vpop.f32.mrf.mxu1  ;;  %v4435_v37 = vpop.f32.mrf.mxu0 }
 0xb73   :  { %v4423_v39 = vadd.f32 %v4422_v29, %v4254_v58  ;;  %v4436_v57 = vadd.f32 %v4435_v37, %v4255_v60  ;;  %v4484_v60 = vpack.c.bf16 %v4161_v2, %v4132_v55  ;;  %v4124_v55 = vadd.f32 %v11289_v40, %v11190_v30 }
 0xb74   :  { %v4912_v2 = vunpack.c.h.b16 %v4481_v20  ;;  %v4119_v40 = vadd.f32 %v11245_v19, %v11190_v30  ;;  %v4090_v30 = vadd.f32 %v11251_v25, %v11205_v53 }
 0xb75   :  { %v4490_v14 = vpack.c.bf16 %v4436_v57, %v4423_v39  ;;  %v4535_v29 = vunpack.c.l.b16 %v4484_v60  ;;  %v4913_v37 = vunpack.c.h.b16 %v4484_v60 }
 0xb77   :  { %v4537_v24 = vunpack.c.l.b16 %v4490_v14  ;;  %v4915_v3 = vunpack.c.h.b16 %v4490_v14  ;;  %v11354_v11 = vpop.f32.mrf.mxu2  ;;  %v11356_v6 = vpop.f32.mrf.mxu3  ;;  %v4541_v59 = vpack.c.b16 %v4536_v43, %v4535_v29  ;;  %v4919_v14 = vpack.c.b16 %v4914_v27, %v4913_v37 }
 0xb78   :  { %v4469_v29 = vpack.c.bf16 %v4148_v22, %v4119_v40  ;;  %v4095_v22 = vadd.f32 %v11295_v38, %v11205_v53 }
 0xb79   :  { %v4542_v46 = vpack.c.b16 %v4537_v24, %v4537_v24  ;;  %v4920_v35 = vpack.c.b16 %v4915_v3, %v4915_v3  ;;  %v4533_v24 = vunpack.c.l.b16 %v11303_v10  ;;  %v4911_v3 = vunpack.c.h.b16 %v11303_v10 }
 0xb7a   :  { %v4424_v51 = vpop.f32.mrf.mxu1  ;;  %v4437_v58 = vpop.f32.mrf.mxu0  ;;  %v4909_v10 = vunpack.c.h.b16 %v11283_v31  ;;  %v4530_v47 = vunpack.c.l.b16 %v4469_v29  ;;  %v4908_v19 = vunpack.c.h.b16 %v4469_v29 }
 0xb7b   :  { %4551 = vmatpush.bf16.xpose.msrb.mxu1 %v4542_v46  ;;  %4929 = vmatpush.bf16.xpose.msra.mxu2 %v4920_v35  ;;  %v4475_v35 = vpack.c.bf16 %v4153_v42, %v4124_v55  ;;  %v4540_v51 = vpack.c.b16 %v4534_v41, %v4533_v24  ;;  %v4918_v58 = vpack.c.b16 %v4912_v2, %v4911_v3 }
 0xb7c   :  { %v4538_v41 = vpack.c.b16 %v4530_v47, %v4529_v32 }
 0xb7d   :  { %v4532_v60 = vunpack.c.l.b16 %v4475_v35  ;;  %v4910_v36 = vunpack.c.h.b16 %v4475_v35  ;;  %v4888_v35 = vunpack.c.h.b16 %v11211_v7 }
 0xb7f   :  { %v11360_v39 = vpop.f32.mrf.mxu2  ;;  %v11362_v57 = vpop.f32.mrf.mxu3  ;;  %v4539_v37 = vpack.c.b16 %v4532_v60, %v4531_v56  ;;  %v4917_v20 = vpack.c.b16 %v4910_v36, %v4909_v10  ;;  %v4256_v60 = vperm.slane %v11324_v18, 4  ;;  %v4257_v36 = vperm.slane %v11324_v18, 5 }
 0xb83   :  { %4552 = vmatpush.bf16.xpose.msrb.mxu1 %v4541_v59  ;;  %4930 = vmatpush.bf16.xpose.msra.mxu2 %v4919_v14  ;;  %v4061_v59 = vadd.f32 %v11249_v9, %v11202_v52  ;;  %v4907_v14 = vunpack.c.h.b16 %v11207_v13  ;;  %v4501_v9 = vunpack.c.l.b16 %v11211_v7  ;;  %v4066_v13 = vadd.f32 %v11293_v16, %v11202_v52 }
 0xb85   :  { %v4468_v42 = vpack.c.bf16 %v4090_v30, %v4061_v59  ;;  %v4916_v2 = vpack.c.b16 %v4908_v19, %v4907_v14  ;;  %v4474_v56 = vpack.c.bf16 %v4095_v22, %v4066_v13  ;;  %v4503_v14 = vunpack.c.l.b16 %v11287_v45 }
 0xb87   :  { %v11370_v44 = vpop.f32.mrf.mxu2  ;;  %v11372_v46 = vpop.f32.mrf.mxu3  ;;  %v4502_v24 = vunpack.c.l.b16 %v4468_v42  ;;  %v4889_v3 = vunpack.c.h.b16 %v4468_v42  ;;  %v4504_v19 = vunpack.c.l.b16 %v4474_v56  ;;  %v4891_v42 = vunpack.c.h.b16 %v4474_v56 }
 0xb89   :  { %v4897_v40 = vpack.c.b16 %v4889_v3, %v4888_v35  ;;  %v4185_v3 = vadd.f32 %v11370_v44, %v11333_v28  ;;  %v4511_v13 = vpack.c.b16 %v4504_v19, %v4503_v14  ;;  %v4180_v44 = vadd.f32 %v11354_v11, %v11333_v28 }
 0xb8b   :  { %4553 = vmatpush.bf16.xpose.msrb.mxu1 %v4540_v51  ;;  %4931 = vmatpush.bf16.xpose.msra.mxu2 %v4918_v58  ;;  %v4510_v58 = vpack.c.b16 %v4502_v24, %v4501_v9  ;;  %v4890_v24 = vunpack.c.h.b16 %v11287_v45 }
 0xb8d   :  { %v4898_v22 = vpack.c.b16 %v4891_v42, %v4890_v24 }
 0xb8f   :  { %v4186_v43 = vpop.f32.mrf.mxu2  ;;  %v4215_v27 = vpop.f32.mrf.mxu3 }
 0xb90   :  { %v4187_v38 = vadd.f32 %v4186_v43, %v11333_v28  ;;  %v4216_v32 = vadd.f32 %v4215_v27, %v11336_v0  ;;  %v4182_v43 = vadd.f32 %v11360_v39, %v11333_v28  ;;  %v4211_v27 = vadd.f32 %v11362_v57, %v11336_v0 }
 0xb91   :  { %v4209_v39 = vadd.f32 %v11356_v6, %v11336_v0  ;;  %v4071_v6 = vadd.f32 %v11313_v12, %v11202_v52 }
 0xb92   :  { %v4476_v11 = vpack.c.bf16 %v4211_v27, %v4182_v43  ;;  %v4892_v43 = vunpack.c.h.b16 %v11307_v4 }
 0xb93   :  { %4554 = vmatpush.bf16.xpose.msrb.mxu1 %v4539_v37  ;;  %4932 = vmatpush.bf16.xpose.msra.mxu2 %v4917_v20 }
 0xb97   :  { %v4189_v31 = vpop.f32.mrf.mxu2  ;;  %v4218_v55 = vpop.f32.mrf.mxu3 }
 0xb98   :  { %v4190_v30 = vadd.f32 %v4189_v31, %v11333_v28  ;;  %v4219_v16 = vadd.f32 %v4218_v55, %v11336_v0  ;;  %v4214_v31 = vadd.f32 %v11372_v46, %v11336_v0 }
 0xb9a   :  { %v4485_v55 = vpack.c.bf16 %v4219_v16, %v4190_v30  ;;  %v4479_v57 = vpack.c.bf16 %v4214_v31, %v4185_v3  ;;  %v4100_v30 = vadd.f32 %v11315_v63, %v11205_v53  ;;  %v4473_v16 = vpack.c.bf16 %v4209_v39, %v4180_v44 }
 0xb9b   :  { %4555 = vmatpush.bf16.xpose.msrb.mxu1 %v4538_v41  ;;  %4933 = vmatpush.bf16.xpose.msra.mxu2 %v4916_v2  ;;  %v4820_v3 = vunpack.c.l.b16 %v11342_v15  ;;  %v5189_v31 = vunpack.c.h.b16 %v11342_v15  ;;  %v4105_v15 = vadd.f32 %v11328_v61, %v11205_v53 }
 0xb9c   :  { %v5195_v56 = vunpack.c.h.b16 %v4485_v55  ;;  %v5193_v19 = vunpack.c.h.b16 %v4479_v57  ;;  %v5191_v14 = vunpack.c.h.b16 %v4473_v16 }
 0xb9f   :  { %v4191_v25 = vpop.f32.mrf.mxu2  ;;  %v4220_v51 = vpop.f32.mrf.mxu3 }
 0xba0   :  { %v4192_v10 = vadd.f32 %v4191_v25, %v11333_v28  ;;  %v4221_v7 = vadd.f32 %v4220_v51, %v11336_v0  ;;  %v4482_v25 = vpack.c.bf16 %v4216_v32, %v4187_v38  ;;  %v4480_v32 = vpack.c.bf16 %v4100_v30, %v4071_v6 }
 0xba2   :  { %4556 = vmatmul.bf16.vlgmr.msrb.gmra.mxu1 %v4510_v58  ;;  %4934 = vmatmul.bf16.vlgmr.msra.gmra.mxu2 %v4897_v40  ;;  %v4488_v18 = vpack.c.bf16 %v4221_v7, %v4192_v10  ;;  %v4177_v10 = vadd.f32 %v11344_v5, %v11333_v28  ;;  %v4206_v7 = vadd.f32 %v11346_v26, %v11336_v0  ;;  %v4823_v0 = vunpack.c.l.b16 %v4476_v11 }
 0xba3   :  { %v5192_v5 = vunpack.c.h.b16 %v4476_v11  ;;  %v4506_v63 = vunpack.c.l.b16 %v4480_v32  ;;  %v4893_v24 = vunpack.c.h.b16 %v4480_v32 }
 0xba4   :  { %v4827_v51 = vunpack.c.l.b16 %v4488_v18  ;;  %v5196_v58 = vunpack.c.h.b16 %v4488_v18  ;;  %v4470_v28 = vpack.c.bf16 %v4206_v7, %v4177_v10  ;;  %v4822_v18 = vunpack.c.l.b16 %v4473_v16 }
 0xba6   :  { %v4821_v42 = vunpack.c.l.b16 %v4470_v28  ;;  %v5190_v12 = vunpack.c.h.b16 %v4470_v28 }
 0xba7   :  { %v4448_v29 = vpop.f32.mrf.mxu2  ;;  %v4461_v37 = vpop.f32.mrf.mxu3 }
 0xba8   :  { %v4449_v20 = vadd.f32 %v4448_v29, %v4256_v60  ;;  %v4462_v59 = vadd.f32 %v4461_v37, %v4257_v36  ;;  %v4826_v36 = vunpack.c.l.b16 %v4485_v55  ;;  %v4825_v29 = vunpack.c.l.b16 %v4482_v25 }
 0xba9   :  { %v5194_v37 = vunpack.c.h.b16 %v4482_v25  ;;  %v4505_v55 = vunpack.c.l.b16 %v11307_v4  ;;  %v4829_v27 = vpack.c.b16 %v4821_v42, %v4820_v3  ;;  %v4899_v25 = vpack.c.b16 %v4893_v24, %v4892_v43 }
 0xbaa   :  { %v4491_v47 = vpack.c.bf16 %v4462_v59, %v4449_v20  ;;  %v4832_v20 = vpack.c.b16 %v4827_v51, %v4826_v36  ;;  %v5201_v59 = vpack.c.b16 %v5196_v58, %v5195_v56  ;;  %v4076_v51 = vadd.f32 %v11326_v50, %v11202_v52 }
 0xbab   :  { %v5200_v38 = vpack.c.b16 %v5194_v37, %v5193_v19  ;;  %v4894_v4 = vunpack.c.h.b16 %v11319_v17 }
 0xbac   :  { %v4828_v41 = vunpack.c.l.b16 %v4491_v47  ;;  %v5197_v2 = vunpack.c.h.b16 %v4491_v47  ;;  %v4824_v47 = vunpack.c.l.b16 %v4479_v57  ;;  %v4486_v58 = vpack.c.bf16 %v4105_v15, %v4076_v51 }
 0xbae   :  { %v4833_v9 = vpack.c.b16 %v4828_v41, %v4828_v41  ;;  %v5202_v35 = vpack.c.b16 %v5197_v2, %v5197_v2  ;;  %v4831_v26 = vpack.c.b16 %v4825_v29, %v4824_v47  ;;  %v4830_v41 = vpack.c.b16 %v4823_v0, %v4822_v18 }
 0xbaf   :  { %v4450_v40 = vpop.f32.mrf.mxu2  ;;  %v4463_v45 = vpop.f32.mrf.mxu3  ;;  %v5199_v2 = vpack.c.b16 %v5192_v5, %v5191_v14 }
 0xbb0   :  { %v4854_v46 = vsel %vm1806_vm1, %v4833_v9, 0  ;;  %v5223_v60 = vsel %vm1806_vm1, %v5202_v35, 0  ;;  %v5198_v9 = vpack.c.b16 %v5190_v12, %v5189_v31  ;;  %v4512_v35 = vpack.c.b16 %v4506_v63, %v4505_v55 }
 0xbb1   :  { %4859 = vmatpush.bf16.msrb.mxu0 %v4854_v46  ;;  %5228 = vmatpush.bf16.msra.mxu3 %v5223_v60  ;;  %v4508_v40 = vunpack.c.l.b16 %v4486_v58  ;;  %v4895_v45 = vunpack.c.h.b16 %v4486_v58  ;;  %v4896_v60 = vunpack.c.h.b16 %v11338_v34 }
 0xbb2   :  { %4561 = vmatmul.bf16.gmra.mxu1 %v4511_v13  ;;  %4939 = vmatmul.bf16.gmra.mxu2 %v4898_v22  ;;  %v4507_v13 = vunpack.c.l.b16 %v11319_v17  ;;  %v4509_v22 = vunpack.c.l.b16 %v11338_v34 }
 0xbb3   :  { %v4900_v46 = vpack.c.b16 %v4895_v45, %v4894_v4  ;;  %v4901_v52 = vpack.c.b16 %v4896_v60, %v4896_v60 }
 0xbb4   :  { %v4513_v44 = vpack.c.b16 %v4508_v40, %v4507_v13  ;;  %v4514_v39 = vpack.c.b16 %v4509_v22, %v4509_v22 }
 0xbb5   :  { %4860 = vmatpush.bf16.msrb.mxu0 %v4832_v20  ;;  %5229 = vmatpush.bf16.msra.mxu3 %v5201_v59 }
 0xbb9   :  { %4861 = vmatpush.bf16.msrb.mxu0 %v4831_v26  ;;  %5230 = vmatpush.bf16.msra.mxu3 %v5200_v38 }
 0xbbd   :  { %4862 = vmatpush.bf16.msrb.mxu0 %v4830_v41  ;;  %5231 = vmatpush.bf16.msra.mxu3 %v5199_v2 }
 0xbc1   :  { %4863 = vmatpush.bf16.msrb.mxu0 %v4829_v27  ;;  %5232 = vmatpush.bf16.msra.mxu3 %v5198_v9 }
 0xbc2   :  { %4566 = vmatmul.bf16.gmra.mxu1 %v4512_v35  ;;  %4944 = vmatmul.bf16.gmra.mxu2 %v4899_v25 }
 0xbd2   :  { %4571 = vmatmul.bf16.gmra.mxu1 %v4513_v44  ;;  %4949 = vmatmul.bf16.gmra.mxu2 %v4900_v46 }
 0xbe2   :  { %4576 = vmatmul.bf16.gmra.mxu1 %v4514_v39  ;;  %4954 = vmatmul.bf16.gmra.mxu2 %v4901_v52 }
 0xc1f   :  { %v4557_v53 = vpop.f32.mrf.mxu1 }
 0xc20   :  { %v11436_v50 = vmul.f32 0.17677669, %v4557_v53 }
 0xc22   :  { %v4590_v61 = vsel %vm1542_vm2, %v11436_v50, -inf }
 0xc23   :  { %4591 = vmax.xlane.f32.xlu0 %v4590_v61 }
 0xc25   :  { %v4935_v17 = vpop.f32.mrf.mxu2 }
 0xc26   :  { %v11440_v57 = vmul.f32 0.17677669, %v4935_v17 }
 0xc27   :  { %v4559_v36 = vpop.f32.mrf.mxu1 }
 0xc28   :  { %v11442_v56 = vmul.f32 0.17677669, %v4559_v36  ;;  %v4968_v34 = vsel %vm1542_vm2, %v11440_v57, -inf }
 0xc2a   :  { %v4593_v10 = vsel %vm1542_vm2, %v11442_v56, -inf }
 0xc2b   :  { %4969 = vmax.xlane.f32.xlu0 %v4968_v34  ;;  %4594 = vmax.xlane.f32.xlu2 %v4593_v10 }
 0xc2d   :  { %v4937_v7 = vpop.f32.mrf.mxu2 }
 0xc2e   :  { %v11448_v11 = vmul.f32 0.17677669, %v4937_v7 }
 0xc2f   :  { %v4562_v29 = vpop.f32.mrf.mxu1 }
 0xc30   :  { %v11450_v37 = vmul.f32 0.17677669, %v4562_v29  ;;  %v4971_v20 = vsel %vm1542_vm2, %v11448_v11, -inf }
 0xc32   :  { %v4596_v59 = vsel %vm1542_vm2, %v11450_v37, -inf }
 0xc33   :  { %4972 = vmax.xlane.f32.xlu0 %v4971_v20  ;;  %4597 = vmax.xlane.f32.xlu1 %v4596_v59 }
 0xc35   :  { %v4940_v6 = vpop.f32.mrf.mxu2 }
 0xc36   :  { %v11456_v30 = vmul.f32 0.17677669, %v4940_v6 }
 0xc37   :  { %v4564_v16 = vpop.f32.mrf.mxu1 }
 0xc38   :  { %v4974_v47 = vsel %vm1542_vm2, %v11456_v30, -inf  ;;  %v11464_v38 = vmul.f32 0.17677669, %v4564_v16 }
 0xc3a   :  { %v4599_v42 = vsel %vm1542_vm2, %v11464_v38, -inf }
 0xc3b   :  { %4975 = vmax.xlane.f32.xlu0 %v4974_v47 }
 0xc3d   :  { %v4942_v19 = vpop.f32.mrf.mxu2 }
 0xc3e   :  { %v11460_v28 = vmul.f32 0.17677669, %v4942_v19 }
 0xc3f   :  { %v4567_v0 = vpop.f32.mrf.mxu1 }
 0xc40   :  { %v4977_v5 = vsel %vm1542_vm2, %v11460_v28, -inf  ;;  %v11472_v12 = vmul.f32 0.17677669, %v4567_v0 }
 0xc42   :  { %v4602_v24 = vsel %vm1542_vm2, %v11472_v12, -inf }
 0xc43   :  { %4978 = vmax.xlane.f32.xlu0 %v4977_v5 }
 0xc45   :  { %v4945_v26 = vpop.f32.mrf.mxu2 }
 0xc46   :  { %v11466_v32 = vmul.f32 0.17677669, %v4945_v26 }
 0xc47   :  { %v4569_v18 = vpop.f32.mrf.mxu1 }
 0xc48   :  { %v4980_v14 = vsel %vm1542_vm2, %v11466_v32, -inf  ;;  %v11480_v55 = vmul.f32 0.17677669, %v4569_v18 }
 0xc49   :  { %4981 = vmax.xlane.f32.xlu1 %v4980_v14 }
 0xc4a   :  { %v4605_v35 = vsel %vm1542_vm2, %v11480_v55, -inf }
 0xc4b   :  { %4600 = vmax.xlane.f32.xlu0 %v4599_v42 }
 0xc4d   :  { %v4947_v41 = vpop.f32.mrf.mxu2 }
 0xc4e   :  { %v11474_v2 = vmul.f32 0.17677669, %v4947_v41 }
 0xc4f   :  { %v4572_v63 = vpop.f32.mrf.mxu1 }
 0xc50   :  { %v4983_v3 = vsel %vm1542_vm2, %v11474_v2, -inf  ;;  %v11496_v45 = vmul.f32 0.17677669, %v4572_v63 }
 0xc51   :  { %4603 = vmax.xlane.f32.xlu1 %v4602_v24 }
 0xc52   :  { %v4608_v4 = vsel %vm1542_vm2, %v11496_v45, -inf }
 0xc53   :  { %4984 = vmax.xlane.f32.xlu0 %v4983_v3 }
 0xc55   :  { %v4950_v31 = vpop.f32.mrf.mxu2 }
 0xc56   :  { %v11482_v43 = vmul.f32 0.17677669, %v4950_v31 }
 0xc57   :  { %v4574_v27 = vpop.f32.mrf.mxu1 }
 0xc58   :  { %v4986_v9 = vsel %vm1542_vm2, %v11482_v43, -inf }
 0xc59   :  { %4987 = vmax.xlane.f32.xlu1 %v4986_v9 }
 0xc5b   :  { %4606 = vmax.xlane.f32.xlu0 %v4605_v35 }
 0xc5d   :  { %v4952_v25 = vpop.f32.mrf.mxu2 }
 0xc5e   :  { %v11488_v51 = vmul.f32 0.17677669, %v4952_v25 }
 0xc5f   :  { %v11490_v15 = vpop.f32.mrf.mxu1 }
 0xc60   :  { %v4989_v58 = vsel %vm1542_vm2, %v11488_v51, -inf }
 0xc63   :  { %4990 = vmax.xlane.f32.xlu0 %v4989_v58 }
 0xc65   :  { %v11494_v40 = vpop.f32.mrf.mxu2 }
 0xc67   :  { %v4579_v13 = vpop.f32.mrf.mxu1 }
 0xc6b   :  { %4609 = vmax.xlane.f32.xlu0 %v4608_v4 }
 0xc6d   :  { %v4957_v44 = vpop.f32.mrf.mxu2 }
 0xc96   :  { %v4592_v46 = vpop.xlane.xlu0 %4591 }
 0xc97   :  { %v4617_v29 = vsub.f32 %v11436_v50, %v4592_v46 }
 0xc9e   :  { %v4970_v22 = vpop.xlane.xlu0 %4969  ;;  %v4595_v60 = vpop.xlane.xlu2 %4594 }
 0xc9f   :  { %v4995_v39 = vsub.f32 %v11440_v57, %v4970_v22  ;;  %v4618_v52 = vsub.f32 %v11442_v56, %v4595_v60 }
 0xca1   :  { %v5004_v53 = vmul.f32 1.442695, %v4995_v39  ;;  %v4628_v61 = vmul.f32 1.442695, %v4618_v52 }
 0xca3   :  { %8228 = vpow2.f32 %v5004_v53 }
 0xca4   :  { %8230 = vpow2.f32 %v4628_v61 }
 0xca6   :  { %v4973_v17 = vpop.xlane.xlu0 %4972  ;;  %v4598_v36 = vpop.xlane.xlu1 %4597 }
 0xca7   :  { %v4996_v34 = vsub.f32 %v11448_v11, %v4973_v17  ;;  %v4619_v10 = vsub.f32 %v11450_v37, %v4598_v36  ;;  %v4626_v11 = vmul.f32 1.442695, %v4617_v29  ;;  %v11513_v37 = vmul.f32 0.17677669, %v4574_v27 }
 0xca9   :  { %v11504_v7 = vpop.eup %8228  ;;  %v5006_v20 = vmul.f32 1.442695, %v4996_v34  ;;  %v4630_v59 = vmul.f32 1.442695, %v4619_v10  ;;  %v4611_v26 = vsel %vm1542_vm2, %v11513_v37, -inf }
 0xcaa   :  { %v11507_v6 = vpop.eup %8230  ;;  %v5022_v57 = vsel %vm1542_vm2, %v11504_v7, 0.0 }
 0xcab   :  { %8232 = vpow2.f32 %v5006_v20  ;;  %5023 = vadd.xlane.f32.xlu2 %v5022_v57  ;;  %v4647_v56 = vsel %vm1542_vm2, %v11507_v6, 0.0 }
 0xcac   :  { %8234 = vpow2.f32 %v4630_v59  ;;  %4648 = vadd.xlane.f32.xlu0 %v4647_v56 }
 0xcad   :  { %8236 = vpow2.f32 %v4626_v11 }
 0xcae   :  { %v4976_v16 = vpop.xlane.xlu0 %4975 }
 0xcaf   :  { %v4997_v50 = vsub.f32 %v11456_v30, %v4976_v16 }
 0xcb1   :  { %v11516_v47 = vpop.eup %8232  ;;  %v5008_v19 = vmul.f32 1.442695, %v4997_v50 }
 0xcb2   :  { %v11518_v0 = vpop.eup %8234  ;;  %v5025_v5 = vsel %vm1542_vm2, %v11516_v47, 0.0 }
 0xcb3   :  { %8238 = vpow2.f32 %v5008_v19  ;;  %5026 = vadd.xlane.f32.xlu1 %v5025_v5  ;;  %v4650_v18 = vsel %vm1542_vm2, %v11518_v0, 0.0  ;;  %4612 = vmax.xlane.f32.xlu2 %v4611_v26  ;;  %v11526_v14 = vpop.eup %8236 }
 0xcb4   :  { %4651 = vadd.xlane.f32.xlu0 %v4650_v18  ;;  %v4644_v24 = vsel %vm1542_vm2, %v11526_v14, 0.0 }
 0xcb6   :  { %v4979_v30 = vpop.xlane.xlu0 %4978 }
 0xcb7   :  { %v4998_v42 = vsub.f32 %v11460_v28, %v4979_v30  ;;  %v11576_v30 = vmul.f32 0.17677669, %v11494_v40 }
 0xcb9   :  { %v11529_v41 = vpop.eup %8238  ;;  %v5010_v63 = vmul.f32 1.442695, %v4998_v42 }
 0xcba   :  { %v5028_v3 = vsel %vm1542_vm2, %v11529_v41, 0.0 }
 0xcbb   :  { %8240 = vpow2.f32 %v5010_v63  ;;  %4645 = vadd.xlane.f32.xlu1 %v4644_v24  ;;  %5029 = vadd.xlane.f32.xlu2 %v5028_v3  ;;  %v4992_v24 = vsel %vm1542_vm2, %v11576_v30, -inf }
 0xcbc   :  { %v4982_v31 = vpop.xlane.xlu1 %4981 }
 0xcbd   :  { %v4999_v27 = vsub.f32 %v11466_v32, %v4982_v31 }
 0xcbe   :  { %v4601_v9 = vpop.xlane.xlu0 %4600 }
 0xcbf   :  { %v5012_v35 = vmul.f32 1.442695, %v4999_v27  ;;  %v4620_v25 = vsub.f32 %v11464_v38, %v4601_v9 }
 0xcc1   :  { %v11537_v28 = vpop.eup %8240  ;;  %8242 = vpow2.f32 %v5012_v35  ;;  %v4632_v58 = vmul.f32 1.442695, %v4620_v25 }
 0xcc2   :  { %v5031_v13 = vsel %vm1542_vm2, %v11537_v28, 0.0 }
 0xcc3   :  { %8244 = vpow2.f32 %v4632_v58  ;;  %5032 = vadd.xlane.f32.xlu1 %v5031_v13 }
 0xcc4   :  { %v4604_v4 = vpop.xlane.xlu1 %4603 }
 0xcc5   :  { %v4621_v44 = vsub.f32 %v11472_v12, %v4604_v4 }
 0xcc6   :  { %v4985_v46 = vpop.xlane.xlu0 %4984 }
 0xcc7   :  { %v11542_v22 = vpop.eup %8242  ;;  %v4634_v32 = vmul.f32 1.442695, %v4621_v44  ;;  %v5000_v60 = vsub.f32 %v11474_v2, %v4985_v46 }
 0xcc8   :  { %v5034_v52 = vsel %vm1542_vm2, %v11542_v22, 0.0 }
 0xcc9   :  { %v11545_v39 = vpop.eup %8244  ;;  %8246 = vpow2.f32 %v4634_v32  ;;  %v5014_v38 = vmul.f32 1.442695, %v5000_v60 }
 0xcca   :  { %v4653_v53 = vsel %vm1542_vm2, %v11545_v39, 0.0 }
 0xccb   :  { %8248 = vpow2.f32 %v5014_v38  ;;  %5035 = vadd.xlane.f32.xlu1 %v5034_v52  ;;  %4654 = vadd.xlane.f32.xlu2 %v4653_v53 }
 0xccc   :  { %v4988_v12 = vpop.xlane.xlu1 %4987 }
 0xccd   :  { %v5001_v61 = vsub.f32 %v11482_v43, %v4988_v12 }
 0xcce   :  { %v4607_v17 = vpop.xlane.xlu0 %4606 }
 0xccf   :  { %v11552_v36 = vpop.eup %8246  ;;  %v5016_v2 = vmul.f32 1.442695, %v5001_v61  ;;  %v4622_v34 = vsub.f32 %v11480_v55, %v4607_v17 }
 0xcd0   :  { %v4656_v59 = vsel %vm1542_vm2, %v11552_v36, 0.0 }
 0xcd1   :  { %v11555_v10 = vpop.eup %8248  ;;  %8250 = vpow2.f32 %v5016_v2  ;;  %v4636_v29 = vmul.f32 1.442695, %v4622_v34 }
 0xcd2   :  { %v5037_v20 = vsel %vm1542_vm2, %v11555_v10, 0.0 }
 0xcd3   :  { %8252 = vpow2.f32 %v4636_v29  ;;  %5038 = vadd.xlane.f32.xlu0 %v5037_v20  ;;  %4657 = vadd.xlane.f32.xlu2 %v4656_v59 }
 0xcd6   :  { %v4991_v43 = vpop.xlane.xlu0 %4990 }
 0xcd7   :  { %v11561_v57 = vpop.eup %8250  ;;  %v5002_v56 = vsub.f32 %v11488_v51, %v4991_v43 }
 0xcd8   :  { %v5040_v50 = vsel %vm1542_vm2, %v11561_v57, 0.0 }
 0xcd9   :  { %v11564_v11 = vpop.eup %8252  ;;  %v5018_v55 = vmul.f32 1.442695, %v5002_v56 }
 0xcda   :  { %v4659_v16 = vsel %vm1542_vm2, %v11564_v11, 0.0 }
 0xcdb   :  { %8254 = vpow2.f32 %v5018_v55  ;;  %4660 = vadd.xlane.f32.xlu1 %v4659_v16  ;;  %5041 = vadd.xlane.f32.xlu0 %v5040_v50 }
 0xcde   :  { %v4610_v19 = vpop.xlane.xlu0 %4609 }
 0xcdf   :  { %v4623_v5 = vsub.f32 %v11496_v45, %v4610_v19  ;;  %v11585_v45 = vmul.f32 0.17677669, %v11490_v15 }
 0xce1   :  { %v11571_v26 = vpop.eup %8254  ;;  %v4638_v18 = vmul.f32 1.442695, %v4623_v5  ;;  %v4614_v3 = vsel %vm1542_vm2, %v11585_v45, -inf }
 0xce2   :  { %v5043_v51 = vsel %vm1542_vm2, %v11571_v26, 0.0 }
 0xce3   :  { %8256 = vpow2.f32 %v4638_v18  ;;  %5044 = vadd.xlane.f32.xlu2 %v5043_v51 }
 0xce9   :  { %v11578_v42 = vpop.eup %8256 }
 0xcea   :  { %v4662_v63 = vsel %vm1542_vm2, %v11578_v42, 0.0 }
 0xceb   :  { %4663 = vadd.xlane.f32.xlu1 %v4662_v63  ;;  %4993 = vmax.xlane.f32.xlu2 %v4992_v24 }
 0xcf3   :  { %4615 = vmax.xlane.f32.xlu1 %v4614_v3 }
 0xd1e   :  { %v5024_v31 = vpop.xlane.xlu2 %5023 }
 0xd1f   :  { %8258 = vrcp.f32 %v5024_v31  ;;  %v11589_v40 = vpop.xlane.xlu0 %4648  ;;  %v5060_v61 = vand.u32 2147483648, %v5024_v31  ;;  %vm5054_vm13 = vweird.f32 %v5024_v31  ;;  %v5058_v2 = vand.u32 2147483647, %v5024_v31 }
 0xd20   :  { %8260 = vrcp.f32 %v11589_v40  ;;  %vm4690_vm7 = vweird.f32 %v11589_v40 }
 0xd21   :  { %v5061_v56 = vor.u32 1.1754944e-38, %v5060_v61  ;;  %vm5059_vm15 = vcmp.eq.f32.partialorder %v5058_v2, 8.507059e+37 }
 0xd25   :  { %v8259_v27 = vpop.eup %8258 }
 0xd26   :  { %v11592_v9 = vpop.eup %8260  ;;  %v5050_v35 = vmul.f32 %v8259_v27, %v5024_v31  ;;  %v5027_v25 = vpop.xlane.xlu1 %5026  ;;  %vm5055_vm1 = vweird.f32 %v8259_v27  ;;  %v4696_v31 = vand.u32 2147483648, %v11589_v40 }
 0xd27   :  { %v4613_v58 = vpop.xlane.xlu2 %4612  ;;  %8262 = vrcp.f32 %v5027_v25  ;;  %v4686_v15 = vmul.f32 %v11592_v9, %v11589_v40  ;;  %v11597_v46 = vpop.xlane.xlu0 %4651  ;;  %vm5056_vm14 = vmor %vm5054_vm13, %vm5055_vm1  ;;  %v5072_v29 = vand.u32 2147483647, %v5027_v25  ;;  %v5074_v20 = vand.u32 2147483648, %v5027_v25 }
 0xd28   :  { %v5051_v13 = vsub.f32 1.0, %v5050_v35  ;;  %v4624_v44 = vsub.f32 %v11513_v37, %v4613_v58  ;;  %vm5068_vm3 = vweird.f32 %v5027_v25  ;;  %vm4691_vm5 = vweird.f32 %v11592_v9 }
 0xd29   :  { %v4687_v38 = vsub.f32 1.0, %v4686_v15  ;;  %v5075_v5 = vor.u32 1.1754944e-38, %v5074_v20  ;;  %vm5073_vm6 = vcmp.eq.f32.partialorder %v5072_v29, 8.507059e+37  ;;  %vm11627_vm8 = vmor %vm4690_vm7, %vm4691_vm5  ;;  %v4697_v2 = vor.u32 1.1754944e-38, %v4696_v31 }
 0xd2a   :  { %v5052_v4 = vmul.f32 %v8259_v27, %v5051_v13  ;;  %v4640_v32 = vmul.f32 1.442695, %v4624_v44  ;;  %v4694_v44 = vand.u32 2147483647, %v11589_v40 }
 0xd2b   :  { %v4688_v37 = vmul.f32 %v11592_v9, %v4687_v38 }
 0xd2c   :  { %v5053_v52 = vadd.f32 %v8259_v27, %v5052_v4  ;;  %8264 = vpow2.f32 %v4640_v32  ;;  %vm4695_vm9 = vcmp.eq.f32.partialorder %v4694_v44, 8.507059e+37 }
 0xd2d   :  { %v8263_v60 = vpop.eup %8262  ;;  %8266 = vrcp.f32 %v11597_v46  ;;  %v4689_v63 = vadd.f32 %v11592_v9, %v4688_v37 }
 0xd2e   :  { %v5064_v53 = vmul.f32 %v8263_v60, %v5027_v25  ;;  %v11599_v12 = vpop.xlane.xlu1 %4645  ;;  %v5057_v59 = vsel %vm5056_vm14, %v8259_v27, %v5053_v52  ;;  %vm5069_vm12 = vweird.f32 %v8263_v60 }
 0xd2f   :  { %v11602_v17 = vpop.xlane.xlu2 %5029  ;;  %8268 = vrcp.f32 %v11599_v12  ;;  %v5062_v19 = vsel %vm5059_vm15, %v5061_v56, %v5057_v59  ;;  %vm5070_vm4 = vmor %vm5068_vm3, %vm5069_vm12  ;;  %v4682_v38 = vand.u32 2147483648, %v11599_v12  ;;  %vm4676_vm10 = vweird.f32 %v11599_v12 }
 0xd30   :  { %v5065_v34 = vsub.f32 1.0, %v5064_v53  ;;  %8270 = vrcp.f32 %v11602_v17  ;;  %v5175_v58 = vmul.f32 %v11504_v7, %v5062_v19  ;;  %v4693_v7 = vsel %vm11627_vm8, %v11592_v9, %v4689_v63 }
 0xd31   :  { %v4680_v53 = vand.u32 2147483647, %v11599_v12  ;;  %v4698_v29 = vsel %vm4695_vm9, %v4697_v2, %v4693_v7  ;;  %v4683_v9 = vor.u32 1.1754944e-38, %v4682_v38  ;;  %v5088_v31 = vand.u32 2147483648, %v11602_v17 }
 0xd32   :  { %v5066_v43 = vmul.f32 %v8263_v60, %v5065_v34  ;;  %v11607_v55 = vpop.eup %8264  ;;  %vm5082_vm15 = vweird.f32 %v11602_v17 }
 0xd33   :  { %v11609_v50 = vpop.eup %8266  ;;  %v4665_v18 = vsel %vm1542_vm2, %v11607_v55, 0.0  ;;  %vm4681_vm13 = vcmp.eq.f32.partialorder %v4680_v53, 8.507059e+37  ;;  %v5089_v38 = vor.u32 1.1754944e-38, %v5088_v31 }
 0xd34   :  { %v5067_v16 = vadd.f32 %v8263_v60, %v5066_v43  ;;  %4666 = vadd.xlane.f32.xlu0 %v4665_v18  ;;  %v4700_v15 = vmul.f32 %v11609_v50, %v11597_v46  ;;  %vm4705_vm12 = vweird.f32 %v11609_v50 }
 0xd35   :  { %v8269_v51 = vpop.eup %8268 }
 0xd36   :  { %v5071_v24 = vsel %vm5070_vm4, %v8263_v60, %v5067_v16  ;;  %v11615_v3 = vpop.xlane.xlu1 %5032  ;;  %v4672_v35 = vmul.f32 %v8269_v51, %v11599_v12  ;;  %v11620_v25 = vpop.eup %8270  ;;  %vm4677_vm11 = vweird.f32 %v8269_v51  ;;  %v4701_v34 = vsub.f32 1.0, %v4700_v15 }
 0xd37   :  { %v5076_v27 = vsel %vm5073_vm6, %v5075_v5, %v5071_v24  ;;  %8272 = vrcp.f32 %v11615_v3  ;;  %v5078_v60 = vmul.f32 %v11620_v25, %v11602_v17  ;;  %vm4678_vm1 = vmor %vm4676_vm10, %vm4677_vm11  ;;  %v4798_v12 = vmul.f32 %v11507_v6, %v4698_v29 }
 0xd38   :  { %v5176_v13 = vmul.f32 %v11516_v47, %v5076_v27  ;;  %v4673_v32 = vsub.f32 1.0, %v4672_v35  ;;  %v4702_v19 = vmul.f32 %v11609_v50, %v4701_v34  ;;  %vm5083_vm14 = vweird.f32 %v11620_v25 }
 0xd39   :  { %v5079_v61 = vsub.f32 1.0, %v5078_v60  ;;  %v5086_v6 = vand.u32 2147483647, %v11602_v17  ;;  %vm4704_vm4 = vweird.f32 %v11597_v46  ;;  %vm11660_vm5 = vmor %vm5082_vm15, %vm5083_vm14  ;;  %v4710_v17 = vand.u32 2147483648, %v11597_v46 }
 0xd3a   :  { %v5184_v47 = vpack.c.bf16 %v5176_v13, %v5175_v58  ;;  %v4674_v52 = vmul.f32 %v8269_v51, %v4673_v32  ;;  %v4703_v35 = vadd.f32 %v11609_v50, %v4702_v19  ;;  %v5102_v13 = vand.u32 2147483648, %v11615_v3  ;;  %vm11668_vm6 = vmor %vm4704_vm4, %vm4705_vm12 }
 0xd3b   :  { %v5080_v20 = vmul.f32 %v11620_v25, %v5079_v61  ;;  %vm5096_vm7 = vweird.f32 %v11615_v3  ;;  %v5100_v32 = vand.u32 2147483647, %v11615_v3  ;;  %vm5087_vm11 = vcmp.eq.f32.partialorder %v5086_v6, 8.507059e+37 }
 0xd3c   :  { %7522 = vmatmul.msk.bf16.vlgmr.msra.gmra.mxu3 %vm1542_vm2, %v5184_v47  ;;  %v4675_v40 = vadd.f32 %v8269_v51, %v4674_v52  ;;  %v4708_v47 = vand.u32 2147483647, %v11597_v46  ;;  %v5103_v61 = vor.u32 1.1754944e-38, %v5102_v13  ;;  %v4711_v29 = vor.u32 1.1754944e-38, %v4710_v17 }
 0xd3d   :  { %v8273_v37 = vpop.eup %8272  ;;  %v5081_v24 = vadd.f32 %v11620_v25, %v5080_v20  ;;  %vm5101_vm9 = vcmp.eq.f32.partialorder %v5100_v32, 8.507059e+37 }
 0xd3e   :  { %v11642_v59 = vpop.xlane.xlu1 %5035  ;;  %v11644_v43 = vpop.xlane.xlu2 %4654  ;;  %v4679_v56 = vsel %vm4678_vm1, %v8269_v51, %v4675_v40  ;;  %v5092_v16 = vmul.f32 %v8273_v37, %v11615_v3  ;;  %vm5097_vm3 = vweird.f32 %v8273_v37  ;;  %v4707_v3 = vsel %vm11668_vm6, %v11609_v50, %v4703_v35 }
 0xd3f   :  { %v4684_v5 = vsel %vm4681_vm13, %v4683_v9, %v4679_v56  ;;  %8274 = vrcp.f32 %v11642_v59  ;;  %v5085_v44 = vsel %vm11660_vm5, %v11620_v25, %v5081_v24  ;;  %vm11684_vm8 = vmor %vm5096_vm7, %vm5097_vm3  ;;  %vm4709_vm10 = vcmp.eq.f32.partialorder %v4708_v47, 8.507059e+37 }
 0xd40   :  { %v4797_v18 = vmul.f32 %v11526_v14, %v4684_v5  ;;  %v5093_v63 = vsub.f32 1.0, %v5092_v16  ;;  %8276 = vrcp.f32 %v11644_v43  ;;  %v5090_v40 = vsel %vm5087_vm11, %v5089_v38, %v5085_v44 }
 0xd41   :  { %v5177_v50 = vmul.f32 %v11529_v41, %v5090_v40  ;;  %v4712_v19 = vsel %vm4709_vm10, %v4711_v29, %v4707_v3  ;;  %vm5110_vm1 = vweird.f32 %v11642_v59  ;;  %v4722_v24 = vand.u32 2147483647, %v11644_v43 }
 0xd42   :  { %v4806_v51 = vpack.c.bf16 %v4798_v12, %v4797_v18  ;;  %v5094_v27 = vmul.f32 %v8273_v37, %v5093_v63  ;;  %v4724_v12 = vand.u32 2147483648, %v11644_v43  ;;  %v5114_v63 = vand.u32 2147483647, %v11642_v59 }
 0xd43   :  { %vm4718_vm14 = vweird.f32 %v11644_v43  ;;  %vm4723_vm3 = vcmp.eq.f32.partialorder %v4722_v24, 8.507059e+37 }
 0xd44   :  { %v5095_v58 = vadd.f32 %v8273_v37, %v5094_v27  ;;  %7517 = vmatmul.msk.bf16.vlgmr.msrb.gmra.mxu0 %vm1542_vm2, %v4806_v51  ;;  %v5116_v27 = vand.u32 2147483648, %v11642_v59  ;;  %v4725_v4 = vor.u32 1.1754944e-38, %v4724_v12  ;;  %vm5115_vm7 = vcmp.eq.f32.partialorder %v5114_v63, 8.507059e+37 }
 0xd45   :  { %v11666_v15 = vpop.eup %8274 }
 0xd46   :  { %v11678_v60 = vpop.xlane.xlu0 %5038  ;;  %v11680_v7 = vpop.xlane.xlu2 %4657  ;;  %v5106_v53 = vmul.f32 %v11666_v15, %v11642_v59  ;;  %v5099_v46 = vsel %vm11684_vm8, %v8273_v37, %v5095_v58  ;;  %vm5111_vm12 = vweird.f32 %v11666_v15 }
 0xd47   :  { %8278 = vrcp.f32 %v11678_v60  ;;  %v8277_v25 = vpop.eup %8276  ;;  %v5104_v20 = vsel %vm5101_vm9, %v5103_v61, %v5099_v46  ;;  %v5130_v32 = vand.u32 2147483648, %v11678_v60  ;;  %vm11731_vm5 = vmor %vm5110_vm1, %vm5111_vm12  ;;  %vm5124_vm6 = vweird.f32 %v11678_v60 }
 0xd48   :  { %8280 = vrcp.f32 %v11680_v7  ;;  %v5107_v2 = vsub.f32 1.0, %v5106_v53  ;;  %v4714_v34 = vmul.f32 %v8277_v25, %v11644_v43  ;;  %v5178_v16 = vmul.f32 %v11537_v28, %v5104_v20 }
 0xd49   :  { %vm4719_vm13 = vweird.f32 %v8277_v25  ;;  %v4799_v53 = vmul.f32 %v11518_v0, %v4712_v19  ;;  %v5128_v46 = vand.u32 2147483647, %v11678_v60  ;;  %v5117_v61 = vor.u32 1.1754944e-38, %v5116_v27 }
 0xd4a   :  { %v4715_v9 = vsub.f32 1.0, %v4714_v34  ;;  %v5108_v56 = vmul.f32 %v11666_v15, %v5107_v2  ;;  %v5185_v31 = vpack.c.bf16 %v5178_v16, %v5177_v50  ;;  %vm11719_vm15 = vmor %vm4718_vm14, %vm4719_vm13  ;;  %v5131_v0 = vor.u32 1.1754944e-38, %v5130_v32 }
 0xd4b   :  { %vm5129_vm9 = vcmp.eq.f32.partialorder %v5128_v46, 8.507059e+37  ;;  %vm4732_vm10 = vweird.f32 %v11680_v7  ;;  %v4736_v16 = vand.u32 2147483647, %v11680_v7 }
 0xd4c   :  { %v4716_v5 = vmul.f32 %v8277_v25, %v4715_v9  ;;  %v5109_v14 = vadd.f32 %v11666_v15, %v5108_v56  ;;  %7523 = vmatmul.msk.bf16.gmra.mxu3 %vm1542_vm2, %v5185_v31  ;;  %v4738_v56 = vand.u32 2147483648, %v11680_v7 }
 0xd4d   :  { %v8279_v37 = vpop.eup %8278  ;;  %vm4737_vm14 = vcmp.eq.f32.partialorder %v4736_v16, 8.507059e+37 }
 0xd4e   :  { %v11703_v18 = vpop.eup %8280  ;;  %v5120_v51 = vmul.f32 %v8279_v37, %v11678_v60  ;;  %v11708_v41 = vpop.xlane.xlu1 %4660  ;;  %v4717_v35 = vadd.f32 %v8277_v25, %v4716_v5  ;;  %vm5125_vm4 = vweird.f32 %v8279_v37 }
 0xd4f   :  { %v11710_v28 = vpop.xlane.xlu0 %5041  ;;  %v4728_v6 = vmul.f32 %v11703_v18, %v11680_v7  ;;  %8282 = vrcp.f32 %v11708_v41  ;;  %vm11743_vm8 = vmor %vm5124_vm6, %vm5125_vm4  ;;  %vm4733_vm11 = vweird.f32 %v11703_v18  ;;  %v4750_v12 = vand.u32 2147483647, %v11708_v41 }
 0xd50   :  { %v5121_v13 = vsub.f32 1.0, %v5120_v51  ;;  %v4721_v43 = vsel %vm11719_vm15, %v8277_v25, %v4717_v35  ;;  %8284 = vrcp.f32 %v11710_v28  ;;  %v5113_v25 = vsel %vm11731_vm5, %v11666_v15, %v5109_v14  ;;  %vm11765_vm1 = vmor %vm4732_vm10, %vm4733_vm11 }
 0xd51   :  { %v4729_v17 = vsub.f32 1.0, %v4728_v6  ;;  %v4726_v52 = vsel %vm4723_vm3, %v4725_v4, %v4721_v43  ;;  %v5118_v20 = vsel %vm5115_vm7, %v5117_v61, %v5113_v25  ;;  %v4752_v27 = vand.u32 2147483648, %v11708_v41 }
 0xd52   :  { %v5122_v44 = vmul.f32 %v8279_v37, %v5121_v13  ;;  %v4800_v59 = vmul.f32 %v11545_v39, %v4726_v52  ;;  %v5179_v24 = vmul.f32 %v11542_v22, %v5118_v20  ;;  %v4739_v35 = vor.u32 1.1754944e-38, %v4738_v56 }
 0xd53   :  { %v4730_v38 = vmul.f32 %v11703_v18, %v4729_v17  ;;  %vm4746_vm12 = vweird.f32 %v11708_v41  ;;  %vm11782_vm3 = vcmp.eq.f32.partialorder %v4750_v12, 8.507059e+37  ;;  %vm5138_vm4 = vweird.f32 %v11710_v28 }
 0xd54   :  { %v5123_v3 = vadd.f32 %v8279_v37, %v5122_v44  ;;  %v4807_v29 = vpack.c.bf16 %v4800_v59, %v4799_v53  ;;  %v5142_v32 = vand.u32 2147483647, %v11710_v28  ;;  %v5144_v47 = vand.u32 2147483648, %v11710_v28 }
 0xd55   :  { %v8283_v34 = vpop.eup %8282  ;;  %v4731_v39 = vadd.f32 %v11703_v18, %v4730_v38 }
 0xd56   :  { %v5127_v40 = vsel %vm11743_vm8, %v8279_v37, %v5123_v3  ;;  %v11750_v15 = vpop.xlane.xlu2 %5044  ;;  %v11752_v9 = vpop.eup %8284  ;;  %v4742_v60 = vmul.f32 %v8283_v34, %v11708_v41  ;;  %7518 = vmatmul.msk.bf16.gmra.mxu0 %vm1542_vm2, %v4807_v29  ;;  %vm4747_vm13 = vweird.f32 %v8283_v34  ;;  %v4753_v41 = vor.u32 1.1754944e-38, %v4752_v27 }
 0xd57   :  { %8286 = vrcp.f32 %v11750_v15  ;;  %v5134_v50 = vmul.f32 %v11752_v9, %v11710_v28  ;;  %v5132_v37 = vsel %vm5129_vm9, %v5131_v0, %v5127_v40  ;;  %v4735_v31 = vsel %vm11765_vm1, %v11703_v18, %v4731_v39  ;;  %vm11778_vm15 = vmor %vm4746_vm12, %vm4747_vm13 }
 0xd58   :  { %v4743_v19 = vsub.f32 1.0, %v4742_v60  ;;  %v5180_v51 = vmul.f32 %v11555_v10, %v5132_v37  ;;  %v4740_v17 = vsel %vm4737_vm14, %v4739_v35, %v4735_v31  ;;  %vm5139_vm5 = vweird.f32 %v11752_v9  ;;  %v8024_v10 = vld [vmem:[%s12393_s13 + $0xf8] sm:$0xff] }
 0xd59   :  { %v5135_v63 = vsub.f32 1.0, %v5134_v50  ;;  %v5156_v25 = vand.u32 2147483647, %v11750_v15  ;;  %v5158_v3 = vand.u32 2147483648, %v11750_v15  ;;  %v4801_v59 = vmul.f32 %v11552_v36, %v4740_v17  ;;  %vm5140_vm7 = vmor %vm5138_vm4, %vm5139_vm5  ;;  %5428 = vmatpush.bf16.msrb.mxu3 %v8024_v10 }
 0xd5a   :  { %v4744_v7 = vmul.f32 %v8283_v34, %v4743_v19  ;;  %v5186_v14 = vpack.c.bf16 %v5180_v51, %v5179_v24  ;;  %vm5152_vm8 = vweird.f32 %v11750_v15  ;;  %v5145_v29 = vor.u32 1.1754944e-38, %v5144_v47 }
 0xd5b   :  { %v5136_v6 = vmul.f32 %v11752_v9, %v5135_v63  ;;  %v5159_v39 = vor.u32 1.1754944e-38, %v5158_v3  ;;  %vm5143_vm9 = vcmp.eq.f32.partialorder %v5142_v32, 8.507059e+37  ;;  %vm5157_vm10 = vcmp.eq.f32.partialorder %v5156_v25, 8.507059e+37  ;;  %v8015_v25 = vld [vmem:[%s12393_s13 + $0xb0] sm:$0xff]  ;;  %v8022_v3 = vld [vmem:[%s12393_s13 + $0xe8] sm:$0xff] }
 0xd5c   :  { %v4745_v13 = vadd.f32 %v8283_v34, %v4744_v7  ;;  %7524 = vmatmul.msk.bf16.gmra.mxu3 %vm1542_vm2, %v5186_v14 }
 0xd5d   :  { %v8287_v58 = vpop.eup %8286  ;;  %v5137_v38 = vadd.f32 %v11752_v9, %v5136_v6 }
 0xd5e   :  { %v5148_v18 = vmul.f32 %v8287_v58, %v11750_v15  ;;  %v11788_v43 = vpop.xlane.xlu1 %4663  ;;  %v4994_v4 = vpop.xlane.xlu2 %4993  ;;  %v4749_v44 = vsel %vm11778_vm15, %v8283_v34, %v4745_v13  ;;  %vm5153_vm6 = vweird.f32 %v8287_v58 }
 0xd5f   :  { %v5003_v53 = vsub.f32 %v11576_v30, %v4994_v4  ;;  %v4754_v46 = vsel %vm11782_vm3, %v4753_v41, %v4749_v44  ;;  %v5141_v30 = vsel %vm5140_vm7, %v11752_v9, %v5137_v38  ;;  %vm5154_vm11 = vmor %vm5152_vm8, %vm5153_vm6  ;;  %v4766_v7 = vand.u32 2147483648, %v11788_v43 }
 0xd60   :  { %v5149_v52 = vsub.f32 1.0, %v5148_v18  ;;  %v4802_v34 = vmul.f32 %v11564_v11, %v4754_v46  ;;  %v5146_v11 = vsel %vm5143_vm9, %v5145_v29, %v5141_v30  ;;  %vm4760_vm13 = vweird.f32 %v11788_v43  ;;  %v8016_v18 = vld [vmem:[%s12393_s13 + $0xb8] sm:$0xff]  ;;  %v8013_v46 = vld [vmem:[%s12393_s13 + $0xa0] sm:$0xff]  ;;  %v8011_v30 = vld [vmem:[%s12393_s13 + $0x90] sm:$0xff] }
 0xd61   :  { %v5020_v2 = vmul.f32 1.442695, %v5003_v53  ;;  %v5181_v50 = vmul.f32 %v11561_v57, %v5146_v11  ;;  %v4764_v27 = vand.u32 2147483647, %v11788_v43  ;;  %5399 = vmatpush.bf16.msra.mxu0 %v8016_v18  ;;  %v8023_v53 = vld [vmem:[%s12393_s13 + $0xf0] sm:$0xff]  ;;  %v8010_v29 = vld [vmem:[%s12393_s13 + $0x88] sm:$0xff] }
 0xd62   :  { %v5150_v61 = vmul.f32 %v8287_v58, %v5149_v52  ;;  %v4808_v0 = vpack.c.bf16 %v4802_v34, %v4801_v59  ;;  %5429 = vmatpush.bf16.msrb.mxu3 %v8023_v53  ;;  %v8020_v59 = vld [vmem:[%s12393_s13 + $0xd8] sm:$0xff]  ;;  %v8018_v34 = vld [vmem:[%s12393_s13 + $0xc8] sm:$0xff] }
 0xd63   :  { %8288 = vpow2.f32 %v5020_v2  ;;  %vm4765_vm15 = vcmp.eq.f32.partialorder %v4764_v27, 8.507059e+37  ;;  %v8012_v2 = vld [vmem:[%s12393_s13 + $0x98] sm:$0xff] }
 0xd64   :  { %v5151_v40 = vadd.f32 %v8287_v58, %v5150_v61  ;;  %v8019_v61 = vld [vmem:[%s12393_s13 + $0xd0] sm:$0xff] }
 0xd65   :  { %5400 = vmatpush.bf16.msra.mxu0 %v8015_v25 }
 0xd66   :  { %v5155_v36 = vsel %vm5154_vm11, %v8287_v58, %v5151_v40  ;;  %v4616_v60 = vpop.xlane.xlu1 %4615  ;;  %7519 = vmatmul.msk.bf16.gmra.mxu0 %vm1542_vm2, %v4808_v0  ;;  %5430 = vmatpush.bf16.msrb.mxu3 %v8022_v3  ;;  %v8017_v0 = vld [vmem:[%s12393_s13 + $0xc0] sm:$0xff] }
 0xd67   :  { %v4625_v20 = vsub.f32 %v11585_v45, %v4616_v60  ;;  %v5160_v56 = vsel %vm5157_vm10, %v5159_v39, %v5155_v36 }
 0xd68   :  { %v5182_v28 = vmul.f32 %v11571_v26, %v5160_v56 }
 0xd69   :  { %v4642_v15 = vmul.f32 1.442695, %v4625_v20  ;;  %v11811_v9 = vpop.eup %8288  ;;  %v8009_v20 = vld [vmem:[%s12393_s13 + $0x80] sm:$0xff] }
 0xd6a   :  { %v5046_v16 = vsel %vm1542_vm2, %v11811_v9, 0.0  ;;  %v5187_v19 = vpack.c.bf16 %v5182_v28, %v5181_v50 }
 0xd6b   :  { %8290 = vpow2.f32 %v4642_v15  ;;  %5047 = vadd.xlane.f32.xlu0 %v5046_v16 }
 0xd6c   :  { %7525 = vmatmul.msk.bf16.gmra.mxu3 %vm1542_vm2, %v5187_v19  ;;  %8292 = vrcp.f32 %v11788_v43 }
 0xd71   :  { %v11817_v45 = vpop.eup %8290 }
 0xd72   :  { %v4668_v37 = vsel %vm1542_vm2, %v11817_v45, 0.0  ;;  %v8293_v26 = vpop.eup %8292 }
 0xd73   :  { %4669 = vadd.xlane.f32.xlu2 %v4668_v37  ;;  %v4756_v5 = vmul.f32 %v8293_v26, %v11788_v43  ;;  %vm4761_vm1 = vweird.f32 %v8293_v26  ;;  %v4767_v43 = vor.u32 1.1754944e-38, %v4766_v7 }
 0xd74   :  { %vm11826_vm14 = vmor %vm4760_vm13, %vm4761_vm1 }
 0xd75   :  { %v4757_v57 = vsub.f32 1.0, %v4756_v5 }
 0xd77   :  { %v4758_v63 = vmul.f32 %v8293_v26, %v4757_v57 }
 0xd79   :  { %v4759_v51 = vadd.f32 %v8293_v26, %v4758_v63 }
 0xd7b   :  { %v4763_v58 = vsel %vm11826_vm14, %v8293_v26, %v4759_v51 }
 0xd7c   :  { %v4768_v44 = vsel %vm4765_vm15, %v4767_v43, %v4763_v58 }
 0xd7d   :  { %v4803_v47 = vmul.f32 %v11578_v42, %v4768_v44  ;;  %v8014_v42 = vld [vmem:[%s12393_s13 + $0xa8] sm:$0xff] }
 0xd7e   :  { %5401 = vmatpush.bf16.msra.mxu0 %v8014_v42 }
 0xd82   :  { %5402 = vmatpush.bf16.msra.mxu0 %v8013_v46 }
 0xd86   :  { %5403 = vmatpush.bf16.msra.mxu0 %v8012_v2 }
 0xd8a   :  { %5404 = vmatpush.bf16.msra.mxu0 %v8011_v30 }
 0xd8e   :  { %5405 = vmatpush.bf16.msra.mxu0 %v8010_v29  ;;  %v8367_v29 = vld [vmem:[%s12454_s7] sm:$0xff] }
 0xd92   :  { %5406 = vmatpush.bf16.msra.mxu0 %v8009_v20 }
 0xda7   :  { %v4667_v12 = vpop.xlane.xlu0 %4666 }
 0xda8   :  { %8294 = vrcp.f32 %v4667_v12  ;;  %v4780_v14 = vand.u32 2147483648, %v4667_v12  ;;  %v4778_v22 = vand.u32 2147483647, %v4667_v12  ;;  %vm4774_vm3 = vweird.f32 %v4667_v12 }
 0xdaa   :  { %v4781_v17 = vor.u32 1.1754944e-38, %v4780_v14  ;;  %vm4779_vm5 = vcmp.eq.f32.partialorder %v4778_v22, 8.507059e+37 }
 0xdae   :  { %v8295_v24 = vpop.eup %8294 }
 0xdaf   :  { %v4770_v31 = vmul.f32 %v8295_v24, %v4667_v12  ;;  %vm4775_vm12 = vweird.f32 %v8295_v24 }
 0xdb0   :  { %vm4776_vm4 = vmor %vm4774_vm3, %vm4775_vm12 }
 0xdb1   :  { %v4771_v35 = vsub.f32 1.0, %v4770_v31 }
 0xdb3   :  { %v4772_v13 = vmul.f32 %v8295_v24, %v4771_v35 }
 0xdb5   :  { %v4773_v4 = vadd.f32 %v8295_v24, %v4772_v13 }
 0xdb7   :  { %v4777_v41 = vsel %vm4776_vm4, %v8295_v24, %v4773_v4 }
 0xdb8   :  { %v4782_v32 = vsel %vm4779_vm5, %v4781_v17, %v4777_v41 }
 0xdb9   :  { %v4804_v38 = vmul.f32 %v11607_v55, %v4782_v32  ;;  %v8021_v55 = vld [vmem:[%s12393_s13 + $0xe0] sm:$0xff] }
 0xdba   :  { %5431 = vmatpush.bf16.msrb.mxu3 %v8021_v55 }
 0xdbb   :  { %v4809_v52 = vpack.c.bf16 %v4804_v38, %v4803_v47 }
 0xdbd   :  { %7520 = vmatmul.msk.bf16.gmra.mxu0 %vm1542_vm2, %v4809_v52 }
 0xdbe   :  { %5432 = vmatpush.bf16.msrb.mxu3 %v8020_v59 }
 0xdbf   :  { %v5234_v56 = vpop.f32.mrf.mxu3 }
 0xdc1   :  { %v4865_v6 = vpop.f32.mrf.mxu0 }
 0xdc2   :  { %5433 = vmatpush.bf16.msrb.mxu3 %v8019_v61 }
 0xdc6   :  { %5434 = vmatpush.bf16.msrb.mxu3 %v8018_v34 }
 0xdc7   :  { %v5236_v27 = vpop.f32.mrf.mxu3 }
 0xdc8   :  { %v5293_v43 = vpack.c.bf16 %v5236_v27, %v5234_v56 }
 0xdc9   :  { %v4867_v18 = vpop.f32.mrf.mxu0 }
 0xdca   :  { %5435 = vmatpush.bf16.msrb.mxu3 %v8017_v0  ;;  %v5292_v44 = vpack.c.bf16 %v4867_v18, %v4865_v6 }
 0xdd3   :  { %v4870_v17 = vpop.f32.mrf.mxu0 }
 0xddb   :  { %v4872_v47 = vpop.f32.mrf.mxu0 }
 0xddc   :  { %v5294_v38 = vpack.c.bf16 %v4872_v47, %v4870_v17 }
 0xdde   :  { %v5048_v40 = vpop.xlane.xlu0 %5047 }
 0xddf   :  { %8296 = vrcp.f32 %v5048_v40  ;;  %v5172_v28 = vand.u32 2147483648, %v5048_v40  ;;  %v5170_v50 = vand.u32 2147483647, %v5048_v40  ;;  %vm5166_vm7 = vweird.f32 %v5048_v40 }
 0xde1   :  { %v5173_v37 = vor.u32 1.1754944e-38, %v5172_v28  ;;  %vm5171_vm11 = vcmp.eq.f32.partialorder %v5170_v50, 8.507059e+37 }
 0xde3   :  { %v4875_v53 = vpop.f32.mrf.mxu0 }
 0xde5   :  { %v8297_v39 = vpop.eup %8296 }
 0xde6   :  { %v4670_v36 = vpop.xlane.xlu2 %4669  ;;  %v5162_v60 = vmul.f32 %v8297_v39, %v5048_v40  ;;  %vm5167_vm6 = vweird.f32 %v8297_v39 }
 0xde7   :  { %8298 = vrcp.f32 %v4670_v36  ;;  %vm5168_vm8 = vmor %vm5166_vm7, %vm5167_vm6  ;;  %v4794_v63 = vand.u32 2147483648, %v4670_v36  ;;  %v4792_v31 = vand.u32 2147483647, %v4670_v36  ;;  %vm4788_vm10 = vweird.f32 %v4670_v36 }
 0xde8   :  { %v5163_v11 = vsub.f32 1.0, %v5162_v60  ;;  %v12528_v60 = vld [vmem:[#allocation8_spill] sm:$0xff] }
 0xde9   :  { %v4795_v14 = vor.u32 1.1754944e-38, %v4794_v63  ;;  %vm4793_vm13 = vcmp.eq.f32.partialorder %v4792_v31, 8.507059e+37 }
 0xdea   :  { %v5164_v15 = vmul.f32 %v8297_v39, %v5163_v11 }
 0xdeb   :  { %v4877_v3 = vpop.f32.mrf.mxu0 }
 0xdec   :  { %v5165_v19 = vadd.f32 %v8297_v39, %v5164_v15  ;;  %v5296_v42 = vpack.c.bf16 %v4877_v3, %v4875_v53 }
 0xded   :  { %v8299_v16 = vpop.eup %8298 }
 0xdee   :  { %v4784_v26 = vmul.f32 %v8299_v16, %v4670_v36  ;;  %v5169_v5 = vsel %vm5168_vm8, %v8297_v39, %v5165_v19  ;;  %vm4789_vm9 = vweird.f32 %v8299_v16  ;;  %v340_v39 = vperm.slane %v8367_v29, 7  ;;  %v8061_v36 = vld [vmem:[%s12394_s14 + $0x1] ss:$0 sm:$0xff] }
 0xdef   :  { %v5174_v12 = vsel %vm5171_vm11, %v5173_v37, %v5169_v5  ;;  %vm4790_vm1 = vmor %vm4788_vm10, %vm4789_vm9 }
 0xdf0   :  { %v4785_v57 = vsub.f32 1.0, %v4784_v26  ;;  %v5183_v24 = vmul.f32 %v11811_v9, %v5174_v12  ;;  %v5239_v9 = vpop.f32.mrf.mxu3  ;;  %v458_v20 = vadd.f32 %v12528_v60, %v340_v39 }
 0xdf2   :  { %v4786_v51 = vmul.f32 %v8299_v16, %v4785_v57  ;;  %v5188_v7 = vpack.c.bf16 %v5183_v24, %v5183_v24  ;;  %v11894_v15 = vperm.slane %v458_v20, 0 }
 0xdf4   :  { %v4787_v35 = vadd.f32 %v8299_v16, %v4786_v51  ;;  %7526 = vmatmul.msk.bf16.gmra.mxu3 %vm1542_vm2, %v5188_v7 }
 0xdf6   :  { %v4791_v58 = vsel %vm4790_vm1, %v8299_v16, %v4787_v35 }
 0xdf7   :  { %v4796_v13 = vsel %vm4793_vm13, %v4795_v14, %v4791_v58 }
 0xdf8   :  { %v4805_v22 = vmul.f32 %v11817_v45, %v4796_v13  ;;  %v5241_v4 = vpop.f32.mrf.mxu3 }
 0xdf9   :  { %v5295_v32 = vpack.c.bf16 %v5241_v4, %v5239_v9 }
 0xdfa   :  { %v4810_v10 = vpack.c.bf16 %v4805_v22, %v4805_v22 }
 0xdfc   :  { %7521 = vmatmul.msk.bf16.gmra.mxu0 %vm1542_vm2, %v4810_v10 }
 0xe00   :  { %v5244_v41 = vpop.f32.mrf.mxu3 }
 0xe04   :  { %5436 = vmatmul.bf16.vlgmr.msrb.gmra.mxu3 %v5293_v43 }
 0xe08   :  { %v5246_v52 = vpop.f32.mrf.mxu3 }
 0xe09   :  { %v5297_v45 = vpack.c.bf16 %v5246_v52, %v5244_v41 }
 0xe0c   :  { %5407 = vmatmul.bf16.vlgmr.msra.gmra.mxu0 %v5292_v44 }
 0xe10   :  { %v5249_v25 = vpop.f32.mrf.mxu3 }
 0xe14   :  { %5441 = vmatmul.bf16.gmra.mxu3 %v5295_v32 }
 0xe18   :  { %v5251_v55 = vpop.f32.mrf.mxu3 }
 0xe19   :  { %v5299_v46 = vpack.c.bf16 %v5251_v55, %v5249_v25 }
 0xe1c   :  { %5412 = vmatmul.bf16.gmra.mxu0 %v5294_v38 }
 0xe24   :  { %5446 = vmatmul.bf16.gmra.mxu3 %v5297_v45 }
 0xe2c   :  { %5417 = vmatmul.bf16.gmra.mxu0 %v5296_v42 }
 0xe34   :  { %5451 = vmatmul.bf16.gmra.mxu3 %v5299_v46 }
 0xe3a   :  { %v4880_v59 = vpop.f32.mrf.mxu0 }
 0xe42   :  { %v4882_v61 = vpop.f32.mrf.mxu0 }
 0xe43   :  { %v5298_v2 = vpack.c.bf16 %v4882_v61, %v4880_v59 }
 0xe45   :  { %5422 = vmatmul.bf16.gmra.mxu0 %v5298_v2 }
 0xe77   :  { %v5254_v34 = vpop.f32.mrf.mxu3 }
 0xe79   :  { %v4885_v30 = vpop.f32.mrf.mxu0 }
 0xe7f   :  { %v5255_v40 = vpop.f32.mrf.mxu3 }
 0xe81   :  { %v4886_v0 = vpop.f32.mrf.mxu0 }
 0xe87   :  { %v5437_v11 = vpop.f32.mrf.mxu3 }
 0xe89   :  { %v5408_v56 = vpop.f32.mrf.mxu0 }
 0xe8a   :  { %v5409_v28 = vadd.f32 %v8061_v36, %v5408_v56 }
 0xe8c   :  { %v5438_v50 = vadd.f32 %v5437_v11, %v5409_v28 }
 0xe8e   :  { %v5458_v16 = vmul.f32 %v11894_v15, %v5438_v50 }
 0xe8f   :  { %v5439_v19 = vpop.f32.mrf.mxu3 }
 0xe90   :  { %v11898_v37 = vadd.f32 %v5458_v16, %v10682_v23 }
 0xe91   :  { %v5410_v26 = vpop.f32.mrf.mxu0 }
 0xe92   :  { %v5411_v5 = vadd.f32 %v8061_v36, %v5410_v26  ;;  %v5474_v57 = vsel %vm353_vm0, %v11898_v37, 0.0 }
 0xe93   :  { %5475 = vadd.xlane.f32.xlu1 %v5474_v57 }
 0xe94   :  { %v5440_v12 = vadd.f32 %v5439_v19, %v5411_v5 }
 0xe96   :  { %v5459_v63 = vmul.f32 %v11894_v15, %v5440_v12 }
 0xe97   :  { %v5442_v24 = vpop.f32.mrf.mxu3 }
 0xe98   :  { %v11904_v51 = vadd.f32 %v5459_v63, %v10687_v62 }
 0xe99   :  { %v5413_v31 = vpop.f32.mrf.mxu0 }
 0xe9a   :  { %v5414_v7 = vadd.f32 %v8061_v36, %v5413_v31  ;;  %v5477_v27 = vsel %vm353_vm0, %v11904_v51, 0.0 }
 0xe9b   :  { %5478 = vadd.xlane.f32.xlu0 %v5477_v27 }
 0xe9c   :  { %v5443_v23 = vadd.f32 %v5442_v24, %v5414_v7 }
 0xe9e   :  { %v5460_v35 = vmul.f32 %v11894_v15, %v5443_v23 }
 0xe9f   :  { %v5444_v6 = vpop.f32.mrf.mxu3 }
 0xea0   :  { %v11910_v14 = vadd.f32 %v5460_v35, %v10711_v54 }
 0xea1   :  { %v5415_v58 = vpop.f32.mrf.mxu0 }
 0xea2   :  { %v5416_v13 = vadd.f32 %v8061_v36, %v5415_v58  ;;  %v5480_v22 = vsel %vm353_vm0, %v11910_v14, 0.0 }
 0xea3   :  { %5481 = vadd.xlane.f32.xlu2 %v5480_v22 }
 0xea4   :  { %v5445_v62 = vadd.f32 %v5444_v6, %v5416_v13 }
 0xea6   :  { %v5461_v10 = vmul.f32 %v11894_v15, %v5445_v62 }
 0xea7   :  { %v5447_v18 = vpop.f32.mrf.mxu3 }
 0xea8   :  { %v11916_v9 = vadd.f32 %v5461_v10, %v10696_v33 }
 0xea9   :  { %v5418_v43 = vpop.f32.mrf.mxu0 }
 0xeaa   :  { %v5419_v4 = vadd.f32 %v8061_v36, %v5418_v43  ;;  %v5483_v17 = vsel %vm353_vm0, %v11916_v9, 0.0 }
 0xeab   :  { %5484 = vadd.xlane.f32.xlu1 %v5483_v17 }
 0xeac   :  { %v5448_v54 = vadd.f32 %v5447_v18, %v5419_v4 }
 0xeae   :  { %v5462_v44 = vmul.f32 %v11894_v15, %v5448_v54 }
 0xeaf   :  { %v5449_v33 = vpop.f32.mrf.mxu3 }
 0xeb0   :  { %v11922_v41 = vadd.f32 %v5462_v44, %v10701_v21  ;;  %v8031_v44 = vld [vmem:[%s12397_s17 + $0x74] sm:$0xf] }
 0xeb1   :  { %v5420_v32 = vpop.f32.mrf.mxu0 }
 0xeb2   :  { %v5421_v47 = vadd.f32 %v8061_v36, %v5420_v32  ;;  %v5486_v38 = vsel %vm353_vm0, %v11922_v41, 0.0  ;;  %v7661_v32 = vld [vmem:[%s12397_s17 + $0x78] sm:$0xf0] }
 0xeb3   :  { %5487 = vadd.xlane.f32.xlu0 %v5486_v38 }
 0xeb4   :  { %v5450_v52 = vadd.f32 %v5449_v33, %v5421_v47  ;;  %v7664_v47 = vor.u32 %v8031_v44, %v7661_v32 }
 0xeb6   :  { %v5463_v53 = vmul.f32 %v11894_v15, %v5450_v52  ;;  %5777 = vmatpush.bf16.msrb.mxu2 %v7664_v47 }
 0xeb7   :  { %v5452_v42 = vpop.f32.mrf.mxu3 }
 0xeb8   :  { %v11928_v45 = vadd.f32 %v5463_v53, %v10706_v8  ;;  %v7659_v53 = vld [vmem:[%s12397_s17 + $0x70] sm:$0xf] }
 0xeba   :  { %v5489_v25 = vsel %vm353_vm0, %v11928_v45, 0.0 }
 0xebb   :  { %5490 = vadd.xlane.f32.xlu2 %v5489_v25  ;;  %v8032_v25 = vld [vmem:[%s12397_s17 + $0x74] sm:$0xf0] }
 0xebf   :  { %v5454_v40 = vpop.f32.mrf.mxu3 }
 0xec2   :  { %v5423_v3 = vpop.f32.mrf.mxu0 }
 0xec3   :  { %v5424_v21 = vadd.f32 %v8061_v36, %v5423_v3  ;;  %v7660_v3 = vor.u32 %v8032_v25, %v7659_v53  ;;  %v12529_v53 = vld [vmem:[#allocation15_spill] sm:$0xff] }
 0xec4   :  { %v5650_v25 = vadd.f32 1.0, %v12529_v53 }
 0xec5   :  { %v5453_v55 = vadd.f32 %v5452_v42, %v5424_v21  ;;  %5748 = vmatpush.bf16.msra.mxu1 %v7660_v3  ;;  %v7651_v21 = vld [vmem:[%s12397_s17 + $0x60] sm:$0xf]  ;;  %v8030_v42 = vld [vmem:[%s12397_s17 + $0x64] sm:$0xf0] }
 0xec7   :  { %v5464_v46 = vmul.f32 %v11894_v15, %v5453_v55  ;;  %v8029_v55 = vld [vmem:[%s12397_s17 + $0x64] sm:$0xf] }
 0xec9   :  { %v11934_v59 = vadd.f32 %v5464_v46, %v10730_v1 }
 0xeca   :  { %v5425_v2 = vpop.f32.mrf.mxu0 }
 0xecb   :  { %v5492_v61 = vsel %vm353_vm0, %v11934_v59, 0.0  ;;  %v5426_v8 = vadd.f32 %v8061_v36, %v5425_v2  ;;  %v7652_v2 = vor.u32 %v8030_v42, %v7651_v21 }
 0xecc   :  { %5493 = vadd.xlane.f32.xlu2 %v5492_v61 }
 0xecd   :  { %v5455_v0 = vadd.f32 %v5454_v40, %v5426_v8  ;;  %v7653_v8 = vld [vmem:[%s12397_s17 + $0x68] sm:$0xf0]  ;;  %5749 = vmatpush.bf16.msra.mxu1 %v7652_v2 }
 0xece   :  { %v7656_v40 = vor.u32 %v8029_v55, %v7653_v8 }
 0xecf   :  { %v5465_v1 = vmul.f32 %v11894_v15, %v5455_v0 }
 0xed0   :  { %5778 = vmatpush.bf16.msrb.mxu2 %v7656_v40 }
 0xed1   :  { %v11951_v56 = vadd.f32 %v5465_v1, %v10736_v48 }
 0xed3   :  { %v5495_v16 = vsel %vm353_vm0, %v11951_v56, 0.0 }
 0xf06   :  { %v5476_v34 = vpop.xlane.xlu1 %5475 }
 0xf07   :  { %v5498_v30 = vmul.f32 %v5476_v34, %v12500_v49 }
 0xf09   :  { %v11940_v29 = vsub.f32 %v11898_v37, %v5498_v30 }
 0xf0b   :  { %v5514_v39 = vmul.f32 %v11940_v29, %v11940_v29 }
 0xf0d   :  { %v5522_v60 = vsel %vm353_vm0, %v5514_v39, 0.0 }
 0xf0e   :  { %v5479_v20 = vpop.xlane.xlu0 %5478  ;;  %5523 = vadd.xlane.f32.xlu1 %v5522_v60  ;;  %v7643_v60 = vld [vmem:[%s12397_s17 + $0x50] sm:$0xf] }
 0xf0f   :  { %v5499_v11 = vmul.f32 %v5479_v20, %v12500_v49  ;;  %v8028_v20 = vld [vmem:[%s12397_s17 + $0x54] sm:$0xf0] }
 0xf11   :  { %v11948_v36 = vsub.f32 %v11904_v51, %v5499_v11 }
 0xf13   :  { %v5515_v28 = vmul.f32 %v11948_v36, %v11948_v36 }
 0xf15   :  { %v5525_v50 = vsel %vm353_vm0, %v5515_v28, 0.0  ;;  %v7644_v28 = vor.u32 %v8028_v20, %v7643_v60 }
 0xf16   :  { %v5482_v19 = vpop.xlane.xlu2 %5481  ;;  %5526 = vadd.xlane.f32.xlu0 %v5525_v50  ;;  %5496 = vadd.xlane.f32.xlu1 %v5495_v16  ;;  %v8027_v50 = vld [vmem:[%s12397_s17 + $0x54] sm:$0xf]  ;;  %v7645_v16 = vld [vmem:[%s12397_s17 + $0x58] sm:$0xf0] }
 0xf17   :  { %v5500_v26 = vmul.f32 %v5482_v19, %v12500_v49  ;;  %5750 = vmatpush.bf16.msra.mxu1 %v7644_v28 }
 0xf19   :  { %v11960_v5 = vsub.f32 %v11910_v14, %v5500_v26  ;;  %v7648_v26 = vor.u32 %v8027_v50, %v7645_v16 }
 0xf1b   :  { %v5516_v48 = vmul.f32 %v11960_v5, %v11960_v5  ;;  %5779 = vmatpush.bf16.msrb.mxu2 %v7648_v26 }
 0xf1d   :  { %v5528_v57 = vsel %vm353_vm0, %v5516_v48, 0.0 }
 0xf1e   :  { %5529 = vadd.xlane.f32.xlu0 %v5528_v57  ;;  %v5485_v12 = vpop.xlane.xlu1 %5484 }
 0xf1f   :  { %v5501_v63 = vmul.f32 %v5485_v12, %v12500_v49  ;;  %v7635_v12 = vld [vmem:[%s12397_s17 + $0x40] sm:$0xf] }
 0xf21   :  { %v11967_v24 = vsub.f32 %v11916_v9, %v5501_v63  ;;  %v8026_v63 = vld [vmem:[%s12397_s17 + $0x44] sm:$0xf0] }
 0xf23   :  { %v5517_v31 = vmul.f32 %v11967_v24, %v11967_v24 }
 0xf25   :  { %v5531_v7 = vsel %vm353_vm0, %v5517_v31, 0.0 }
 0xf26   :  { %v5488_v27 = vpop.xlane.xlu0 %5487  ;;  %5532 = vadd.xlane.f32.xlu2 %v5531_v7 }
 0xf27   :  { %v5502_v23 = vmul.f32 %v5488_v27, %v12500_v49  ;;  %v7636_v27 = vor.u32 %v8026_v63, %v7635_v12 }
 0xf29   :  { %v11974_v35 = vsub.f32 %v11922_v41, %v5502_v23  ;;  %v8025_v23 = vld [vmem:[%s12397_s17 + $0x44] sm:$0xf]  ;;  %5751 = vmatpush.bf16.msra.mxu1 %v7636_v27 }
 0xf2b   :  { %v5518_v6 = vmul.f32 %v11974_v35, %v11974_v35 }
 0xf2d   :  { %v5534_v58 = vsel %vm353_vm0, %v5518_v6, 0.0  ;;  %v7637_v6 = vld [vmem:[%s12397_s17 + $0x48] sm:$0xf0] }
 0xf2e   :  { %v5491_v13 = vpop.xlane.xlu2 %5490  ;;  %5535 = vadd.xlane.f32.xlu0 %v5534_v58 }
 0xf2f   :  { %v5503_v22 = vmul.f32 %v5491_v13, %v12500_v49  ;;  %5661 = vrot.lane.b32.xlu1 %v11894_v15, %s8369_s28  ;;  %v7640_v13 = vor.u32 %v8025_v23, %v7637_v6 }
 0xf31   :  { %v11983_v62 = vsub.f32 %v11928_v45, %v5503_v22  ;;  %5780 = vmatpush.bf16.msrb.mxu2 %v7640_v13 }
 0xf33   :  { %v5519_v10 = vmul.f32 %v11983_v62, %v11983_v62 }
 0xf35   :  { %v5537_v18 = vsel %vm353_vm0, %v5519_v10, 0.0 }
 0xf36   :  { %5538 = vadd.xlane.f32.xlu2 %v5537_v18 }
 0xf3f   :  { %v5494_v43 = vpop.xlane.xlu2 %5493 }
 0xf40   :  { %v5504_v4 = vmul.f32 %v5494_v43, %v12500_v49 }
 0xf42   :  { %v11990_v17 = vsub.f32 %v11934_v59, %v5504_v4 }
 0xf44   :  { %v5520_v54 = vmul.f32 %v11990_v17, %v11990_v17 }
 0xf46   :  { %v5540_v15 = vsel %vm353_vm0, %v5520_v54, 0.0 }
 0xf47   :  { %5541 = vadd.xlane.f32.xlu0 %v5540_v15 }
 0xf81   :  { %v5524_v38 = vpop.xlane.xlu1 %5523 }
 0xf82   :  { %v5546_v33 = vmul.f32 %v5524_v38, %v12500_v49 }
 0xf84   :  { %v5554_v52 = vadd.f32 1e-06, %v5546_v33 }
 0xf86   :  { %8300 = vrsqrt.f32 %v5554_v52  ;;  %vm5568_vm14 = vweird.f32 %v5554_v52 }
 0xf89   :  { %v5527_v46 = vpop.xlane.xlu0 %5526  ;;  %v5497_v61 = vpop.xlane.xlu1 %5496 }
 0xf8a   :  { %v5547_v34 = vmul.f32 %v5527_v46, %v12500_v49  ;;  %v5505_v30 = vmul.f32 %v5497_v61, %v12500_v49  ;;  %v12056_v61 = vperm.slane %v5650_v25, 0 }
 0xf8c   :  { %v8301_v0 = vpop.eup %8300  ;;  %v5555_v39 = vadd.f32 1e-06, %v5547_v34  ;;  %v12023_v1 = vsub.f32 %v11951_v56, %v5505_v30 }
 0xf8d   :  { %v5563_v11 = vmul.f32 %v8301_v0, %v5554_v52  ;;  %vm5569_vm2 = vweird.f32 %v8301_v0 }
 0xf8e   :  { %8302 = vrsqrt.f32 %v5555_v39  ;;  %v5521_v19 = vmul.f32 %v12023_v1, %v12023_v1  ;;  %vm5570_vm12 = vmor %vm5568_vm14, %vm5569_vm2  ;;  %vm5578_vm3 = vweird.f32 %v5555_v39 }
 0xf8f   :  { %v5564_v48 = vmul.f32 %v8301_v0, %v5563_v11 }
 0xf90   :  { %v5543_v57 = vsel %vm353_vm0, %v5521_v19, 0.0 }
 0xf91   :  { %v5565_v31 = vmul.f32 0.5, %v5564_v48  ;;  %v5530_v7 = vpop.xlane.xlu0 %5529  ;;  %5544 = vadd.xlane.f32.xlu2 %v5543_v57 }
 0xf92   :  { %v5548_v58 = vmul.f32 %v5530_v7, %v12500_v49 }
 0xf93   :  { %v5566_v22 = vsub.f32 1.5, %v5565_v31 }
 0xf94   :  { %v8303_v10 = vpop.eup %8302  ;;  %v5556_v18 = vadd.f32 1e-06, %v5548_v58 }
 0xf95   :  { %v5573_v43 = vmul.f32 %v8303_v10, %v5555_v39  ;;  %v5567_v4 = vmul.f32 %v8301_v0, %v5566_v22  ;;  %vm5579_vm15 = vweird.f32 %v8303_v10 }
 0xf96   :  { %8304 = vrsqrt.f32 %v5556_v18  ;;  %vm5580_vm4 = vmor %vm5578_vm3, %vm5579_vm15  ;;  %vm5588_vm6 = vweird.f32 %v5556_v18 }
 0xf97   :  { %v5574_v54 = vmul.f32 %v8303_v10, %v5573_v43  ;;  %v5571_v47 = vsel %vm5570_vm12, %v8301_v0, %v5567_v4 }
 0xf98   :  { %v5642_v55 = vmul.f32 %v5571_v47, %v11940_v29 }
 0xf99   :  { %v5575_v15 = vmul.f32 0.5, %v5574_v54  ;;  %v5533_v44 = vpop.xlane.xlu2 %5532 }
 0xf9a   :  { %v5549_v32 = vmul.f32 %v5533_v44, %v12500_v49  ;;  %v5652_v40 = vmul.f32 %v12056_v61, %v5642_v55 }
 0xf9b   :  { %v5576_v38 = vsub.f32 1.5, %v5575_v15 }
 0xf9c   :  { %v8305_v33 = vpop.eup %8304  ;;  %v5557_v3 = vadd.f32 1e-06, %v5549_v32 }
 0xf9d   :  { %v5577_v21 = vmul.f32 %v8303_v10, %v5576_v38  ;;  %v5583_v42 = vmul.f32 %v8305_v33, %v5556_v18  ;;  %vm5589_vm5 = vweird.f32 %v8305_v33 }
 0xf9e   :  { %8306 = vrsqrt.f32 %v5557_v3  ;;  %vm5590_vm7 = vmor %vm5588_vm6, %vm5589_vm5  ;;  %vm5598_vm11 = vweird.f32 %v5557_v3 }
 0xf9f   :  { %v5581_v52 = vsel %vm5580_vm4, %v8303_v10, %v5577_v21  ;;  %v5584_v46 = vmul.f32 %v8305_v33, %v5583_v42 }
 0xfa0   :  { %v5643_v2 = vmul.f32 %v5581_v52, %v11948_v36 }
 0xfa1   :  { %v5585_v8 = vmul.f32 0.5, %v5584_v46  ;;  %v5536_v34 = vpop.xlane.xlu0 %5535  ;;  %v12059_v30 = vpop.permute.xlu1 %5661 }
 0xfa2   :  { %v5653_v0 = vmul.f32 %v12056_v61, %v5643_v2  ;;  %v5550_v39 = vmul.f32 %v5536_v34, %v12500_v49  ;;  %v5664_v11 = vadd.f32 %v12059_v30, %v5652_v40 }
 0xfa3   :  { %v5586_v60 = vsub.f32 1.5, %v5585_v8 }
 0xfa4   :  { %v8307_v29 = vpop.eup %8306  ;;  %v5558_v20 = vadd.f32 1e-06, %v5550_v39  ;;  %v5665_v28 = vadd.f32 %v12059_v30, %v5653_v0 }
 0xfa5   :  { %v5587_v50 = vmul.f32 %v8305_v33, %v5586_v60  ;;  %v5593_v36 = vmul.f32 %v8307_v29, %v5557_v3  ;;  %vm5599_vm8 = vweird.f32 %v8307_v29 }
 0xfa6   :  { %8308 = vrsqrt.f32 %v5558_v20  ;;  %v5683_v16 = vpack.c.bf16 %v5665_v28, %v5664_v11  ;;  %vm5600_vm9 = vmor %vm5598_vm11, %vm5599_vm8  ;;  %vm5608_vm1 = vweird.f32 %v5558_v20 }
 0xfa7   :  { %v5594_v19 = vmul.f32 %v8307_v29, %v5593_v36  ;;  %v5591_v26 = vsel %vm5590_vm7, %v8305_v33, %v5587_v50 }
 0xfa8   :  { %7665 = vmatmul.msk.bf16.vlgmr.msra.gmra.mxu1 %vm353_vm0, %v5683_v16  ;;  %7669 = vmatmul.msk.bf16.vlgmr.msrb.gmra.mxu2 %vm353_vm0, %v5683_v16  ;;  %v5644_v7 = vmul.f32 %v5591_v26, %v11960_v5 }
 0xfa9   :  { %v5595_v48 = vmul.f32 0.5, %v5594_v19  ;;  %v5539_v57 = vpop.xlane.xlu2 %5538 }
 0xfaa   :  { %v5551_v12 = vmul.f32 %v5539_v57, %v12500_v49  ;;  %v5654_v10 = vmul.f32 %v12056_v61, %v5644_v7 }
 0xfab   :  { %v5596_v63 = vsub.f32 1.5, %v5595_v48 }
 0xfac   :  { %v8309_v31 = vpop.eup %8308  ;;  %v5559_v27 = vadd.f32 1e-06, %v5551_v12  ;;  %v5666_v15 = vadd.f32 %v12059_v30, %v5654_v10 }
 0xfad   :  { %v5597_v23 = vmul.f32 %v8307_v29, %v5596_v63  ;;  %v5603_v6 = vmul.f32 %v8309_v31, %v5558_v20  ;;  %vm5609_vm10 = vweird.f32 %v8309_v31  ;;  %v8040_v63 = vld [vmem:[%s12399_s19 + $0xb8] sm:$0xff] }
 0xfae   :  { %8310 = vrsqrt.f32 %v5559_v27  ;;  %vm5610_vm13 = vmor %vm5608_vm1, %vm5609_vm10  ;;  %vm5618_vm14 = vweird.f32 %v5559_v27  ;;  %6088 = vmatpush.bf16.msrb.mxu0 %v8040_v63 }
 0xfaf   :  { %v5601_v58 = vsel %vm5600_vm9, %v8307_v29, %v5597_v23  ;;  %v5604_v13 = vmul.f32 %v8309_v31, %v5603_v6  ;;  %v8039_v23 = vld [vmem:[%s12399_s19 + $0xb0] sm:$0xff] }
 0xfb0   :  { %v5645_v22 = vmul.f32 %v5601_v58, %v11967_v24 }
 0xfb1   :  { %v5605_v18 = vmul.f32 0.5, %v5604_v13  ;;  %v8048_v13 = vld [vmem:[%s12399_s19 + $0xf8] sm:$0xff] }
 0xfb2   :  { %v5655_v43 = vmul.f32 %v12056_v61, %v5645_v22  ;;  %6089 = vmatpush.bf16.msrb.mxu0 %v8039_v23  ;;  %6117 = vmatpush.bf16.msra.mxu3 %v8048_v13  ;;  %v8038_v22 = vld [vmem:[%s12399_s19 + $0xa8] sm:$0xff] }
 0xfb3   :  { %v5606_v4 = vsub.f32 1.5, %v5605_v18 }
 0xfb4   :  { %v8311_v54 = vpop.eup %8310  ;;  %v5667_v5 = vadd.f32 %v12059_v30, %v5655_v43  ;;  %v8047_v43 = vld [vmem:[%s12399_s19 + $0xf0] sm:$0xff] }
 0xfb5   :  { %v5607_v44 = vmul.f32 %v8309_v31, %v5606_v4  ;;  %v5613_v32 = vmul.f32 %v8311_v54, %v5559_v27  ;;  %vm5619_vm2 = vweird.f32 %v8311_v54 }
 0xfb6   :  { %v5684_v47 = vpack.c.bf16 %v5667_v5, %v5666_v15  ;;  %vm5620_vm12 = vmor %vm5618_vm14, %vm5619_vm2  ;;  %6090 = vmatpush.bf16.msrb.mxu0 %v8038_v22  ;;  %6118 = vmatpush.bf16.msra.mxu3 %v8047_v43 }
 0xfb7   :  { %v5614_v38 = vmul.f32 %v8311_v54, %v5613_v32  ;;  %v5611_v24 = vsel %vm5610_vm13, %v8309_v31, %v5607_v44  ;;  %v8036_v44 = vld [vmem:[%s12399_s19 + $0x98] sm:$0xff] }
 0xfb8   :  { %7666 = vmatmul.msk.bf16.gmra.mxu1 %vm353_vm0, %v5684_v47  ;;  %7670 = vmatmul.msk.bf16.gmra.mxu2 %vm353_vm0, %v5684_v47  ;;  %v5646_v3 = vmul.f32 %v5611_v24, %v11974_v35 }
 0xfb9   :  { %v5615_v33 = vmul.f32 0.5, %v5614_v38  ;;  %v8045_v38 = vld [vmem:[%s12399_s19 + $0xe0] sm:$0xff] }
 0xfba   :  { %v5656_v52 = vmul.f32 %v12056_v61, %v5646_v3  ;;  %v5542_v35 = vpop.xlane.xlu0 %5541 }
 0xfbb   :  { %v5616_v25 = vsub.f32 1.5, %v5615_v33  ;;  %v5552_v40 = vmul.f32 %v5542_v35, %v12500_v49  ;;  %v8035_v33 = vld [vmem:[%s12399_s19 + $0x90] sm:$0xff] }
 0xfbc   :  { %v5668_v2 = vadd.f32 %v12059_v30, %v5656_v52  ;;  %v8034_v52 = vld [vmem:[%s12399_s19 + $0x88] sm:$0xff] }
 0xfbd   :  { %v5617_v21 = vmul.f32 %v8311_v54, %v5616_v25  ;;  %v5560_v0 = vadd.f32 1e-06, %v5552_v40 }
 0xfbf   :  { %v5621_v42 = vsel %vm5620_vm12, %v8311_v54, %v5617_v21  ;;  %8312 = vrsqrt.f32 %v5560_v0  ;;  %vm5628_vm3 = vweird.f32 %v5560_v0  ;;  %v8037_v54 = vld [vmem:[%s12399_s19 + $0xa0] sm:$0xff] }
 0xfc0   :  { %v5647_v55 = vmul.f32 %v5621_v42, %v11983_v62  ;;  %6091 = vmatpush.bf16.msrb.mxu0 %v8037_v54  ;;  %v8044_v42 = vld [vmem:[%s12399_s19 + $0xd8] sm:$0xff] }
 0xfc2   :  { %v5657_v46 = vmul.f32 %v12056_v61, %v5647_v55 }
 0xfc4   :  { %v5669_v8 = vadd.f32 %v12059_v30, %v5657_v46  ;;  %6092 = vmatpush.bf16.msrb.mxu0 %v8036_v44 }
 0xfc5   :  { %v8313_v39 = vpop.eup %8312 }
 0xfc6   :  { %v5685_v34 = vpack.c.bf16 %v5669_v8, %v5668_v2  ;;  %v5623_v62 = vmul.f32 %v8313_v39, %v5560_v0  ;;  %vm5629_vm15 = vweird.f32 %v8313_v39  ;;  %v8043_v0 = vld [vmem:[%s12399_s19 + $0xd0] sm:$0xff] }
 0xfc7   :  { %vm5630_vm4 = vmor %vm5628_vm3, %vm5629_vm15 }
 0xfc8   :  { %7667 = vmatmul.msk.bf16.gmra.mxu1 %vm353_vm0, %v5685_v34  ;;  %7671 = vmatmul.msk.bf16.gmra.mxu2 %vm353_vm0, %v5685_v34  ;;  %v5624_v60 = vmul.f32 %v8313_v39, %v5623_v62 }
 0xfc9   :  { %6093 = vmatpush.bf16.msrb.mxu0 %v8035_v33 }
 0xfca   :  { %v5625_v28 = vmul.f32 0.5, %v5624_v60  ;;  %v8033_v60 = vld [vmem:[%s12399_s19 + $0x80] sm:$0xff] }
 0xfcc   :  { %v5626_v50 = vsub.f32 1.5, %v5625_v28 }
 0xfcd   :  { %6094 = vmatpush.bf16.msrb.mxu0 %v8034_v52 }
 0xfce   :  { %v5627_v16 = vmul.f32 %v8313_v39, %v5626_v50 }
 0xfd0   :  { %v5631_v48 = vsel %vm5630_vm4, %v8313_v39, %v5627_v16 }
 0xfd1   :  { %v5648_v31 = vmul.f32 %v5631_v48, %v11990_v17  ;;  %6095 = vmatpush.bf16.msrb.mxu0 %v8033_v60 }
 0xfd3   :  { %v5658_v58 = vmul.f32 %v12056_v61, %v5648_v31  ;;  %v8041_v31 = vld [vmem:[%s12399_s19 + $0xc0] sm:$0xff] }
 0xfd5   :  { %v5670_v10 = vadd.f32 %v12059_v30, %v5658_v58 }
0x1004   :  { %v5545_v29 = vpop.xlane.xlu2 %5544 }
0x1005   :  { %v5553_v20 = vmul.f32 %v5545_v29, %v12500_v49  ;;  %v8042_v29 = vld [vmem:[%s12399_s19 + $0xc8] sm:$0xff] }
0x1007   :  { %v5561_v11 = vadd.f32 1e-06, %v5553_v20 }
0x1009   :  { %8314 = vrsqrt.f32 %v5561_v11  ;;  %vm5638_vm6 = vweird.f32 %v5561_v11 }
0x100f   :  { %v8315_v36 = vpop.eup %8314 }
0x1010   :  { %v5633_v19 = vmul.f32 %v8315_v36, %v5561_v11  ;;  %vm5639_vm5 = vweird.f32 %v8315_v36 }
0x1011   :  { %vm5640_vm7 = vmor %vm5638_vm6, %vm5639_vm5 }
0x1012   :  { %v5634_v26 = vmul.f32 %v8315_v36, %v5633_v19 }
0x1014   :  { %v5635_v57 = vmul.f32 0.5, %v5634_v26 }
0x1016   :  { %v5636_v12 = vsub.f32 1.5, %v5635_v57 }
0x1018   :  { %v5637_v7 = vmul.f32 %v8315_v36, %v5636_v12 }
0x101a   :  { %v5641_v27 = vsel %vm5640_vm7, %v8315_v36, %v5637_v7 }
0x101b   :  { %v5649_v6 = vmul.f32 %v5641_v27, %v12023_v1  ;;  %v7632_v1 = vld [vmem:[%s12400_s18 + $0x2] sm:$0x3] }
0x101c   :  { %v12129_v47 = vperm.slane %v7632_v1, 1 }
0x101d   :  { %v5659_v17 = vmul.f32 %v12056_v61, %v5649_v6  ;;  %v12111_v61 = vperm.slane %v7632_v1, 0 }
0x101f   :  { %v5671_v18 = vadd.f32 %v12059_v30, %v5659_v17  ;;  %v8046_v30 = vld [vmem:[%s12399_s19 + $0xe8] sm:$0xff] }
0x1020   :  { %6119 = vmatpush.bf16.msra.mxu3 %v8046_v30 }
0x1021   :  { %v5686_v4 = vpack.c.bf16 %v5671_v18, %v5670_v10 }
0x1023   :  { %7668 = vmatmul.msk.bf16.gmra.mxu1 %vm353_vm0, %v5686_v4  ;;  %7672 = vmatmul.msk.bf16.gmra.mxu2 %vm353_vm0, %v5686_v4 }
0x1024   :  { %6120 = vmatpush.bf16.msra.mxu3 %v8045_v38 }
0x1025   :  { %v5753_v15 = vpop.f32.mrf.mxu1 }
0x1026   :  { %v12122_v5 = vadd.f32 %v5753_v15, %v12111_v61 }
0x1028   :  { %v5802_v32 = vmul.f32 %v12122_v5, %v12122_v5  ;;  %6121 = vmatpush.bf16.msra.mxu3 %v8044_v42 }
0x102a   :  { %v5818_v24 = vmul.f32 %v5802_v32, %v12122_v5 }
0x102b   :  { %v5782_v25 = vpop.f32.mrf.mxu2 }
0x102c   :  { %v5834_v3 = vmul.f32 0.044715, %v5818_v24  ;;  %v12139_v21 = vadd.f32 %v5782_v25, %v12129_v47  ;;  %6122 = vmatpush.bf16.msra.mxu3 %v8043_v0 }
0x102d   :  { %v5755_v55 = vpop.f32.mrf.mxu1 }
0x102e   :  { %v5850_v46 = vadd.f32 %v5834_v3, %v12122_v5  ;;  %v5803_v2 = vmul.f32 %v12139_v21, %v12139_v21  ;;  %v5756_v8 = vadd.f32 %v5755_v55, %v12111_v61 }
0x1030   :  { %v5866_v34 = vmul.f32 0.7978846, %v5850_v46  ;;  %v5819_v35 = vmul.f32 %v5803_v2, %v12139_v21  ;;  %v5804_v40 = vmul.f32 %v5756_v8, %v5756_v8  ;;  %6123 = vmatpush.bf16.msra.mxu3 %v8042_v29 }
0x1032   :  { %v5835_v39 = vmul.f32 0.044715, %v5819_v35  ;;  %v5820_v62 = vmul.f32 %v5804_v40, %v5756_v8  ;;  %8316 = vtanh.f32 %v5866_v34 }
0x1033   :  { %v5784_v20 = vpop.f32.mrf.mxu2 }
0x1034   :  { %v5851_v11 = vadd.f32 %v5835_v39, %v12139_v21  ;;  %v5836_v28 = vmul.f32 0.044715, %v5820_v62  ;;  %v12163_v50 = vadd.f32 %v5784_v20, %v12129_v47  ;;  %6124 = vmatpush.bf16.msra.mxu3 %v8041_v31 }
0x1035   :  { %v5758_v36 = vpop.f32.mrf.mxu1 }
0x1036   :  { %v5867_v16 = vmul.f32 0.7978846, %v5851_v11  ;;  %v5852_v19 = vadd.f32 %v5836_v28, %v5756_v8  ;;  %v5805_v26 = vmul.f32 %v12163_v50, %v12163_v50  ;;  %v12168_v48 = vadd.f32 %v5758_v36, %v12111_v61 }
0x1038   :  { %v5868_v57 = vmul.f32 0.7978846, %v5852_v19  ;;  %v5821_v12 = vmul.f32 %v5805_v26, %v12163_v50  ;;  %v5806_v63 = vmul.f32 %v12168_v48, %v12168_v48  ;;  %8318 = vtanh.f32 %v5867_v16  ;;  %v8317_v7 = vpop.eup %8316 }
0x1039   :  { %v5898_v22 = vadd.f32 1.0, %v8317_v7 }
0x103a   :  { %8320 = vtanh.f32 %v5868_v57  ;;  %v5837_v27 = vmul.f32 0.044715, %v5821_v12  ;;  %v5822_v23 = vmul.f32 %v5806_v63, %v12168_v48 }
0x103b   :  { %v5787_v6 = vpop.f32.mrf.mxu2  ;;  %v5914_v38 = vmul.f32 0.5, %v5898_v22 }
0x103c   :  { %v5853_v58 = vadd.f32 %v5837_v27, %v12163_v50  ;;  %v5838_v13 = vmul.f32 0.044715, %v5822_v23  ;;  %v12179_v17 = vadd.f32 %v5787_v6, %v12129_v47 }
0x103d   :  { %v5760_v10 = vpop.f32.mrf.mxu1  ;;  %v5930_v34 = vmul.f32 %v5914_v38, %v12122_v5 }
0x103e   :  { %v5869_v18 = vmul.f32 0.7978846, %v5853_v58  ;;  %v5854_v1 = vadd.f32 %v5838_v13, %v12168_v48  ;;  %v5807_v43 = vmul.f32 %v12179_v17, %v12179_v17  ;;  %v12185_v4 = vadd.f32 %v5760_v10, %v12111_v61  ;;  %v8319_v54 = vpop.eup %8318 }
0x103f   :  { %v5899_v3 = vadd.f32 1.0, %v8319_v54 }
0x1040   :  { %v8321_v30 = vpop.eup %8320  ;;  %8322 = vtanh.f32 %v5869_v18  ;;  %v5870_v15 = vmul.f32 0.7978846, %v5854_v1  ;;  %v5823_v44 = vmul.f32 %v5807_v43, %v12179_v17  ;;  %v5808_v32 = vmul.f32 %v12185_v4, %v12185_v4 }
0x1041   :  { %v5900_v24 = vadd.f32 1.0, %v8321_v30  ;;  %v5915_v20 = vmul.f32 0.5, %v5899_v3 }
0x1042   :  { %v5839_v33 = vmul.f32 0.044715, %v5823_v44  ;;  %v5824_v25 = vmul.f32 %v5808_v32, %v12185_v4  ;;  %8324 = vtanh.f32 %v5870_v15 }
0x1043   :  { %v5916_v42 = vmul.f32 0.5, %v5900_v24  ;;  %v5789_v55 = vpop.f32.mrf.mxu2  ;;  %v5931_v12 = vmul.f32 %v5915_v20, %v12139_v21 }
0x1044   :  { %v5855_v52 = vadd.f32 %v5839_v33, %v12179_v17  ;;  %v5840_v46 = vmul.f32 0.044715, %v5824_v25  ;;  %v12193_v2 = vadd.f32 %v5789_v55, %v12129_v47 }
0x1045   :  { %v5932_v35 = vmul.f32 %v5916_v42, %v5756_v8  ;;  %v5763_v40 = vpop.f32.mrf.mxu1 }
0x1046   :  { %v8323_v0 = vpop.eup %8322  ;;  %v5871_v39 = vmul.f32 0.7978846, %v5855_v52  ;;  %v5856_v62 = vadd.f32 %v5840_v46, %v12185_v4  ;;  %v5809_v60 = vmul.f32 %v12193_v2, %v12193_v2  ;;  %v12200_v29 = vadd.f32 %v5763_v40, %v12111_v61 }
0x1047   :  { %v5981_v11 = vpack.c.bf16 %v5932_v35, %v5930_v34  ;;  %v5901_v28 = vadd.f32 1.0, %v8323_v0 }
0x1048   :  { %v5872_v36 = vmul.f32 0.7978846, %v5856_v62  ;;  %v5825_v16 = vmul.f32 %v5809_v60, %v12193_v2  ;;  %v5810_v5 = vmul.f32 %v12200_v29, %v12200_v29  ;;  %8326 = vtanh.f32 %v5871_v39  ;;  %v8325_v19 = vpop.eup %8324 }
0x1049   :  { %v5917_v8 = vmul.f32 0.5, %v5901_v28  ;;  %6096 = vmatmul.bf16.vlgmr.msrb.gmra.mxu0 %v5981_v11  ;;  %v5902_v13 = vadd.f32 1.0, %v8325_v19 }
0x104a   :  { %8328 = vtanh.f32 %v5872_v36  ;;  %v5841_v26 = vmul.f32 0.044715, %v5825_v16  ;;  %v5826_v57 = vmul.f32 %v5810_v5, %v12200_v29 }
0x104b   :  { %v5933_v63 = vmul.f32 %v5917_v8, %v12163_v50  ;;  %v5792_v31 = vpop.f32.mrf.mxu2  ;;  %v5918_v44 = vmul.f32 0.5, %v5902_v13 }
0x104c   :  { %v5857_v7 = vadd.f32 %v5841_v26, %v12193_v2  ;;  %v5842_v27 = vmul.f32 0.044715, %v5826_v57  ;;  %v12210_v23 = vadd.f32 %v5792_v31, %v12129_v47 }
0x104d   :  { %v5982_v6 = vpack.c.bf16 %v5933_v63, %v5931_v12  ;;  %v5765_v58 = vpop.f32.mrf.mxu1  ;;  %v5934_v52 = vmul.f32 %v5918_v44, %v12168_v48 }
0x104e   :  { %v5873_v22 = vmul.f32 0.7978846, %v5857_v7  ;;  %v5858_v10 = vadd.f32 %v5842_v27, %v12200_v29  ;;  %v5811_v18 = vmul.f32 %v12210_v23, %v12210_v23  ;;  %v5766_v21 = vadd.f32 %v5765_v58, %v12111_v61  ;;  %v8327_v1 = vpop.eup %8326 }
0x104f   :  { %6125 = vmatmul.bf16.vlgmr.msra.gmra.mxu3 %v5982_v6  ;;  %v5903_v25 = vadd.f32 1.0, %v8327_v1 }
0x1050   :  { %v8329_v50 = vpop.eup %8328  ;;  %8330 = vtanh.f32 %v5873_v22  ;;  %v5874_v43 = vmul.f32 0.7978846, %v5858_v10  ;;  %v5827_v54 = vmul.f32 %v5811_v18, %v12210_v23  ;;  %v5812_v30 = vmul.f32 %v5766_v21, %v5766_v21 }
0x1051   :  { %v5904_v15 = vadd.f32 1.0, %v8329_v50  ;;  %v5919_v60 = vmul.f32 0.5, %v5903_v25 }
0x1052   :  { %v5843_v32 = vmul.f32 0.044715, %v5827_v54  ;;  %v5828_v38 = vmul.f32 %v5812_v30, %v5766_v21  ;;  %8332 = vtanh.f32 %v5874_v43 }
0x1053   :  { %v5794_v24 = vpop.f32.mrf.mxu2  ;;  %v5920_v33 = vmul.f32 0.5, %v5904_v15  ;;  %v5935_v5 = vmul.f32 %v5919_v60, %v12179_v17 }
0x1054   :  { %v5859_v3 = vadd.f32 %v5843_v32, %v12210_v23  ;;  %v5844_v42 = vmul.f32 0.044715, %v5828_v38  ;;  %v5795_v55 = vadd.f32 %v5794_v24, %v12129_v47 }
0x1055   :  { %v5936_v46 = vmul.f32 %v5920_v33, %v12185_v4 }
0x1056   :  { %v8331_v34 = vpop.eup %8330  ;;  %v5875_v35 = vmul.f32 0.7978846, %v5859_v3  ;;  %v5860_v40 = vadd.f32 %v5844_v42, %v5766_v21  ;;  %v5813_v0 = vmul.f32 %v5795_v55, %v5795_v55 }
0x1057   :  { %v5983_v39 = vpack.c.bf16 %v5936_v46, %v5934_v52  ;;  %v5905_v62 = vadd.f32 1.0, %v8331_v34 }
0x1058   :  { %v5876_v20 = vmul.f32 0.7978846, %v5860_v40  ;;  %v5829_v11 = vmul.f32 %v5813_v0, %v5795_v55  ;;  %8334 = vtanh.f32 %v5875_v35  ;;  %v8333_v36 = vpop.eup %8332 }
0x1059   :  { %6101 = vmatmul.bf16.gmra.mxu0 %v5983_v39  ;;  %v5921_v28 = vmul.f32 0.5, %v5905_v62  ;;  %v5906_v19 = vadd.f32 1.0, %v8333_v36 }
0x105a   :  { %8336 = vtanh.f32 %v5876_v20  ;;  %v5845_v16 = vmul.f32 0.044715, %v5829_v11 }
0x105b   :  { %v5937_v48 = vmul.f32 %v5921_v28, %v12193_v2  ;;  %v5922_v31 = vmul.f32 0.5, %v5906_v19 }
0x105c   :  { %v5861_v4 = vadd.f32 %v5845_v16, %v5795_v55 }
0x105d   :  { %v5984_v8 = vpack.c.bf16 %v5937_v48, %v5935_v5  ;;  %v5938_v6 = vmul.f32 %v5922_v31, %v12200_v29 }
0x105e   :  { %v5877_v26 = vmul.f32 0.7978846, %v5861_v4  ;;  %v8335_v57 = vpop.eup %8334 }
0x105f   :  { %6130 = vmatmul.bf16.gmra.mxu3 %v5984_v8  ;;  %v5907_v27 = vadd.f32 1.0, %v8335_v57 }
0x1060   :  { %v8337_v12 = vpop.eup %8336  ;;  %8338 = vtanh.f32 %v5877_v26 }
0x1061   :  { %v5908_v63 = vadd.f32 1.0, %v8337_v12  ;;  %v5923_v10 = vmul.f32 0.5, %v5907_v27 }
0x1063   :  { %v5924_v7 = vmul.f32 0.5, %v5908_v63  ;;  %v5939_v18 = vmul.f32 %v5923_v10, %v12210_v23 }
0x1065   :  { %v5940_v58 = vmul.f32 %v5924_v7, %v5766_v21 }
0x1066   :  { %v8339_v13 = vpop.eup %8338 }
0x1067   :  { %v5985_v22 = vpack.c.bf16 %v5940_v58, %v5938_v6  ;;  %v5909_v17 = vadd.f32 1.0, %v8339_v13 }
0x1069   :  { %6106 = vmatmul.bf16.gmra.mxu0 %v5985_v22  ;;  %v5925_v2 = vmul.f32 0.5, %v5909_v17  ;;  %v8062_v22 = vld [vmem:[%s12401_s20 + $0x1] ss:$0 sm:$0xff] }
0x106b   :  { %v5941_v1 = vmul.f32 %v5925_v2, %v5795_v55 }
0x106d   :  { %v5986_v50 = vpack.c.bf16 %v5941_v1, %v5939_v18 }
0x106f   :  { %6135 = vmatmul.bf16.gmra.mxu3 %v5986_v50 }
0x10a0   :  { %v5768_v43 = vpop.f32.mrf.mxu1 }
0x10a1   :  { %v5769_v54 = vadd.f32 %v5768_v43, %v12111_v61 }
0x10a3   :  { %v5814_v30 = vmul.f32 %v5769_v54, %v5769_v54 }
0x10a5   :  { %v5830_v15 = vmul.f32 %v5814_v30, %v5769_v54 }
0x10a6   :  { %v5797_v44 = vpop.f32.mrf.mxu2 }
0x10a7   :  { %v5846_v32 = vmul.f32 0.044715, %v5830_v15  ;;  %v5798_v29 = vadd.f32 %v5797_v44, %v12129_v47 }
0x10a8   :  { %v5770_v21 = vpop.f32.mrf.mxu1 }
0x10a9   :  { %v5862_v38 = vadd.f32 %v5846_v32, %v5769_v54  ;;  %v5815_v24 = vmul.f32 %v5798_v29, %v5798_v29  ;;  %v5771_v33 = vadd.f32 %v5770_v21, %v12111_v61 }
0x10ab   :  { %v5878_v25 = vmul.f32 0.7978846, %v5862_v38  ;;  %v5831_v3 = vmul.f32 %v5815_v24, %v5798_v29  ;;  %v5816_v23 = vmul.f32 %v5771_v33, %v5771_v33 }
0x10ad   :  { %v5847_v42 = vmul.f32 0.044715, %v5831_v3  ;;  %v5832_v55 = vmul.f32 %v5816_v23, %v5771_v33  ;;  %8340 = vtanh.f32 %v5878_v25 }
0x10ae   :  { %v5799_v52 = vpop.f32.mrf.mxu2 }
0x10af   :  { %v5863_v46 = vadd.f32 %v5847_v42, %v5798_v29  ;;  %v5848_v34 = vmul.f32 0.044715, %v5832_v55  ;;  %v5800_v35 = vadd.f32 %v5799_v52, %v12129_v47 }
0x10b1   :  { %v5879_v40 = vmul.f32 0.7978846, %v5863_v46  ;;  %v5864_v0 = vadd.f32 %v5848_v34, %v5771_v33  ;;  %v5817_v39 = vmul.f32 %v5800_v35, %v5800_v35  ;;  %v6146_v46 = vperm.slane %v12529_v53, 0 }
0x10b3   :  { %v5880_v62 = vmul.f32 0.7978846, %v5864_v0  ;;  %v5833_v60 = vmul.f32 %v5817_v39, %v5800_v35  ;;  %8342 = vtanh.f32 %v5879_v40  ;;  %v8341_v20 = vpop.eup %8340 }
0x10b4   :  { %v5910_v28 = vadd.f32 1.0, %v8341_v20 }
0x10b5   :  { %8344 = vtanh.f32 %v5880_v62  ;;  %v5849_v61 = vmul.f32 0.044715, %v5833_v60 }
0x10b6   :  { %v5926_v4 = vmul.f32 0.5, %v5910_v28 }
0x10b7   :  { %v5865_v11 = vadd.f32 %v5849_v61, %v5800_v35 }
0x10b8   :  { %v5942_v47 = vmul.f32 %v5926_v4, %v5769_v54 }
0x10b9   :  { %v5881_v36 = vmul.f32 0.7978846, %v5865_v11  ;;  %v8343_v16 = vpop.eup %8342 }
0x10ba   :  { %v5911_v19 = vadd.f32 1.0, %v8343_v16 }
0x10bb   :  { %v8345_v5 = vpop.eup %8344  ;;  %8346 = vtanh.f32 %v5881_v36 }
0x10bc   :  { %v5912_v48 = vadd.f32 1.0, %v8345_v5  ;;  %v5927_v31 = vmul.f32 0.5, %v5911_v19 }
0x10be   :  { %v5928_v8 = vmul.f32 0.5, %v5912_v48  ;;  %v5943_v6 = vmul.f32 %v5927_v31, %v5798_v29 }
0x10c0   :  { %v5944_v26 = vmul.f32 %v5928_v8, %v5771_v33 }
0x10c1   :  { %v8347_v57 = vpop.eup %8346 }
0x10c2   :  { %v5987_v12 = vpack.c.bf16 %v5944_v26, %v5942_v47  ;;  %v5913_v63 = vadd.f32 1.0, %v8347_v57 }
0x10c4   :  { %6111 = vmatmul.bf16.gmra.mxu0 %v5987_v12  ;;  %v5929_v7 = vmul.f32 0.5, %v5913_v63 }
0x10c6   :  { %v6097_v27 = vpop.f32.mrf.mxu0  ;;  %v5945_v58 = vmul.f32 %v5929_v7, %v5800_v35 }
0x10c7   :  { %v6098_v10 = vadd.f32 %v8062_v22, %v6097_v27 }
0x10c8   :  { %v5988_v13 = vpack.c.bf16 %v5945_v58, %v5943_v6 }
0x10ca   :  { %6140 = vmatmul.bf16.gmra.mxu3 %v5988_v13 }
0x10ce   :  { %v6099_v17 = vpop.f32.mrf.mxu0 }
0x10cf   :  { %v6100_v50 = vadd.f32 %v8062_v22, %v6099_v17 }
0x10d2   :  { %v6126_v2 = vpop.f32.mrf.mxu3 }
0x10d3   :  { %v6127_v18 = vadd.f32 %v6126_v2, %v6098_v10 }
0x10d5   :  { %6155 = vrot.lane.b32.xlu0 %v6127_v18, %s8369_s28 }
0x10d6   :  { %v6102_v1 = vpop.f32.mrf.mxu0 }
0x10d7   :  { %v6103_v30 = vadd.f32 %v8062_v22, %v6102_v1 }
0x10da   :  { %v6128_v43 = vpop.f32.mrf.mxu3 }
0x10db   :  { %v6129_v54 = vadd.f32 %v6128_v43, %v6100_v50 }
0x10dd   :  { %6157 = vrot.lane.b32.xlu2 %v6129_v54, %s8369_s28 }
0x10de   :  { %v6104_v15 = vpop.f32.mrf.mxu0 }
0x10df   :  { %v6105_v29 = vadd.f32 %v8062_v22, %v6104_v15 }
0x10e2   :  { %v6131_v44 = vpop.f32.mrf.mxu3 }
0x10e3   :  { %v6132_v32 = vadd.f32 %v6131_v44, %v6103_v30 }
0x10e5   :  { %6159 = vrot.lane.b32.xlu1 %v6132_v32, %s8369_s28 }
0x10e6   :  { %v6107_v24 = vpop.f32.mrf.mxu0 }
0x10e7   :  { %v6108_v33 = vadd.f32 %v8062_v22, %v6107_v24 }
0x10ea   :  { %v6133_v21 = vpop.f32.mrf.mxu3 }
0x10eb   :  { %v6134_v38 = vadd.f32 %v6133_v21, %v6105_v29 }
0x10ed   :  { %6161 = vrot.lane.b32.xlu1 %v6134_v38, %s8369_s28 }
0x10ee   :  { %v6109_v23 = vpop.f32.mrf.mxu0 }
0x10ef   :  { %v6110_v42 = vadd.f32 %v8062_v22, %v6109_v23 }
0x10f2   :  { %v6136_v25 = vpop.f32.mrf.mxu3 }
0x10f3   :  { %v6137_v3 = vadd.f32 %v6136_v25, %v6108_v33 }
0x10f5   :  { %6163 = vrot.lane.b32.xlu0 %v6137_v3, %s8369_s28 }
0x10fa   :  { %v6138_v55 = vpop.f32.mrf.mxu3 }
0x10fb   :  { %v6139_v52 = vadd.f32 %v6138_v55, %v6110_v42 }
0x10fd   :  { %6165 = vrot.lane.b32.xlu1 %v6139_v52, %s8369_s28 }
0x1137   :  { %v6158_v34 = vpop.permute.xlu2 %6157 }
0x1138   :  { %v6180_v35 = vmul.f32 %v6158_v34, %v6146_v46 }
0x113a   :  { %6197 = vrot.lane.b32.xlu0 %v6180_v35, %s8369_s28 }
0x1141   :  { %v6112_v40 = vpop.f32.mrf.mxu0 }
0x1142   :  { %v6113_v62 = vadd.f32 %v8062_v22, %v6112_v40 }
0x1147   :  { %v6156_v0 = vpop.permute.xlu0 %6155 }
0x1148   :  { %v6179_v39 = vmul.f32 %v6156_v0, %v6146_v46 }
0x1149   :  { %v6114_v61 = vpop.f32.mrf.mxu0 }
0x114a   :  { %6195 = vrot.lane.b32.xlu2 %v6179_v39, %s8369_s28  ;;  %v6115_v11 = vadd.f32 %v8062_v22, %v6114_v61 }
0x114d   :  { %v6141_v60 = vpop.f32.mrf.mxu3 }
0x114e   :  { %v6142_v20 = vadd.f32 %v6141_v60, %v6113_v62 }
0x1150   :  { %6167 = vrot.lane.b32.xlu1 %v6142_v20, %s8369_s28 }
0x1155   :  { %v6143_v28 = vpop.f32.mrf.mxu3 }
0x1156   :  { %v6144_v36 = vadd.f32 %v6143_v28, %v6115_v11 }
0x1157   :  { %v6160_v16 = vpop.permute.xlu1 %6159 }
0x1158   :  { %v6181_v53 = vmul.f32 %v6160_v16, %v6146_v46  ;;  %6169 = vrot.lane.b32.xlu2 %v6144_v36, %s8369_s28 }
0x115a   :  { %6199 = vrot.lane.b32.xlu0 %v6181_v53, %s8369_s28 }
0x115f   :  { %v6162_v5 = vpop.permute.xlu1 %6161 }
0x1160   :  { %v6182_v48 = vmul.f32 %v6162_v5, %v6146_v46 }
0x1162   :  { %6201 = vrot.lane.b32.xlu1 %v6182_v48, %s8369_s28 }
0x1167   :  { %v6164_v4 = vpop.permute.xlu0 %6163 }
0x1168   :  { %v6183_v8 = vmul.f32 %v6164_v4, %v6146_v46  ;;  %v8052_v4 = vld [vmem:[%s12405_s25 + $0x18] sm:$0xff] }
0x1169   :  { %6459 = vmatpush.bf16.msrb.mxu1 %v8052_v4 }
0x116a   :  { %6203 = vrot.lane.b32.xlu2 %v6183_v8, %s8369_s28 }
0x116f   :  { %v6166_v19 = vpop.permute.xlu1 %6165 }
0x1170   :  { %v6184_v47 = vmul.f32 %v6166_v19, %v6146_v46  ;;  %v8051_v19 = vld [vmem:[%s12405_s25 + $0x10] sm:$0xff] }
0x1171   :  { %6460 = vmatpush.bf16.msrb.mxu1 %v8051_v19 }
0x1172   :  { %6205 = vrot.lane.b32.xlu0 %v6184_v47, %s8369_s28 }
0x11a4   :  { %v6196_v26 = vpop.permute.xlu2 %6195 }
0x11a5   :  { %v6219_v57 = vadd.f32 %v6196_v26, %v11898_v37  ;;  %v8050_v26 = vld [vmem:[%s12405_s25 + $0x8] sm:$0xff] }
0x11a6   :  { %6461 = vmatpush.bf16.msrb.mxu1 %v8050_v26 }
0x11a7   :  { %v6227_v12 = vsel %vm353_vm0, %v6219_v57, 0.0 }
0x11a8   :  { %6228 = vadd.xlane.f32.xlu1 %v6227_v12 }
0x11ac   :  { %v6198_v63 = vpop.permute.xlu0 %6197 }
0x11ad   :  { %v6220_v31 = vadd.f32 %v6198_v63, %v11904_v51  ;;  %v8049_v63 = vld [vmem:[%s12405_s25] sm:$0xff] }
0x11ae   :  { %6462 = vmatpush.bf16.msrb.mxu1 %v8049_v63 }
0x11af   :  { %v6230_v7 = vsel %vm353_vm0, %v6220_v31, 0.0 }
0x11b0   :  { %6231 = vadd.xlane.f32.xlu2 %v6230_v7 }
0x11b2   :  { %v6170_v27 = vpop.permute.xlu2 %6169 }
0x11b3   :  { %v6186_v37 = vmul.f32 %v6170_v27, %v6146_v46 }
0x11c2   :  { %v6168_v6 = vpop.permute.xlu1 %6167 }
0x11c3   :  { %v6185_v58 = vmul.f32 %v6168_v6, %v6146_v46 }
0x11c4   :  { %v6204_v13 = vpop.permute.xlu2 %6203 }
0x11c5   :  { %v6223_v22 = vadd.f32 %v6204_v13, %v11922_v41  ;;  %6207 = vrot.lane.b32.xlu0 %v6185_v58, %s8369_s28 }
0x11c7   :  { %v6239_v17 = vsel %vm353_vm0, %v6223_v22, 0.0 }
0x11c8   :  { %6240 = vadd.xlane.f32.xlu1 %v6239_v17 }
0x11cc   :  { %v6200_v18 = vpop.permute.xlu0 %6199 }
0x11cd   :  { %6209 = vrot.lane.b32.xlu0 %v6186_v37, %s8369_s28  ;;  %v6221_v43 = vadd.f32 %v6200_v18, %v11910_v14 }
0x11cf   :  { %v6233_v54 = vsel %vm353_vm0, %v6221_v43, 0.0 }
0x11d4   :  { %v6202_v10 = vpop.permute.xlu1 %6201 }
0x11d5   :  { %v6222_v51 = vadd.f32 %v6202_v10, %v11916_v9 }
0x11d7   :  { %v6236_v2 = vsel %vm353_vm0, %v6222_v51, 0.0 }
0x11d8   :  { %6237 = vadd.xlane.f32.xlu2 %v6236_v2 }
0x11e4   :  { %v6206_v1 = vpop.permute.xlu0 %6205 }
0x11e5   :  { %v6224_v50 = vadd.f32 %v6206_v1, %v11928_v45 }
0x11e7   :  { %v6242_v41 = vsel %vm353_vm0, %v6224_v50, 0.0 }
0x11e8   :  { %6243 = vadd.xlane.f32.xlu2 %v6242_v41 }
0x11f7   :  { %6234 = vadd.xlane.f32.xlu0 %v6233_v54 }
0x121b   :  { %v6229_v30 = vpop.xlane.xlu1 %6228 }
0x121c   :  { %v6251_v15 = vmul.f32 %v6229_v30, %v12500_v49 }
0x121e   :  { %v12262_v44 = vsub.f32 %v6219_v57, %v6251_v15 }
0x1220   :  { %v6267_v9 = vmul.f32 %v12262_v44, %v12262_v44 }
0x1222   :  { %v6275_v32 = vsel %vm353_vm0, %v6267_v9, 0.0 }
0x1223   :  { %6276 = vadd.xlane.f32.xlu1 %v6275_v32  ;;  %v6232_v45 = vpop.xlane.xlu2 %6231 }
0x1224   :  { %v6252_v29 = vmul.f32 %v6232_v45, %v12500_v49 }
0x1226   :  { %v12268_v21 = vsub.f32 %v6220_v31, %v6252_v29 }
0x1228   :  { %v6268_v14 = vmul.f32 %v12268_v21, %v12268_v21 }
0x122a   :  { %v6278_v38 = vsel %vm353_vm0, %v6268_v14, 0.0 }
0x122b   :  { %6279 = vadd.xlane.f32.xlu2 %v6278_v38 }
0x1237   :  { %v6208_v24 = vpop.permute.xlu0 %6207 }
0x1238   :  { %v12274_v33 = vadd.f32 %v6208_v24, %v11934_v59 }
0x123a   :  { %v6245_v25 = vsel %vm353_vm0, %v12274_v33, 0.0 }
0x123b   :  { %v6241_v3 = vpop.xlane.xlu1 %6240  ;;  %6246 = vadd.xlane.f32.xlu1 %v6245_v25 }
0x123c   :  { %v6255_v23 = vmul.f32 %v6241_v3, %v12500_v49 }
0x123e   :  { %v12282_v52 = vsub.f32 %v6223_v22, %v6255_v23 }
0x123f   :  { %v6210_v42 = vpop.permute.xlu0 %6209 }
0x1240   :  { %v12280_v55 = vadd.f32 %v6210_v42, %v11951_v56  ;;  %v6271_v59 = vmul.f32 %v12282_v52, %v12282_v52 }
0x1242   :  { %v6248_v46 = vsel %vm353_vm0, %v12280_v55, 0.0  ;;  %v6287_v34 = vsel %vm353_vm0, %v6271_v59, 0.0 }
0x1243   :  { %6249 = vadd.xlane.f32.xlu0 %v6248_v46 }
0x124b   :  { %v6238_v35 = vpop.xlane.xlu2 %6237  ;;  %6288 = vadd.xlane.f32.xlu0 %v6287_v34 }
0x124c   :  { %v6254_v40 = vmul.f32 %v6238_v35, %v12500_v49 }
0x124e   :  { %v12290_v0 = vsub.f32 %v6222_v51, %v6254_v40 }
0x1250   :  { %v6270_v56 = vmul.f32 %v12290_v0, %v12290_v0 }
0x1252   :  { %v6284_v39 = vsel %vm353_vm0, %v6270_v56, 0.0 }
0x1253   :  { %6285 = vadd.xlane.f32.xlu1 %v6284_v39 }
0x125b   :  { %v6244_v62 = vpop.xlane.xlu2 %6243 }
0x125c   :  { %v6256_v61 = vmul.f32 %v6244_v62, %v12500_v49 }
0x125e   :  { %v12301_v36 = vsub.f32 %v6224_v50, %v6256_v61 }
0x1260   :  { %v6272_v53 = vmul.f32 %v12301_v36, %v12301_v36 }
0x1262   :  { %v6290_v5 = vsel %vm353_vm0, %v6272_v53, 0.0 }
0x126a   :  { %v6235_v60 = vpop.xlane.xlu0 %6234 }
0x126b   :  { %v6253_v20 = vmul.f32 %v6235_v60, %v12500_v49 }
0x126d   :  { %v12297_v11 = vsub.f32 %v6221_v43, %v6253_v20 }
0x126f   :  { %v6269_v28 = vmul.f32 %v12297_v11, %v12297_v11 }
0x1271   :  { %v6281_v16 = vsel %vm353_vm0, %v6269_v28, 0.0 }
0x1272   :  { %6282 = vadd.xlane.f32.xlu2 %v6281_v16 }
0x127a   :  { %6291 = vadd.xlane.f32.xlu2 %v6290_v5 }
0x1296   :  { %v6277_v48 = vpop.xlane.xlu1 %6276 }
0x1297   :  { %v6299_v8 = vmul.f32 %v6277_v48, %v12500_v49 }
0x1299   :  { %v6307_v47 = vadd.f32 1e-06, %v6299_v8 }
0x129b   :  { %8348 = vrsqrt.f32 %v6307_v47  ;;  %vm6321_vm11 = vweird.f32 %v6307_v47 }
0x129e   :  { %v6280_v57 = vpop.xlane.xlu2 %6279 }
0x129f   :  { %v6300_v12 = vmul.f32 %v6280_v57, %v12500_v49 }
0x12a1   :  { %v8349_v31 = vpop.eup %8348  ;;  %v6308_v7 = vadd.f32 1e-06, %v6300_v12 }
0x12a2   :  { %v6316_v27 = vmul.f32 %v8349_v31, %v6307_v47  ;;  %vm6322_vm8 = vweird.f32 %v8349_v31 }
0x12a3   :  { %8350 = vrsqrt.f32 %v6308_v7  ;;  %vm6323_vm10 = vmor %vm6321_vm11, %vm6322_vm8  ;;  %vm6331_vm1 = vweird.f32 %v6308_v7 }
0x12a4   :  { %v6317_v6 = vmul.f32 %v8349_v31, %v6316_v27 }
0x12a6   :  { %v6318_v58 = vmul.f32 0.5, %v6317_v6 }
0x12a8   :  { %v6319_v22 = vsub.f32 1.5, %v6318_v58 }
0x12a9   :  { %v8351_v13 = vpop.eup %8350 }
0x12aa   :  { %v6326_v17 = vmul.f32 %v8351_v13, %v6308_v7  ;;  %v6320_v10 = vmul.f32 %v8349_v31, %v6319_v22  ;;  %vm6332_vm9 = vweird.f32 %v8351_v13 }
0x12ab   :  { %vm6333_vm13 = vmor %vm6331_vm1, %vm6332_vm9 }
0x12ac   :  { %v6327_v37 = vmul.f32 %v8351_v13, %v6326_v17  ;;  %v6324_v41 = vsel %vm6323_vm10, %v8349_v31, %v6320_v10 }
0x12ad   :  { %v6395_v15 = vmul.f32 %v6324_v41, %v12262_v44 }
0x12ae   :  { %v6328_v51 = vmul.f32 0.5, %v6327_v37  ;;  %v6247_v2 = vpop.xlane.xlu1 %6246 }
0x12af   :  { %v6257_v18 = vmul.f32 %v6247_v2, %v12500_v49 }
0x12b0   :  { %v6329_v1 = vsub.f32 1.5, %v6328_v51 }
0x12b1   :  { %v12323_v50 = vsub.f32 %v12274_v33, %v6257_v18 }
0x12b2   :  { %v6330_v43 = vmul.f32 %v8351_v13, %v6329_v1 }
0x12b3   :  { %v6273_v54 = vmul.f32 %v12323_v50, %v12323_v50 }
0x12b4   :  { %v6334_v30 = vsel %vm6333_vm13, %v8351_v13, %v6330_v43 }
0x12b5   :  { %v6396_v9 = vmul.f32 %v6334_v30, %v12268_v21  ;;  %v6293_v32 = vsel %vm353_vm0, %v6273_v54, 0.0 }
0x12b6   :  { %6294 = vadd.xlane.f32.xlu1 %v6293_v32  ;;  %v6250_v45 = vpop.xlane.xlu0 %6249 }
0x12b7   :  { %v6412_v29 = vpack.c.bf16 %v6396_v9, %v6395_v15  ;;  %v6258_v14 = vmul.f32 %v6250_v45, %v12500_v49  ;;  %v8063_v15 = vld [vmem:[%s12406_s26] ss:$0 sm:$0xff] }
0x12b9   :  { %v12332_v38 = vsub.f32 %v12280_v55, %v6258_v14  ;;  %7786 = vmatmul.msk.bf16.vlgmr.msrb.gmra.mxu1 %vm353_vm0, %v6412_v29 }
0x12bb   :  { %v6274_v24 = vmul.f32 %v12332_v38, %v12332_v38 }
0x12bd   :  { %v6296_v33 = vsel %vm353_vm0, %v6274_v24, 0.0 }
0x12be   :  { %6297 = vadd.xlane.f32.xlu0 %v6296_v33  ;;  %v6289_v3 = vpop.xlane.xlu0 %6288 }
0x12bf   :  { %v6303_v42 = vmul.f32 %v6289_v3, %v12500_v49 }
0x12c1   :  { %v6311_v34 = vadd.f32 1e-06, %v6303_v42 }
0x12c3   :  { %vm6361_vm11 = vweird.f32 %v6311_v34 }
0x12c6   :  { %v6286_v44 = vpop.xlane.xlu1 %6285 }
0x12c7   :  { %v6302_v21 = vmul.f32 %v6286_v44, %v12500_v49 }
0x12c9   :  { %v6310_v25 = vadd.f32 1e-06, %v6302_v21 }
0x12cb   :  { %8352 = vrsqrt.f32 %v6310_v25  ;;  %vm6351_vm14 = vweird.f32 %v6310_v25 }
0x12d1   :  { %v8353_v23 = vpop.eup %8352 }
0x12d2   :  { %v6346_v46 = vmul.f32 %v8353_v23, %v6310_v25  ;;  %vm6352_vm2 = vweird.f32 %v8353_v23 }
0x12d3   :  { %vm6353_vm15 = vmor %vm6351_vm14, %vm6352_vm2 }
0x12d4   :  { %v6347_v40 = vmul.f32 %v8353_v23, %v6346_v46 }
0x12d6   :  { %v6348_v56 = vmul.f32 0.5, %v6347_v40 }
0x12d8   :  { %v6349_v28 = vsub.f32 1.5, %v6348_v56 }
0x12da   :  { %v6350_v48 = vmul.f32 %v8353_v23, %v6349_v28 }
0x12dc   :  { %v6354_v26 = vsel %vm6353_vm15, %v8353_v23, %v6350_v48 }
0x12dd   :  { %v6398_v27 = vmul.f32 %v6354_v26, %v12290_v0 }
0x12e5   :  { %v6283_v55 = vpop.xlane.xlu2 %6282 }
0x12e6   :  { %v6301_v59 = vmul.f32 %v6283_v55, %v12500_v49 }
0x12e8   :  { %v6309_v35 = vadd.f32 1e-06, %v6301_v59 }
0x12ea   :  { %8354 = vrsqrt.f32 %v6309_v35  ;;  %vm6341_vm3 = vweird.f32 %v6309_v35 }
0x12eb   :  { %8356 = vrsqrt.f32 %v6311_v34 }
0x12ed   :  { %v6292_v39 = vpop.xlane.xlu2 %6291 }
0x12ee   :  { %v6304_v62 = vmul.f32 %v6292_v39, %v12500_v49 }
0x12f0   :  { %v8355_v60 = vpop.eup %8354  ;;  %v6312_v20 = vadd.f32 1e-06, %v6304_v62 }
0x12f1   :  { %v8357_v61 = vpop.eup %8356  ;;  %v6336_v16 = vmul.f32 %v8355_v60, %v6309_v35  ;;  %vm6342_vm12 = vweird.f32 %v8355_v60 }
0x12f2   :  { %8358 = vrsqrt.f32 %v6312_v20  ;;  %v6356_v5 = vmul.f32 %v8357_v61, %v6311_v34  ;;  %vm6343_vm4 = vmor %vm6341_vm3, %vm6342_vm12  ;;  %vm6362_vm6 = vweird.f32 %v8357_v61  ;;  %vm6371_vm7 = vweird.f32 %v6312_v20 }
0x12f3   :  { %v6337_v53 = vmul.f32 %v8355_v60, %v6336_v16  ;;  %vm6363_vm9 = vmor %vm6361_vm11, %vm6362_vm6 }
0x12f4   :  { %v6357_v47 = vmul.f32 %v8357_v61, %v6356_v5 }
0x12f5   :  { %v6338_v4 = vmul.f32 0.5, %v6337_v53 }
0x12f6   :  { %v6358_v6 = vmul.f32 0.5, %v6357_v47 }
0x12f7   :  { %v6339_v8 = vsub.f32 1.5, %v6338_v4 }
0x12f8   :  { %v8359_v19 = vpop.eup %8358  ;;  %v6359_v17 = vsub.f32 1.5, %v6358_v6 }
0x12f9   :  { %v6340_v57 = vmul.f32 %v8355_v60, %v6339_v8  ;;  %v6366_v12 = vmul.f32 %v8359_v19, %v6312_v20  ;;  %vm6372_vm5 = vweird.f32 %v8359_v19 }
0x12fa   :  { %v6360_v10 = vmul.f32 %v8357_v61, %v6359_v17  ;;  %vm6373_vm8 = vmor %vm6371_vm7, %vm6372_vm5 }
0x12fb   :  { %v6344_v63 = vsel %vm6343_vm4, %v8355_v60, %v6340_v57  ;;  %v6367_v31 = vmul.f32 %v8359_v19, %v6366_v12 }
0x12fc   :  { %v6397_v7 = vmul.f32 %v6344_v63, %v12297_v11  ;;  %v6364_v2 = vsel %vm6363_vm9, %v8357_v61, %v6360_v10 }
0x12fd   :  { %v6368_v58 = vmul.f32 0.5, %v6367_v31  ;;  %v6399_v0 = vmul.f32 %v6364_v2, %v12282_v52 }
0x12fe   :  { %v6413_v13 = vpack.c.bf16 %v6398_v27, %v6397_v7 }
0x12ff   :  { %v6369_v22 = vsub.f32 1.5, %v6368_v58 }
0x1300   :  { %7787 = vmatmul.msk.bf16.gmra.mxu1 %vm353_vm0, %v6413_v13 }
0x1301   :  { %v6370_v37 = vmul.f32 %v8359_v19, %v6369_v22 }
0x1303   :  { %v6374_v51 = vsel %vm6373_vm8, %v8359_v19, %v6370_v37 }
0x1304   :  { %v6400_v11 = vmul.f32 %v6374_v51, %v12301_v36 }
0x1306   :  { %v6414_v18 = vpack.c.bf16 %v6400_v11, %v6399_v0 }
0x1310   :  { %7788 = vmatmul.msk.bf16.gmra.mxu1 %vm353_vm0, %v6414_v18 }
0x1329   :  { %v6295_v1 = vpop.xlane.xlu1 %6294 }
0x132a   :  { %v6305_v41 = vmul.f32 %v6295_v1, %v12500_v49 }
0x132c   :  { %v6313_v43 = vadd.f32 1e-06, %v6305_v41 }
0x132e   :  { %8360 = vrsqrt.f32 %v6313_v43  ;;  %vm6381_vm1 = vweird.f32 %v6313_v43 }
0x1331   :  { %v6298_v54 = vpop.xlane.xlu0 %6297 }
0x1332   :  { %v6306_v30 = vmul.f32 %v6298_v54, %v12500_v49 }
0x1334   :  { %v8361_v9 = vpop.eup %8360  ;;  %v6314_v32 = vadd.f32 1e-06, %v6306_v30 }
0x1335   :  { %v6376_v36 = vmul.f32 %v8361_v9, %v6313_v43  ;;  %vm6382_vm10 = vweird.f32 %v8361_v9 }
0x1336   :  { %8362 = vrsqrt.f32 %v6314_v32  ;;  %v6464_v52 = vpop.f32.mrf.mxu1  ;;  %vm6383_vm2 = vmor %vm6381_vm1, %vm6382_vm10  ;;  %vm6391_vm14 = vweird.f32 %v6314_v32 }
0x1337   :  { %v6377_v45 = vmul.f32 %v8361_v9, %v6376_v36  ;;  %v6465_v29 = vadd.f32 %v8063_v15, %v6464_v52 }
0x1339   :  { %v6378_v14 = vmul.f32 0.5, %v6377_v45  ;;  %6484 = vst [vmem:[%s12407_s27] sm:$0xff] %v6465_v29 }
0x133b   :  { %v6379_v33 = vsub.f32 1.5, %v6378_v14 }
0x133c   :  { %v8363_v24 = vpop.eup %8362 }
0x133d   :  { %v6386_v44 = vmul.f32 %v8363_v24, %v6314_v32  ;;  %v6380_v3 = vmul.f32 %v8361_v9, %v6379_v33  ;;  %vm6392_vm13 = vweird.f32 %v8363_v24 }
0x133e   :  { %v6466_v49 = vpop.f32.mrf.mxu1  ;;  %vm6393_vm12 = vmor %vm6391_vm14, %vm6392_vm13 }
0x133f   :  { %v6387_v21 = vmul.f32 %v8363_v24, %v6386_v44  ;;  %v6467_v25 = vadd.f32 %v8063_v15, %v6466_v49  ;;  %v6384_v46 = vsel %vm6383_vm2, %v8361_v9, %v6380_v3 }
0x1340   :  { %v6401_v34 = vmul.f32 %v6384_v46, %v12323_v50 }
0x1341   :  { %v6388_v23 = vmul.f32 0.5, %v6387_v21  ;;  %6485 = vst [vmem:[%s12407_s27 + $0x8] sm:$0xff] %v6467_v25 }
0x1343   :  { %v6389_v42 = vsub.f32 1.5, %v6388_v23 }
0x1345   :  { %v6390_v55 = vmul.f32 %v8363_v24, %v6389_v42 }
0x1347   :  { %v6394_v59 = vsel %vm6393_vm12, %v8363_v24, %v6390_v55 }
0x1348   :  { %v6402_v35 = vmul.f32 %v6394_v59, %v12332_v38 }
0x134a   :  { %v6415_v40 = vpack.c.bf16 %v6402_v35, %v6401_v34 }
0x134c   :  { %7789 = vmatmul.msk.bf16.gmra.mxu1 %vm353_vm0, %v6415_v40 }
0x137d   :  { %v6469_v56 = vpop.f32.mrf.mxu1 }
0x137e   :  { %v6470_v39 = vadd.f32 %v8063_v15, %v6469_v56 }
0x1380   :  { %6486 = vst [vmem:[%s12407_s27 + $0x10] sm:$0xff] %v6470_v39 }
0x1385   :  { %v6471_v62 = vpop.f32.mrf.mxu1 }
0x1386   :  { %v6472_v60 = vadd.f32 %v8063_v15, %v6471_v62 }
0x1388   :  { %6487 = vst [vmem:[%s12407_s27 + $0x18] sm:$0xff] %v6472_v60 }
0x138d   :  { %v6474_v20 = vpop.f32.mrf.mxu1 }
0x138e   :  { %v6475_v61 = vadd.f32 %v8063_v15, %v6474_v20 }
0x1390   :  { %6488 = vst [vmem:[%s12407_s27 + $0x20] sm:$0xff] %v6475_v61 }
0x1395   :  { %v6476_v50 = vpop.f32.mrf.mxu1 }
0x1396   :  { %v6477_v38 = vadd.f32 %v8063_v15, %v6476_v50 }
0x1398   :  { %6489 = vst [vmem:[%s12407_s27 + $0x28] sm:$0xff] %v6477_v38 }
0x13c9   :  { %v6479_v28 = vpop.f32.mrf.mxu1 }
0x13ca   :  { %v6480_v16 = vadd.f32 %v8063_v15, %v6479_v28 }
0x13cc   :  { %6490 = vst [vmem:[%s12407_s27 + $0x30] sm:$0xff] %v6480_v16 }
0x13d1   :  { %v6481_v53 = vpop.f32.mrf.mxu1 }
0x13d2   :  { %v6482_v5 = vadd.f32 %v8063_v15, %v6481_v53 }
0x13d4   :  { %6491 = vst [vmem:[%s12407_s27 + $0x38] sm:$0xff] %v6482_v5 }

</bundles_post_ra>
